<compile_context>
chip_gen: v6e
topology: v6e:2x2x1
jax: 0.10.0
libtpu: 0.0.40
codegen_flags: <defaults>
</compile_context>

<pallas_src>
import functools

import jax
import jax.numpy as jnp
from jax.experimental import pallas as pl
from jax.experimental.pallas import tpu as pltpu


def _round_up(x, m):
    return ((x + m - 1) // m) * m


def basic_block_kernel(x_ref, masks_ref, w1_ref, w2_ref, b1_ref, b2_ref,
                       out_ref, *, W):
    """One image per grid step; x_ref / out_ref are (H*W, C) with C lane-padded.

    conv3x3 = 3 MXU dots (one per kernel row kh) with K = 3*C: the three
    column taps are source-masked + lane-concatenated into a (HW, 3C) tensor;
    the kh = 0 / 2 variants are single sublane rolls (+-W) of that concat plus
    a row (output-side) mask.
    """
    HW, C = out_ref.shape
    mx = w1_ref.dtype                         # matmul / roll / mask dtype

    x_c = x_ref[...].astype(mx)               # cast once (no-op if already mx)

    # (HW, 1) masks, built once in the wrapper:
    #  [0] w > 0      source mask: zero first column  (right-neighbour taps)
    #  [1] w < W - 1  source mask: zero last column   (left-neighbour taps)
    #  [2] h > 0      output mask for kh = 0
    #  [3] h < H - 1  output mask for kh = 2
    m_nf = masks_ref[0].astype(mx)
    m_nl = masks_ref[1].astype(mx)
    m_h0 = masks_ref[2].astype(mx)
    m_h2 = masks_ref[3].astype(mx)

    def conv3x3(a, w_ref):
        a_nl = a * m_nl                       # last column zeroed  (kw = 0 taps)
        a_nf = a * m_nf                       # first column zeroed (kw = 2 taps)
        # centre-row concat: [ x[h, w-1] | x[h, w] | x[h, w+1] ] -> (HW, 3C)
        base = jnp.concatenate(
            [pltpu.roll(a_nl, shift=1, axis=0),
             a,
             pltpu.roll(a_nf, shift=HW - 1, axis=0)],
            axis=-1)
        top = pltpu.roll(base, shift=W, axis=0) * m_h0        # row h-1 (kh = 0)
        bot = pltpu.roll(base, shift=HW - W, axis=0) * m_h2   # row h+1 (kh = 2)
        acc = jnp.dot(top, w_ref[0], preferred_element_type=jnp.float32)
        acc = acc + jnp.dot(base, w_ref[1], preferred_element_type=jnp.float32)
        acc = acc + jnp.dot(bot, w_ref[2], preferred_element_type=jnp.float32)
        return acc                            # (HW, C) float32

    # conv1 (BN1 scale folded into w1) + bias -> relu
    mid = jnp.maximum(conv3x3(x_c, w1_ref) + b1_ref[...], 0.0)
    # conv2 (BN2 folded) + bias -> + identity (re-read resident input) -> relu
    out = jnp.maximum(conv3x3(mid.astype(mx), w2_ref) + b2_ref[...]
                      + x_ref[...].astype(jnp.float32), 0.0)
    out_ref[...] = out.astype(out_ref.dtype)


def basic_block_pallas_nhwc(x_nhwc, w1_hwio, w2_hwio,
                            gamma1, beta1, mean1, var1,
                            gamma2, beta2, mean2, var2, *,
                            eps=1e-5, compute_dtype=jnp.float32):
    """NHWC core entry point.

    For stacked BasicBlocks keep the lane-padded NHWC activations end-to-end
    (skip the pad / channel-slice and the NCHW adapter between blocks).
    """
    N, H, W, Cin = x_nhwc.shape
    Cout = w1_hwio.shape[-1]
    assert Cin == Cout, (
        "default BasicBlock (stride=1, downsample=None) needs in_planes == planes")

    # Lane-pad channels so every matmul operand / bias broadcast / store is
    # lane-dense (128-wide).
    C = _round_up(max(Cin, Cout, 1), 128)
    HW = H * W
    item = jnp.dtype(compute_dtype).itemsize

    # ---- fold BN into the conv weights (scale) and a per-channel bias ----
    def fold_scale(g, v):
        return (g / jnp.sqrt(v + eps)).astype(jnp.float32)

    s1 = fold_scale(gamma1, var1)
    s2 = fold_scale(gamma2, var2)
    b1 = (beta1 - mean1 * s1).astype(jnp.float32)
    b2 = (beta2 - mean2 * s2).astype(jnp.float32)

    def prep_w(w_hwio, scale, ci, co):
        # HWIO, BN scale folded into output channels, padded, then reshaped to
        # (3, 3*C, C) with the K axis ordered (kw, cin) to match the in-kernel
        # lane concat [kw=0 | kw=1 | kw=2].
        w = w_hwio.astype(jnp.float32) * scale[None, None, None, :]
        w = jnp.pad(w, ((0, 0), (0, 0), (0, C - ci), (0, C - co)))
        return w.reshape(3, 3 * C, C).astype(compute_dtype)

    w1 = prep_w(w1_hwio, s1, Cin, Cout)       # (3, 3C, C)
    w2 = prep_w(w2_hwio, s2, Cout, Cout)      # (3, 3C, C)
    b1p = jnp.pad(b1, (0, C - Cout)).reshape(1, C)
    b2p = jnp.pad(b2, (0, C - Cout)).reshape(1, C)

    # ---- border masks, built once (hoisted out of the per-image body) ----
    w_idx = jnp.arange(HW, dtype=jnp.int32) % W
    h_idx = jnp.arange(HW, dtype=jnp.int32) // W
    masks = jnp.stack([(w_idx > 0),            # zero-first-col source mask
                       (w_idx < W - 1),        # zero-last-col  source mask
                       (h_idx > 0),            # kh = 0 output mask
                       (h_idx < H - 1)],       # kh = 2 output mask
                      axis=0).astype(compute_dtype).reshape(4, HW, 1)

    # ---- channel-pad + flatten the activation to (N, HW, C) ----
    xp = jnp.pad(x_nhwc.astype(compute_dtype),
                 ((0, 0), (0, 0), (0, 0), (0, C - Cin))).reshape(N, HW, C)

    # ---- VMEM budget / cost estimate from actual block sizes ----
    block_bytes = (2 * HW * C * item               # x block, double-buffered
                   + 2 * HW * C * item             # out block
                   + 2 * (w1.size + w2.size) * item
                   + 2 * 4 * HW * 128 * item       # masks (lane-padded)
                   + 2 * 2 * C * 4)                # biases
    body_bytes = (3 * HW * 3 * C * item            # base / top / bot concats
                  + 3 * HW * C * 4                 # f32 acc / mid / out
                  + 2 * HW * C * item)             # a_nl / a_nf
    vmem_need = int(1.4 * (block_bytes + body_bytes))
    try:
        vmem_cap = int(pltpu.get_tpu_info().vmem_capacity_bytes)
    except Exception:
        vmem_cap = 64 * 1024 * 1024
    vmem_limit = min(max(32 * 1024 * 1024, vmem_need), (3 * vmem_cap) // 4)

    flops = 2 * (2 * 9 * N * HW * C * C)           # two 3x3 convs
    bytes_accessed = int(xp.size * item + N * HW * C * item
                         + (w1.size + w2.size) * item
                         + masks.size * item + 2 * C * 4)

    out = pl.pallas_call(
        functools.partial(basic_block_kernel, W=W),
        out_shape=jax.ShapeDtypeStruct((N, HW, C), compute_dtype),
        grid_spec=pltpu.PrefetchScalarGridSpec(
            num_scalar_prefetch=0,
            grid=(N,),
            in_specs=[
                pl.BlockSpec((None, HW, C), lambda n: (n, 0, 0)),   # x (squeezed N)
                pl.BlockSpec((4, HW, 1), lambda n: (0, 0, 0)),      # masks
                pl.BlockSpec((3, 3 * C, C), lambda n: (0, 0, 0)),   # w1 (BN folded)
                pl.BlockSpec((3, 3 * C, C), lambda n: (0, 0, 0)),   # w2 (BN folded)
                pl.BlockSpec((1, C), lambda n: (0, 0)),             # b1
                pl.BlockSpec((1, C), lambda n: (0, 0)),             # b2
            ],
            out_specs=pl.BlockSpec((None, HW, C), lambda n: (n, 0, 0)),
        ),
        compiler_params=pltpu.CompilerParams(
            dimension_semantics=("parallel",),        # batch axis is independent
            vmem_limit_bytes=vmem_limit,
        ),
        cost_estimate=pl.CostEstimate(
            flops=flops, transcendentals=0, bytes_accessed=bytes_accessed),
    )(xp, masks, w1, w2, b1p, b2p)

    return out.reshape(N, H, W, C)[..., :Cout]       # drop lane padding (NHWC)


def basic_block_pallas(x_nchw, w1_oihw, w2_oihw,
                       gamma1, beta1, mean1, var1,
                       gamma2, beta2, mean2, var2,
                       eps=1e-5, compute_dtype=jnp.float32):
    """NCHW adapter matching the PyTorch interface. x_nchw: (N, C, H, W)."""
    x_nhwc = jnp.transpose(x_nchw, (0, 2, 3, 1))
    w1 = jnp.transpose(w1_oihw, (2, 3, 1, 0))   # OIHW -> HWIO
    w2 = jnp.transpose(w2_oihw, (2, 3, 1, 0))
    out_nhwc = basic_block_pallas_nhwc(
        x_nhwc, w1, w2, gamma1, beta1, mean1, var1, gamma2, beta2, mean2, var2,
        eps=eps, compute_dtype=compute_dtype)
    return jnp.transpose(out_nhwc, (0, 3, 1, 2)).astype(x_nchw.dtype)


def basic_block_reference(x, w1, w2, g1, be1, m1, v1, g2, be2, m2, v2, eps=1e-5):
    """Pure-JAX NCHW reference (mirrors the PyTorch forward in eval mode)."""
    def conv3x3(x, w):
        return jax.lax.conv_general_dilated(
            x, w, window_strides=(1, 1), padding=((1, 1), (1, 1)),
            dimension_numbers=("NCHW", "OIHW", "NCHW"))

    def bn(x, g, b, m, v):
        g, b, m, v = (a.reshape(1, -1, 1, 1) for a in (g, b, m, v))
        return (x - m) / jnp.sqrt(v + eps) * g + b

    out = jnp.maximum(bn(conv3x3(x, w1), g1, be1, m1, v1), 0.0)
    out = bn(conv3x3(out, w2), g2, be2, m2, v2)
    return jnp.maximum(out + x, 0.0)


if __name__ == "__main__":
    N, C, H, W = 2, 8, 16, 16        # in_planes == planes == 8, stride 1
    key = jax.random.PRNGKey(0)
    ks = jax.random.split(key, 8)

    x = jax.random.normal(ks[0], (N, C, H, W), jnp.float32)
    w1 = jax.random.normal(ks[1], (C, C, 3, 3), jnp.float32) * 0.1   # OIHW
    w2 = jax.random.normal(ks[2], (C, C, 3, 3), jnp.float32) * 0.1   # OIHW

    gamma1 = 1.0 + 0.1 * jax.random.normal(ks[3], (C,), jnp.float32)
    beta1 = 0.1 * jax.random.normal(ks[4], (C,), jnp.float32)
    mean1 = 0.1 * jax.random.normal(ks[5], (C,), jnp.float32)
    var1 = jnp.abs(jax.random.normal(ks[6], (C,), jnp.float32)) + 0.5

    gamma2 = jnp.ones((C,), jnp.float32)
    beta2 = jnp.zeros((C,), jnp.float32)
    mean2 = 0.05 * jax.random.normal(ks[7], (C,), jnp.float32)
    var2 = jnp.ones((C,), jnp.float32)

    ref = basic_block_reference(x, w1, w2, gamma1, beta1, mean1, var1,
                                gamma2, beta2, mean2, var2)

    # f32 path: strict numerical check against the reference.
    out_f32 = basic_block_pallas(x, w1, w2, gamma1, beta1, mean1, var1,
                                 gamma2, beta2, mean2, var2,
                                 compute_dtype=jnp.float32)
    out_f32 = jax.block_until_ready(out_f32)
    assert out_f32.shape == (N, C, H, W)
    assert jnp.allclose(out_f32, ref, atol=1e-4, rtol=1e-4), \
        float(jnp.max(jnp.abs(out_f32 - ref)))

    # bf16 path (MXU/VPU-friendly operands, f32 accumulation): loose check.
    out_bf16 = basic_block_pallas(x, w1, w2, gamma1, beta1, mean1, var1,
                                  gamma2, beta2, mean2, var2,
                                  compute_dtype=jnp.bfloat16)
    out_bf16 = jax.block_until_ready(out_bf16)
    assert out_bf16.shape == (N, C, H, W)
    assert jnp.allclose(out_bf16, ref, atol=1e-1, rtol=1e-1), \
        float(jnp.max(jnp.abs(out_bf16 - ref)))

    print("KERNEL_OK")
</pallas_src>

<mosaic_0001>
module attributes {stable_mosaic.version = 11 : i64} {
  func.func @basic_block_kernel(%arg0: i32, %arg1: memref<1x256x128xf32, #tpu.memory_space<vmem>>, %arg2: memref<4x256x1xf32, #tpu.memory_space<vmem>>, %arg3: memref<3x384x128xf32, #tpu.memory_space<vmem>>, %arg4: memref<3x384x128xf32, #tpu.memory_space<vmem>>, %arg5: memref<1x128xf32, #tpu.memory_space<vmem>>, %arg6: memref<1x128xf32, #tpu.memory_space<vmem>>, %arg7: memref<1x256x128xf32, #tpu.memory_space<vmem>>) attributes {dimension_semantics = [#tpu.dimension_semantics<parallel>], iteration_bounds = array<i64: 2>, scalar_prefetch = 0 : i64, scratch_operands = 0 : i64, tpu.core_type = #tpu.core_type<tc>, window_params = [{transform_indices = @transform_0, window_bounds = array<i64: 1, 256, 128>}, {pipeline_mode = #tpu.pipeline_mode<synchronous>, transform_indices = @transform_1, window_bounds = array<i64: 4, 256, 1>}, {pipeline_mode = #tpu.pipeline_mode<synchronous>, transform_indices = @transform_2, window_bounds = array<i64: 3, 384, 128>}, {pipeline_mode = #tpu.pipeline_mode<synchronous>, transform_indices = @transform_3, window_bounds = array<i64: 3, 384, 128>}, {pipeline_mode = #tpu.pipeline_mode<synchronous>, transform_indices = @transform_4, window_bounds = array<i64: 1, 128>}, {pipeline_mode = #tpu.pipeline_mode<synchronous>, transform_indices = @transform_5, window_bounds = array<i64: 1, 128>}, {transform_indices = @transform_6, window_bounds = array<i64: 1, 256, 128>}]} {
    %c0 = arith.constant 0 : index
    %c0_0 = arith.constant 0 : index
    %c0_1 = arith.constant 0 : index
    %0 = vector.load %arg1[%c0, %c0_0, %c0_1] : memref<1x256x128xf32, #tpu.memory_space<vmem>>, vector<1x256x128xf32>
    %1 = vector.shape_cast %0 : vector<1x256x128xf32> to vector<256x128xf32>
    %c0_2 = arith.constant 0 : index
    %c0_3 = arith.constant 0 : index
    %c0_4 = arith.constant 0 : index
    %2 = vector.load %arg2[%c0_2, %c0_3, %c0_4] : memref<4x256x1xf32, #tpu.memory_space<vmem>>, vector<1x256x1xf32>
    %3 = vector.shape_cast %2 : vector<1x256x1xf32> to vector<256x1xf32>
    %c1 = arith.constant 1 : index
    %c0_5 = arith.constant 0 : index
    %c0_6 = arith.constant 0 : index
    %4 = vector.load %arg2[%c1, %c0_5, %c0_6] : memref<4x256x1xf32, #tpu.memory_space<vmem>>, vector<1x256x1xf32>
    %5 = vector.shape_cast %4 : vector<1x256x1xf32> to vector<256x1xf32>
    %c2 = arith.constant 2 : index
    %c0_7 = arith.constant 0 : index
    %c0_8 = arith.constant 0 : index
    %6 = vector.load %arg2[%c2, %c0_7, %c0_8] : memref<4x256x1xf32, #tpu.memory_space<vmem>>, vector<1x256x1xf32>
    %7 = vector.shape_cast %6 : vector<1x256x1xf32> to vector<256x1xf32>
    %c3 = arith.constant 3 : index
    %c0_9 = arith.constant 0 : index
    %c0_10 = arith.constant 0 : index
    %8 = vector.load %arg2[%c3, %c0_9, %c0_10] : memref<4x256x1xf32, #tpu.memory_space<vmem>>, vector<1x256x1xf32>
    %9 = vector.shape_cast %8 : vector<1x256x1xf32> to vector<256x1xf32>
    %10 = vector.broadcast %5 : vector<256x1xf32> to vector<256x128xf32>
    %11 = arith.mulf %1, %10 : vector<256x128xf32>
    %12 = vector.broadcast %3 : vector<256x1xf32> to vector<256x128xf32>
    %13 = arith.mulf %1, %12 : vector<256x128xf32>
    %c1_i32 = arith.constant 1 : i32
    %14 = tpu.dynamic_rotate %11 by %c1_i32 dim 0 : vector<256x128xf32>, i32 -> vector<256x128xf32>
    %c255_i32 = arith.constant 255 : i32
    %15 = tpu.dynamic_rotate %13 by %c255_i32 dim 0 : vector<256x128xf32>, i32 -> vector<256x128xf32>
    %16 = tpu.concatenate %14, %1, %15 in 1 : vector<256x128xf32>, vector<256x128xf32>, vector<256x128xf32> -> vector<256x384xf32>
    %c16_i32 = arith.constant 16 : i32
    %17 = tpu.dynamic_rotate %16 by %c16_i32 dim 0 : vector<256x384xf32>, i32 -> vector<256x384xf32>
    %18 = vector.broadcast %7 : vector<256x1xf32> to vector<256x384xf32>
    %19 = arith.mulf %17, %18 : vector<256x384xf32>
    %c240_i32 = arith.constant 240 : i32
    %20 = tpu.dynamic_rotate %16 by %c240_i32 dim 0 : vector<256x384xf32>, i32 -> vector<256x384xf32>
    %21 = vector.broadcast %9 : vector<256x1xf32> to vector<256x384xf32>
    %22 = arith.mulf %20, %21 : vector<256x384xf32>
    %c0_11 = arith.constant 0 : index
    %c0_12 = arith.constant 0 : index
    %c0_13 = arith.constant 0 : index
    %23 = vector.load %arg3[%c0_11, %c0_12, %c0_13] : memref<3x384x128xf32, #tpu.memory_space<vmem>>, vector<1x384x128xf32>
    %24 = vector.shape_cast %23 : vector<1x384x128xf32> to vector<384x128xf32>
    %cst = arith.constant dense<0.000000e+00> : vector<256x128xf32>
    %25 = tpu.matmul %19, %24, %cst {dimension_numbers = #tpu.dot_dimension_numbers<[1], [0], [0], [1], [0, 0, 1, 1], [], []>} : vector<256x384xf32>, vector<384x128xf32>, vector<256x128xf32> -> vector<256x128xf32>
    %c1_14 = arith.constant 1 : index
    %c0_15 = arith.constant 0 : index
    %c0_16 = arith.constant 0 : index
    %26 = vector.load %arg3[%c1_14, %c0_15, %c0_16] : memref<3x384x128xf32, #tpu.memory_space<vmem>>, vector<1x384x128xf32>
    %27 = vector.shape_cast %26 : vector<1x384x128xf32> to vector<384x128xf32>
    %cst_17 = arith.constant dense<0.000000e+00> : vector<256x128xf32>
    %28 = tpu.matmul %16, %27, %cst_17 {dimension_numbers = #tpu.dot_dimension_numbers<[1], [0], [0], [1], [0, 0, 1, 1], [], []>} : vector<256x384xf32>, vector<384x128xf32>, vector<256x128xf32> -> vector<256x128xf32>
    %29 = arith.addf %25, %28 : vector<256x128xf32>
    %c2_18 = arith.constant 2 : index
    %c0_19 = arith.constant 0 : index
    %c0_20 = arith.constant 0 : index
    %30 = vector.load %arg3[%c2_18, %c0_19, %c0_20] : memref<3x384x128xf32, #tpu.memory_space<vmem>>, vector<1x384x128xf32>
    %31 = vector.shape_cast %30 : vector<1x384x128xf32> to vector<384x128xf32>
    %cst_21 = arith.constant dense<0.000000e+00> : vector<256x128xf32>
    %32 = tpu.matmul %22, %31, %cst_21 {dimension_numbers = #tpu.dot_dimension_numbers<[1], [0], [0], [1], [0, 0, 1, 1], [], []>} : vector<256x384xf32>, vector<384x128xf32>, vector<256x128xf32> -> vector<256x128xf32>
    %33 = arith.addf %29, %32 : vector<256x128xf32>
    %c0_22 = arith.constant 0 : index
    %c0_23 = arith.constant 0 : index
    %34 = vector.load %arg5[%c0_22, %c0_23] : memref<1x128xf32, #tpu.memory_space<vmem>>, vector<1x128xf32>
    %35 = vector.broadcast %34 : vector<1x128xf32> to vector<256x128xf32>
    %36 = arith.addf %33, %35 : vector<256x128xf32>
    %cst_24 = arith.constant 0.000000e+00 : f32
    %37 = vector.broadcast %cst_24 : f32 to vector<256x128xf32>
    %38 = arith.maximumf %36, %37 : vector<256x128xf32>
    %39 = vector.broadcast %5 : vector<256x1xf32> to vector<256x128xf32>
    %40 = arith.mulf %38, %39 : vector<256x128xf32>
    %41 = vector.broadcast %3 : vector<256x1xf32> to vector<256x128xf32>
    %42 = arith.mulf %38, %41 : vector<256x128xf32>
    %c1_i32_25 = arith.constant 1 : i32
    %43 = tpu.dynamic_rotate %40 by %c1_i32_25 dim 0 : vector<256x128xf32>, i32 -> vector<256x128xf32>
    %c255_i32_26 = arith.constant 255 : i32
    %44 = tpu.dynamic_rotate %42 by %c255_i32_26 dim 0 : vector<256x128xf32>, i32 -> vector<256x128xf32>
    %45 = tpu.concatenate %43, %38, %44 in 1 : vector<256x128xf32>, vector<256x128xf32>, vector<256x128xf32> -> vector<256x384xf32>
    %c16_i32_27 = arith.constant 16 : i32
    %46 = tpu.dynamic_rotate %45 by %c16_i32_27 dim 0 : vector<256x384xf32>, i32 -> vector<256x384xf32>
    %47 = vector.broadcast %7 : vector<256x1xf32> to vector<256x384xf32>
    %48 = arith.mulf %46, %47 : vector<256x384xf32>
    %c240_i32_28 = arith.constant 240 : i32
    %49 = tpu.dynamic_rotate %45 by %c240_i32_28 dim 0 : vector<256x384xf32>, i32 -> vector<256x384xf32>
    %50 = vector.broadcast %9 : vector<256x1xf32> to vector<256x384xf32>
    %51 = arith.mulf %49, %50 : vector<256x384xf32>
    %c0_29 = arith.constant 0 : index
    %c0_30 = arith.constant 0 : index
    %c0_31 = arith.constant 0 : index
    %52 = vector.load %arg4[%c0_29, %c0_30, %c0_31] : memref<3x384x128xf32, #tpu.memory_space<vmem>>, vector<1x384x128xf32>
    %53 = vector.shape_cast %52 : vector<1x384x128xf32> to vector<384x128xf32>
    %cst_32 = arith.constant dense<0.000000e+00> : vector<256x128xf32>
    %54 = tpu.matmul %48, %53, %cst_32 {dimension_numbers = #tpu.dot_dimension_numbers<[1], [0], [0], [1], [0, 0, 1, 1], [], []>} : vector<256x384xf32>, vector<384x128xf32>, vector<256x128xf32> -> vector<256x128xf32>
    %c1_33 = arith.constant 1 : index
    %c0_34 = arith.constant 0 : index
    %c0_35 = arith.constant 0 : index
    %55 = vector.load %arg4[%c1_33, %c0_34, %c0_35] : memref<3x384x128xf32, #tpu.memory_space<vmem>>, vector<1x384x128xf32>
    %56 = vector.shape_cast %55 : vector<1x384x128xf32> to vector<384x128xf32>
    %cst_36 = arith.constant dense<0.000000e+00> : vector<256x128xf32>
    %57 = tpu.matmul %45, %56, %cst_36 {dimension_numbers = #tpu.dot_dimension_numbers<[1], [0], [0], [1], [0, 0, 1, 1], [], []>} : vector<256x384xf32>, vector<384x128xf32>, vector<256x128xf32> -> vector<256x128xf32>
    %58 = arith.addf %54, %57 : vector<256x128xf32>
    %c2_37 = arith.constant 2 : index
    %c0_38 = arith.constant 0 : index
    %c0_39 = arith.constant 0 : index
    %59 = vector.load %arg4[%c2_37, %c0_38, %c0_39] : memref<3x384x128xf32, #tpu.memory_space<vmem>>, vector<1x384x128xf32>
    %60 = vector.shape_cast %59 : vector<1x384x128xf32> to vector<384x128xf32>
    %cst_40 = arith.constant dense<0.000000e+00> : vector<256x128xf32>
    %61 = tpu.matmul %51, %60, %cst_40 {dimension_numbers = #tpu.dot_dimension_numbers<[1], [0], [0], [1], [0, 0, 1, 1], [], []>} : vector<256x384xf32>, vector<384x128xf32>, vector<256x128xf32> -> vector<256x128xf32>
    %62 = arith.addf %58, %61 : vector<256x128xf32>
    %c0_41 = arith.constant 0 : index
    %c0_42 = arith.constant 0 : index
    %63 = vector.load %arg6[%c0_41, %c0_42] : memref<1x128xf32, #tpu.memory_space<vmem>>, vector<1x128xf32>
    %64 = vector.broadcast %63 : vector<1x128xf32> to vector<256x128xf32>
    %65 = arith.addf %62, %64 : vector<256x128xf32>
    %c0_43 = arith.constant 0 : index
    %c0_44 = arith.constant 0 : index
    %c0_45 = arith.constant 0 : index
    %66 = vector.load %arg1[%c0_43, %c0_44, %c0_45] : memref<1x256x128xf32, #tpu.memory_space<vmem>>, vector<1x256x128xf32>
    %67 = vector.shape_cast %66 : vector<1x256x128xf32> to vector<256x128xf32>
    %68 = arith.addf %65, %67 : vector<256x128xf32>
    %cst_46 = arith.constant 0.000000e+00 : f32
    %69 = vector.broadcast %cst_46 : f32 to vector<256x128xf32>
    %70 = arith.maximumf %68, %69 : vector<256x128xf32>
    %c0_47 = arith.constant 0 : index
    %c0_48 = arith.constant 0 : index
    %c0_49 = arith.constant 0 : index
    %71 = vector.load %arg7[%c0_47, %c0_48, %c0_49] : memref<1x256x128xf32, #tpu.memory_space<vmem>>, vector<1x256x128xf32>
    %72 = vector.shape_cast %71 : vector<1x256x128xf32> to vector<256x128xf32>
    %73 = vector.shape_cast %70 : vector<256x128xf32> to vector<1x256x128xf32>
    tpu.vector_store %arg7[%c0_47, %c0_48, %c0_49], %73 {strides = array<i32>} : memref<1x256x128xf32, #tpu.memory_space<vmem>>, vector<1x256x128xf32>,
    return
  }
  func.func @transform_0(%arg0: i32) -> (i32, i32, i32) {
    %c0_i32 = arith.constant 0 : i32
    %c0_i32_0 = arith.constant 0 : i32
    %c0_i32_1 = arith.constant 0 : i32
    return %arg0, %c0_i32, %c0_i32_0 : i32, i32, i32
  }
  func.func @transform_1(%arg0: i32) -> (i32, i32, i32) {
    %c0_i32 = arith.constant 0 : i32
    %c0_i32_0 = arith.constant 0 : i32
    %c0_i32_1 = arith.constant 0 : i32
    %c0_i32_2 = arith.constant 0 : i32
    return %c0_i32, %c0_i32_0, %c0_i32_1 : i32, i32, i32
  }
  func.func @transform_2(%arg0: i32) -> (i32, i32, i32) {
    %c0_i32 = arith.constant 0 : i32
    %c0_i32_0 = arith.constant 0 : i32
    %c0_i32_1 = arith.constant 0 : i32
    %c0_i32_2 = arith.constant 0 : i32
    return %c0_i32, %c0_i32_0, %c0_i32_1 : i32, i32, i32
  }
  func.func @transform_3(%arg0: i32) -> (i32, i32, i32) {
    %c0_i32 = arith.constant 0 : i32
    %c0_i32_0 = arith.constant 0 : i32
    %c0_i32_1 = arith.constant 0 : i32
    %c0_i32_2 = arith.constant 0 : i32
    return %c0_i32, %c0_i32_0, %c0_i32_1 : i32, i32, i32
  }
  func.func @transform_4(%arg0: i32) -> (i32, i32) {
    %c0_i32 = arith.constant 0 : i32
    %c0_i32_0 = arith.constant 0 : i32
    %c0_i32_1 = arith.constant 0 : i32
    return %c0_i32, %c0_i32_0 : i32, i32
  }
  func.func @transform_5(%arg0: i32) -> (i32, i32) {
    %c0_i32 = arith.constant 0 : i32
    %c0_i32_0 = arith.constant 0 : i32
    %c0_i32_1 = arith.constant 0 : i32
    return %c0_i32, %c0_i32_0 : i32, i32
  }
  func.func @transform_6(%arg0: i32) -> (i32, i32, i32) {
    %c0_i32 = arith.constant 0 : i32
    %c0_i32_0 = arith.constant 0 : i32
    %c0_i32_1 = arith.constant 0 : i32
    return %arg0, %c0_i32, %c0_i32_0 : i32, i32, i32
  }
}

</mosaic_0001>

<bundles_post_ra>
// kernel: tpu_custom_call.1
= control target key start
LH: loop header
LB: loop body
LE: loop exit
PB: predicated region body
PF: predicated region fallthrough
CT: control target
= control target key end

     0   :  { %11 = vsyncpa [#allocation3], 0  ;;  %s10197_s0 = inlined_call_operand.vmem [shape: f32[2,256,128], index: 0, kind: input, shape index: {}]   ;;  %s10198_s1 = inlined_call_operand.vmem [shape: f32[4,256,1], index: 1, kind: input, shape index: {}]   ;;  %s10199_s2 = inlined_call_operand.hbm [shape: f32[3,384,128], index: 2, kind: input, shape index: {}]   ;;  %s10200_s3 = inlined_call_operand.hbm [shape: f32[3,384,128], index: 3, kind: input, shape index: {}]   ;;  %s10201_s4 = inlined_call_operand.vmem [shape: f32[1,128], index: 4, kind: input, shape index: {}]   ;;  %s10202_s5 = inlined_call_operand.vmem [shape: f32[1,128], index: 5, kind: input, shape index: {}]   ;;  %s10203_s6 = inlined_call_operand.hbm [shape: f32[2,256,128], index: 6, kind: output, shape index: {}]  }
   0x1   :  { %12 = vsyncpa [#allocation6], 0 }
   0x2   :  { %13 = vsyncpa [#allocation4], 0 }
   0x3   :  { %15 = vsyncpa [#allocation4 + $0x1], 0  ;;  %s6398_s21 = smov 0   ;;  %s6400_s22 = smov 0  }
   0x4   :  { %s6402_s23 = smov 0   ;;  %s6404_s24 = smov 0  }
   0x5 LB: > { %s6419_s25 = sadd.s32 4294967295, %s6352_s24   ;;  %s5215_s26 = sadd.s32 4294967294, %s6352_s24   ;;  %s6352_s24 = sphi %s6404_s24, %s11324_s24   ;;  %s6348_s23 = sphi %s6402_s23, %s11323_s23   ;;  %s6344_s22 = sphi %s6400_s22, %s11322_s22   ;;  %s6340_s21 = sphi %s6398_s21, %s11321_s21  }
   0x6   : > { %s6423_s27 = sadd.s32 1, %s6352_s24   ;;  %s159_s28 = sadd.s32 1, %s6348_s23 }
   0x7   : > { %s156_s29 = ssub.s32 %s6352_s24, %s6423_s27  ;;  %p169_p0 = scmp.ne.s32.totalorder %s6348_s23, %s6344_s22 }
   0x8   : > { %p157_p1 = scmp.eq.s32.totalorder %s156_s29, 0  ;;  %p170_p2 = scmp.eq.s32.totalorder %s6419_s25, 1 }
   0x9   : > { %p175_p3 = scmp.ne.s32.totalorder %s6344_s22, %s6340_s21  ;;  %p176_p4 = scmp.eq.s32.totalorder %s5215_s26, 1 }
   0xa   : > { %s6434_s30 = scalar_select %p157_p1, %s6348_s23, %s159_s28  }
   0xb   : > { %p6436_p5 = por %p170_p2, %p169_p0  ;;  %p6440_p6 = por %p176_p4, %p175_p3 }
   0xc   : > { %p5216_p7 = scmp.ge.s32.totalorder %s6352_s24, 1  ;;  %p183_p8 = scmp.lt.s32.totalorder %s6352_s24, 3 }
   0xd   : > { %s10611_s8 = scalar_select %p6440_p6, 1, 0 }
   0xe   : > { %p10204_p9 = scmp.eq.s32.totalorder %s6419_s25, 0  ;;  %p6447_p10 = pnand %p5216_p7, %p183_p8 }
   0xf   : > { %s6354_s10 = smov [#allocation2]   ;;  %s6355_s13 = smov [#allocation5]  }
  0x10   : > { %s198_s11 = sshll.u32 %s6354_s10, 4  ;;  %p6109_p11 = pneg %p6447_p10  ;;  %s199_s11 = int_to_ptr.vmem [resolvable:$true] %s198_s11 }
  0x11   : > { %s211_s14 = sshll.u32 %s6355_s13, 4  ;;  %s6243_s15 = scalar_lea.vmem %s199_s11, 18432  ;;  %s212_s14 = int_to_ptr.vmem [resolvable:$true] %s211_s14 }
  0x12   : > { %p6455_p12 = pnand %p10204_p9, %p6109_p11  ;;  %p6244_p0 = scmp.ne.s32.totalorder %s199_s11, %s6243_s15 }
  0x13   : > { %p6251_p3 = scmp.lt.s32.totalorder %s199_s11, %s199_s11  ;;  %p6252_p4 = scmp.lt.s32.totalorder %s6243_s15, %s6243_s15 }
  0x14   : > { %p6234_p13 = pneg %p6455_p12 }
  0x15   : > { %p6253_p7 = por %p6252_p4, %p6251_p3 }
  0x16   : > { %p6246_p1 = pnand %p6244_p0, %p6234_p13 }
  0x18   : > { %p6247_p2 = pneg %p6246_p1 }
  0x1a   : > { %p6254_p8 = pnand %p6253_p7, %p6247_p2 }
  0x1c   : > { %6257 = shalt.err (!%p6254_p8)
}
  0x1d   : > { %s6356_s16 = smov 128   ;;  %s6357_s17 = smov 8  }
  0x1e   : > { %6112 = dma.hbm_to_vmem [thread:$0]  (!%p6455_p12), %s10199_s2, 18432, %s199_s11, [#allocation3], %s6356_s16, %s6356_s16, %s6357_s17  }
  0x1f   : > { %s6269_s20 = scalar_lea.vmem %s212_s14, 18432  ;;  %p6277_p9 = scmp.lt.s32.totalorder %s212_s14, %s212_s14 }
  0x20   : > { %p6270_p11 = scmp.ne.s32.totalorder %s212_s14, %s6269_s20  ;;  %p6278_p6 = scmp.lt.s32.totalorder %s6269_s20, %s6269_s20 }
  0x22   : > { %p6272_p0 = pnand %p6270_p11, %p6234_p13  ;;  %p6279_p3 = por %p6278_p6, %p6277_p9 }
  0x24   : > { %p6273_p1 = pneg %p6272_p0 }
  0x26   : > { %p6280_p2 = pnand %p6279_p3, %p6273_p1 }
  0x28   : > { %6283 = shalt.err (!%p6280_p2)
}
  0x29   : > { %6115 = dma.hbm_to_vmem [thread:$0]  (!%p6455_p12), %s10200_s3, 18432, %s212_s14, [#allocation6], %s6356_s16, %s6356_s16, %s6357_s17  }
  0x2a   : > { %241 = sbr.rel (%p6447_p10) target bundleno = 1270 (0x4f6), region = 44 }
  0x2f   : > { %p10614_p4 = scmp.eq.s32.totalorder %s6419_s25, 0 }
  0x31   : > { %6327 = dma.done.wait (%p10614_p4), [#allocation3], 18432   ;;  %p10615_p13 = pmov %p10614_p4 }
  0x32   : > { %p10616_p7 = pmov %p10614_p4 }
  0x33   : > { %6329 = vsyncadd (%p10615_p13), [#allocation3], 4294948864 }
  0x34   : > { %6331 = dma.done.wait (%p10616_p7), [#allocation6], 18432   ;;  %p10617_p6 = pmov %p10614_p4 }
  0x35   : > { %v6358_v0 = vmov 0   ;;  %v314_v1 = vld [vmem:[%s10198_s1 + $0x10] sm:$0xff]  ;;  %v312_v2 = vld [vmem:[%s10198_s1] sm:$0xff]  ;;  %v315_v3 = vld [vmem:[%s10198_s1 + $0x18] sm:$0xff]  ;;  %v10206_v7 = vmov 0.0   ;;  %p275_p9 = scmp.lt.s32.totalorder %s6419_s25, 1 }
  0x36   : > { %6333 = vsyncadd (%p10617_p6), [#allocation6], 4294948864  ;;  %6166 = vset.pattern.permute.xlu1 %v6358_v0  ;;  %6165 = vset.pattern.permute.xlu0 %v6358_v0  ;;  %v313_v4 = vld [vmem:[%s10198_s1 + $0x8] sm:$0xff]  ;;  %v316_v6 = vld [vmem:[%s10198_s1 + $0x20] sm:$0xff]  ;;  %s272_s17 = sand.u32 1, %s6344_s22   ;;  %s5330_s28 = sshll.u32 %s6419_s25, 12 }
  0x37   : > { %647 = vperm.xlu1 %6166, %v314_v1   ;;  %637 = vperm.xlu0 %6165, %v312_v2   ;;  %v317_v5 = vld [vmem:[%s10198_s1 + $0x28] sm:$0xff]  ;;  %v319_v8 = vld [vmem:[%s10198_s1 + $0x38] sm:$0xff]  ;;  %v318_v9 = vld [vmem:[%s10198_s1 + $0x30] sm:$0xff]  ;;  %s276_s13 = scalar_select %p275_p9, %s6419_s25, 1 }
  0x38   : > { %1568 = vmatprep.subr.mxu0 %v10206_v7  ;;  %v321_v10 = vld [vmem:[%s10198_s1 + $0x48] sm:$0xff]  ;;  %v320_v11 = vld [vmem:[%s10198_s1 + $0x40] sm:$0xff]  ;;  %v1567_v12 = vld [vmem:[#allocation2 + $0x2f8] sm:$0xff]  ;;  %s5223_s20 = sshll.u32 %s272_s17, 8  ;;  %s10150_s12 = scalar_lea.hbm %s10203_s6, %s5330_s28 }
  0x39   : > { %v1566_v13 = vld [vmem:[#allocation2 + $0x2f0] sm:$0xff]  ;;  %v323_v14 = vld [vmem:[%s10198_s1 + $0x58] sm:$0xff]  ;;  %5619 = vmatprep.subr.mxu1 %v1567_v12  ;;  %s5329_s18 = sshll.u32 %s276_s13, 8  ;;  %v1565_v16 = vld [vmem:[#allocation2 + $0x2e8] sm:$0xff]  ;;  %s10021_s26 = scalar_lea.vmem [#allocation7], %s5223_s20 }
  0x3a   : > { %v322_v15 = vld [vmem:[%s10198_s1 + $0x50] sm:$0xff]  ;;  %5620 = vmatpush3.msra.mxu1 %v1567_v12  ;;  %v325_v17 = vld [vmem:[%s10198_s1 + $0x68] sm:$0xff]  ;;  %v324_v18 = vld [vmem:[%s10198_s1 + $0x60] sm:$0xff]  ;;  %s6535_s9 = scalar_lea.vmem %s10197_s0, %s5329_s18  ;;  %s5131_s29 = sshll.u32 %s10021_s26, 4  ;;  %s10152_s29 = int_to_ptr.vmem [resolvable:$true] %s5131_s29 }
  0x3b   : > { %652 = vperm.xlu1 %6166, %v315_v3   ;;  %642 = vperm.xlu0 %6165, %v313_v4   ;;  %v1564_v19 = vld [vmem:[#allocation2 + $0x2e0] sm:$0xff]  ;;  %v1563_v20 = vld [vmem:[#allocation2 + $0x2d8] sm:$0xff]  ;;  %v326_v23 = vld [vmem:[%s10198_s1 + $0x70] sm:$0xff]  ;;  %s10157_s13 = scalar_lea.sflag [#allocation4], %s272_s17  ;;  %s6284_s25 = scalar_lea.vmem %s10152_s29, 4096 }
  0x3c   : > { %5621 = vmatprep.subr.mxu1 %v1566_v13  ;;  %v6538_v21 = vld [vmem:[%s6535_s9] sm:$0xff]  ;;  %v327_v22 = vld [vmem:[%s10198_s1 + $0x78] sm:$0xff]  ;;  %v1562_v24 = vld [vmem:[#allocation2 + $0x2d0] sm:$0xff]  ;;  %p6285_p10 = scmp.ne.s32.totalorder %s10152_s29, %s6284_s25 }
  0x3d   : > { %5622 = vmatpush3.msra.mxu1 %v1566_v13  ;;  %1632 = vmatprep.mubr.f32.mxu0 %v6538_v21  ;;  %v329_v25 = vld [vmem:[%s10198_s1 + $0x88] sm:$0xff]  ;;  %v328_v26 = vld [vmem:[%s10198_s1 + $0x80] sm:$0xff]  ;;  %v1535_v27 = vld [vmem:[#allocation2 + $0x1f8] sm:$0xff] }
  0x3e   : > { %5623 = vmatprep.subr.mxu1 %v1565_v16  ;;  %v1561_v28 = vld [vmem:[#allocation2 + $0x2c8] sm:$0xff]  ;;  %1569 = vmatpush1.msra.mxu0 %v1535_v27  ;;  %v1534_v29 = vld [vmem:[#allocation2 + $0x1f0] sm:$0xff]  ;;  %v1560_v30 = vld [vmem:[#allocation2 + $0x2c0] sm:$0xff]  ;;  %p6286_p12 = pnand %p6285_p10, %p6436_p5 }
  0x3f   : > { %662 = vperm.xlu1 %6166, %v317_v5   ;;  %657 = vperm.xlu0 %6165, %v316_v6   ;;  %v1533_v31 = vld [vmem:[#allocation2 + $0x1e8] sm:$0xff]  ;;  %v331_v32 = vld [vmem:[%s10198_s1 + $0x98] sm:$0xff]  ;;  %v330_v33 = vld [vmem:[%s10198_s1 + $0x90] sm:$0xff] }
  0x40   : > { %5624 = vmatpush3.msra.mxu1 %v1565_v16  ;;  %1570 = vmatprep.subr.mxu0 %v10206_v7  ;;  %v1559_v34 = vld [vmem:[#allocation2 + $0x2b8] sm:$0xff]  ;;  %v1532_v35 = vld [vmem:[#allocation2 + $0x1e0] sm:$0xff]  ;;  %v333_v36 = vld [vmem:[%s10198_s1 + $0xa8] sm:$0xff]  ;;  %p6287_p8 = pneg %p6286_p12 }
  0x41   : > { %5625 = vmatprep.subr.mxu1 %v1564_v19  ;;  %1571 = vmatpush1.msra.mxu0 %v1534_v29  ;;  %v332_v37 = vld [vmem:[%s10198_s1 + $0xa0] sm:$0xff]  ;;  %v1558_v38 = vld [vmem:[#allocation2 + $0x2b0] sm:$0xff]  ;;  %v1531_v39 = vld [vmem:[#allocation2 + $0x1d8] sm:$0xff] }
  0x42   : > { %5626 = vmatpush3.msra.mxu1 %v1564_v19  ;;  %1572 = vmatprep.subr.mxu0 %v10206_v7  ;;  %v1557_v40 = vld [vmem:[#allocation2 + $0x2a8] sm:$0xff]  ;;  %v1530_v41 = vld [vmem:[#allocation2 + $0x1d0] sm:$0xff]  ;;  %v335_v42 = vld [vmem:[%s10198_s1 + $0xb8] sm:$0xff] }
  0x43   : > { %672 = vperm.xlu1 %6166, %v319_v8   ;;  %667 = vperm.xlu0 %6165, %v318_v9   ;;  %v334_v43 = vld [vmem:[%s10198_s1 + $0xb0] sm:$0xff]  ;;  %v1556_v44 = vld [vmem:[#allocation2 + $0x2a0] sm:$0xff]  ;;  %v1529_v45 = vld [vmem:[#allocation2 + $0x1c8] sm:$0xff] }
  0x44   : > { %5627 = vmatprep.subr.mxu1 %v1563_v20  ;;  %1573 = vmatpush1.msra.mxu0 %v1533_v31  ;;  %v337_v46 = vld [vmem:[%s10198_s1 + $0xc8] sm:$0xff]  ;;  %v336_v47 = vld [vmem:[%s10198_s1 + $0xc0] sm:$0xff]  ;;  %v1555_v48 = vld [vmem:[#allocation2 + $0x298] sm:$0xff] }
  0x45   : > { %5628 = vmatpush3.msra.mxu1 %v1563_v20  ;;  %1574 = vmatprep.subr.mxu0 %v10206_v7  ;;  %v1528_v49 = vld [vmem:[#allocation2 + $0x1c0] sm:$0xff]  ;;  %v1554_v50 = vld [vmem:[#allocation2 + $0x290] sm:$0xff]  ;;  %v1527_v51 = vld [vmem:[#allocation2 + $0x1b8] sm:$0xff] }
  0x46   : > { %5629 = vmatprep.subr.mxu1 %v1562_v24  ;;  %1575 = vmatpush1.msra.mxu0 %v1532_v35  ;;  %v339_v52 = vld [vmem:[%s10198_s1 + $0xd8] sm:$0xff]  ;;  %v338_v53 = vld [vmem:[%s10198_s1 + $0xd0] sm:$0xff]  ;;  %v1553_v54 = vld [vmem:[#allocation2 + $0x288] sm:$0xff] }
  0x47   : > { %682 = vperm.xlu1 %6166, %v321_v10   ;;  %677 = vperm.xlu0 %6165, %v320_v11   ;;  %v1526_v55 = vld [vmem:[#allocation2 + $0x1b0] sm:$0xff]  ;;  %v341_v56 = vld [vmem:[%s10198_s1 + $0xe8] sm:$0xff]  ;;  %v340_v57 = vld [vmem:[%s10198_s1 + $0xe0] sm:$0xff] }
  0x48   : > { %5630 = vmatpush3.msra.mxu1 %v1562_v24  ;;  %1576 = vmatprep.subr.mxu0 %v10206_v7  ;;  %v1552_v58 = vld [vmem:[#allocation2 + $0x280] sm:$0xff]  ;;  %v1525_v59 = vld [vmem:[#allocation2 + $0x1a8] sm:$0xff]  ;;  %v343_v61 = vld [vmem:[%s10198_s1 + $0xf8] sm:$0xff] }
  0x49   : > { %5631 = vmatprep.subr.mxu1 %v1561_v28  ;;  %1577 = vmatpush1.msra.mxu0 %v1531_v39  ;;  %v1524_v60 = vld [vmem:[#allocation2 + $0x1a0] sm:$0xff]  ;;  %v342_v62 = vld [vmem:[%s10198_s1 + $0xf0] sm:$0xff]  ;;  %v1523_v63 = vld [vmem:[#allocation2 + $0x198] sm:$0xff] }
  0x4a   : > { %5632 = vmatpush3.msra.mxu1 %v1561_v28  ;;  %1578 = vmatprep.subr.mxu0 %v10206_v7  ;;  %v5256_v0 = vld [vmem:[%s10198_s1 + $0x1f0] sm:$0xff]  ;;  %v5255_v1 = vld [vmem:[%s10198_s1 + $0x1e8] sm:$0xff]  ;;  %v5257_v4 = vld [vmem:[%s10198_s1 + $0x1f8] sm:$0xff] }
  0x4b   : > { %692 = vperm.xlu1 %6166, %v323_v14   ;;  %687 = vperm.xlu0 %6165, %v322_v15   ;;  %v1522_v2 = vld [vmem:[#allocation2 + $0x190] sm:$0xff]  ;;  %v1521_v3 = vld [vmem:[#allocation2 + $0x188] sm:$0xff]  ;;  %v5226_v5 = vld [vmem:[%s10198_s1 + $0x100] sm:$0xff] }
  0x4c   : > { %5633 = vmatprep.subr.mxu1 %v1560_v30  ;;  %1579 = vmatpush1.msra.mxu0 %v1530_v41  ;;  %v1520_v6 = vld [vmem:[#allocation2 + $0x180] sm:$0xff]  ;;  %v5227_v8 = vld [vmem:[%s10198_s1 + $0x108] sm:$0xff]  ;;  %v1551_v10 = vld [vmem:[#allocation2 + $0x278] sm:$0xff] }
  0x4d   : > { %5634 = vmatpush3.msra.mxu1 %v1560_v30  ;;  %1580 = vmatprep.subr.mxu0 %v10206_v7  ;;  %v5258_v9 = vld [vmem:[%s10198_s1 + $0x200] sm:$0xff]  ;;  %v1550_v11 = vld [vmem:[#allocation2 + $0x270] sm:$0xff]  ;;  %v5259_v13 = vld [vmem:[%s10198_s1 + $0x208] sm:$0xff] }
  0x4e   : > { %5635 = vmatprep.subr.mxu1 %v1559_v34  ;;  %1581 = vmatpush1.msra.mxu0 %v1529_v45  ;;  %v5228_v12 = vld [vmem:[%s10198_s1 + $0x110] sm:$0xff]  ;;  %v1549_v14 = vld [vmem:[#allocation2 + $0x268] sm:$0xff]  ;;  %v5229_v15 = vld [vmem:[%s10198_s1 + $0x118] sm:$0xff] }
  0x4f   : > { %702 = vperm.xlu1 %6166, %v325_v17   ;;  %697 = vperm.xlu0 %6165, %v324_v18   ;;  %v5260_v16 = vld [vmem:[%s10198_s1 + $0x210] sm:$0xff]  ;;  %v1548_v17 = vld [vmem:[#allocation2 + $0x260] sm:$0xff]  ;;  %v1547_v18 = vld [vmem:[#allocation2 + $0x258] sm:$0xff] }
  0x50   : > { %5636 = vmatpush3.msra.mxu1 %v1559_v34  ;;  %1582 = vmatprep.subr.mxu0 %v10206_v7  ;;  %v5230_v19 = vld [vmem:[%s10198_s1 + $0x120] sm:$0xff]  ;;  %v5261_v20 = vld [vmem:[%s10198_s1 + $0x218] sm:$0xff]  ;;  %v5232_v27 = vld [vmem:[%s10198_s1 + $0x130] sm:$0xff] }
  0x51   : > { %5637 = vmatprep.subr.mxu1 %v1558_v38  ;;  %1583 = vmatpush1.msra.mxu0 %v1528_v49  ;;  %v5262_v24 = vld [vmem:[%s10198_s1 + $0x220] sm:$0xff]  ;;  %v5263_v28 = vld [vmem:[%s10198_s1 + $0x228] sm:$0xff]  ;;  %v1543_v29 = vld [vmem:[#allocation2 + $0x238] sm:$0xff] }
  0x52   : > { %5638 = vmatpush3.msra.mxu1 %v1558_v38  ;;  %1584 = vmatprep.subr.mxu0 %v10206_v7  ;;  %v5233_v30 = vld [vmem:[%s10198_s1 + $0x138] sm:$0xff]  ;;  %v5264_v31 = vld [vmem:[%s10198_s1 + $0x230] sm:$0xff]  ;;  %v5234_v34 = vld [vmem:[%s10198_s1 + $0x140] sm:$0xff] }
  0x53   : > { %712 = vperm.xlu1 %6166, %v327_v22   ;;  %707 = vperm.xlu0 %6165, %v326_v23   ;;  %v1546_v22 = vld [vmem:[#allocation2 + $0x250] sm:$0xff]  ;;  %v5231_v23 = vld [vmem:[%s10198_s1 + $0x128] sm:$0xff]  ;;  %v5265_v35 = vld [vmem:[%s10198_s1 + $0x238] sm:$0xff] }
  0x54   : > { %5639 = vmatprep.subr.mxu1 %v1557_v40  ;;  %1585 = vmatpush1.msra.mxu0 %v1527_v51  ;;  %v5266_v38 = vld [vmem:[%s10198_s1 + $0x240] sm:$0xff]  ;;  %v1539_v39 = vld [vmem:[#allocation2 + $0x218] sm:$0xff]  ;;  %v5236_v41 = vld [vmem:[%s10198_s1 + $0x150] sm:$0xff] }
  0x55   : > { %5640 = vmatpush3.msra.mxu1 %v1557_v40  ;;  %1586 = vmatprep.subr.mxu0 %v10206_v7  ;;  %v1538_v40 = vld [vmem:[#allocation2 + $0x210] sm:$0xff]  ;;  %v5269_v49 = vld [vmem:[%s10198_s1 + $0x258] sm:$0xff]  ;;  %v5270_v51 = vld [vmem:[%s10198_s1 + $0x260] sm:$0xff] }
  0x56   : > { %5641 = vmatprep.subr.mxu1 %v1556_v44  ;;  %1587 = vmatpush1.msra.mxu0 %v1526_v55  ;;  %v5268_v45 = vld [vmem:[%s10198_s1 + $0x250] sm:$0xff] }
  0x57   : > { %722 = vperm.xlu1 %6166, %v329_v25   ;;  %717 = vperm.xlu0 %6165, %v328_v26   ;;  %v1545_v25 = vld [vmem:[#allocation2 + $0x248] sm:$0xff]  ;;  %v1544_v26 = vld [vmem:[#allocation2 + $0x240] sm:$0xff] }
  0x58   : > { %5642 = vmatpush3.msra.mxu1 %v1556_v44  ;;  %1588 = vmatprep.subr.mxu0 %v10206_v7  ;;  %v5237_v44 = vld [vmem:[%s10198_s1 + $0x158] sm:$0xff] }
  0x59   : > { %5643 = vmatprep.subr.mxu1 %v1555_v48  ;;  %1589 = vmatpush1.msra.mxu0 %v1525_v59  ;;  %v6737_v59 = vld [vmem:[%s6535_s9 + $0x8] sm:$0xff] }
  0x5a   : > { %5644 = vmatpush3.msra.mxu1 %v1555_v48  ;;  %1590 = vmatprep.subr.mxu0 %v10206_v7  ;;  %v5238_v48 = vld [vmem:[%s10198_s1 + $0x160] sm:$0xff] }
  0x5b   : > { %732 = vperm.xlu1 %6166, %v331_v32   ;;  %727 = vperm.xlu0 %6165, %v330_v33   ;;  %v1542_v32 = vld [vmem:[#allocation2 + $0x230] sm:$0xff]  ;;  %v1541_v33 = vld [vmem:[#allocation2 + $0x228] sm:$0xff] }
  0x5c   : > { %5645 = vmatprep.subr.mxu1 %v1554_v50  ;;  %1591 = vmatpush1.msra.mxu0 %v1524_v60  ;;  %v5241_v60 = vld [vmem:[%s10198_s1 + $0x178] sm:$0xff] }
  0x5d   : > { %5646 = vmatpush3.msra.mxu1 %v1554_v50  ;;  %1592 = vmatprep.subr.mxu0 %v10206_v7  ;;  %v5239_v50 = vld [vmem:[%s10198_s1 + $0x168] sm:$0xff] }
  0x5e   : > { %5647 = vmatprep.subr.mxu1 %v1553_v54  ;;  %1593 = vmatpush1.msra.mxu0 %v1523_v63 }
  0x5f   : > { %742 = vperm.xlu1 %6166, %v333_v36   ;;  %737 = vperm.xlu0 %6165, %v332_v37   ;;  %v1540_v36 = vld [vmem:[#allocation2 + $0x220] sm:$0xff]  ;;  %v5235_v37 = vld [vmem:[%s10198_s1 + $0x148] sm:$0xff] }
  0x60   : > { %5648 = vmatpush3.msra.mxu1 %v1553_v54  ;;  %1594 = vmatprep.subr.mxu0 %v10206_v7  ;;  %v859_v54 = vlaneseq }
  0x61   : > { %5649 = vmatprep.subr.mxu1 %v1552_v58  ;;  %1595 = vmatpush1.msra.mxu0 %v1522_v2 }
  0x62   : > { %5650 = vmatpush3.msra.mxu1 %v1552_v58  ;;  %1596 = vmatprep.subr.mxu0 %v10206_v7  ;;  %v6734_v58 = vld [vmem:[%s6535_s9 + $0x18] sm:$0xff] }
  0x63   : > { %752 = vperm.xlu1 %6166, %v335_v42   ;;  %747 = vperm.xlu0 %6165, %v334_v43   ;;  %v5267_v42 = vld [vmem:[%s10198_s1 + $0x248] sm:$0xff] }
  0x64   : > { %2018 = vmatprep.subr.mxu1 %v10206_v7  ;;  %1597 = vmatpush1.msra.mxu0 %v1521_v3  ;;  %v1537_v43 = vld [vmem:[#allocation2 + $0x208] sm:$0xff] }
  0x65   : > { %1598 = vmatprep.subr.mxu0 %v10206_v7 }
  0x66   : > { %1599 = vmatpush1.msra.mxu0 %v1520_v6  ;;  %v5242_v6 = vld [vmem:[%s10198_s1 + $0x180] sm:$0xff] }
  0x67   : > { %762 = vperm.xlu1 %6166, %v337_v46   ;;  %757 = vperm.xlu0 %6165, %v336_v47   ;;  %v1536_v46 = vld [vmem:[#allocation2 + $0x200] sm:$0xff]  ;;  %v6705_v47 = vld [vmem:[#allocation2 + $0x178] sm:$0xff] }
  0x68   : > { %1600 = vmatprep.subr.mxu0 %v10206_v7 }
  0x69   : > { %1601 = vmatpush2.msra.mxu0 %v1551_v10 }
  0x6a   : > { %1602 = vmatprep.subr.mxu0 %v10206_v7 }
  0x6b   : > { %772 = vperm.xlu1 %6166, %v339_v52   ;;  %767 = vperm.xlu0 %6165, %v338_v53   ;;  %v5240_v52 = vld [vmem:[%s10198_s1 + $0x170] sm:$0xff]  ;;  %v5271_v53 = vld [vmem:[%s10198_s1 + $0x268] sm:$0xff] }
  0x6c   : > { %1603 = vmatpush2.msra.mxu0 %v1550_v11 }
  0x6d   : > { %1604 = vmatprep.subr.mxu0 %v10206_v7 }
  0x6e   : > { %1605 = vmatpush2.msra.mxu0 %v1549_v14 }
  0x6f   : > { %782 = vperm.xlu1 %6166, %v341_v56   ;;  %777 = vperm.xlu0 %6165, %v340_v57   ;;  %v6731_v57 = vld [vmem:[%s6535_s9 + $0x10] sm:$0xff] }
  0x70   : > { %1606 = vmatprep.subr.mxu0 %v10206_v7 }
  0x71   : > { %1607 = vmatpush2.msra.mxu0 %v1548_v17 }
  0x72   : > { %1608 = vmatprep.subr.mxu0 %v10206_v7 }
  0x73   : > { %792 = vperm.xlu1 %6166, %v343_v61   ;;  %787 = vperm.xlu0 %6165, %v342_v62   ;;  %v5272_v61 = vld [vmem:[%s10198_s1 + $0x270] sm:$0xff]  ;;  %v6745_v62 = vshrl.u32 %v859_v54, 7 }
  0x74   : > { %1609 = vmatpush2.msra.mxu0 %v1547_v18  ;;  %v6790_v18 = vld [vmem:[%s6535_s9 + $0x38] sm:$0xff] }
  0x75   : > { %1610 = vmatprep.subr.mxu0 %v10206_v7  ;;  %10620 = vst [vmem:[#allocation13_spill] sm:$0xff] %v6745_v62  ;;  %vm926_vm0 = vcmp.lt.s32.totalorder %v6745_v62, 7  ;;  %vm861_vm1 = vcmp.lt.s32.totalorder %v6745_v62, 1  ;;  %v7956_v62 = vld [vmem:[%s6535_s9 + $0xf8] sm:$0xff] }
  0x76   : > { %1611 = vmatpush2.msra.mxu0 %v1546_v22  ;;  %v6798_v22 = vld [vmem:[%s6535_s9 + $0x30] sm:$0xff]  ;;  %10793 = vst [vmem:[#allocation179_spill] sm:$0xff] %v7956_v62 }
  0x77   : > { %595 = vperm.xlu1 %6166, %v5256_v0   ;;  %590 = vperm.xlu0 %6165, %v5255_v1  }
  0x78   : > { %1612 = vmatprep.subr.mxu0 %v10206_v7 }
  0x79   : > { %1613 = vmatpush2.msra.mxu0 %v1545_v25 }
  0x7a   : > { %1614 = vmatprep.subr.mxu0 %v10206_v7 }
  0x7b   : > { %600 = vperm.xlu1 %6166, %v5257_v4   ;;  %445 = vperm.xlu0 %6165, %v5226_v5   ;;  %v6762_v5 = vld [vmem:[%s6535_s9 + $0x28] sm:$0xff] }
  0x7c   : > { %1615 = vmatpush2.msra.mxu0 %v1544_v26 }
  0x7d   : > { %1616 = vmatprep.subr.mxu0 %v10206_v7 }
  0x7e   : > { %1617 = vmatpush2.msra.mxu0 %v1543_v29 }
  0x7f   : > { %450 = vperm.xlu1 %6166, %v5227_v8   ;;  %961 = vperm.xlu0 %6165, %v5258_v9   ;;  %v5273_v8 = vld [vmem:[%s10198_s1 + $0x278] sm:$0xff] }
  0x80   : > { %1618 = vmatprep.subr.mxu0 %v10206_v7 }
  0x81   : > { %1619 = vmatpush2.msra.mxu0 %v1542_v32 }
  0x82   : > { %1620 = vmatprep.subr.mxu0 %v10206_v7 }
  0x83   : > { %455 = vperm.xlu1 %6166, %v5228_v12   ;;  %966 = vperm.xlu0 %6165, %v5259_v13  }
  0x84   : > { %1621 = vmatpush2.msra.mxu0 %v1541_v33 }
  0x85   : > { %1622 = vmatprep.subr.mxu0 %v10206_v7 }
  0x86   : > { %1623 = vmatpush2.msra.mxu0 %v1540_v36 }
  0x87   : > { %460 = vperm.xlu1 %6166, %v5229_v15   ;;  %971 = vperm.xlu0 %6165, %v5260_v16  }
  0x88   : > { %1624 = vmatprep.subr.mxu0 %v10206_v7 }
  0x89   : > { %1625 = vmatpush2.msra.mxu0 %v1539_v39  ;;  %v5275_v39 = vld [vmem:[%s10198_s1 + $0x288] sm:$0xff] }
  0x8a   : > { %1626 = vmatprep.subr.mxu0 %v10206_v7 }
  0x8b   : > { %465 = vperm.xlu1 %6166, %v5230_v19   ;;  %976 = vperm.xlu0 %6165, %v5261_v20   ;;  %v1486_v19 = vld [vmem:[#allocation2 + $0x78] sm:$0xff] }
  0x8c   : > { %1627 = vmatpush2.msra.mxu0 %v1538_v40 }
  0x8d   : > { %1628 = vmatprep.subr.mxu0 %v10206_v7 }
  0x8e   : > { %1629 = vmatpush2.msra.mxu0 %v1537_v43 }
  0x8f   : > { %470 = vperm.xlu1 %6166, %v5231_v23   ;;  %981 = vperm.xlu0 %6165, %v5262_v24   ;;  %v5243_v23 = vld [vmem:[%s10198_s1 + $0x188] sm:$0xff]  ;;  %v5274_v24 = vld [vmem:[%s10198_s1 + $0x280] sm:$0xff] }
  0x90   : > { %1630 = vmatprep.subr.mxu0 %v10206_v7 }
  0x91   : > { %1631 = vmatpush2.msra.mxu0 %v1536_v46 }
  0x92   : > { %5699 = vmatprep.subr.mxu0 %v6705_v47 }
  0x93   : > { %475 = vperm.xlu1 %6166, %v5232_v27   ;;  %986 = vperm.xlu0 %6165, %v5263_v28  }
  0x97   : > { %480 = vperm.xlu1 %6166, %v5233_v30   ;;  %991 = vperm.xlu0 %6165, %v5264_v31   ;;  %v1485_v30 = vld [vmem:[#allocation2 + $0x70] sm:$0xff] }
  0x9b   : > { %485 = vperm.xlu1 %6166, %v5234_v34   ;;  %996 = vperm.xlu0 %6165, %v5265_v35   ;;  %v6826_v34 = vld [vmem:[%s6535_s9 + $0x40] sm:$0xff]  ;;  %v1484_v35 = vld [vmem:[#allocation2 + $0x68] sm:$0xff] }
  0x9f   : > { %490 = vperm.xlu1 %6166, %v5235_v37   ;;  %1001 = vperm.xlu0 %6165, %v5266_v38   ;;  %v6829_v37 = vld [vmem:[%s6535_s9 + $0x48] sm:$0xff]  ;;  %v5244_v38 = vld [vmem:[%s10198_s1 + $0x190] sm:$0xff] }
  0xa3   : > { %495 = vperm.xlu1 %6166, %v5236_v41   ;;  %1006 = vperm.xlu0 %6165, %v5267_v42  }
  0xa7   : > { %500 = vperm.xlu1 %6166, %v5237_v44   ;;  %1011 = vperm.xlu0 %6165, %v5268_v45   ;;  %v1483_v45 = vld [vmem:[#allocation2 + $0x60] sm:$0xff] }
  0xab   : > { %505 = vperm.xlu1 %6166, %v5238_v48   ;;  %1016 = vperm.xlu0 %6165, %v5269_v49   ;;  %v6857_v49 = vld [vmem:[%s6535_s9 + $0x50] sm:$0xff] }
  0xaf   : > { %510 = vperm.xlu1 %6166, %v5239_v50   ;;  %1021 = vperm.xlu0 %6165, %v5270_v51   ;;  %v1482_v51 = vld [vmem:[#allocation2 + $0x58] sm:$0xff] }
  0xb2   : > { %v6726_v55 = vpop.permute.xlu1 %647  ;;  %v6728_v56 = vpop.permute.xlu0 %637 }
  0xb3   : > { %10618 = vst [vmem:[#allocation11_spill] sm:$0xff] %v6726_v55  ;;  %10619 = vst [vmem:[#allocation12_spill] sm:$0xff] %v6728_v56  ;;  %515 = vperm.xlu1 %6166, %v5240_v52   ;;  %1026 = vperm.xlu0 %6165, %v5271_v53   ;;  %v6749_v63 = vmul.f32 %v6728_v56, %v6538_v21  ;;  %v797_v0 = vmul.f32 %v6726_v55, %v6731_v57  ;;  %v6765_v21 = vld [vmem:[%s6535_s9 + $0x20] sm:$0xff]  ;;  %v6863_v53 = vld [vmem:[%s6535_s9 + $0x58] sm:$0xff] }
  0xb4   : > { %v7146_v56 = vld [vmem:[%s6535_s9 + $0xf8] sm:$0xff] }
  0xb5   : > { %v10205_v9 = vrot.slane %v6749_v63, 1  ;;  %v896_v12 = vrot.slane %v797_v0, 1 }
  0xb6   : > { %v6753_v1 = vpop.permute.xlu1 %652  ;;  %v6755_v2 = vpop.permute.xlu0 %642 }
  0xb7   : > { %10621 = vst [vmem:[#allocation14_spill] sm:$0xff] %v6753_v1  ;;  %10622 = vst [vmem:[#allocation15_spill] sm:$0xff] %v6755_v2  ;;  %v798_v3 = vmul.f32 %v6753_v1, %v6734_v58  ;;  %v796_v4 = vmul.f32 %v6755_v2, %v6737_v59  ;;  %520 = vperm.xlu1 %6166, %v5241_v60   ;;  %1031 = vperm.xlu0 %6165, %v5272_v61   ;;  %v5245_v60 = vld [vmem:[%s10198_s1 + $0x198] sm:$0xff]  ;;  %v5276_v61 = vld [vmem:[%s10198_s1 + $0x290] sm:$0xff] }
  0xb9   : > { %v897_v10 = vrot.slane %v798_v3, 1  ;;  %v895_v11 = vrot.slane %v796_v4, 1 }
  0xba   : > { %v6775_v13 = vpop.permute.xlu1 %662  ;;  %v6777_v14 = vpop.permute.xlu0 %657 }
  0xbb   : > { %10623 = vst [vmem:[#allocation16_spill] sm:$0xff] %v6775_v13  ;;  %10624 = vst [vmem:[#allocation17_spill] sm:$0xff] %v6777_v14  ;;  %v800_v15 = vmul.f32 %v6775_v13, %v6762_v5  ;;  %v799_v16 = vmul.f32 %v6777_v14, %v6765_v21  ;;  %525 = vperm.xlu1 %6166, %v5242_v6   ;;  %1036 = vperm.xlu0 %6165, %v5273_v8   ;;  %v1481_v6 = vld [vmem:[#allocation2 + $0x50] sm:$0xff]  ;;  %v6883_v8 = vld [vmem:[%s6535_s9 + $0x60] sm:$0xff] }
  0xbc   : > { %v6787_v17 = vsel %vm926_vm0, %v10205_v9, %v895_v11  ;;  %v6795_v20 = vsel %vm926_vm0, %v895_v11, %v896_v12  ;;  %v6809_v26 = vsel %vm926_vm0, %v896_v12, %v897_v10  ;;  %v1498_v14 = vld [vmem:[#allocation2 + $0xd8] sm:$0xff] }
  0xbd   : > { %10625 = vst [vmem:[#allocation18_spill] sm:$0xff] %v6787_v17  ;;  %5651 = vmatprep.mubr.f32.mxu1 %v6787_v17  ;;  %10626 = vst [vmem:[#allocation19_spill] sm:$0xff] %v6795_v20  ;;  %v898_v25 = vrot.slane %v799_v16, 1  ;;  %v899_v27 = vrot.slane %v800_v15, 1 }
  0xbe   : > { %5652 = vmatmul.mubr.f32.vlgmr.msra.gmra.mxu1 %v6795_v20  ;;  %v6811_v28 = vpop.permute.xlu1 %672  ;;  %v6813_v29 = vpop.permute.xlu0 %667 }
  0xbf   : > { %10627 = vst [vmem:[#allocation20_spill] sm:$0xff] %v6811_v28  ;;  %10628 = vst [vmem:[#allocation21_spill] sm:$0xff] %v6813_v29  ;;  %5654 = vmatprep.mubr.f32.mxu1 %v6809_v26  ;;  %2019 = vmatpush1.msra.mxu1 %v1486_v19  ;;  %v802_v31 = vmul.f32 %v6811_v28, %v6790_v18  ;;  %v801_v32 = vmul.f32 %v6813_v29, %v6798_v22  ;;  %v1480_v19 = vld [vmem:[#allocation2 + $0x48] sm:$0xff]  ;;  %v5252_v28 = vld [vmem:[%s10198_s1 + $0x1d0] sm:$0xff] }
  0xc0   : > { %530 = vperm.xlu1 %6166, %v5243_v23   ;;  %1041 = vperm.xlu0 %6165, %v5274_v24   ;;  %v6822_v33 = vsel %vm926_vm0, %v897_v10, %v898_v25  ;;  %v6845_v42 = vsel %vm926_vm0, %v898_v25, %v899_v27  ;;  %v6897_v23 = vld [vmem:[%s6535_s9 + $0x68] sm:$0xff]  ;;  %v5246_v25 = vld [vmem:[%s10198_s1 + $0x1a0] sm:$0xff] }
  0xc1   : > { %2020 = vmatprep.subr.mxu1 %v10206_v7  ;;  %v900_v36 = vrot.slane %v801_v32, 1  ;;  %v901_v43 = vrot.slane %v802_v31, 1  ;;  %v1479_v32 = vld [vmem:[#allocation2 + $0x40] sm:$0xff] }
  0xc2   : > { %2021 = vmatpush1.msra.mxu1 %v1485_v30  ;;  %v6839_v40 = vpop.permute.xlu1 %682  ;;  %v6841_v41 = vpop.permute.xlu0 %677 }
  0xc3   : > { %5655 = vmatmul.mubr.f32.gmra.mxu1 %v6822_v33  ;;  %2022 = vmatprep.subr.mxu1 %v10206_v7  ;;  %10629 = vst [vmem:[#allocation22_spill] sm:$0xff] %v6839_v40  ;;  %10630 = vst [vmem:[#allocation23_spill] sm:$0xff] %v6841_v41  ;;  %v803_v44 = vmul.f32 %v6841_v41, %v6826_v34  ;;  %v804_v46 = vmul.f32 %v6839_v40, %v6829_v37 }
  0xc4   : > { %5657 = vmatprep.mubr.f32.mxu1 %v6845_v42  ;;  %2023 = vmatpush1.msra.mxu1 %v1484_v35  ;;  %v6854_v48 = vsel %vm926_vm0, %v899_v27, %v900_v36  ;;  %v6879_v3 = vsel %vm926_vm0, %v900_v36, %v901_v43  ;;  %v5277_v27 = vld [vmem:[%s10198_s1 + $0x298] sm:$0xff]  ;;  %v6915_v35 = vld [vmem:[%s6535_s9 + $0x70] sm:$0xff] }
  0xc5   : > { %535 = vperm.xlu1 %6166, %v5244_v38   ;;  %1046 = vperm.xlu0 %6165, %v5275_v39   ;;  %v902_v50 = vrot.slane %v803_v44, 1  ;;  %v903_v4 = vrot.slane %v804_v46, 1  ;;  %v295_v46 = vld [vmem:[%s6535_s9 + $0x78] sm:$0xff] }
  0xc6   : > { %2024 = vmatprep.subr.mxu1 %v10206_v7  ;;  %v6860_v52 = vpop.permute.xlu1 %692  ;;  %v6865_v54 = vpop.permute.xlu0 %687 }
  0xc7   : > { %2025 = vmatpush1.msra.mxu1 %v1483_v45  ;;  %10631 = vst [vmem:[#allocation24_spill] sm:$0xff] %v6860_v52  ;;  %10632 = vst [vmem:[#allocation25_spill] sm:$0xff] %v6865_v54  ;;  %v805_v0 = vmul.f32 %v6865_v54, %v6857_v49  ;;  %v806_v10 = vmul.f32 %v6860_v52, %v6863_v53  ;;  %v6889_v11 = vsel %vm926_vm0, %v901_v43, %v902_v50  ;;  %v1478_v45 = vld [vmem:[#allocation2 + $0x38] sm:$0xff] }
  0xc8   : > { %5658 = vmatmul.mubr.f32.gmra.mxu1 %v6854_v48  ;;  %2026 = vmatprep.subr.mxu1 %v10206_v7  ;;  %v6911_v30 = vsel %vm926_vm0, %v902_v50, %v903_v4 }
  0xc9   : > { %5660 = vmatprep.mubr.f32.mxu1 %v6879_v3  ;;  %2027 = vmatpush1.msra.mxu1 %v1482_v51  ;;  %v904_v12 = vrot.slane %v805_v0, 1  ;;  %v905_v31 = vrot.slane %v806_v10, 1  ;;  %v5247_v51 = vld [vmem:[%s10198_s1 + $0x1a8] sm:$0xff] }
  0xca   : > { %540 = vperm.xlu1 %6166, %v5245_v60   ;;  %1051 = vperm.xlu0 %6165, %v5276_v61   ;;  %v6892_v15 = vpop.permute.xlu1 %702  ;;  %v6894_v16 = vpop.permute.xlu0 %697  ;;  %v5278_v60 = vld [vmem:[%s10198_s1 + $0x2a0] sm:$0xff] }
  0xcb   : > { %2028 = vmatprep.subr.mxu1 %v10206_v7  ;;  %10633 = vst [vmem:[#allocation26_spill] sm:$0xff] %v6892_v15  ;;  %10634 = vst [vmem:[#allocation27_spill] sm:$0xff] %v6894_v16  ;;  %v807_v24 = vmul.f32 %v6894_v16, %v6883_v8  ;;  %v808_v36 = vmul.f32 %v6892_v15, %v6897_v23  ;;  %v6921_v38 = vsel %vm926_vm0, %v903_v4, %v904_v12  ;;  %v1477_v4 = vld [vmem:[#allocation2 + $0x30] sm:$0xff] }
  0xcc   : > { %2029 = vmatpush1.msra.mxu1 %v1481_v6  ;;  %v6941_v61 = vsel %vm926_vm0, %v904_v12, %v905_v31 }
  0xcd   : > { %5661 = vmatmul.mubr.f32.gmra.mxu1 %v6889_v11  ;;  %2030 = vmatprep.subr.mxu1 %v10206_v7  ;;  %v906_v44 = vrot.slane %v807_v24, 1  ;;  %v907_v0 = vrot.slane %v808_v36, 1 }
  0xce   : > { %5663 = vmatprep.mubr.f32.mxu1 %v6911_v30  ;;  %2031 = vmatpush1.msra.mxu1 %v1480_v19  ;;  %v6923_v39 = vpop.permute.xlu1 %712  ;;  %v6925_v43 = vpop.permute.xlu0 %707  ;;  %v296_v19 = vld [vmem:[%s6535_s9 + $0x80] sm:$0xff] }
  0xcf   : > { %545 = vperm.xlu1 %6166, %v5246_v25   ;;  %1056 = vperm.xlu0 %6165, %v5277_v27   ;;  %10635 = vst [vmem:[#allocation28_spill] sm:$0xff] %v6923_v39  ;;  %10636 = vst [vmem:[#allocation29_spill] sm:$0xff] %v6925_v43  ;;  %v809_v50 = vmul.f32 %v6925_v43, %v6915_v35  ;;  %v810_v24 = vmul.f32 %v6923_v39, %v295_v46  ;;  %v1476_v27 = vld [vmem:[#allocation2 + $0x28] sm:$0xff]  ;;  %v1474_v43 = vld [vmem:[#allocation2 + $0x18] sm:$0xff] }
  0xd0   : > { %2032 = vmatprep.subr.mxu1 %v10206_v7  ;;  %v6952_v25 = vsel %vm926_vm0, %v905_v31, %v906_v44  ;;  %v5279_v46 = vld [vmem:[%s10198_s1 + $0x2a8] sm:$0xff]  ;;  %v6967_v31 = vsel %vm926_vm0, %v906_v44, %v907_v0 }
  0xd1   : > { %2033 = vmatpush1.msra.mxu1 %v1479_v32  ;;  %10639 = vst [vmem:[#allocation32_spill] sm:$0xff] %v6952_v25  ;;  %v908_v12 = vrot.slane %v809_v50, 1  ;;  %v297_v32 = vld [vmem:[%s6535_s9 + $0x88] sm:$0xff]  ;;  %10640 = vst [vmem:[#allocation33_spill] sm:$0xff] %v6967_v31 }
  0xd2   : > { %5664 = vmatmul.mubr.f32.gmra.mxu1 %v6921_v38  ;;  %2034 = vmatprep.subr.mxu1 %v10206_v7  ;;  %v6944_v6 = vpop.permute.xlu1 %722  ;;  %v6946_v10 = vpop.permute.xlu0 %717 }
  0xd3   : > { %5666 = vmatprep.mubr.f32.mxu1 %v6941_v61  ;;  %2035 = vmatpush1.msra.mxu1 %v1478_v45  ;;  %10637 = vst [vmem:[#allocation30_spill] sm:$0xff] %v6944_v6  ;;  %10638 = vst [vmem:[#allocation31_spill] sm:$0xff] %v6946_v10  ;;  %v811_v36 = vmul.f32 %v6946_v10, %v296_v19  ;;  %v5248_v45 = vld [vmem:[%s10198_s1 + $0x1b0] sm:$0xff]  ;;  %v812_v9 = vmul.f32 %v6944_v6, %v297_v32  ;;  %v10644_v10 = vmov 0.0  }
  0xd4   : > { %550 = vperm.xlu1 %6166, %v5247_v51   ;;  %1061 = vperm.xlu0 %6165, %v5278_v60   ;;  %v909_v60 = vrot.slane %v810_v24, 1  ;;  %v298_v19 = vld [vmem:[%s6535_s9 + $0x90] sm:$0xff]  ;;  %v299_v24 = vld [vmem:[%s6535_s9 + $0x98] sm:$0xff] }
  0xd5   : > { %2036 = vmatprep.subr.mxu1 %v10206_v7  ;;  %v910_v44 = vrot.slane %v811_v36, 1  ;;  %v5280_v32 = vld [vmem:[%s10198_s1 + $0x2b0] sm:$0xff] }
  0xd6   : > { %2037 = vmatpush1.msra.mxu1 %v1477_v4  ;;  %v6969_v50 = vpop.permute.xlu1 %732  ;;  %v6971_v51 = vpop.permute.xlu0 %727  ;;  %v1475_v4 = vld [vmem:[#allocation2 + $0x20] sm:$0xff]  ;;  %v6997_v36 = vsel %vm926_vm0, %v908_v12, %v909_v60 }
  0xd7   : > { %5667 = vmatmul.mubr.f32.gmra.mxu1 %v6952_v25  ;;  %2038 = vmatprep.subr.mxu1 %v10206_v7  ;;  %10641 = vst [vmem:[#allocation34_spill] sm:$0xff] %v6969_v50  ;;  %10642 = vst [vmem:[#allocation35_spill] sm:$0xff] %v6971_v51  ;;  %v6978_v7 = vsel %vm926_vm0, %v907_v0, %v908_v12  ;;  %v813_v39 = vmul.f32 %v6971_v51, %v298_v19  ;;  %v300_v19 = vld [vmem:[%s6535_s9 + $0xa0] sm:$0xff]  ;;  %v1472_v12 = vld [vmem:[#allocation2 + $0x8] sm:$0xff] }
  0xd8   : > { %5669 = vmatprep.mubr.f32.mxu1 %v6967_v31  ;;  %2039 = vmatpush1.msra.mxu1 %v1476_v27  ;;  %10643 = vst [vmem:[#allocation36_spill] sm:$0xff] %v6978_v7  ;;  %v5249_v27 = vld [vmem:[%s10198_s1 + $0x1b8] sm:$0xff]  ;;  %10647 = vst [vmem:[#allocation39_spill] sm:$0xff] %v6997_v36  ;;  %v814_v51 = vmul.f32 %v6969_v50, %v299_v24  ;;  %v7004_v6 = vsel %vm926_vm0, %v909_v60, %v910_v44  ;;  %v5250_v24 = vld [vmem:[%s10198_s1 + $0x1c0] sm:$0xff] }
  0xd9   : > { %555 = vperm.xlu1 %6166, %v5248_v45   ;;  %1066 = vperm.xlu0 %6165, %v5279_v46   ;;  %v911_v46 = vrot.slane %v812_v9, 1  ;;  %10648 = vst [vmem:[#allocation40_spill] sm:$0xff] %v7004_v6  ;;  %v912_v16 = vrot.slane %v813_v39, 1  ;;  %v5281_v39 = vld [vmem:[%s10198_s1 + $0x2b8] sm:$0xff] }
  0xda   : > { %2040 = vmatprep.subr.mxu1 %v10644_v10  ;;  %v6989_v45 = vpop.permute.xlu1 %742  ;;  %v6991_v0 = vpop.permute.xlu0 %737 }
  0xdb   : > { %2041 = vmatpush1.msra.mxu1 %v1475_v4  ;;  %10645 = vst [vmem:[#allocation37_spill] sm:$0xff] %v6989_v45  ;;  %10646 = vst [vmem:[#allocation38_spill] sm:$0xff] %v6991_v0  ;;  %v1473_v4 = vld [vmem:[#allocation2 + $0x10] sm:$0xff]  ;;  %v815_v54 = vmul.f32 %v6991_v0, %v300_v19  ;;  %v7023_v60 = vsel %vm926_vm0, %v910_v44, %v911_v46  ;;  %v7030_v0 = vsel %vm926_vm0, %v911_v46, %v912_v16  ;;  %v5282_v46 = vld [vmem:[%s10198_s1 + $0x2c0] sm:$0xff] }
  0xdc   : > { %5670 = vmatmul.mubr.f32.gmra.mxu1 %v6978_v7  ;;  %2042 = vmatprep.subr.mxu1 %v10644_v10  ;;  %10651 = vst [vmem:[#allocation43_spill] sm:$0xff] %v7023_v60  ;;  %10652 = vst [vmem:[#allocation44_spill] sm:$0xff] %v7030_v0 }
  0xdd   : > { %5672 = vmatprep.mubr.f32.mxu1 %v6997_v36  ;;  %2043 = vmatpush1.msra.mxu1 %v1474_v43  ;;  %v301_v43 = vld [vmem:[%s6535_s9 + $0xa8] sm:$0xff]  ;;  %v914_v44 = vrot.slane %v815_v54, 1 }
  0xde   : > { %560 = vperm.xlu1 %6166, %v5249_v27   ;;  %1071 = vperm.xlu0 %6165, %v5280_v32   ;;  %v7007_v15 = vpop.permute.xlu1 %752  ;;  %v7009_v9 = vpop.permute.xlu0 %747  ;;  %v913_v27 = vrot.slane %v814_v51, 1  ;;  %v1471_v32 = vld [vmem:[#allocation2] sm:$0xff]  ;;  %v816_v19 = vmul.f32 %v6989_v45, %v301_v43  ;;  %v1502_v51 = vld [vmem:[#allocation2 + $0xf8] sm:$0xff]  ;;  %v5251_v43 = vld [vmem:[%s10198_s1 + $0x1c8] sm:$0xff] }
  0xdf   : > { %2044 = vmatprep.subr.mxu1 %v10644_v10  ;;  %10649 = vst [vmem:[#allocation41_spill] sm:$0xff] %v7007_v15  ;;  %10650 = vst [vmem:[#allocation42_spill] sm:$0xff] %v7009_v9 }
  0xe0   : > { %2045 = vmatpush1.msra.mxu1 %v1473_v4  ;;  %v302_v4 = vld [vmem:[%s6535_s9 + $0xb0] sm:$0xff]  ;;  %v7049_v54 = vsel %vm926_vm0, %v912_v16, %v913_v27  ;;  %v7060_v40 = vsel %vm926_vm0, %v913_v27, %v914_v44 }
  0xe1   : > { %5673 = vmatmul.mubr.f32.gmra.mxu1 %v7004_v6  ;;  %2046 = vmatprep.subr.mxu1 %v10644_v10  ;;  %v817_v41 = vmul.f32 %v7009_v9, %v302_v4  ;;  %10655 = vst [vmem:[#allocation47_spill] sm:$0xff] %v7049_v54  ;;  %10658 = vst [vmem:[#allocation50_spill] sm:$0xff] %v7060_v40 }
  0xe2   : > { %5675 = vmatprep.mubr.f32.mxu1 %v7023_v60  ;;  %2047 = vmatpush1.msra.mxu1 %v1472_v12  ;;  %v7032_v50 = vpop.permute.xlu1 %762  ;;  %v7034_v52 = vpop.permute.xlu0 %757  ;;  %v303_v12 = vld [vmem:[%s6535_s9 + $0xb8] sm:$0xff]  ;;  %v2479_v60 = vld [vmem:[#allocation2 + $0x350] sm:$0xff] }
  0xe3   : > { %565 = vperm.xlu1 %6166, %v5250_v24   ;;  %1076 = vperm.xlu0 %6165, %v5281_v39   ;;  %10653 = vst [vmem:[#allocation45_spill] sm:$0xff] %v7032_v50  ;;  %10654 = vst [vmem:[#allocation46_spill] sm:$0xff] %v7034_v52  ;;  %v915_v24 = vrot.slane %v816_v19, 1  ;;  %v1501_v39 = vld [vmem:[#allocation2 + $0xf0] sm:$0xff]  ;;  %v818_v45 = vmul.f32 %v7007_v15, %v303_v12  ;;  %v916_v16 = vrot.slane %v817_v41, 1  ;;  %v1500_v19 = vld [vmem:[#allocation2 + $0xe8] sm:$0xff] }
  0xe4   : > { %2048 = vmatprep.subr.mxu1 %v10644_v10  ;;  %v5283_v12 = vld [vmem:[%s10198_s1 + $0x2c8] sm:$0xff] }
  0xe5   : > { %2049 = vmatpush1.msra.mxu1 %v1471_v32  ;;  %v304_v32 = vld [vmem:[%s6535_s9 + $0xc0] sm:$0xff]  ;;  %v7075_v41 = vsel %vm926_vm0, %v914_v44, %v915_v24  ;;  %v7086_v15 = vsel %vm926_vm0, %v915_v24, %v916_v16 }
  0xe6   : > { %5676 = vmatmul.mubr.f32.gmra.mxu1 %v7030_v0  ;;  %2050 = vmatprep.subr.mxu1 %v10644_v10  ;;  %v7053_v4 = vpop.permute.xlu1 %772  ;;  %v7055_v9 = vpop.permute.xlu0 %767  ;;  %v819_v29 = vmul.f32 %v7034_v52, %v304_v32  ;;  %10659 = vst [vmem:[#allocation51_spill] sm:$0xff] %v7075_v41  ;;  %v306_v32 = vld [vmem:[%s6535_s9 + $0xd0] sm:$0xff]  ;;  %10662 = vst [vmem:[#allocation54_spill] sm:$0xff] %v7086_v15 }
  0xe7   : > { %5678 = vmatprep.mubr.f32.mxu1 %v7049_v54  ;;  %2051 = vmatpush2.msra.mxu1 %v1502_v51  ;;  %10656 = vst [vmem:[#allocation48_spill] sm:$0xff] %v7053_v4  ;;  %10657 = vst [vmem:[#allocation49_spill] sm:$0xff] %v7055_v9  ;;  %v305_v51 = vld [vmem:[%s6535_s9 + $0xc8] sm:$0xff]  ;;  %v821_v13 = vmul.f32 %v7055_v9, %v306_v32  ;;  %v308_v32 = vld [vmem:[%s6535_s9 + $0xe0] sm:$0xff] }
  0xe8   : > { %570 = vperm.xlu1 %6166, %v5251_v43   ;;  %1081 = vperm.xlu0 %6165, %v5282_v46   ;;  %v917_v46 = vrot.slane %v818_v45, 1  ;;  %v820_v52 = vmul.f32 %v7032_v50, %v305_v51  ;;  %v918_v44 = vrot.slane %v819_v29, 1  ;;  %v307_v45 = vld [vmem:[%s6535_s9 + $0xd8] sm:$0xff] }
  0xe9   : > { %2052 = vmatprep.subr.mxu1 %v10644_v10  ;;  %v822_v9 = vmul.f32 %v7053_v4, %v307_v45  ;;  %v920_v55 = vrot.slane %v821_v13, 1  ;;  %v5285_v13 = vld [vmem:[%s10198_s1 + $0x2d8] sm:$0xff] }
  0xea   : > { %2053 = vmatpush2.msra.mxu1 %v1501_v39  ;;  %v7077_v27 = vpop.permute.xlu1 %782  ;;  %v7079_v43 = vpop.permute.xlu0 %777  ;;  %v1499_v39 = vld [vmem:[#allocation2 + $0xe0] sm:$0xff]  ;;  %v7105_v29 = vsel %vm926_vm0, %v916_v16, %v917_v46  ;;  %v7112_v50 = vsel %vm926_vm0, %v917_v46, %v918_v44  ;;  %v1496_v16 = vld [vmem:[#allocation2 + $0xc8] sm:$0xff] }
  0xeb   : > { %5679 = vmatmul.mubr.f32.gmra.mxu1 %v7060_v40  ;;  %2054 = vmatprep.subr.mxu1 %v10644_v10  ;;  %10660 = vst [vmem:[#allocation52_spill] sm:$0xff] %v7077_v27  ;;  %10661 = vst [vmem:[#allocation53_spill] sm:$0xff] %v7079_v43  ;;  %v823_v45 = vmul.f32 %v7079_v43, %v308_v32  ;;  %v5254_v46 = vld [vmem:[%s10198_s1 + $0x1e0] sm:$0xff]  ;;  %v7137_v32 = vld [vmem:[%s6535_s9 + $0xf0] sm:$0xff] }
  0xec   : > { %5681 = vmatprep.mubr.f32.mxu1 %v7075_v41  ;;  %2055 = vmatpush2.msra.mxu1 %v1500_v19  ;;  %v5253_v19 = vld [vmem:[%s10198_s1 + $0x1d8] sm:$0xff]  ;;  %10665 = vst [vmem:[#allocation57_spill] sm:$0xff] %v7105_v29  ;;  %10666 = vst [vmem:[#allocation58_spill] sm:$0xff] %v7112_v50 }
  0xed   : > { %575 = vperm.xlu1 %6166, %v5252_v28   ;;  %1086 = vperm.xlu0 %6165, %v5283_v12   ;;  %v5284_v28 = vld [vmem:[%s10198_s1 + $0x2d0] sm:$0xff]  ;;  %v919_v12 = vrot.slane %v820_v52, 1  ;;  %v922_v2 = vrot.slane %v823_v45, 1  ;;  %v5287_v45 = vld [vmem:[%s10198_s1 + $0x2e8] sm:$0xff] }
  0xee   : > { %2056 = vmatprep.subr.mxu1 %v10644_v10  ;;  %v7097_v51 = vpop.permute.xlu1 %792  ;;  %v7099_v24 = vpop.permute.xlu0 %787 }
  0xef   : > { %2057 = vmatpush2.msra.mxu1 %v1499_v39  ;;  %10663 = vst [vmem:[#allocation55_spill] sm:$0xff] %v7097_v51  ;;  %10664 = vst [vmem:[#allocation56_spill] sm:$0xff] %v7099_v24  ;;  %v1497_v39 = vld [vmem:[#allocation2 + $0xd0] sm:$0xff]  ;;  %v7143_v4 = vsel %vm926_vm0, %v919_v12, %v920_v55 }
  0xf0   : > { %5682 = vmatmul.mubr.f32.gmra.mxu1 %v7086_v15  ;;  %2058 = vmatprep.subr.mxu1 %v10644_v10  ;;  %10670 = vst [vmem:[#allocation62_spill] sm:$0xff] %v7143_v4 }
  0xf1   : > { %5684 = vmatprep.mubr.f32.mxu1 %v7105_v29  ;;  %2059 = vmatpush2.msra.mxu1 %v1498_v14  ;;  %v7120_v14 = vld [vmem:[%s6535_s9 + $0xe8] sm:$0xff]  ;;  %v1493_v29 = vld [vmem:[#allocation2 + $0xb0] sm:$0xff] }
  0xf2   : > { %580 = vperm.xlu1 %6166, %v5253_v19   ;;  %1091 = vperm.xlu0 %6165, %v5284_v28   ;;  %v7115_v1 = vpop.permute.xlu1 %595  ;;  %v7117_v52 = vpop.permute.xlu0 %590  ;;  %v7133_v19 = vsel %vm926_vm0, %v918_v44, %v919_v12  ;;  %v921_v28 = vrot.slane %v822_v9, 1  ;;  %v824_v43 = vmul.f32 %v7077_v27, %v7120_v14  ;;  %v5286_v27 = vld [vmem:[%s10198_s1 + $0x2e0] sm:$0xff] }
  0xf3   : > { %2060 = vmatprep.subr.mxu1 %v10644_v10  ;;  %10667 = vst [vmem:[#allocation59_spill] sm:$0xff] %v7115_v1  ;;  %10668 = vst [vmem:[#allocation60_spill] sm:$0xff] %v7117_v52 }
  0xf4   : > { %2061 = vmatpush2.msra.mxu1 %v1497_v39  ;;  %10669 = vst [vmem:[#allocation61_spill] sm:$0xff] %v7133_v19  ;;  %v1495_v39 = vld [vmem:[#allocation2 + $0xc0] sm:$0xff] }
  0xf5   : > { %5685 = vmatmul.mubr.f32.gmra.mxu1 %v7112_v50  ;;  %2062 = vmatprep.subr.mxu1 %v10644_v10  ;;  %v7179_v50 = vmul.f32 %v7097_v51, %v7146_v56  ;;  %v1492_v51 = vld [vmem:[#allocation2 + $0xa8] sm:$0xff] }
  0xf6   : > { %5687 = vmatprep.mubr.f32.mxu1 %v7133_v19  ;;  %2063 = vmatpush2.msra.mxu1 %v1496_v16  ;;  %v7148_v44 = vpop.permute.xlu1 %600  ;;  %v7150_v9 = vpop.permute.xlu0 %445  ;;  %v1494_v16 = vld [vmem:[#allocation2 + $0xb8] sm:$0xff] }
  0xf7   : > { %585 = vperm.xlu1 %6166, %v5254_v46   ;;  %1096 = vperm.xlu0 %6165, %v5285_v13   ;;  %10671 = vst [vmem:[#allocation63_spill] sm:$0xff] %v7148_v44  ;;  %10672 = vst [vmem:[#allocation64_spill] sm:$0xff] %v7150_v9  ;;  %v7155_v19 = vmul.f32 %v7148_v44, %v7146_v56  ;;  %v7158_v46 = vld [vmem:[%s6535_s9] sm:$0xff]  ;;  %v825_v13 = vmul.f32 %v7099_v24, %v7137_v32  ;;  %v923_v24 = vrot.slane %v824_v43, 1 }
  0xf8   : > { %2064 = vmatprep.subr.mxu1 %v10644_v10  ;;  %v603_v12 = vmul.f32 %v7158_v46, %v7150_v9  ;;  %v7174_v44 = vsel %vm926_vm0, %v920_v55, %v921_v28  ;;  %v7189_v55 = vsel %vm926_vm0, %v921_v28, %v922_v2  ;;  %v5288_v28 = vld [vmem:[%s10198_s1 + $0x2f0] sm:$0xff] }
  0xf9   : > { %2065 = vmatpush2.msra.mxu1 %v1495_v39  ;;  %10673 = vst [vmem:[#allocation65_spill] sm:$0xff] %v7174_v44  ;;  %v10252_v39 = vrot.slane %v7155_v19, 7  ;;  %10676 = vst [vmem:[#allocation68_spill] sm:$0xff] %v7189_v55 }
  0xfa   : > { %5688 = vmatmul.mubr.f32.gmra.mxu1 %v7143_v4  ;;  %2066 = vmatprep.subr.mxu1 %v10644_v10  ;;  %v827_v9 = vrot.slane %v603_v12, 7  ;;  %v7183_v4 = vpop.permute.xlu1 %450  ;;  %v7185_v15 = vpop.permute.xlu0 %961  ;;  %v924_v12 = vrot.slane %v825_v13, 1  ;;  %v7212_v13 = vmul.f32 %v7115_v1, %v7137_v32 }
  0xfb   : > { %5690 = vmatprep.mubr.f32.mxu1 %v7174_v44  ;;  %2067 = vmatpush2.msra.mxu1 %v1494_v16  ;;  %10674 = vst [vmem:[#allocation66_spill] sm:$0xff] %v7183_v4  ;;  %10675 = vst [vmem:[#allocation67_spill] sm:$0xff] %v7185_v15  ;;  %v604_v43 = vmul.f32 %v7183_v4, %v6737_v59  ;;  %v1120_v41 = vmul.f32 %v7185_v15, %v7137_v32  ;;  %v5295_v32 = vld [vmem:[%s10198_s1 + $0x328] sm:$0xff] }
  0xfc   : > { %1106 = vperm.xlu1 %6166, %v5287_v45   ;;  %1101 = vperm.xlu0 %6165, %v5286_v27   ;;  %v7197_v16 = vsel %vm861_vm1, %v10252_v39, %v827_v9  ;;  %v5289_v27 = vld [vmem:[%s10198_s1 + $0x2f8] sm:$0xff] }
  0xfd   : > { %10677 = vst [vmem:[#allocation69_spill] sm:$0xff] %v7197_v16  ;;  %2068 = vmatprep.subr.mxu1 %v10644_v10  ;;  %1633 = vmatmul.mubr.f32.vlgmr.msra.gmra.mxu0 %v7197_v16  ;;  %v828_v45 = vrot.slane %v604_v43, 7  ;;  %v925_v43 = vrot.slane %v7179_v50, 1  ;;  %v7238_v50 = vsel %vm926_vm0, %v923_v24, %v924_v12 }
  0xfe   : > { %2069 = vmatpush2.msra.mxu1 %v1493_v29  ;;  %5700 = vmatpush3.msra.mxu0 %v6705_v47  ;;  %v7216_v29 = vsel %vm926_vm0, %v922_v2, %v923_v24  ;;  %v7218_v39 = vpop.permute.xlu1 %455  ;;  %v7220_v4 = vpop.permute.xlu0 %966  ;;  %v7225_v47 = vmul.f32 %v7117_v52, %v7120_v14  ;;  %10682 = vst [vmem:[#allocation74_spill] sm:$0xff] %v7238_v50  ;;  %v1490_v14 = vld [vmem:[#allocation2 + $0x98] sm:$0xff]  ;;  %v1489_v52 = vld [vmem:[#allocation2 + $0x90] sm:$0xff] }
  0xff   : > { %5691 = vmatmul.mubr.f32.gmra.mxu1 %v7189_v55  ;;  %2070 = vmatprep.subr.mxu1 %v10644_v10  ;;  %10678 = vst [vmem:[#allocation70_spill] sm:$0xff] %v7216_v29  ;;  %10679 = vst [vmem:[#allocation71_spill] sm:$0xff] %v7218_v39  ;;  %v1491_v55 = vld [vmem:[#allocation2 + $0xa0] sm:$0xff]  ;;  %v7230_v1 = vmul.f32 %v7218_v39, %v6731_v57  ;;  %v7234_v2 = vsel %vm861_vm1, %v827_v9, %v828_v45  ;;  %v5291_v39 = vld [vmem:[%s10198_s1 + $0x308] sm:$0xff] }
 0x100   : > { %10680 = vst [vmem:[#allocation72_spill] sm:$0xff] %v7220_v4  ;;  %5693 = vmatprep.mubr.f32.mxu1 %v7216_v29  ;;  %2071 = vmatpush2.msra.mxu1 %v1492_v51  ;;  %10681 = vst [vmem:[#allocation73_spill] sm:$0xff] %v7234_v2  ;;  %v5290_v9 = vld [vmem:[%s10198_s1 + $0x300] sm:$0xff] }
 0x101   : > { %1116 = vperm.xlu1 %6166, %v5289_v27   ;;  %1111 = vperm.xlu0 %6165, %v5288_v28   ;;  %v857_v28 = vrot.slane %v7212_v13, 7  ;;  %v10686_v29 = vrot.slane %v7230_v1, 7  ;;  %v1488_v13 = vld [vmem:[#allocation2 + $0x88] sm:$0xff] }
 0x102   : > { %2072 = vmatprep.subr.mxu1 %v10644_v10  ;;  %1637 = vmatprep.mubr.f32.mxu0 %v6737_v59  ;;  %v7250_v24 = vpop.permute.xlu1 %460  ;;  %v7252_v27 = vpop.permute.xlu0 %971 }
 0x103   : > { %2073 = vmatpush2.msra.mxu1 %v1491_v55  ;;  %1638 = vmatmul.mubr.f32.gmra.mxu0 %v7234_v2  ;;  %10683 = vst [vmem:[#allocation75_spill] sm:$0xff] %v7250_v24  ;;  %10684 = vst [vmem:[#allocation76_spill] sm:$0xff] %v7252_v27  ;;  %v7260_v55 = vsel %vm926_vm0, %v924_v12, %v925_v43  ;;  %v7267_v44 = vsel %vm861_vm1, %v828_v45, %v10686_v29  ;;  %v5293_v12 = vld [vmem:[%s10198_s1 + $0x318] sm:$0xff] }
 0x104   : > { %5694 = vmatmul.mubr.f32.gmra.mxu1 %v7238_v50  ;;  %2074 = vmatprep.subr.mxu1 %v10644_v10  ;;  %10685 = vst [vmem:[#allocation77_spill] sm:$0xff] %v7260_v55  ;;  %v10689_v50 = vrot.slane %v7225_v47, 7 }
 0x105   : > { %5696 = vmatprep.mubr.f32.mxu1 %v7260_v55  ;;  %2075 = vmatpush2.msra.mxu1 %v1490_v14 }
 0x106   : > { %1222 = vperm.xlu1 %6166, %v5291_v39   ;;  %1217 = vperm.xlu0 %6165, %v5290_v9   ;;  %v7274_v51 = vpop.permute.xlu1 %465  ;;  %v7276_v14 = vpop.permute.xlu0 %976  ;;  %v7282_v45 = vsel %vm861_vm1, %v10689_v50, %v857_v28  ;;  %v10691_v39 = vrot.slane %v6749_v63, 1  ;;  %v5292_v9 = vld [vmem:[%s10198_s1 + $0x310] sm:$0xff]  ;;  %v2484_v50 = vld [vmem:[#allocation2 + $0x378] sm:$0xff] }
 0x107   : > { %2076 = vmatprep.subr.mxu1 %v10644_v10  ;;  %1642 = vmatprep.mubr.f32.mxu0 %v6731_v57  ;;  %10687 = vst [vmem:[#allocation78_spill] sm:$0xff] %v7274_v51  ;;  %10688 = vst [vmem:[#allocation79_spill] sm:$0xff] %v7276_v14  ;;  %v1119_v63 = vmul.f32 %v7185_v15, %v7282_v45 }
 0x108   : > { %10690 = vst [vmem:[#allocation80_spill] sm:$0xff] %v7282_v45  ;;  %2077 = vmatpush2.msra.mxu1 %v1489_v52  ;;  %v7288_v29 = vsel %vm926_vm0, %v925_v43, %v10691_v39  ;;  %1643 = vmatmul.mubr.f32.gmra.mxu0 %v7267_v44  ;;  %v1487_v52 = vld [vmem:[#allocation2 + $0x80] sm:$0xff]  ;;  %v606_v43 = vmul.f32 %v7250_v24, %v6734_v58  ;;  %v1517_v24 = vld [vmem:[#allocation2 + $0x170] sm:$0xff] }
 0x109   : > { %10692 = vst [vmem:[#allocation81_spill] sm:$0xff] %v7288_v29  ;;  %5697 = vmatmul.mubr.f32.gmra.mxu1 %v7288_v29  ;;  %2078 = vmatprep.subr.mxu1 %v10644_v10  ;;  %v1123_v39 = vmul.f32 %v7220_v4, %v7146_v56 }
 0x10a   : > { %2079 = vmatpush2.msra.mxu1 %v1488_v13  ;;  %1232 = vperm.xlu1 %6166, %v5293_v12   ;;  %v7308_v40 = vpop.permute.xlu1 %470  ;;  %v7310_v54 = vpop.permute.xlu0 %981  ;;  %v5294_v13 = vld [vmem:[%s10198_s1 + $0x320] sm:$0xff]  ;;  %v10695_v12 = vrot.slane %v7155_v19, 7  ;;  %v2483_v19 = vld [vmem:[#allocation2 + $0x370] sm:$0xff] }
 0x10b   : > { %1227 = vperm.xlu0 %6165, %v5292_v9   ;;  %2080 = vmatprep.subr.mxu1 %v10644_v10  ;;  %10693 = vst [vmem:[#allocation82_spill] sm:$0xff] %v7308_v40  ;;  %10694 = vst [vmem:[#allocation83_spill] sm:$0xff] %v7310_v54 }
 0x10c   : > { %2081 = vmatpush2.msra.mxu1 %v1487_v52  ;;  %2082 = vmatprep.mubr.f32.mxu1 %v1120_v41  ;;  %v7319_v9 = vsel %vm861_vm1, %v857_v28, %v10695_v12  ;;  %v830_v41 = vrot.slane %v606_v43, 7  ;;  %v7326_v52 = vmul.f32 %v7274_v51, %v6765_v21  ;;  %v5297_v28 = vld [vmem:[%s10198_s1 + $0x338] sm:$0xff]  ;;  %v5296_v43 = vld [vmem:[%s10198_s1 + $0x330] sm:$0xff] }
 0x10d   : > { %10696 = vst [vmem:[#allocation84_spill] sm:$0xff] %v7319_v9  ;;  %2517 = vmatprep.subr.mxu1 %v10644_v10  ;;  %2083 = vmatmul.mubr.f32.vlgmr.msra.gmra.mxu1 %v1119_v63  ;;  %v1122_v56 = vmul.f32 %v7220_v4, %v7319_v9  ;;  %v1126_v63 = vmul.f32 %v7158_v46, %v7252_v27 }
 0x10e   : > { %2518 = vmatpush1.msra.mxu1 %v2484_v50  ;;  %1242 = vperm.xlu1 %6166, %v5295_v32   ;;  %v7333_v12 = vpop.permute.xlu1 %475  ;;  %v7335_v0 = vpop.permute.xlu0 %986  ;;  %v1125_v50 = vmul.f32 %v7252_v27, %v7197_v16  ;;  %v831_v46 = vrot.slane %v7326_v52, 7  ;;  %v10699_v32 = vrot.slane %v7230_v1, 7  ;;  %v5298_v1 = vld [vmem:[%s10198_s1 + $0x340] sm:$0xff]  ;;  %v608_v52 = vmul.f32 %v7308_v40, %v6762_v5 }
 0x10f   : > { %1237 = vperm.xlu0 %6165, %v5294_v13   ;;  %2087 = vmatprep.mubr.f32.mxu1 %v1123_v39  ;;  %10697 = vst [vmem:[#allocation85_spill] sm:$0xff] %v7333_v12  ;;  %10698 = vst [vmem:[#allocation86_spill] sm:$0xff] %v7335_v0  ;;  %v2482_v13 = vld [vmem:[#allocation2 + $0x368] sm:$0xff] }
 0x110   : > { %2519 = vmatprep.subr.mxu1 %v10644_v10  ;;  %5701 = vmatprep.subr.mxu0 %v1517_v24  ;;  %v7348_v39 = vsel %vm861_vm1, %v10699_v32, %v830_v41  ;;  %v1132_v32 = vmul.f32 %v7310_v54, %v6731_v57  ;;  %v609_v57 = vmul.f32 %v7333_v12, %v6798_v22  ;;  %v5302_v12 = vld [vmem:[%s10198_s1 + $0x360] sm:$0xff] }
 0x111   : > { %2088 = vmatmul.mubr.f32.gmra.mxu1 %v1122_v56  ;;  %5702 = vmatpush3.msra.mxu0 %v1517_v24  ;;  %v5299_v56 = vld [vmem:[%s10198_s1 + $0x348] sm:$0xff]  ;;  %v1129_v24 = vmul.f32 %v7276_v14, %v6737_v59  ;;  %v1128_v59 = vmul.f32 %v7276_v14, %v7234_v2 }
 0x112   : > { %2520 = vmatpush1.msra.mxu1 %v2483_v19  ;;  %1252 = vperm.xlu1 %6166, %v5297_v28   ;;  %v7355_v19 = vpop.permute.xlu1 %480  ;;  %v7357_v28 = vpop.permute.xlu0 %991  ;;  %v5303_v2 = vld [vmem:[%s10198_s1 + $0x368] sm:$0xff] }
 0x113   : > { %1247 = vperm.xlu0 %6165, %v5296_v43   ;;  %2092 = vmatprep.mubr.f32.mxu1 %v1126_v63  ;;  %10700 = vst [vmem:[#allocation87_spill] sm:$0xff] %v7355_v19  ;;  %10701 = vst [vmem:[#allocation88_spill] sm:$0xff] %v7357_v28  ;;  %v7371_v63 = vsel %vm861_vm1, %v830_v41, %v831_v46  ;;  %v2481_v43 = vld [vmem:[#allocation2 + $0x360] sm:$0xff]  ;;  %v5300_v41 = vld [vmem:[%s10198_s1 + $0x350] sm:$0xff]  ;;  %v610_v16 = vmul.f32 %v7355_v19, %v6790_v18 }
 0x114   : > { %2521 = vmatprep.subr.mxu1 %v10644_v10  ;;  %1647 = vmatprep.mubr.f32.mxu0 %v6734_v58  ;;  %v1137_v19 = vmul.f32 %v7357_v28, %v7371_v63 }
 0x115   : > { %2093 = vmatmul.mubr.f32.gmra.mxu1 %v1125_v50  ;;  %1648 = vmatmul.mubr.f32.gmra.mxu0 %v7348_v39  ;;  %v5301_v50 = vld [vmem:[%s10198_s1 + $0x358] sm:$0xff] }
 0x116   : > { %2522 = vmatpush1.msra.mxu1 %v2482_v13  ;;  %1262 = vperm.xlu1 %6166, %v5299_v56   ;;  %v7378_v40 = vpop.permute.xlu1 %485  ;;  %v7380_v51 = vpop.permute.xlu0 %996  ;;  %v832_v13 = vrot.slane %v608_v52, 7  ;;  %v1516_v56 = vld [vmem:[#allocation2 + $0x168] sm:$0xff] }
 0x117   : > { %1257 = vperm.xlu0 %6165, %v5298_v1   ;;  %2097 = vmatprep.mubr.f32.mxu1 %v1129_v24  ;;  %10702 = vst [vmem:[#allocation89_spill] sm:$0xff] %v7378_v40  ;;  %10703 = vst [vmem:[#allocation90_spill] sm:$0xff] %v7380_v51  ;;  %v1131_v24 = vmul.f32 %v7310_v54, %v7267_v44  ;;  %v2480_v1 = vld [vmem:[#allocation2 + $0x358] sm:$0xff] }
 0x118   : > { %2523 = vmatprep.subr.mxu1 %v10644_v10  ;;  %1652 = vmatprep.mubr.f32.mxu0 %v6765_v21 }
 0x119   : > { %2098 = vmatmul.mubr.f32.gmra.mxu1 %v1128_v59  ;;  %1653 = vmatmul.mubr.f32.gmra.mxu0 %v7371_v63 }
 0x11a   : > { %2524 = vmatpush1.msra.mxu1 %v2481_v43  ;;  %1272 = vperm.xlu1 %6166, %v5301_v50   ;;  %v7395_v52 = vpop.permute.xlu1 %490  ;;  %v7397_v59 = vpop.permute.xlu0 %1001  ;;  %v1135_v43 = vmul.f32 %v7335_v0, %v6734_v58  ;;  %v833_v50 = vrot.slane %v609_v57, 7  ;;  %v5305_v58 = vld [vmem:[%s10198_s1 + $0x378] sm:$0xff] }
 0x11b   : > { %1267 = vperm.xlu0 %6165, %v5300_v41   ;;  %2102 = vmatprep.mubr.f32.mxu1 %v1132_v32  ;;  %10704 = vst [vmem:[#allocation91_spill] sm:$0xff] %v7395_v52  ;;  %10705 = vst [vmem:[#allocation92_spill] sm:$0xff] %v7397_v59  ;;  %v7407_v32 = vsel %vm861_vm1, %v831_v46, %v832_v13  ;;  %v1134_v41 = vmul.f32 %v7335_v0, %v7348_v39 }
 0x11c   : > { %5703 = vmatprep.subr.mxu0 %v1516_v56  ;;  %2525 = vmatprep.subr.mxu1 %v10644_v10  ;;  %v7430_v57 = vsel %vm861_vm1, %v832_v13, %v833_v50  ;;  %v5306_v13 = vld [vmem:[%s10198_s1 + $0x380] sm:$0xff]  ;;  %v612_v6 = vmul.f32 %v7395_v52, %v6829_v37 }
 0x11d   : > { %2103 = vmatmul.mubr.f32.gmra.mxu1 %v1131_v24  ;;  %5704 = vmatpush3.msra.mxu0 %v1516_v56  ;;  %v834_v24 = vrot.slane %v610_v16, 7  ;;  %v2478_v16 = vld [vmem:[#allocation2 + $0x348] sm:$0xff] }
 0x11e   : > { %2526 = vmatpush1.msra.mxu1 %v2480_v1  ;;  %1282 = vperm.xlu1 %6166, %v5303_v2   ;;  %v7417_v56 = vpop.permute.xlu1 %495  ;;  %v7419_v46 = vpop.permute.xlu0 %1006  ;;  %v5304_v2 = vld [vmem:[%s10198_s1 + $0x370] sm:$0xff]  ;;  %v1515_v1 = vld [vmem:[#allocation2 + $0x160] sm:$0xff] }
 0x11f   : > { %1277 = vperm.xlu0 %6165, %v5302_v12   ;;  %1657 = vmatprep.mubr.f32.mxu0 %v6762_v5  ;;  %10706 = vst [vmem:[#allocation93_spill] sm:$0xff] %v7417_v56  ;;  %10707 = vst [vmem:[#allocation94_spill] sm:$0xff] %v7419_v46  ;;  %v1138_v12 = vmul.f32 %v7357_v28, %v6765_v21 }
 0x120   : > { %1658 = vmatmul.mubr.f32.gmra.mxu0 %v7407_v32  ;;  %2107 = vmatprep.mubr.f32.mxu1 %v1135_v43  ;;  %v611_v43 = vmul.f32 %v7378_v40, %v6826_v34  ;;  %v1140_v40 = vmul.f32 %v7380_v51, %v7407_v32 }
 0x121   : > { %2527 = vmatprep.subr.mxu1 %v10644_v10  ;;  %2108 = vmatmul.mubr.f32.gmra.mxu1 %v1134_v41 }
 0x122   : > { %2528 = vmatpush1.msra.mxu1 %v2479_v60  ;;  %1292 = vperm.xlu1 %6166, %v5305_v58   ;;  %v7437_v21 = vpop.permute.xlu1 %500  ;;  %v7439_v41 = vpop.permute.xlu0 %1011  ;;  %v5307_v60 = vld [vmem:[%s10198_s1 + $0x388] sm:$0xff]  ;;  %v1141_v58 = vmul.f32 %v7380_v51, %v6762_v5  ;;  %v2477_v5 = vld [vmem:[#allocation2 + $0x340] sm:$0xff] }
 0x123   : > { %1287 = vperm.xlu0 %6165, %v5304_v2   ;;  %1662 = vmatprep.mubr.f32.mxu0 %v6798_v22  ;;  %10708 = vst [vmem:[#allocation95_spill] sm:$0xff] %v7437_v21  ;;  %10709 = vst [vmem:[#allocation96_spill] sm:$0xff] %v7439_v41  ;;  %v835_v2 = vrot.slane %v611_v43, 7  ;;  %v836_v43 = vrot.slane %v612_v6, 7  ;;  %v5311_v6 = vld [vmem:[%s10198_s1 + $0x3a8] sm:$0xff]  ;;  %v614_v31 = vmul.f32 %v7437_v21, %v6863_v53 }
 0x124   : > { %1663 = vmatmul.mubr.f32.gmra.mxu0 %v7430_v57  ;;  %2112 = vmatprep.mubr.f32.mxu1 %v1138_v12  ;;  %v7453_v12 = vsel %vm861_vm1, %v833_v50, %v834_v24  ;;  %v5308_v50 = vld [vmem:[%s10198_s1 + $0x390] sm:$0xff] }
 0x125   : > { %5705 = vmatprep.subr.mxu0 %v1515_v1  ;;  %2529 = vmatprep.subr.mxu1 %v10644_v10  ;;  %10710 = vst [vmem:[#allocation97_spill] sm:$0xff] %v7453_v12 }
 0x126   : > { %2113 = vmatmul.mubr.f32.gmra.mxu1 %v1137_v19  ;;  %5706 = vmatpush3.msra.mxu0 %v1515_v1  ;;  %v7459_v36 = vpop.permute.xlu1 %505  ;;  %v7461_v7 = vpop.permute.xlu0 %1016  ;;  %v5309_v19 = vld [vmem:[%s10198_s1 + $0x398] sm:$0xff]  ;;  %v1144_v1 = vmul.f32 %v7397_v59, %v6798_v22 }
 0x127   : > { %2530 = vmatpush1.msra.mxu1 %v2478_v16  ;;  %1302 = vperm.xlu1 %6166, %v5307_v60   ;;  %10711 = vst [vmem:[#allocation98_spill] sm:$0xff] %v7459_v36  ;;  %10712 = vst [vmem:[#allocation99_spill] sm:$0xff] %v7461_v7  ;;  %v1514_v16 = vld [vmem:[#allocation2 + $0x158] sm:$0xff]  ;;  %v7480_v60 = vmul.f32 %v7417_v56, %v6857_v49  ;;  %v615_v21 = vmul.f32 %v7459_v36, %v6883_v8  ;;  %v5314_v8 = vld [vmem:[%s10198_s1 + $0x3c0] sm:$0xff] }
 0x128   : > { %1297 = vperm.xlu0 %6165, %v5306_v13   ;;  %1667 = vmatprep.mubr.f32.mxu0 %v6790_v18  ;;  %v7476_v18 = vsel %vm861_vm1, %v834_v24, %v835_v2  ;;  %v1143_v13 = vmul.f32 %v7397_v59, %v7430_v57  ;;  %v5310_v24 = vld [vmem:[%s10198_s1 + $0x3a0] sm:$0xff] }
 0x129   : > { %1668 = vmatmul.mubr.f32.gmra.mxu0 %v7453_v12  ;;  %2117 = vmatprep.mubr.f32.mxu1 %v1141_v58  ;;  %10713 = vst [vmem:[#allocation100_spill] sm:$0xff] %v7476_v18  ;;  %v1149_v25 = vmul.f32 %v7439_v41, %v7476_v18 }
 0x12a   : > { %2531 = vmatprep.subr.mxu1 %v10644_v10  ;;  %2118 = vmatmul.mubr.f32.gmra.mxu1 %v1140_v40  ;;  %v7484_v22 = vpop.permute.xlu1 %510  ;;  %v7486_v58 = vpop.permute.xlu0 %1021  ;;  %v2476_v40 = vld [vmem:[#allocation2 + $0x338] sm:$0xff] }
 0x12b   : > { %2532 = vmatpush1.msra.mxu1 %v2477_v5  ;;  %1312 = vperm.xlu1 %6166, %v5309_v19   ;;  %10714 = vst [vmem:[#allocation101_spill] sm:$0xff] %v7484_v22  ;;  %10715 = vst [vmem:[#allocation102_spill] sm:$0xff] %v7486_v58  ;;  %v7498_v5 = vld [vmem:[%s6535_s9 + $0x38] sm:$0xff]  ;;  %v837_v19 = vrot.slane %v7480_v60, 7  ;;  %v5312_v60 = vld [vmem:[%s10198_s1 + $0x3b0] sm:$0xff] }
 0x12c   : > { %1307 = vperm.xlu0 %6165, %v5308_v50   ;;  %1672 = vmatprep.mubr.f32.mxu0 %v6826_v34  ;;  %v1147_v34 = vmul.f32 %v7498_v5, %v7419_v46  ;;  %v7505_v50 = vsel %vm861_vm1, %v835_v2, %v836_v43  ;;  %v5313_v2 = vld [vmem:[%s10198_s1 + $0x3b8] sm:$0xff] }
 0x12d   : > { %1673 = vmatmul.mubr.f32.gmra.mxu0 %v7476_v18  ;;  %2122 = vmatprep.mubr.f32.mxu1 %v1144_v1  ;;  %10716 = vst [vmem:[#allocation103_spill] sm:$0xff] %v7505_v50  ;;  %v1146_v1 = vmul.f32 %v7419_v46, %v7453_v12  ;;  %v1152_v36 = vmul.f32 %v7461_v7, %v7505_v50  ;;  %v7568_v18 = vld [vmem:[%s6535_s9 + $0x58] sm:$0xff] }
 0x12e   : > { %5707 = vmatprep.subr.mxu0 %v1514_v16  ;;  %2533 = vmatprep.subr.mxu1 %v10644_v10  ;;  %v7509_v56 = vpop.permute.xlu1 %515  ;;  %v7511_v52 = vpop.permute.xlu0 %1026  ;;  %10727 = vst [vmem:[#allocation114_spill] sm:$0xff] %v7568_v18 }
 0x12f   : > { %2123 = vmatmul.mubr.f32.gmra.mxu1 %v1143_v13  ;;  %5708 = vmatpush3.msra.mxu0 %v1514_v16  ;;  %10717 = vst [vmem:[#allocation104_spill] sm:$0xff] %v7509_v56  ;;  %10718 = vst [vmem:[#allocation105_spill] sm:$0xff] %v7511_v52  ;;  %v2475_v16 = vld [vmem:[#allocation2 + $0x330] sm:$0xff]  ;;  %v7524_v13 = vld [vmem:[%s6535_s9 + $0x40] sm:$0xff] }
 0x130   : > { %2534 = vmatpush1.msra.mxu1 %v2476_v40  ;;  %1322 = vperm.xlu1 %6166, %v5311_v6   ;;  %10719 = vst [vmem:[#allocation106_spill] sm:$0xff] %v7524_v13  ;;  %v1150_v53 = vmul.f32 %v7524_v13, %v7439_v41  ;;  %v7597_v13 = vld [vmem:[%s6535_s9 + $0x60] sm:$0xff] }
 0x131   : > { %1317 = vperm.xlu0 %6165, %v5310_v24   ;;  %1677 = vmatprep.mubr.f32.mxu0 %v6829_v37  ;;  %v7531_v37 = vsel %vm861_vm1, %v836_v43, %v837_v19  ;;  %v838_v24 = vrot.slane %v614_v31, 7  ;;  %v2474_v43 = vld [vmem:[#allocation2 + $0x328] sm:$0xff]  ;;  %10732 = vst [vmem:[#allocation119_spill] sm:$0xff] %v7597_v13 }
 0x132   : > { %1678 = vmatmul.mubr.f32.gmra.mxu0 %v7505_v50  ;;  %2127 = vmatprep.mubr.f32.mxu1 %v1147_v34  ;;  %10720 = vst [vmem:[#allocation107_spill] sm:$0xff] %v7531_v37  ;;  %v7533_v40 = vpop.permute.xlu1 %520  ;;  %v7535_v6 = vpop.permute.xlu0 %1031  ;;  %v1513_v34 = vld [vmem:[#allocation2 + $0x150] sm:$0xff]  ;;  %v5315_v31 = vld [vmem:[%s10198_s1 + $0x3c8] sm:$0xff]  ;;  %v617_v50 = vmul.f32 %v7509_v56, %v6915_v35  ;;  %v5318_v35 = vld [vmem:[%s10198_s1 + $0x3e0] sm:$0xff] }
 0x133   : > { %2535 = vmatprep.subr.mxu1 %v10644_v10  ;;  %2128 = vmatmul.mubr.f32.gmra.mxu1 %v1146_v1  ;;  %10721 = vst [vmem:[#allocation108_spill] sm:$0xff] %v7533_v40  ;;  %10722 = vst [vmem:[#allocation109_spill] sm:$0xff] %v7535_v6  ;;  %v7551_v1 = vld [vmem:[%s6535_s9 + $0x48] sm:$0xff]  ;;  %v7619_v56 = vld [vmem:[%s6535_s9 + $0x78] sm:$0xff] }
 0x134   : > { %2536 = vmatpush1.msra.mxu1 %v2475_v16  ;;  %1332 = vperm.xlu1 %6166, %v5313_v2   ;;  %10723 = vst [vmem:[#allocation110_spill] sm:$0xff] %v7551_v1  ;;  %10736 = vst [vmem:[#allocation123_spill] sm:$0xff] %v7619_v56 }
 0x135   : > { %1327 = vperm.xlu0 %6165, %v5312_v60   ;;  %1682 = vmatprep.mubr.f32.mxu0 %v6857_v49  ;;  %v1153_v49 = vmul.f32 %v7551_v1, %v7461_v7  ;;  %v839_v60 = vrot.slane %v615_v21, 7  ;;  %v616_v1 = vmul.f32 %v7484_v22, %v6897_v23  ;;  %v2473_v21 = vld [vmem:[#allocation2 + $0x320] sm:$0xff]  ;;  %v1512_v22 = vld [vmem:[#allocation2 + $0x148] sm:$0xff] }
 0x136   : > { %1683 = vmatmul.mubr.f32.gmra.mxu0 %v7531_v37  ;;  %2132 = vmatprep.mubr.f32.mxu1 %v1150_v53  ;;  %v7555_v16 = vpop.permute.xlu1 %525  ;;  %v7557_v2 = vpop.permute.xlu0 %1036  ;;  %v7561_v53 = vsel %vm861_vm1, %v837_v19, %v838_v24  ;;  %v5316_v19 = vld [vmem:[%s10198_s1 + $0x3d0] sm:$0xff] }
 0x137   : > { %5709 = vmatprep.subr.mxu0 %v1513_v34  ;;  %2537 = vmatprep.subr.mxu1 %v10644_v10  ;;  %10724 = vst [vmem:[#allocation111_spill] sm:$0xff] %v7555_v16  ;;  %10725 = vst [vmem:[#allocation112_spill] sm:$0xff] %v7557_v2  ;;  %v1158_v12 = vmul.f32 %v7511_v52, %v7561_v53 }
 0x138   : > { %2133 = vmatmul.mubr.f32.gmra.mxu1 %v1149_v25  ;;  %5710 = vmatpush3.msra.mxu0 %v1513_v34  ;;  %10726 = vst [vmem:[#allocation113_spill] sm:$0xff] %v7561_v53  ;;  %v5317_v25 = vld [vmem:[%s10198_s1 + $0x3d8] sm:$0xff]  ;;  %v7579_v34 = vld [vmem:[%s6535_s9 + $0x50] sm:$0xff] }
 0x139   : > { %2538 = vmatpush1.msra.mxu1 %v2474_v43  ;;  %1342 = vperm.xlu1 %6166, %v5315_v31   ;;  %10728 = vst [vmem:[#allocation115_spill] sm:$0xff] %v7579_v34  ;;  %v1156_v23 = vmul.f32 %v7579_v34, %v7486_v58  ;;  %v1155_v34 = vmul.f32 %v7486_v58, %v7531_v37 }
 0x13a   : > { %1337 = vperm.xlu0 %6165, %v5314_v8   ;;  %1687 = vmatprep.mubr.f32.mxu0 %v7568_v18  ;;  %v7590_v8 = vsel %vm861_vm1, %v838_v24, %v839_v60  ;;  %v5319_v24 = vld [vmem:[%s10198_s1 + $0x3e8] sm:$0xff]  ;;  %v618_v37 = vmul.f32 %v7619_v56, %v7533_v40 }
 0x13b   : > { %1688 = vmatmul.mubr.f32.gmra.mxu0 %v7561_v53  ;;  %2137 = vmatprep.mubr.f32.mxu1 %v1153_v49  ;;  %v7583_v43 = vpop.permute.xlu1 %530  ;;  %v7585_v31 = vpop.permute.xlu0 %1041  ;;  %10731 = vst [vmem:[#allocation118_spill] sm:$0xff] %v7590_v8  ;;  %v840_v49 = vrot.slane %v616_v1, 7  ;;  %v1159_v1 = vmul.f32 %v7568_v18, %v7511_v52  ;;  %v7626_v18 = vld [vmem:[%s6535_s9 + $0x68] sm:$0xff] }
 0x13c   : > { %10729 = vst [vmem:[#allocation116_spill] sm:$0xff] %v7583_v43  ;;  %10730 = vst [vmem:[#allocation117_spill] sm:$0xff] %v7585_v31  ;;  %2539 = vmatprep.subr.mxu1 %v10644_v10  ;;  %2138 = vmatmul.mubr.f32.gmra.mxu1 %v1152_v36  ;;  %v2472_v36 = vld [vmem:[#allocation2 + $0x318] sm:$0xff] }
 0x13d   : > { %2540 = vmatpush1.msra.mxu1 %v2473_v21  ;;  %1352 = vperm.xlu1 %6166, %v5317_v25   ;;  %10737 = vst [vmem:[#allocation124_spill] sm:$0xff] %v7626_v18 }
 0x13e   : > { %1347 = vperm.xlu0 %6165, %v5316_v19   ;;  %1692 = vmatprep.mubr.f32.mxu0 %v7597_v13  ;;  %v841_v19 = vrot.slane %v617_v50, 7  ;;  %v5321_v50 = vld [vmem:[%s10198_s1 + $0x3f8] sm:$0xff] }
 0x13f   : > { %1693 = vmatmul.mubr.f32.gmra.mxu0 %v7590_v8  ;;  %2142 = vmatprep.mubr.f32.mxu1 %v1156_v23  ;;  %v7616_v23 = vsel %vm861_vm1, %v839_v60, %v840_v49  ;;  %v5320_v60 = vld [vmem:[%s10198_s1 + $0x3f0] sm:$0xff] }
 0x140   : > { %5711 = vmatprep.subr.mxu0 %v1512_v22  ;;  %2541 = vmatprep.subr.mxu1 %v10644_v10  ;;  %v7610_v21 = vpop.permute.xlu1 %535  ;;  %v7612_v25 = vpop.permute.xlu0 %1046  ;;  %10735 = vst [vmem:[#allocation122_spill] sm:$0xff] %v7616_v23 }
 0x141   : > { %10733 = vst [vmem:[#allocation120_spill] sm:$0xff] %v7610_v21  ;;  %10734 = vst [vmem:[#allocation121_spill] sm:$0xff] %v7612_v25  ;;  %2143 = vmatmul.mubr.f32.gmra.mxu1 %v1155_v34  ;;  %5712 = vmatpush3.msra.mxu0 %v1512_v22  ;;  %v2471_v22 = vld [vmem:[#allocation2 + $0x310] sm:$0xff]  ;;  %v1162_v34 = vmul.f32 %v7597_v13, %v7535_v6  ;;  %v1511_v13 = vld [vmem:[#allocation2 + $0x140] sm:$0xff] }
 0x142   : > { %2542 = vmatpush1.msra.mxu1 %v2472_v36  ;;  %1362 = vperm.xlu1 %6166, %v5319_v24   ;;  %v842_v36 = vrot.slane %v618_v37, 7  ;;  %v7641_v24 = vsel %vm861_vm1, %v840_v49, %v841_v19  ;;  %v7655_v37 = vld [vmem:[%s6535_s9 + $0x70] sm:$0xff]  ;;  %v2470_v49 = vld [vmem:[#allocation2 + $0x308] sm:$0xff] }
 0x143   : > { %1357 = vperm.xlu0 %6165, %v5318_v35   ;;  %1697 = vmatprep.mubr.f32.mxu0 %v7626_v18  ;;  %10738 = vst [vmem:[#allocation125_spill] sm:$0xff] %v7641_v24  ;;  %v7644_v35 = vld [vmem:[%s6535_s9 + $0x80] sm:$0xff]  ;;  %10742 = vst [vmem:[#allocation129_spill] sm:$0xff] %v7655_v37 }
 0x144   : > { %1698 = vmatmul.mubr.f32.gmra.mxu0 %v7616_v23  ;;  %2147 = vmatprep.mubr.f32.mxu1 %v1159_v1  ;;  %10739 = vst [vmem:[#allocation126_spill] sm:$0xff] %v7644_v35  ;;  %v619_v1 = vmul.f32 %v7644_v35, %v7555_v16  ;;  %v1165_v16 = vmul.f32 %v7626_v18, %v7557_v2 }
 0x145   : > { %2543 = vmatprep.subr.mxu1 %v10644_v10  ;;  %2148 = vmatmul.mubr.f32.gmra.mxu1 %v1158_v12  ;;  %v7648_v40 = vpop.permute.xlu1 %540  ;;  %v7650_v53 = vpop.permute.xlu0 %1051  ;;  %v1161_v12 = vmul.f32 %v7535_v6, %v7590_v8 }
 0x146   : > { %10740 = vst [vmem:[#allocation127_spill] sm:$0xff] %v7648_v40  ;;  %10741 = vst [vmem:[#allocation128_spill] sm:$0xff] %v7650_v53  ;;  %2544 = vmatpush1.msra.mxu1 %v2471_v22  ;;  %1372 = vperm.xlu1 %6166, %v5321_v50   ;;  %v843_v22 = vrot.slane %v619_v1, 7  ;;  %v7664_v50 = vsel %vm861_vm1, %v841_v19, %v842_v36  ;;  %v1168_v19 = vmul.f32 %v7655_v37, %v7585_v31  ;;  %v1510_v1 = vld [vmem:[#allocation2 + $0x138] sm:$0xff] }
 0x147   : > { %1367 = vperm.xlu0 %6165, %v5320_v60   ;;  %1702 = vmatprep.mubr.f32.mxu0 %v7655_v37  ;;  %10743 = vst [vmem:[#allocation130_spill] sm:$0xff] %v7664_v50  ;;  %v7667_v60 = vld [vmem:[%s6535_s9 + $0x88] sm:$0xff]  ;;  %v2500_v37 = vld [vmem:[#allocation2 + $0x3f8] sm:$0xff] }
 0x148   : > { %1703 = vmatmul.mubr.f32.gmra.mxu0 %v7641_v24  ;;  %2152 = vmatprep.mubr.f32.mxu1 %v1162_v34  ;;  %10744 = vst [vmem:[#allocation131_spill] sm:$0xff] %v7667_v60  ;;  %v620_v8 = vmul.f32 %v7667_v60, %v7583_v43  ;;  %v1164_v34 = vmul.f32 %v7557_v2, %v7616_v23 }
 0x149   : > { %5713 = vmatprep.subr.mxu0 %v1511_v13  ;;  %2545 = vmatprep.subr.mxu1 %v10644_v10  ;;  %v7685_v43 = vsel %vm861_vm1, %v842_v36, %v843_v22 }
 0x14a   : > { %2153 = vmatmul.mubr.f32.gmra.mxu1 %v1161_v12  ;;  %5714 = vmatpush3.msra.mxu0 %v1511_v13  ;;  %v7673_v18 = vpop.permute.xlu1 %545  ;;  %v7675_v6 = vpop.permute.xlu0 %1056  ;;  %v2469_v12 = vld [vmem:[#allocation2 + $0x300] sm:$0xff]  ;;  %v844_v13 = vrot.slane %v620_v8, 7  ;;  %10747 = vst [vmem:[#allocation134_spill] sm:$0xff] %v7685_v43  ;;  %v1171_v8 = vmul.f32 %v7619_v56, %v7612_v25 }
 0x14b   : > { %10745 = vst [vmem:[#allocation132_spill] sm:$0xff] %v7673_v18  ;;  %10746 = vst [vmem:[#allocation133_spill] sm:$0xff] %v7675_v6  ;;  %2546 = vmatpush1.msra.mxu1 %v2470_v49  ;;  %1707 = vmatprep.mubr.f32.mxu0 %v7619_v56  ;;  %v7688_v49 = vld [vmem:[%s6535_s9 + $0x90] sm:$0xff] }
 0x14c   : > { %1708 = vmatmul.mubr.f32.gmra.mxu0 %v7664_v50  ;;  %2157 = vmatprep.mubr.f32.mxu1 %v1165_v16  ;;  %10748 = vst [vmem:[#allocation135_spill] sm:$0xff] %v7688_v49  ;;  %v621_v23 = vmul.f32 %v7688_v49, %v7610_v21  ;;  %v1167_v16 = vmul.f32 %v7585_v31, %v7641_v24  ;;  %v2499_v56 = vld [vmem:[#allocation2 + $0x3f0] sm:$0xff] }
 0x14d   : > { %2547 = vmatprep.subr.mxu1 %v10644_v10  ;;  %1712 = vmatprep.mubr.f32.mxu0 %v7644_v35  ;;  %v1170_v24 = vmul.f32 %v7612_v25, %v7664_v50  ;;  %v2498_v50 = vld [vmem:[#allocation2 + $0x3e8] sm:$0xff]  ;;  %v2497_v25 = vld [vmem:[#allocation2 + $0x3e0] sm:$0xff] }
 0x14e   : > { %2158 = vmatmul.mubr.f32.gmra.mxu1 %v1164_v34  ;;  %5715 = vmatprep.subr.mxu0 %v1510_v1  ;;  %v845_v21 = vrot.slane %v621_v23, 7  ;;  %v7704_v34 = vsel %vm861_vm1, %v843_v22, %v844_v13  ;;  %v1509_v23 = vld [vmem:[#allocation2 + $0x130] sm:$0xff] }
 0x14f   : > { %2548 = vmatpush1.msra.mxu1 %v2469_v12  ;;  %2162 = vmatprep.mubr.f32.mxu1 %v1168_v19  ;;  %v7696_v2 = vpop.permute.xlu1 %550  ;;  %v7698_v36 = vpop.permute.xlu0 %1061  ;;  %10751 = vst [vmem:[#allocation138_spill] sm:$0xff] %v7704_v34  ;;  %v7707_v12 = vld [vmem:[%s6535_s9 + $0x98] sm:$0xff] }
 0x150   : > { %10749 = vst [vmem:[#allocation136_spill] sm:$0xff] %v7696_v2  ;;  %10750 = vst [vmem:[#allocation137_spill] sm:$0xff] %v7698_v36  ;;  %1713 = vmatmul.mubr.f32.gmra.mxu0 %v7685_v43  ;;  %2549 = vmatprep.subr.mxu1 %v10644_v10  ;;  %v622_v19 = vmul.f32 %v7707_v12, %v7648_v40  ;;  %v7725_v40 = vsel %vm861_vm1, %v844_v13, %v845_v21 }
 0x151   : > { %5716 = vmatpush3.msra.mxu0 %v1510_v1  ;;  %2550 = vmatpush2.msra.mxu1 %v2500_v37  ;;  %10752 = vst [vmem:[#allocation139_spill] sm:$0xff] %v7707_v12  ;;  %v1174_v37 = vmul.f32 %v7644_v35, %v7650_v53  ;;  %10755 = vst [vmem:[#allocation142_spill] sm:$0xff] %v7725_v40  ;;  %v1177_v13 = vmul.f32 %v7667_v60, %v7675_v6 }
 0x152   : > { %2163 = vmatmul.mubr.f32.gmra.mxu1 %v1167_v16  ;;  %1717 = vmatprep.mubr.f32.mxu0 %v7667_v60  ;;  %v846_v16 = vrot.slane %v622_v19, 7  ;;  %v1508_v19 = vld [vmem:[#allocation2 + $0x128] sm:$0xff] }
 0x153   : > { %2167 = vmatprep.mubr.f32.mxu1 %v1171_v8  ;;  %2551 = vmatprep.subr.mxu1 %v10644_v10  ;;  %v7728_v8 = vld [vmem:[%s6535_s9 + $0xa0] sm:$0xff] }
 0x154   : > { %1718 = vmatmul.mubr.f32.gmra.mxu0 %v7704_v34  ;;  %2552 = vmatpush2.msra.mxu1 %v2499_v56  ;;  %v7718_v22 = vpop.permute.xlu1 %555  ;;  %v7720_v1 = vpop.permute.xlu0 %1066  ;;  %10756 = vst [vmem:[#allocation143_spill] sm:$0xff] %v7728_v8  ;;  %v623_v35 = vmul.f32 %v7728_v8, %v7673_v18  ;;  %v1173_v56 = vmul.f32 %v7650_v53, %v7685_v43  ;;  %v7745_v18 = vld [vmem:[%s6535_s9 + $0xa8] sm:$0xff] }
 0x155   : > { %10753 = vst [vmem:[#allocation140_spill] sm:$0xff] %v7718_v22  ;;  %10754 = vst [vmem:[#allocation141_spill] sm:$0xff] %v7720_v1  ;;  %1722 = vmatprep.mubr.f32.mxu0 %v7688_v49  ;;  %5717 = vmatprep.subr.mxu0 %v1509_v23 }
 0x156   : > { %2168 = vmatmul.mubr.f32.gmra.mxu1 %v1170_v24  ;;  %2553 = vmatprep.subr.mxu1 %v10644_v10  ;;  %v847_v31 = vrot.slane %v623_v35, 7  ;;  %v7741_v24 = vsel %vm861_vm1, %v845_v21, %v846_v16  ;;  %10758 = vst [vmem:[#allocation145_spill] sm:$0xff] %v7745_v18  ;;  %v1176_v35 = vmul.f32 %v7675_v6, %v7704_v34  ;;  %v7765_v34 = vld [vmem:[%s6535_s9 + $0xb0] sm:$0xff] }
 0x157   : > { %2172 = vmatprep.mubr.f32.mxu1 %v1174_v37  ;;  %5718 = vmatpush3.msra.mxu0 %v1509_v23  ;;  %10757 = vst [vmem:[#allocation144_spill] sm:$0xff] %v7741_v24  ;;  %v624_v23 = vmul.f32 %v7745_v18, %v7696_v2  ;;  %v1180_v21 = vmul.f32 %v7688_v49, %v7698_v36  ;;  %v2496_v2 = vld [vmem:[#allocation2 + $0x3d8] sm:$0xff]  ;;  %10762 = vst [vmem:[#allocation149_spill] sm:$0xff] %v7765_v34  ;;  %v2495_v49 = vld [vmem:[#allocation2 + $0x3d0] sm:$0xff] }
 0x158   : > { %1723 = vmatmul.mubr.f32.gmra.mxu0 %v7725_v40  ;;  %2554 = vmatpush2.msra.mxu1 %v2498_v50  ;;  %v1507_v50 = vld [vmem:[#allocation2 + $0x120] sm:$0xff] }
 0x159   : > { %1727 = vmatprep.mubr.f32.mxu0 %v7707_v12  ;;  %2555 = vmatprep.subr.mxu1 %v10644_v10  ;;  %v7749_v37 = vpop.permute.xlu1 %560  ;;  %v7751_v60 = vpop.permute.xlu0 %1071  ;;  %v848_v43 = vrot.slane %v624_v23, 7 }
 0x15a   : > { %10759 = vst [vmem:[#allocation146_spill] sm:$0xff] %v7749_v37  ;;  %10760 = vst [vmem:[#allocation147_spill] sm:$0xff] %v7751_v60  ;;  %2173 = vmatmul.mubr.f32.gmra.mxu1 %v1173_v56  ;;  %5719 = vmatprep.subr.mxu0 %v1508_v19  ;;  %v7762_v56 = vsel %vm861_vm1, %v846_v16, %v847_v31  ;;  %v1183_v16 = vmul.f32 %v7707_v12, %v7720_v1 }
 0x15b   : > { %2177 = vmatprep.mubr.f32.mxu1 %v1177_v13  ;;  %2556 = vmatpush2.msra.mxu1 %v2497_v25  ;;  %10761 = vst [vmem:[#allocation148_spill] sm:$0xff] %v7762_v56  ;;  %v625_v25 = vmul.f32 %v7765_v34, %v7718_v22  ;;  %v1179_v13 = vmul.f32 %v7698_v36, %v7725_v40  ;;  %v7785_v22 = vld [vmem:[%s6535_s9 + $0xb8] sm:$0xff] }
 0x15c   : > { %1728 = vmatmul.mubr.f32.gmra.mxu0 %v7741_v24  ;;  %2557 = vmatprep.subr.mxu1 %v10644_v10  ;;  %10766 = vst [vmem:[#allocation153_spill] sm:$0xff] %v7785_v22  ;;  %v1182_v12 = vmul.f32 %v7720_v1, %v7741_v24  ;;  %v1506_v36 = vld [vmem:[#allocation2 + $0x118] sm:$0xff] }
 0x15d   : > { %1732 = vmatprep.mubr.f32.mxu0 %v7728_v8  ;;  %5720 = vmatpush3.msra.mxu0 %v1508_v19  ;;  %v849_v19 = vrot.slane %v625_v25, 7  ;;  %v1186_v25 = vmul.f32 %v7728_v8, %v7751_v60  ;;  %v2492_v24 = vld [vmem:[#allocation2 + $0x3b8] sm:$0xff] }
 0x15e   : > { %2178 = vmatmul.mubr.f32.gmra.mxu1 %v1176_v35  ;;  %5721 = vmatprep.subr.mxu0 %v1507_v50  ;;  %v7771_v23 = vpop.permute.xlu1 %565  ;;  %v7773_v6 = vpop.permute.xlu0 %1076  ;;  %v7782_v35 = vsel %vm861_vm1, %v847_v31, %v848_v43 }
 0x15f   : > { %10763 = vst [vmem:[#allocation150_spill] sm:$0xff] %v7771_v23  ;;  %10764 = vst [vmem:[#allocation151_spill] sm:$0xff] %v7773_v6  ;;  %2182 = vmatprep.mubr.f32.mxu1 %v1180_v21  ;;  %2558 = vmatpush2.msra.mxu1 %v2496_v2  ;;  %v626_v21 = vmul.f32 %v7785_v22, %v7749_v37  ;;  %v2494_v2 = vld [vmem:[#allocation2 + $0x3c8] sm:$0xff]  ;;  %v7802_v37 = vsel %vm861_vm1, %v848_v43, %v849_v19  ;;  %v1505_v43 = vld [vmem:[#allocation2 + $0x110] sm:$0xff] }
 0x160   : > { %1733 = vmatmul.mubr.f32.gmra.mxu0 %v7762_v56  ;;  %2559 = vmatprep.subr.mxu1 %v10644_v10  ;;  %10765 = vst [vmem:[#allocation152_spill] sm:$0xff] %v7782_v35  ;;  %10769 = vst [vmem:[#allocation156_spill] sm:$0xff] %v7802_v37 }
 0x161   : > { %1737 = vmatprep.mubr.f32.mxu0 %v7745_v18  ;;  %2560 = vmatpush2.msra.mxu1 %v2495_v49  ;;  %v2493_v49 = vld [vmem:[#allocation2 + $0x3c0] sm:$0xff] }
 0x162   : > { %2183 = vmatmul.mubr.f32.gmra.mxu1 %v1179_v13  ;;  %2561 = vmatprep.subr.mxu1 %v10644_v10  ;;  %v850_v13 = vrot.slane %v626_v21, 7  ;;  %v1189_v21 = vmul.f32 %v7745_v18, %v7773_v6  ;;  %v7826_v18 = vld [vmem:[%s6535_s9 + $0xc8] sm:$0xff] }
 0x163   : > { %2187 = vmatprep.mubr.f32.mxu1 %v1183_v16  ;;  %5722 = vmatpush3.msra.mxu0 %v1507_v50  ;;  %v7794_v31 = vpop.permute.xlu1 %570  ;;  %v7796_v40 = vpop.permute.xlu0 %1081  ;;  %v7805_v16 = vld [vmem:[%s6535_s9 + $0xc0] sm:$0xff] }
 0x164   : > { %10767 = vst [vmem:[#allocation154_spill] sm:$0xff] %v7794_v31  ;;  %10768 = vst [vmem:[#allocation155_spill] sm:$0xff] %v7796_v40  ;;  %1738 = vmatmul.mubr.f32.gmra.mxu0 %v7782_v35  ;;  %2562 = vmatpush2.msra.mxu1 %v2494_v2  ;;  %v627_v50 = vmul.f32 %v7805_v16, %v7771_v23  ;;  %v1185_v2 = vmul.f32 %v7751_v60, %v7762_v56  ;;  %v2491_v60 = vld [vmem:[#allocation2 + $0x3b0] sm:$0xff] }
 0x165   : > { %1742 = vmatprep.mubr.f32.mxu0 %v7765_v34  ;;  %10770 = vst [vmem:[#allocation157_spill] sm:$0xff] %v7805_v16  ;;  %2563 = vmatprep.subr.mxu1 %v10644_v10  ;;  %v1188_v56 = vmul.f32 %v7773_v6, %v7782_v35  ;;  %v1504_v35 = vld [vmem:[#allocation2 + $0x108] sm:$0xff] }
 0x166   : > { %2188 = vmatmul.mubr.f32.gmra.mxu1 %v1182_v12  ;;  %5723 = vmatprep.subr.mxu0 %v1506_v36  ;;  %v851_v12 = vrot.slane %v627_v50, 7  ;;  %v1192_v50 = vmul.f32 %v7765_v34, %v7796_v40 }
 0x167   : > { %2192 = vmatprep.mubr.f32.mxu1 %v1186_v25  ;;  %2564 = vmatpush2.msra.mxu1 %v2493_v49  ;;  %v7823_v25 = vsel %vm861_vm1, %v849_v19, %v850_v13  ;;  %v628_v49 = vmul.f32 %v7826_v18, %v7794_v31 }
 0x168   : > { %1743 = vmatmul.mubr.f32.gmra.mxu0 %v7802_v37  ;;  %2565 = vmatprep.subr.mxu1 %v10644_v10  ;;  %v7816_v8 = vpop.permute.xlu1 %575  ;;  %v7818_v23 = vpop.permute.xlu0 %1086  ;;  %10773 = vst [vmem:[#allocation160_spill] sm:$0xff] %v7823_v25 }
 0x169   : > { %10771 = vst [vmem:[#allocation158_spill] sm:$0xff] %v7816_v8  ;;  %10772 = vst [vmem:[#allocation159_spill] sm:$0xff] %v7818_v23  ;;  %1747 = vmatprep.mubr.f32.mxu0 %v7785_v22  ;;  %5724 = vmatpush3.msra.mxu0 %v1506_v36  ;;  %v852_v19 = vrot.slane %v628_v49, 7  ;;  %v7839_v36 = vsel %vm861_vm1, %v850_v13, %v851_v12  ;;  %v1191_v49 = vmul.f32 %v7796_v40, %v7802_v37  ;;  %v7883_v37 = vld [vmem:[%s6535_s9 + $0xe0] sm:$0xff] }
 0x16a   : > { %2193 = vmatmul.mubr.f32.gmra.mxu1 %v1185_v2  ;;  %5725 = vmatprep.subr.mxu0 %v1505_v43  ;;  %v7842_v2 = vld [vmem:[%s6535_s9 + $0xd0] sm:$0xff]  ;;  %v1195_v13 = vmul.f32 %v7785_v22, %v7818_v23  ;;  %v1503_v22 = vld [vmem:[#allocation2 + $0x100] sm:$0xff]  ;;  %10782 = vst [vmem:[#allocation169_spill] sm:$0xff] %v7883_v37 }
 0x16b   : > { %2197 = vmatprep.mubr.f32.mxu1 %v1189_v21  ;;  %2566 = vmatpush2.msra.mxu1 %v2492_v24  ;;  %10774 = vst [vmem:[#allocation161_spill] sm:$0xff] %v7842_v2  ;;  %v629_v21 = vmul.f32 %v7842_v2, %v7816_v8  ;;  %v2490_v24 = vld [vmem:[#allocation2 + $0x3a8] sm:$0xff]  ;;  %v2489_v8 = vld [vmem:[#allocation2 + $0x3a0] sm:$0xff] }
 0x16c   : > { %1748 = vmatmul.mubr.f32.gmra.mxu0 %v7823_v25  ;;  %2567 = vmatprep.subr.mxu1 %v10644_v10 }
 0x16d   : > { %1752 = vmatprep.mubr.f32.mxu0 %v7805_v16  ;;  %v7846_v31 = vpop.permute.xlu1 %580  ;;  %v7848_v34 = vpop.permute.xlu0 %1091  ;;  %2568 = vmatpush2.msra.mxu1 %v2491_v60  ;;  %v853_v6 = vrot.slane %v629_v21, 7  ;;  %v7859_v60 = vsel %vm861_vm1, %v851_v12, %v852_v19 }
 0x16e   : > { %10775 = vst [vmem:[#allocation162_spill] sm:$0xff] %v7846_v31  ;;  %10776 = vst [vmem:[#allocation163_spill] sm:$0xff] %v7848_v34  ;;  %2198 = vmatmul.mubr.f32.gmra.mxu1 %v1188_v56  ;;  %2569 = vmatprep.subr.mxu1 %v10644_v10  ;;  %v7862_v56 = vld [vmem:[%s6535_s9 + $0xd8] sm:$0xff]  ;;  %v1198_v12 = vmul.f32 %v7805_v16, %v7848_v34  ;;  %v2487_v16 = vld [vmem:[#allocation2 + $0x390] sm:$0xff] }
 0x16f   : > { %2202 = vmatprep.mubr.f32.mxu1 %v1192_v50  ;;  %5726 = vmatpush3.msra.mxu0 %v1505_v43  ;;  %10777 = vst [vmem:[#allocation164_spill] sm:$0xff] %v7859_v60  ;;  %10778 = vst [vmem:[#allocation165_spill] sm:$0xff] %v7862_v56  ;;  %v630_v50 = vmul.f32 %v7862_v56, %v7846_v31  ;;  %v1194_v43 = vmul.f32 %v7818_v23, %v7823_v25  ;;  %v2488_v31 = vld [vmem:[#allocation2 + $0x398] sm:$0xff] }
 0x170   : > { %1753 = vmatmul.mubr.f32.gmra.mxu0 %v7839_v36  ;;  %2570 = vmatpush2.msra.mxu1 %v2490_v24  ;;  %v7880_v25 = vsel %vm861_vm1, %v852_v19, %v853_v6 }
 0x171   : > { %1757 = vmatprep.mubr.f32.mxu0 %v7826_v18  ;;  %2571 = vmatprep.subr.mxu1 %v10644_v10  ;;  %10781 = vst [vmem:[#allocation168_spill] sm:$0xff] %v7880_v25 }
 0x172   : > { %2203 = vmatmul.mubr.f32.gmra.mxu1 %v1191_v49  ;;  %v7869_v24 = vpop.permute.xlu1 %585  ;;  %v7871_v21 = vpop.permute.xlu0 %1096  ;;  %5727 = vmatprep.subr.mxu0 %v1504_v35  ;;  %v854_v49 = vrot.slane %v630_v50, 7 }
 0x173   : > { %10779 = vst [vmem:[#allocation166_spill] sm:$0xff] %v7869_v24  ;;  %10780 = vst [vmem:[#allocation167_spill] sm:$0xff] %v7871_v21  ;;  %2207 = vmatprep.mubr.f32.mxu1 %v1195_v13  ;;  %2572 = vmatpush2.msra.mxu1 %v2489_v8  ;;  %v631_v13 = vmul.f32 %v7883_v37, %v7869_v24  ;;  %v1197_v8 = vmul.f32 %v7848_v34, %v7839_v36 }
 0x174   : > { %1758 = vmatmul.mubr.f32.gmra.mxu0 %v7859_v60  ;;  %2573 = vmatprep.subr.mxu1 %v10644_v10  ;;  %v1201_v50 = vmul.f32 %v7826_v18, %v7871_v21 }
 0x175   : > { %1762 = vmatprep.mubr.f32.mxu0 %v7842_v2  ;;  %5728 = vmatpush3.msra.mxu0 %v1504_v35  ;;  %v855_v23 = vrot.slane %v631_v13, 7  ;;  %v7898_v35 = vsel %vm861_vm1, %v853_v6, %v854_v49  ;;  %v2516_v13 = vld [vmem:[#allocation2 + $0x478] sm:$0xff]  ;;  %v2485_v6 = vld [vmem:[#allocation2 + $0x380] sm:$0xff] }
 0x176   : > { %2208 = vmatmul.mubr.f32.gmra.mxu1 %v1194_v43  ;;  %5729 = vmatprep.subr.mxu0 %v1503_v22  ;;  %10784 = vst [vmem:[#allocation171_spill] sm:$0xff] %v7898_v35  ;;  %v2486_v43 = vld [vmem:[#allocation2 + $0x388] sm:$0xff] }
 0x177   : > { %2212 = vmatprep.mubr.f32.mxu1 %v1198_v12  ;;  %2574 = vmatpush2.msra.mxu1 %v2488_v31  ;;  %v7892_v19 = vpop.permute.xlu0 %1101  ;;  %v1200_v12 = vmul.f32 %v7871_v21, %v7859_v60  ;;  %v7941_v60 = vld [vmem:[%s6535_s9 + $0xf0] sm:$0xff] }
 0x178   : > { %1763 = vmatmul.mubr.f32.gmra.mxu0 %v7880_v25  ;;  %10783 = vst [vmem:[#allocation170_spill] sm:$0xff] %v7892_v19  ;;  %2575 = vmatprep.subr.mxu1 %v10644_v10  ;;  %v1204_v31 = vmul.f32 %v7842_v2, %v7892_v19  ;;  %10791 = vst [vmem:[#allocation177_spill] sm:$0xff] %v7941_v60 }
 0x179   : > { %1767 = vmatprep.mubr.f32.mxu0 %v7862_v56  ;;  %2576 = vmatpush2.msra.mxu1 %v2487_v16  ;;  %v7909_v16 = vsel %vm861_vm1, %v854_v49, %v855_v23  ;;  %v7922_v49 = vld [vmem:[%s6535_s9 + $0xe8] sm:$0xff] }
 0x17a   : > { %2213 = vmatmul.mubr.f32.gmra.mxu1 %v1197_v8  ;;  %2577 = vmatprep.subr.mxu1 %v10644_v10  ;;  %10785 = vst [vmem:[#allocation172_spill] sm:$0xff] %v7909_v16  ;;  %v7912_v8 = vpop.permute.xlu1 %1106  ;;  %10787 = vst [vmem:[#allocation174_spill] sm:$0xff] %v7922_v49 }
 0x17b   : > { %2217 = vmatprep.mubr.f32.mxu1 %v1201_v50  ;;  %5730 = vmatpush3.msra.mxu0 %v1503_v22  ;;  %10786 = vst [vmem:[#allocation173_spill] sm:$0xff] %v7912_v8  ;;  %v1203_v22 = vmul.f32 %v7892_v19, %v7880_v25  ;;  %v10789_v25 = vrot.slane %v7225_v47, 7  ;;  %v1206_v2 = vmul.f32 %v7912_v8, %v7898_v35 }
 0x17c   : > { %1768 = vmatmul.mubr.f32.gmra.mxu0 %v7898_v35  ;;  %2578 = vmatpush2.msra.mxu1 %v2486_v43  ;;  %v7927_v24 = vpop.permute.xlu0 %1111 }
 0x17d   : > { %1772 = vmatprep.mubr.f32.mxu0 %v7883_v37  ;;  %2579 = vmatprep.subr.mxu1 %v10644_v10  ;;  %10788 = vst [vmem:[#allocation175_spill] sm:$0xff] %v7927_v24 }
 0x17e   : > { %2218 = vmatmul.mubr.f32.gmra.mxu1 %v1200_v12  ;;  %v7916_v50 = vpop.f32.mrf.mxu1  ;;  %5779 = vmatprep.subr.mxu0 %v2516_v13  ;;  %v1207_v12 = vmul.f32 %v7862_v56, %v7912_v8  ;;  %v7948_v47 = vpop.permute.xlu1 %1116 }
 0x17f   : > { %2222 = vmatprep.mubr.f32.mxu1 %v1204_v31  ;;  %2580 = vmatpush2.msra.mxu1 %v2485_v6  ;;  %v7933_v31 = vsel %vm861_vm1, %v855_v23, %v10789_v25  ;;  %10792 = vst [vmem:[#allocation178_spill] sm:$0xff] %v7948_v47  ;;  %v1209_v23 = vmul.f32 %v7927_v24, %v7909_v16 }
 0x180   : > { %1773 = vmatmul.mubr.f32.gmra.mxu0 %v7909_v16  ;;  %v7919_v43 = vpop.f32.mrf.mxu1  ;;  %10790 = vst [vmem:[#allocation176_spill] sm:$0xff] %v7933_v31 }
 0x181   : > { %1777 = vmatprep.mubr.f32.mxu0 %v7922_v49 }
 0x182   : > { %2223 = vmatmul.mubr.f32.gmra.mxu1 %v1203_v22  ;;  %v1210_v22 = vmul.f32 %v7883_v37, %v7927_v24  ;;  %v7961_v37 = vpop.permute.xlu0 %1217  ;;  %v7976_v35 = vpop.permute.xlu1 %1222 }
 0x183   : > { %2227 = vmatprep.mubr.f32.mxu1 %v1207_v12  ;;  %v7935_v6 = vpop.f32.mrf.mxu1  ;;  %10794 = vst [vmem:[#allocation180_spill] sm:$0xff] %v7961_v37  ;;  %10795 = vst [vmem:[#allocation181_spill] sm:$0xff] %v7976_v35 }
 0x184   : > { %1778 = vmatmul.mubr.f32.gmra.mxu0 %v7933_v31 }
 0x185   : > { %1782 = vmatprep.mubr.f32.mxu0 %v7941_v60  ;;  %v7946_v12 = vpop.f32.mrf.mxu1  ;;  %v1213_v60 = vmul.f32 %v7922_v49, %v7948_v47 }
 0x186   : > { %2228 = vmatmul.mubr.f32.gmra.mxu1 %v1206_v2 }
 0x187   : > { %2232 = vmatprep.mubr.f32.mxu1 %v1210_v22  ;;  %v1121_v22 = vmul.f32 %v7185_v15, %v7260_v55  ;;  %v2515_v15 = vld [vmem:[#allocation2 + $0x470] sm:$0xff] }
 0x188   : > { %1783 = vmatmul.mubr.f32.gmra.mxu0 %v7282_v45  ;;  %v7953_v25 = vpop.f32.mrf.mxu1  ;;  %v1212_v45 = vmul.f32 %v7948_v47, %v7933_v31  ;;  %v10846_v31 = vld [vmem:[#allocation147_spill] sm:$0xff] }
 0x189   : > { %1787 = vmatprep.mubr.f32.mxu0 %v7956_v62  ;;  %v6193_v62 = vld [vmem:[%s6535_s9 + $0x10] sm:$0xff] }
 0x18a   : > { %2233 = vmatmul.mubr.f32.gmra.mxu1 %v1209_v23  ;;  %v7963_v2 = vpop.f32.mrf.mxu1  ;;  %v1376_v16 = vmul.f32 %v6193_v62, %v7961_v37  ;;  %v1124_v23 = vmul.f32 %v7220_v4, %v7288_v29  ;;  %v6194_v62 = vld [vmem:[%s6535_s9 + $0x18] sm:$0xff]  ;;  %v2514_v4 = vld [vmem:[#allocation2 + $0x468] sm:$0xff]  ;;  %v7986_v29 = vpop.permute.xlu0 %1227 }
 0x18b   : > { %2237 = vmatprep.mubr.f32.mxu1 %v1213_v60  ;;  %v1127_v60 = vmul.f32 %v7252_v27, %v6787_v17  ;;  %v1379_v55 = vmul.f32 %v6194_v62, %v7976_v35  ;;  %10796 = vst [vmem:[#allocation182_spill] sm:$0xff] %v7986_v29  ;;  %v10815_v27 = vld [vmem:[#allocation100_spill] sm:$0xff] }
 0x18c   : > { %1788 = vmatmul.mubr.f32.gmra.mxu0 %v7319_v9 }
 0x18d   : > { %5731 = vmatprep.mubr.f32.mxu0 %v1121_v22  ;;  %v7972_v49 = vpop.f32.mrf.mxu1  ;;  %v1375_v22 = vmul.f32 %v7961_v37, %v7267_v44  ;;  %v1133_v44 = vmul.f32 %v7310_v54, %v6809_v26 }
 0x18e   : > { %2238 = vmatmul.mubr.f32.gmra.mxu1 %v1212_v45  ;;  %v1130_v45 = vmul.f32 %v7276_v14, %v6795_v20  ;;  %v2512_v14 = vld [vmem:[#allocation2 + $0x458] sm:$0xff]  ;;  %v8014_v54 = vpop.permute.xlu0 %1237  ;;  %v10822_v20 = vld [vmem:[#allocation117_spill] sm:$0xff] }
 0x18f   : > { %2581 = vmatprep.mubr.f32.mxu1 %v1376_v16  ;;  %v7980_v9 = vpop.f32.mrf.mxu1  ;;  %10801 = vst [vmem:[#allocation187_spill] sm:$0xff] %v8014_v54 }
 0x190   : > { %5732 = vmatmul.mubr.f32.vlgmr.msra.gmra.mxu0 %v1124_v23  ;;  %v1378_v23 = vmul.f32 %v7976_v35, %v7348_v39  ;;  %v1139_v39 = vmul.f32 %v7357_v28, %v6845_v42 }
 0x191   : > { %5734 = vmatprep.mubr.f32.mxu0 %v1127_v60  ;;  %5780 = vmatpush3.msra.mxu0 %v2516_v13  ;;  %v2513_v13 = vld [vmem:[#allocation2 + $0x460] sm:$0xff] }
 0x192   : > { %2582 = vmatmul.mubr.f32.vlgmr.msra.gmra.mxu1 %v1375_v22  ;;  %5781 = vmatprep.subr.mxu0 %v2515_v15  ;;  %v7990_v16 = vpop.f32.mrf.mxu1  ;;  %v6195_v22 = vld [vmem:[%s6535_s9 + $0x20] sm:$0xff] }
 0x193   : > { %10797 = vst [vmem:[#allocation183_spill] sm:$0xff] %v7990_v16  ;;  %2586 = vmatprep.mubr.f32.mxu1 %v1379_v55  ;;  %5782 = vmatpush3.msra.mxu0 %v2515_v15  ;;  %v1382_v62 = vmul.f32 %v6195_v22, %v7986_v29  ;;  %v8000_v55 = vpop.permute.xlu1 %1232  ;;  %v1136_v15 = vmul.f32 %v7335_v0, %v6822_v33  ;;  %v6196_v22 = vld [vmem:[%s6535_s9 + $0x28] sm:$0xff] }
 0x194   : > { %5735 = vmatmul.mubr.f32.gmra.mxu0 %v1130_v45  ;;  %5783 = vmatprep.subr.mxu0 %v2514_v4  ;;  %v7996_v60 = vpop.f32.mrf.mxu1  ;;  %10798 = vst [vmem:[#allocation184_spill] sm:$0xff] %v8000_v55 }
 0x195   : > { %5737 = vmatprep.mubr.f32.mxu0 %v1133_v44  ;;  %5784 = vmatpush3.msra.mxu0 %v2514_v4  ;;  %v2511_v44 = vld [vmem:[#allocation2 + $0x450] sm:$0xff]  ;;  %v1381_v4 = vmul.f32 %v7986_v29, %v7371_v63  ;;  %v1145_v63 = vmul.f32 %v7397_v59, %v6879_v3 }
 0x196   : > { %2587 = vmatmul.mubr.f32.gmra.mxu1 %v1378_v23  ;;  %5785 = vmatprep.subr.mxu0 %v2513_v13  ;;  %v1385_v23 = vmul.f32 %v6196_v22, %v8000_v55  ;;  %v6197_v22 = vld [vmem:[%s6535_s9 + $0x30] sm:$0xff] }
 0x197   : > { %2591 = vmatprep.mubr.f32.mxu1 %v1382_v62  ;;  %5786 = vmatpush3.msra.mxu0 %v2513_v13  ;;  %v8006_v45 = vpop.f32.mrf.mxu1  ;;  %v2510_v62 = vld [vmem:[#allocation2 + $0x448] sm:$0xff]  ;;  %v1142_v13 = vmul.f32 %v7380_v51, %v6854_v48  ;;  %v2508_v51 = vld [vmem:[#allocation2 + $0x438] sm:$0xff]  ;;  %v8026_v28 = vpop.permute.xlu1 %1242 }
 0x198   : > { %10799 = vst [vmem:[#allocation185_spill] sm:$0xff] %v8006_v45  ;;  %5738 = vmatmul.mubr.f32.gmra.mxu0 %v1136_v15  ;;  %5787 = vmatprep.subr.mxu0 %v2512_v14  ;;  %v2509_v15 = vld [vmem:[#allocation2 + $0x440] sm:$0xff]  ;;  %10803 = vst [vmem:[#allocation189_spill] sm:$0xff] %v8026_v28 }
 0x199   : > { %5740 = vmatprep.mubr.f32.mxu0 %v1139_v39  ;;  %5788 = vmatpush3.msra.mxu0 %v2512_v14  ;;  %v8012_v0 = vpop.f32.mrf.mxu1  ;;  %v1384_v14 = vmul.f32 %v8000_v55, %v7407_v32  ;;  %v1151_v32 = vmul.f32 %v7439_v41, %v6911_v30 }
 0x19a   : > { %10800 = vst [vmem:[#allocation186_spill] sm:$0xff] %v8012_v0  ;;  %2592 = vmatmul.mubr.f32.gmra.mxu1 %v1381_v4  ;;  %5789 = vmatprep.subr.mxu0 %v2511_v44  ;;  %v1388_v4 = vmul.f32 %v6197_v22, %v8014_v54  ;;  %v2506_v22 = vld [vmem:[#allocation2 + $0x428] sm:$0xff]  ;;  %v10852_v0 = vld [vmem:[#allocation151_spill] sm:$0xff] }
 0x19b   : > { %2596 = vmatprep.mubr.f32.mxu1 %v1385_v23  ;;  %5790 = vmatpush3.msra.mxu0 %v2511_v44  ;;  %v1148_v44 = vmul.f32 %v7419_v46, %v6889_v11  ;;  %v8040_v46 = vpop.permute.xlu0 %1247  ;;  %v8052_v41 = vpop.permute.xlu1 %1252 }
 0x19c   : > { %5741 = vmatmul.mubr.f32.gmra.mxu0 %v1142_v13  ;;  %v8022_v39 = vpop.f32.mrf.mxu1  ;;  %5791 = vmatprep.subr.mxu0 %v2510_v62  ;;  %v2507_v13 = vld [vmem:[#allocation2 + $0x430] sm:$0xff]  ;;  %10806 = vst [vmem:[#allocation192_spill] sm:$0xff] %v8040_v46 }
 0x19d   : > { %10802 = vst [vmem:[#allocation188_spill] sm:$0xff] %v8022_v39  ;;  %5743 = vmatprep.mubr.f32.mxu0 %v1145_v63  ;;  %5792 = vmatpush3.msra.mxu0 %v2510_v62  ;;  %v1387_v62 = vmul.f32 %v8014_v54, %v7430_v57  ;;  %v1391_v63 = vmul.f32 %v7498_v5, %v8026_v28  ;;  %v10808_v5 = vld [vmem:[#allocation97_spill] sm:$0xff] }
 0x19e   : > { %2597 = vmatmul.mubr.f32.gmra.mxu1 %v1384_v14  ;;  %v8030_v23 = vpop.f32.mrf.mxu1  ;;  %5793 = vmatprep.subr.mxu0 %v2509_v15  ;;  %v1157_v57 = vmul.f32 %v7486_v58, %v6941_v61  ;;  %10810 = vst [vmem:[#allocation97_spill] sm:$0xff] %v8052_v41 }
 0x19f   : > { %10804 = vst [vmem:[#allocation190_spill] sm:$0xff] %v8030_v23  ;;  %2601 = vmatprep.mubr.f32.mxu1 %v1388_v4  ;;  %5794 = vmatpush3.msra.mxu0 %v2509_v15  ;;  %v1154_v15 = vmul.f32 %v7461_v7, %v6921_v38  ;;  %v2504_v7 = vld [vmem:[#allocation2 + $0x418] sm:$0xff] }
 0x1a0   : > { %5744 = vmatmul.mubr.f32.gmra.mxu0 %v1148_v44  ;;  %5795 = vmatprep.subr.mxu0 %v2508_v51  ;;  %v2505_v44 = vld [vmem:[#allocation2 + $0x420] sm:$0xff] }
 0x1a1   : > { %5746 = vmatprep.mubr.f32.mxu0 %v1151_v32  ;;  %v8038_v14 = vpop.f32.mrf.mxu1  ;;  %5796 = vmatpush3.msra.mxu0 %v2508_v51  ;;  %v1390_v51 = vmul.f32 %v8026_v28, %v10808_v5  ;;  %v10809_v32 = vld [vmem:[#allocation106_spill] sm:$0xff] }
 0x1a2   : > { %10805 = vst [vmem:[#allocation191_spill] sm:$0xff] %v8038_v14  ;;  %2602 = vmatmul.mubr.f32.gmra.mxu1 %v1387_v62  ;;  %5797 = vmatprep.subr.mxu0 %v2507_v13  ;;  %v1394_v62 = vmul.f32 %v10809_v32, %v8040_v46  ;;  %v8066_v14 = vpop.permute.xlu0 %1257 }
 0x1a3   : > { %2606 = vmatprep.mubr.f32.mxu1 %v1391_v63  ;;  %v8046_v4 = vpop.f32.mrf.mxu1  ;;  %5798 = vmatpush3.msra.mxu0 %v2507_v13  ;;  %v10811_v63 = vld [vmem:[#allocation32_spill] sm:$0xff]  ;;  %v10813_v13 = vld [vmem:[#allocation33_spill] sm:$0xff] }
 0x1a4   : > { %10807 = vst [vmem:[#allocation193_spill] sm:$0xff] %v8046_v4  ;;  %5747 = vmatmul.mubr.f32.gmra.mxu0 %v1154_v15  ;;  %5799 = vmatprep.subr.mxu0 %v2506_v22  ;;  %v1160_v58 = vmul.f32 %v7511_v52, %v10811_v63  ;;  %v10814_v15 = vld [vmem:[#allocation109_spill] sm:$0xff]  ;;  %10818 = vst [vmem:[#allocation33_spill] sm:$0xff] %v8066_v14 }
 0x1a5   : > { %5749 = vmatprep.mubr.f32.mxu0 %v1157_v57  ;;  %5800 = vmatpush3.msra.mxu0 %v2506_v22  ;;  %v1163_v5 = vmul.f32 %v10814_v15, %v10813_v13  ;;  %v2503_v57 = vld [vmem:[#allocation2 + $0x410] sm:$0xff]  ;;  %v1393_v22 = vmul.f32 %v8040_v46, %v10815_v27  ;;  %v10820_v15 = vld [vmem:[#allocation112_spill] sm:$0xff] }
 0x1a6   : > { %2607 = vmatmul.mubr.f32.gmra.mxu1 %v1390_v51  ;;  %v8056_v59 = vpop.f32.mrf.mxu1  ;;  %5801 = vmatprep.subr.mxu0 %v2505_v44  ;;  %v10817_v51 = vld [vmem:[#allocation110_spill] sm:$0xff] }
 0x1a7   : > { %10812 = vst [vmem:[#allocation106_spill] sm:$0xff] %v8056_v59  ;;  %2611 = vmatprep.mubr.f32.mxu1 %v1394_v62  ;;  %5802 = vmatpush3.msra.mxu0 %v2505_v44  ;;  %v1397_v52 = vmul.f32 %v10817_v51, %v8052_v41  ;;  %v2502_v59 = vld [vmem:[#allocation2 + $0x408] sm:$0xff] }
 0x1a8   : > { %5750 = vmatmul.mubr.f32.gmra.mxu0 %v1160_v58  ;;  %v8062_v32 = vpop.f32.mrf.mxu1  ;;  %5803 = vmatprep.subr.mxu0 %v2504_v7  ;;  %v10819_v62 = vld [vmem:[#allocation36_spill] sm:$0xff]  ;;  %v10821_v58 = vld [vmem:[#allocation39_spill] sm:$0xff] }
 0x1a9   : > { %10816 = vst [vmem:[#allocation32_spill] sm:$0xff] %v8062_v32  ;;  %5752 = vmatprep.mubr.f32.mxu0 %v1163_v5  ;;  %5804 = vmatpush3.msra.mxu0 %v2504_v7  ;;  %v1166_v44 = vmul.f32 %v10820_v15, %v10819_v62  ;;  %v1169_v27 = vmul.f32 %v10822_v20, %v10821_v58  ;;  %v2501_v5 = vld [vmem:[#allocation2 + $0x400] sm:$0xff]  ;;  %v10828_v20 = vld [vmem:[#allocation40_spill] sm:$0xff]  ;;  %v10829_v15 = vld [vmem:[#allocation121_spill] sm:$0xff] }
 0x1aa   : > { %2612 = vmatmul.mubr.f32.gmra.mxu1 %v1393_v22  ;;  %5805 = vmatprep.subr.mxu0 %v2503_v57  ;;  %v10824_v32 = vld [vmem:[#allocation103_spill] sm:$0xff] }
 0x1ab   : > { %2616 = vmatprep.mubr.f32.mxu1 %v1397_v52  ;;  %v8072_v4 = vpop.f32.mrf.mxu1  ;;  %5806 = vmatpush3.msra.mxu0 %v2503_v57  ;;  %v1396_v7 = vmul.f32 %v8052_v41, %v10824_v32  ;;  %v10825_v22 = vld [vmem:[#allocation115_spill] sm:$0xff]  ;;  %v8080_v52 = vpop.permute.xlu1 %1262 }
 0x1ac   : > { %10823 = vst [vmem:[#allocation100_spill] sm:$0xff] %v8072_v4  ;;  %5753 = vmatmul.mubr.f32.gmra.mxu0 %v1166_v44  ;;  %5807 = vmatprep.subr.mxu0 %v2502_v59  ;;  %v1400_v51 = vmul.f32 %v10825_v22, %v8066_v14  ;;  %10827 = vst [vmem:[#allocation36_spill] sm:$0xff] %v8080_v52  ;;  %v1172_v4 = vmul.f32 %v10829_v15, %v10828_v20  ;;  %v10830_v57 = vld [vmem:[#allocation43_spill] sm:$0xff]  ;;  %v10836_v15 = vld [vmem:[#allocation133_spill] sm:$0xff] }
 0x1ad   : > { %5755 = vmatprep.mubr.f32.mxu0 %v1169_v27  ;;  %v8078_v17 = vpop.f32.mrf.mxu1  ;;  %5808 = vmatpush3.msra.mxu0 %v2502_v59  ;;  %v1175_v44 = vmul.f32 %v7650_v53, %v10830_v57  ;;  %v10831_v32 = vld [vmem:[#allocation107_spill] sm:$0xff]  ;;  %v10833_v59 = vld [vmem:[#allocation114_spill] sm:$0xff] }
 0x1ae   : > { %10826 = vst [vmem:[#allocation110_spill] sm:$0xff] %v8078_v17  ;;  %2617 = vmatmul.mubr.f32.gmra.mxu1 %v1396_v7  ;;  %5809 = vmatprep.subr.mxu0 %v2501_v5  ;;  %v1399_v27 = vmul.f32 %v8066_v14, %v10831_v32  ;;  %v1403_v7 = vmul.f32 %v10833_v59, %v8080_v52  ;;  %v8093_v17 = vpop.permute.xlu0 %1267 }
 0x1af   : > { %2621 = vmatprep.mubr.f32.mxu1 %v1400_v51  ;;  %5810 = vmatpush3.msra.mxu0 %v2501_v5  ;;  %10834 = vst [vmem:[#allocation103_spill] sm:$0xff] %v8093_v17  ;;  %v10835_v51 = vld [vmem:[#allocation44_spill] sm:$0xff]  ;;  %v10839_v5 = vld [vmem:[#allocation137_spill] sm:$0xff] }
 0x1b0   : > { %5756 = vmatmul.mubr.f32.gmra.mxu0 %v1172_v4  ;;  %v8088_v22 = vpop.f32.mrf.mxu1  ;;  %3551 = vmatprep.subr.mxu0 %v10644_v10  ;;  %v1178_v39 = vmul.f32 %v10836_v15, %v10835_v51  ;;  %v10838_v4 = vld [vmem:[#allocation47_spill] sm:$0xff]  ;;  %v10844_v15 = vld [vmem:[#allocation50_spill] sm:$0xff] }
 0x1b1   : > { %10832 = vst [vmem:[#allocation39_spill] sm:$0xff] %v8088_v22  ;;  %5758 = vmatprep.mubr.f32.mxu0 %v1175_v44  ;;  %v1181_v32 = vmul.f32 %v10839_v5, %v10838_v4  ;;  %v10840_v22 = vld [vmem:[#allocation113_spill] sm:$0xff]  ;;  %v10841_v44 = vld [vmem:[#allocation119_spill] sm:$0xff] }
 0x1b2   : > { %2622 = vmatmul.mubr.f32.gmra.mxu1 %v1399_v27  ;;  %v8097_v53 = vpop.f32.mrf.mxu1  ;;  %v1402_v10 = vmul.f32 %v8080_v52, %v10840_v22  ;;  %v1406_v59 = vmul.f32 %v10841_v44, %v8093_v17  ;;  %v8107_v27 = vpop.permute.xlu1 %1272  ;;  %v10848_v22 = vld [vmem:[#allocation118_spill] sm:$0xff]  ;;  %v10849_v44 = vld [vmem:[#allocation124_spill] sm:$0xff] }
 0x1b3   : > { %10837 = vst [vmem:[#allocation115_spill] sm:$0xff] %v8097_v53  ;;  %2626 = vmatprep.mubr.f32.mxu1 %v1403_v7  ;;  %10843 = vst [vmem:[#allocation43_spill] sm:$0xff] %v8107_v27  ;;  %v1184_v53 = vmul.f32 %v7720_v1, %v10844_v15  ;;  %v10845_v7 = vld [vmem:[#allocation51_spill] sm:$0xff]  ;;  %v8119_v45 = vpop.permute.xlu0 %1277 }
 0x1b4   : > { %5759 = vmatmul.mubr.f32.gmra.mxu0 %v1178_v39  ;;  %v1187_v5 = vmul.f32 %v10846_v31, %v10845_v7  ;;  %10850 = vst [vmem:[#allocation114_spill] sm:$0xff] %v8119_v45  ;;  %v10854_v31 = vld [vmem:[#allocation57_spill] sm:$0xff] }
 0x1b5   : > { %5761 = vmatprep.mubr.f32.mxu0 %v1181_v32  ;;  %v8105_v23 = vpop.f32.mrf.mxu1  ;;  %v1405_v32 = vmul.f32 %v8093_v17, %v10848_v22 }
 0x1b6   : > { %10842 = vst [vmem:[#allocation40_spill] sm:$0xff] %v8105_v23  ;;  %2627 = vmatmul.mubr.f32.gmra.mxu1 %v1402_v10  ;;  %v1409_v23 = vmul.f32 %v10849_v44, %v8107_v27  ;;  %v10851_v10 = vld [vmem:[#allocation54_spill] sm:$0xff]  ;;  %v10857_v44 = vld [vmem:[#allocation129_spill] sm:$0xff]  ;;  %v8133_v56 = vpop.permute.xlu1 %1282 }
 0x1b7   : > { %2631 = vmatprep.mubr.f32.mxu1 %v1406_v59  ;;  %v8113_v39 = vpop.f32.mrf.mxu1  ;;  %v1190_v1 = vmul.f32 %v10852_v0, %v10851_v10  ;;  %v1412_v16 = vmul.f32 %v10857_v44, %v8119_v45  ;;  %10858 = vst [vmem:[#allocation113_spill] sm:$0xff] %v8133_v56  ;;  %v10859_v0 = vld [vmem:[#allocation58_spill] sm:$0xff] }
 0x1b8   : > { %10847 = vst [vmem:[#allocation107_spill] sm:$0xff] %v8113_v39  ;;  %5762 = vmatmul.mubr.f32.gmra.mxu0 %v1184_v53  ;;  %v1193_v39 = vmul.f32 %v7796_v40, %v10854_v31  ;;  %v10855_v53 = vld [vmem:[#allocation122_spill] sm:$0xff]  ;;  %v10864_v31 = vld [vmem:[#allocation123_spill] sm:$0xff] }
 0x1b9   : > { %5764 = vmatprep.mubr.f32.mxu0 %v1187_v5  ;;  %v1408_v22 = vmul.f32 %v8107_v27, %v10855_v53 }
 0x1ba   : > { %2632 = vmatmul.mubr.f32.gmra.mxu1 %v1405_v32  ;;  %v8123_v59 = vpop.f32.mrf.mxu1 }
 0x1bb   : > { %10853 = vst [vmem:[#allocation44_spill] sm:$0xff] %v8123_v59  ;;  %2636 = vmatprep.mubr.f32.mxu1 %v1409_v23  ;;  %v10860_v59 = vld [vmem:[#allocation159_spill] sm:$0xff] }
 0x1bc   : > { %5765 = vmatmul.mubr.f32.gmra.mxu0 %v1190_v1  ;;  %v8129_v5 = vpop.f32.mrf.mxu1  ;;  %v1196_v23 = vmul.f32 %v10860_v59, %v10859_v0  ;;  %v10861_v1 = vld [vmem:[#allocation61_spill] sm:$0xff]  ;;  %v8148_v59 = vpop.permute.xlu0 %1287 }
 0x1bd   : > { %10856 = vst [vmem:[#allocation47_spill] sm:$0xff] %v8129_v5  ;;  %5767 = vmatprep.mubr.f32.mxu0 %v1193_v39  ;;  %v1634_v32 = vpop.f32.mrf.mxu0  ;;  %v1199_v40 = vmul.f32 %v7848_v34, %v10861_v1  ;;  %v10863_v39 = vld [vmem:[#allocation125_spill] sm:$0xff]  ;;  %10866 = vst [vmem:[#allocation118_spill] sm:$0xff] %v8148_v59  ;;  %v10869_v34 = vld [vmem:[#allocation130_spill] sm:$0xff] }
 0x1be   : > { %2637 = vmatmul.mubr.f32.gmra.mxu1 %v1408_v22  ;;  %v1860_v10 = vadd.f32 %v7919_v43, %v1634_v32  ;;  %v1411_v44 = vmul.f32 %v8119_v45, %v10863_v39  ;;  %v1415_v22 = vmul.f32 %v10864_v31, %v8133_v56  ;;  %v10867_v43 = vld [vmem:[#allocation62_spill] sm:$0xff]  ;;  %v10868_v32 = vld [vmem:[#allocation65_spill] sm:$0xff] }
 0x1bf   : > { %2641 = vmatprep.mubr.f32.mxu1 %v1412_v16  ;;  %v8140_v53 = vpop.f32.mrf.mxu1  ;;  %v1636_v5 = vpop.f32.mrf.mxu0  ;;  %v1202_v16 = vmul.f32 %v7871_v21, %v10867_v43  ;;  %v10871_v31 = vld [vmem:[#allocation126_spill] sm:$0xff]  ;;  %v10873_v21 = vld [vmem:[#allocation68_spill] sm:$0xff] }
 0x1c0   : > { %10862 = vst [vmem:[#allocation119_spill] sm:$0xff] %v8140_v53  ;;  %5768 = vmatmul.mubr.f32.gmra.mxu0 %v1196_v23  ;;  %v1205_v5 = vmul.f32 %v7892_v19, %v10868_v32  ;;  %v1418_v53 = vmul.f32 %v10871_v31, %v8148_v59 }
 0x1c1   : > { %5770 = vmatprep.mubr.f32.mxu0 %v1199_v40  ;;  %v8146_v7 = vpop.f32.mrf.mxu1  ;;  %v1414_v40 = vmul.f32 %v8133_v56, %v10869_v34  ;;  %v10876_v34 = vld [vmem:[#allocation134_spill] sm:$0xff] }
 0x1c2   : > { %10865 = vst [vmem:[#allocation50_spill] sm:$0xff] %v8146_v7  ;;  %2642 = vmatmul.mubr.f32.gmra.mxu1 %v1411_v44  ;;  %v8160_v44 = vpop.permute.xlu1 %1292 }
 0x1c3   : > { %2646 = vmatprep.mubr.f32.mxu1 %v1415_v22  ;;  %v1639_v23 = vpop.f32.mrf.mxu0  ;;  %10872 = vst [vmem:[#allocation122_spill] sm:$0xff] %v8160_v44  ;;  %v1208_v22 = vmul.f32 %v7912_v8, %v10873_v21  ;;  %v10880_v8 = vld [vmem:[#allocation74_spill] sm:$0xff] }
 0x1c4   : > { %5771 = vmatmul.mubr.f32.gmra.mxu0 %v1202_v16  ;;  %v8156_v39 = vpop.f32.mrf.mxu1  ;;  %v10875_v16 = vld [vmem:[#allocation70_spill] sm:$0xff] }
 0x1c5   : > { %10870 = vst [vmem:[#allocation124_spill] sm:$0xff] %v8156_v39  ;;  %5773 = vmatprep.mubr.f32.mxu0 %v1205_v5  ;;  %v1641_v7 = vpop.f32.mrf.mxu0  ;;  %v1211_v19 = vmul.f32 %v7927_v24, %v10875_v16  ;;  %v1417_v5 = vmul.f32 %v8148_v59, %v10876_v34 }
 0x1c6   : > { %2647 = vmatmul.mubr.f32.gmra.mxu1 %v1414_v40  ;;  %v8164_v43 = vpop.f32.mrf.mxu1  ;;  %v10877_v7 = vld [vmem:[#allocation131_spill] sm:$0xff]  ;;  %v8174_v40 = vpop.permute.xlu0 %1297 }
 0x1c7   : > { %10874 = vst [vmem:[#allocation129_spill] sm:$0xff] %v8164_v43  ;;  %2651 = vmatprep.mubr.f32.mxu1 %v1418_v53  ;;  %v1421_v31 = vmul.f32 %v10877_v7, %v8160_v44  ;;  %10879 = vst [vmem:[#allocation61_spill] sm:$0xff] %v8174_v40  ;;  %v1214_v53 = vmul.f32 %v7948_v47, %v10880_v8  ;;  %v10882_v7 = vld [vmem:[#allocation135_spill] sm:$0xff]  ;;  %v8188_v47 = vpop.permute.xlu1 %1302 }
 0x1c8   : > { %5774 = vmatmul.mubr.f32.gmra.mxu0 %v1208_v22  ;;  %v1644_v39 = vpop.f32.mrf.mxu0  ;;  %v1377_v22 = vmul.f32 %v7961_v37, %v6809_v26  ;;  %10883 = vst [vmem:[#allocation125_spill] sm:$0xff] %v8188_v47  ;;  %v1865_v26 = vadd.f32 %v7916_v50, %v1639_v23  ;;  %v1386_v50 = vmul.f32 %v8000_v55, %v6854_v48 }
 0x1c9   : > { %5776 = vmatprep.mubr.f32.mxu0 %v1211_v19  ;;  %v8172_v32 = vpop.f32.mrf.mxu1  ;;  %v10881_v19 = vld [vmem:[#allocation138_spill] sm:$0xff] }
 0x1ca   : > { %10878 = vst [vmem:[#allocation58_spill] sm:$0xff] %v8172_v32  ;;  %2652 = vmatmul.mubr.f32.gmra.mxu1 %v1417_v5  ;;  %v1646_v43 = vpop.f32.mrf.mxu0  ;;  %v1420_v34 = vmul.f32 %v8160_v44, %v10881_v19  ;;  %v1424_v32 = vmul.f32 %v10882_v7, %v8174_v40  ;;  %v1380_v5 = vmul.f32 %v7976_v35, %v6822_v33  ;;  %v10885_v7 = vld [vmem:[#allocation139_spill] sm:$0xff]  ;;  %v8199_v37 = vpop.permute.xlu0 %1307 }
 0x1cb   : > { %2656 = vmatprep.mubr.f32.mxu1 %v1421_v31  ;;  %v8180_v24 = vpop.f32.mrf.mxu1  ;;  %v1383_v31 = vmul.f32 %v7986_v29, %v6845_v42  ;;  %v1427_v33 = vmul.f32 %v10885_v7, %v8188_v47  ;;  %10886 = vst [vmem:[#allocation123_spill] sm:$0xff] %v8199_v37  ;;  %v1870_v42 = vadd.f32 %v7946_v12, %v1644_v39  ;;  %v8212_v48 = vpop.permute.xlu1 %1312  ;;  %v10890_v7 = vld [vmem:[#allocation148_spill] sm:$0xff] }
 0x1cc   : > { %5777 = vmatmul.mubr.f32.gmra.mxu0 %v1214_v53  ;;  %10889 = vst [vmem:[#allocation130_spill] sm:$0xff] %v8212_v48  ;;  %v1395_v39 = vmul.f32 %v8040_v46, %v6911_v30 }
 0x1cd   : > { %5811 = vmatprep.mubr.f32.mxu0 %v1377_v22  ;;  %v2084_v16 = vpop.f32.mrf.mxu1  ;;  %v10884_v22 = vld [vmem:[#allocation142_spill] sm:$0xff] }
 0x1ce   : > { %2657 = vmatmul.mubr.f32.gmra.mxu1 %v1420_v34  ;;  %v8190_v43 = vadd.f32 %v2084_v16, %v1860_v10  ;;  %v1423_v19 = vmul.f32 %v8174_v40, %v10884_v22  ;;  %v10887_v16 = vld [vmem:[#allocation144_spill] sm:$0xff] }
 0x1cf   : > { %2661 = vmatprep.mubr.f32.mxu1 %v1424_v32  ;;  %v2086_v53 = vpop.f32.mrf.mxu1  ;;  %v1389_v32 = vmul.f32 %v8014_v54, %v6879_v3  ;;  %v1426_v34 = vmul.f32 %v8188_v47, %v10887_v16 }
 0x1d0   : > { %5812 = vmatmul.mubr.f32.vlgmr.msra.gmra.mxu0 %v1380_v5  ;;  %v10888_v5 = vld [vmem:[#allocation143_spill] sm:$0xff] }
 0x1d1   : > { %5814 = vmatprep.mubr.f32.mxu0 %v1383_v31  ;;  %v2089_v35 = vpop.f32.mrf.mxu1  ;;  %v1430_v31 = vmul.f32 %v10888_v5, %v8199_v37 }
 0x1d2   : > { %2662 = vmatmul.mubr.f32.gmra.mxu1 %v1423_v19  ;;  %v8203_v10 = vadd.f32 %v2089_v35, %v1865_v26  ;;  %v1392_v35 = vmul.f32 %v8026_v28, %v6889_v11 }
 0x1d3   : > { %2666 = vmatprep.mubr.f32.mxu1 %v1427_v33  ;;  %v2091_v23 = vpop.f32.mrf.mxu1  ;;  %v1429_v33 = vmul.f32 %v8199_v37, %v10890_v7  ;;  %v10896_v7 = vld [vmem:[#allocation156_spill] sm:$0xff] }
 0x1d4   : > { %5815 = vmatmul.mubr.f32.gmra.mxu0 %v1386_v50  ;;  %v10891_v50 = vld [vmem:[#allocation145_spill] sm:$0xff] }
 0x1d5   : > { %5817 = vmatprep.mubr.f32.mxu0 %v1389_v32  ;;  %v2094_v53 = vpop.f32.mrf.mxu1  ;;  %v1649_v22 = vpop.f32.mrf.mxu0  ;;  %v1433_v32 = vmul.f32 %v10891_v50, %v8212_v48 }
 0x1d6   : > { %2667 = vmatmul.mubr.f32.gmra.mxu1 %v1426_v34  ;;  %v8216_v12 = vadd.f32 %v2094_v53, %v1870_v42  ;;  %v1875_v3 = vadd.f32 %v7935_v6, %v1649_v22  ;;  %v8225_v42 = vpop.permute.xlu0 %1317  ;;  %v1398_v6 = vmul.f32 %v8052_v41, %v6921_v38  ;;  %v1401_v34 = vmul.f32 %v8066_v14, %v6941_v61  ;;  %v10893_v53 = vld [vmem:[#allocation152_spill] sm:$0xff]  ;;  %v8238_v38 = vpop.permute.xlu1 %1322 }
 0x1d7   : > { %2671 = vmatprep.mubr.f32.mxu1 %v1430_v31  ;;  %v2096_v26 = vpop.f32.mrf.mxu1  ;;  %v1651_v19 = vpop.f32.mrf.mxu0  ;;  %10892 = vst [vmem:[#allocation126_spill] sm:$0xff] %v8225_v42  ;;  %v1432_v22 = vmul.f32 %v8212_v48, %v10893_v53  ;;  %10895 = vst [vmem:[#allocation68_spill] sm:$0xff] %v8238_v38  ;;  %v1407_v61 = vmul.f32 %v8093_v17, %v10813_v13  ;;  %v10899_v53 = vld [vmem:[#allocation160_spill] sm:$0xff] }
 0x1d8   : > { %5818 = vmatmul.mubr.f32.gmra.mxu0 %v1392_v35  ;;  %v10894_v35 = vld [vmem:[#allocation149_spill] sm:$0xff] }
 0x1d9   : > { %5820 = vmatprep.mubr.f32.mxu0 %v1395_v39  ;;  %v2099_v23 = vpop.f32.mrf.mxu1  ;;  %v1654_v11 = vpop.f32.mrf.mxu0  ;;  %v1436_v39 = vmul.f32 %v10894_v35, %v8225_v42 }
 0x1da   : > { %2672 = vmatmul.mubr.f32.gmra.mxu1 %v1429_v33  ;;  %v8229_v16 = vadd.f32 %v2099_v23, %v1875_v3  ;;  %v1880_v30 = vadd.f32 %v7963_v2, %v1654_v11  ;;  %v1404_v2 = vmul.f32 %v8080_v52, %v10811_v63  ;;  %v1435_v33 = vmul.f32 %v8225_v42, %v10896_v7  ;;  %v8251_v63 = vpop.permute.xlu0 %1327  ;;  %v8261_v35 = vpop.permute.xlu1 %1332 }
 0x1db   : > { %2676 = vmatprep.mubr.f32.mxu1 %v1433_v32  ;;  %v2101_v5 = vpop.f32.mrf.mxu1  ;;  %v1656_v31 = vpop.f32.mrf.mxu0  ;;  %v10897_v32 = vld [vmem:[#allocation153_spill] sm:$0xff]  ;;  %10898 = vst [vmem:[#allocation134_spill] sm:$0xff] %v8251_v63  ;;  %10900 = vst [vmem:[#allocation131_spill] sm:$0xff] %v8261_v35 }
 0x1dc   : > { %5821 = vmatmul.mubr.f32.gmra.mxu0 %v1398_v6  ;;  %v1439_v23 = vmul.f32 %v10897_v32, %v8238_v38 }
 0x1dd   : > { %5823 = vmatprep.mubr.f32.mxu0 %v1401_v34  ;;  %v2104_v26 = vpop.f32.mrf.mxu1  ;;  %v1413_v34 = vmul.f32 %v8119_v45, %v10821_v58  ;;  %v1416_v58 = vmul.f32 %v8133_v56, %v10828_v20 }
 0x1de   : > { %2677 = vmatmul.mubr.f32.gmra.mxu1 %v1432_v22  ;;  %v8242_v3 = vadd.f32 %v2104_v26, %v1880_v30  ;;  %v1410_v30 = vmul.f32 %v8107_v27, %v10819_v62  ;;  %v1438_v22 = vmul.f32 %v8238_v38, %v10899_v53 }
 0x1df   : > { %2681 = vmatprep.mubr.f32.mxu1 %v1436_v39  ;;  %v2106_v19 = vpop.f32.mrf.mxu1  ;;  %v10901_v39 = vld [vmem:[#allocation157_spill] sm:$0xff] }
 0x1e0   : > { %5824 = vmatmul.mubr.f32.gmra.mxu0 %v1404_v2  ;;  %v1659_v50 = vpop.f32.mrf.mxu0  ;;  %v1442_v26 = vmul.f32 %v10901_v39, %v8251_v63  ;;  %v1419_v19 = vmul.f32 %v8148_v59, %v10830_v57  ;;  %v1422_v57 = vmul.f32 %v8160_v44, %v10835_v51 }
 0x1e1   : > { %5826 = vmatprep.mubr.f32.mxu0 %v1407_v61  ;;  %v1885_v11 = vadd.f32 %v7953_v25, %v1659_v50  ;;  %v2109_v6 = vpop.f32.mrf.mxu1 }
 0x1e2   : > { %2682 = vmatmul.mubr.f32.gmra.mxu1 %v1435_v33  ;;  %v1661_v13 = vpop.f32.mrf.mxu0  ;;  %v1441_v33 = vmul.f32 %v8251_v63, %v7839_v36 }
 0x1e3   : > { %2686 = vmatprep.mubr.f32.mxu1 %v1439_v23  ;;  %v8257_v5 = vadd.f32 %v2109_v6, %v1885_v11  ;;  %v2111_v31 = vpop.f32.mrf.mxu1  ;;  %v8276_v23 = vpop.permute.xlu0 %1337  ;;  %v1425_v6 = vmul.f32 %v8174_v40, %v10838_v4  ;;  %v10903_v13 = vld [vmem:[#allocation164_spill] sm:$0xff]  ;;  %v1428_v4 = vmul.f32 %v8188_v47, %v10844_v15 }
 0x1e4   : > { %5827 = vmatmul.mubr.f32.gmra.mxu0 %v1410_v30  ;;  %v1664_v25 = vpop.f32.mrf.mxu0  ;;  %10902 = vst [vmem:[#allocation74_spill] sm:$0xff] %v8276_v23  ;;  %v10904_v31 = vld [vmem:[#allocation161_spill] sm:$0xff] }
 0x1e5   : > { %5829 = vmatprep.mubr.f32.mxu0 %v1413_v34  ;;  %v1890_v62 = vadd.f32 %v7980_v9, %v1664_v25  ;;  %v1445_v9 = vmul.f32 %v7826_v18, %v8261_v35  ;;  %v1444_v18 = vmul.f32 %v8261_v35, %v10903_v13  ;;  %v10906_v25 = vld [vmem:[#allocation51_spill] sm:$0xff] }
 0x1e6   : > { %2687 = vmatmul.mubr.f32.gmra.mxu1 %v1438_v22  ;;  %v1666_v2 = vpop.f32.mrf.mxu0  ;;  %v2114_v61 = vpop.f32.mrf.mxu1  ;;  %v1431_v39 = vmul.f32 %v8199_v37, %v10906_v25 }
 0x1e7   : > { %2691 = vmatprep.mubr.f32.mxu1 %v1442_v26  ;;  %v8270_v7 = vadd.f32 %v2114_v61, %v1890_v62  ;;  %v8289_v22 = vpop.permute.xlu1 %1342  ;;  %v10907_v2 = vld [vmem:[#allocation168_spill] sm:$0xff] }
 0x1e8   : > { %5830 = vmatmul.mubr.f32.gmra.mxu0 %v1416_v58  ;;  %v2116_v50 = vpop.f32.mrf.mxu1  ;;  %10905 = vst [vmem:[#allocation138_spill] sm:$0xff] %v8289_v22  ;;  %v1447_v61 = vmul.f32 %v8276_v23, %v10907_v2  ;;  %v1443_v2 = vmul.f32 %v8251_v63, %v10861_v1 }
 0x1e9   : > { %5832 = vmatprep.mubr.f32.mxu0 %v1419_v19  ;;  %v1669_v32 = vpop.f32.mrf.mxu0  ;;  %v10908_v19 = vld [vmem:[#allocation165_spill] sm:$0xff]  ;;  %v8302_v50 = vpop.permute.xlu0 %1347 }
 0x1ea   : > { %2692 = vmatmul.mubr.f32.gmra.mxu1 %v1441_v33  ;;  %v1895_v20 = vadd.f32 %v7972_v49, %v1669_v32  ;;  %v2119_v11 = vpop.f32.mrf.mxu1  ;;  %v1448_v49 = vmul.f32 %v10904_v31, %v8276_v23  ;;  %v1451_v33 = vmul.f32 %v10908_v19, %v8289_v22  ;;  %10909 = vst [vmem:[#allocation135_spill] sm:$0xff] %v8302_v50 }
 0x1eb   : > { %2696 = vmatprep.mubr.f32.mxu1 %v1445_v9  ;;  %v1671_v36 = vpop.f32.mrf.mxu0  ;;  %v10910_v9 = vld [vmem:[#allocation54_spill] sm:$0xff] }
 0x1ec   : > { %5833 = vmatmul.mubr.f32.gmra.mxu0 %v1422_v57  ;;  %v8283_v30 = vadd.f32 %v2119_v11, %v1895_v20  ;;  %v2121_v34 = vpop.f32.mrf.mxu1  ;;  %v1434_v32 = vmul.f32 %v8212_v48, %v10910_v9  ;;  %v10911_v20 = vld [vmem:[#allocation183_spill] sm:$0xff]  ;;  %v10912_v11 = vld [vmem:[#allocation57_spill] sm:$0xff]  ;;  %v10918_v9 = vld [vmem:[#allocation174_spill] sm:$0xff] }
 0x1ed   : > { %5835 = vmatprep.mubr.f32.mxu0 %v1425_v6  ;;  %v1674_v53 = vpop.f32.mrf.mxu0  ;;  %v1437_v6 = vmul.f32 %v8225_v42, %v10912_v11 }
 0x1ee   : > { %2697 = vmatmul.mubr.f32.gmra.mxu1 %v1444_v18  ;;  %v1900_v51 = vadd.f32 %v7996_v60, %v1674_v53  ;;  %v10913_v18 = vld [vmem:[#allocation171_spill] sm:$0xff] }
 0x1ef   : > { %2701 = vmatprep.mubr.f32.mxu1 %v1448_v49  ;;  %v1676_v26 = vpop.f32.mrf.mxu0  ;;  %v2124_v62 = vpop.f32.mrf.mxu1  ;;  %v1450_v34 = vmul.f32 %v8289_v22, %v10913_v18  ;;  %v10914_v49 = vld [vmem:[#allocation169_spill] sm:$0xff] }
 0x1f0   : > { %5836 = vmatmul.mubr.f32.gmra.mxu0 %v1428_v4  ;;  %v8296_v58 = vadd.f32 %v2124_v62, %v1900_v51  ;;  %v1454_v53 = vmul.f32 %v10914_v49, %v8302_v50  ;;  %v8315_v4 = vpop.permute.xlu1 %1352  ;;  %v10916_v26 = vld [vmem:[#allocation186_spill] sm:$0xff]  ;;  %v10923_v49 = vld [vmem:[#allocation176_spill] sm:$0xff] }
 0x1f1   : > { %5838 = vmatprep.mubr.f32.mxu0 %v1431_v39  ;;  %v2126_v60 = vpop.f32.mrf.mxu1  ;;  %10915 = vst [vmem:[#allocation142_spill] sm:$0xff] %v8315_v4  ;;  %v1440_v39 = vmul.f32 %v8238_v38, %v10859_v0 }
 0x1f2   : > { %2702 = vmatmul.mubr.f32.gmra.mxu1 %v1447_v61  ;;  %v1679_v15 = vpop.f32.mrf.mxu0 }
 0x1f3   : > { %2706 = vmatprep.mubr.f32.mxu1 %v1451_v33  ;;  %v1905_v57 = vadd.f32 %v10911_v20, %v1679_v15  ;;  %v2129_v36 = vpop.f32.mrf.mxu1  ;;  %v10917_v33 = vld [vmem:[#allocation172_spill] sm:$0xff]  ;;  %v8328_v20 = vpop.permute.xlu0 %1357 }
 0x1f4   : > { %5839 = vmatmul.mubr.f32.gmra.mxu0 %v1434_v32  ;;  %v1681_v13 = vpop.f32.mrf.mxu0  ;;  %v1453_v60 = vmul.f32 %v8302_v50, %v10917_v33  ;;  %v1457_v32 = vmul.f32 %v10918_v9, %v8315_v4  ;;  %10919 = vst [vmem:[#allocation139_spill] sm:$0xff] %v8328_v20  ;;  %v10926_v33 = vld [vmem:[#allocation70_spill] sm:$0xff] }
 0x1f5   : > { %5841 = vmatprep.mubr.f32.mxu0 %v1437_v6  ;;  %v8311_v31 = vadd.f32 %v2129_v36, %v1905_v57  ;;  %v2131_v51 = vpop.f32.mrf.mxu1  ;;  %v10920_v57 = vld [vmem:[#allocation62_spill] sm:$0xff]  ;;  %v10921_v6 = vld [vmem:[#allocation65_spill] sm:$0xff] }
 0x1f6   : > { %2707 = vmatmul.mubr.f32.gmra.mxu1 %v1450_v34  ;;  %v1684_v25 = vpop.f32.mrf.mxu0  ;;  %v1446_v11 = vmul.f32 %v8261_v35, %v10920_v57  ;;  %v1449_v36 = vmul.f32 %v8276_v23, %v10921_v6  ;;  %v10922_v13 = vld [vmem:[#allocation185_spill] sm:$0xff]  ;;  %v10927_v9 = vld [vmem:[#allocation190_spill] sm:$0xff]  ;;  %v10929_v6 = vld [vmem:[#allocation179_spill] sm:$0xff] }
 0x1f7   : > { %2711 = vmatprep.mubr.f32.mxu1 %v1454_v53  ;;  %v1910_v62 = vadd.f32 %v10916_v26, %v1684_v25  ;;  %v1456_v53 = vmul.f32 %v8315_v4, %v10923_v49  ;;  %v10924_v25 = vld [vmem:[#allocation177_spill] sm:$0xff]  ;;  %v8339_v26 = vpop.permute.xlu1 %1362 }
 0x1f8   : > { %5842 = vmatmul.mubr.f32.gmra.mxu0 %v1440_v39  ;;  %v1686_v61 = vpop.f32.mrf.mxu0  ;;  %v2134_v19 = vpop.f32.mrf.mxu1  ;;  %v1460_v39 = vmul.f32 %v10924_v25, %v8328_v20  ;;  %10925 = vst [vmem:[#allocation144_spill] sm:$0xff] %v8339_v26  ;;  %v10931_v49 = vld [vmem:[#allocation77_spill] sm:$0xff] }
 0x1f9   : > { %5844 = vmatprep.mubr.f32.mxu0 %v1443_v2  ;;  %v8324_v15 = vadd.f32 %v2134_v19, %v1910_v62  ;;  %v1452_v61 = vmul.f32 %v8289_v22, %v10873_v21 }
 0x1fa   : > { %2712 = vmatmul.mubr.f32.gmra.mxu1 %v1453_v60  ;;  %v2136_v0 = vpop.f32.mrf.mxu1  ;;  %v1455_v60 = vmul.f32 %v8302_v50, %v10926_v33 }
 0x1fb   : > { %2716 = vmatprep.mubr.f32.mxu1 %v1457_v32  ;;  %v1689_v1 = vpop.f32.mrf.mxu0  ;;  %v10928_v0 = vld [vmem:[#allocation80_spill] sm:$0xff] }
 0x1fc   : > { %v1915_v18 = vadd.f32 %v10922_v13, %v1689_v1  ;;  %5845 = vmatmul.mubr.f32.gmra.mxu0 %v1446_v11  ;;  %v2139_v34 = vpop.f32.mrf.mxu1  ;;  %v1459_v57 = vmul.f32 %v8328_v20, %v10928_v0  ;;  %v8352_v13 = vpop.permute.xlu0 %1367 }
 0x1fd   : > { %5847 = vmatprep.mubr.f32.mxu0 %v1449_v36  ;;  %v1691_v51 = vpop.f32.mrf.mxu0  ;;  %v1463_v36 = vmul.f32 %v10929_v6, %v8339_v26  ;;  %10930 = vst [vmem:[#allocation143_spill] sm:$0xff] %v8352_v13 }
 0x1fe   : > { %v8341_v62 = vadd.f32 %v2139_v34, %v1915_v18  ;;  %2717 = vmatmul.mubr.f32.gmra.mxu1 %v1456_v53  ;;  %v2141_v2 = vpop.f32.mrf.mxu1  ;;  %v1458_v18 = vmul.f32 %v8315_v4, %v10880_v8  ;;  %v1461_v53 = vmul.f32 %v8328_v20, %v10931_v49  ;;  %v3550_v51 = vld [vmem:[#allocation5 + $0x2f8] sm:$0xff]  ;;  %v3549_v8 = vld [vmem:[#allocation5 + $0x2f0] sm:$0xff] }
 0x1ff   : > { %2721 = vmatprep.mubr.f32.mxu1 %v1460_v39  ;;  %v1694_v19 = vpop.f32.mrf.mxu0  ;;  %v10932_v39 = vld [vmem:[#allocation84_spill] sm:$0xff]  ;;  %5859 = vmatprep.subr.mxu1 %v3550_v51 }
 0x200   : > { %v1920_v32 = vadd.f32 %v10927_v9, %v1694_v19  ;;  %5848 = vmatmul.mubr.f32.gmra.mxu0 %v1452_v61  ;;  %v1462_v2 = vmul.f32 %v8339_v26, %v10932_v39  ;;  %v10933_v61 = vld [vmem:[#allocation188_spill] sm:$0xff]  ;;  %5860 = vmatpush3.msra.mxu1 %v3550_v51 }
 0x201   : > { %5850 = vmatprep.mubr.f32.mxu0 %v1455_v60  ;;  %v1696_v11 = vpop.f32.mrf.mxu0  ;;  %v2144_v1 = vpop.f32.mrf.mxu1  ;;  %v6198_v60 = vld [vmem:[%s6535_s9] sm:$0xff]  ;;  %5861 = vmatprep.subr.mxu1 %v3549_v8 }
 0x202   : > { %v8354_v21 = vadd.f32 %v2144_v1, %v1920_v32  ;;  %2722 = vmatmul.mubr.f32.gmra.mxu1 %v1459_v57  ;;  %v1466_v9 = vmul.f32 %v6198_v60, %v8352_v13  ;;  %v8365_v32 = vpop.permute.xlu1 %1372  ;;  %v10935_v57 = vld [vmem:[#allocation81_spill] sm:$0xff] }
 0x203   : > { %2726 = vmatprep.mubr.f32.mxu1 %v1463_v36  ;;  %v2146_v34 = vpop.f32.mrf.mxu1  ;;  %10934 = vst [vmem:[#allocation148_spill] sm:$0xff] %v8365_v32  ;;  %v1464_v11 = vmul.f32 %v8339_v26, %v10935_v57  ;;  %v10936_v36 = vld [vmem:[#allocation18_spill] sm:$0xff]  ;;  %5862 = vmatpush3.msra.mxu1 %v3549_v8 }
 0x204   : > { %v1699_v25 = vpop.f32.mrf.mxu0  ;;  %5851 = vmatmul.mubr.f32.gmra.mxu0 %v1458_v18  ;;  %v1467_v18 = vmul.f32 %v8352_v13, %v10936_v36  ;;  %v3548_v34 = vld [vmem:[#allocation5 + $0x2e8] sm:$0xff]  ;;  %v3546_v57 = vld [vmem:[#allocation5 + $0x2d8] sm:$0xff]  ;;  %v10940_v36 = vld [vmem:[#allocation73_spill] sm:$0xff] }
 0x205   : > { %v1925_v19 = vadd.f32 %v10933_v61, %v1699_v25  ;;  %5853 = vmatprep.mubr.f32.mxu0 %v1461_v53  ;;  %v2149_v33 = vpop.f32.mrf.mxu1  ;;  %v10937_v53 = vld [vmem:[#allocation69_spill] sm:$0xff]  ;;  %5863 = vmatprep.subr.mxu1 %v3548_v34 }
 0x206   : > { %v1701_v0 = vpop.f32.mrf.mxu0  ;;  %2727 = vmatmul.mubr.f32.gmra.mxu1 %v1462_v2  ;;  %v1465_v51 = vmul.f32 %v8352_v13, %v10937_v53  ;;  %v10938_v25 = vld [vmem:[#allocation193_spill] sm:$0xff]  ;;  %v6199_v2 = vld [vmem:[%s6535_s9 + $0x8] sm:$0xff] }
 0x207   : > { %v8369_v1 = vadd.f32 %v2149_v33, %v1925_v19  ;;  %2731 = vmatprep.mubr.f32.mxu1 %v1466_v9  ;;  %v2151_v6 = vpop.f32.mrf.mxu1  ;;  %v1469_v61 = vmul.f32 %v6199_v2, %v8365_v32  ;;  %5864 = vmatpush3.msra.mxu1 %v3548_v34  ;;  %v3547_v19 = vld [vmem:[#allocation5 + $0x2e0] sm:$0xff]  ;;  %v3545_v53 = vld [vmem:[#allocation5 + $0x2d0] sm:$0xff]  ;;  %v3544_v2 = vld [vmem:[#allocation5 + $0x2c8] sm:$0xff] }
 0x208   : > { %v1704_v49 = vpop.f32.mrf.mxu0  ;;  %5854 = vmatmul.mubr.f32.gmra.mxu0 %v1464_v11  ;;  %v10939_v9 = vld [vmem:[#allocation19_spill] sm:$0xff]  ;;  %5865 = vmatprep.subr.mxu1 %v3547_v19 }
 0x209   : > { %v1930_v39 = vadd.f32 %v10938_v25, %v1704_v49  ;;  %5856 = vmatprep.mubr.f32.mxu0 %v1467_v18  ;;  %v1470_v8 = vmul.f32 %v8365_v32, %v10939_v9  ;;  %5866 = vmatpush3.msra.mxu1 %v3547_v19  ;;  %v1468_v18 = vmul.f32 %v8365_v32, %v10940_v36  ;;  %v10941_v34 = vld [vmem:[#allocation191_spill] sm:$0xff] }
 0x20a   : > { %v1706_v33 = vpop.f32.mrf.mxu0  ;;  %v2154_v60 = vpop.f32.mrf.mxu1  ;;  %2732 = vmatmul.mubr.f32.gmra.mxu1 %v1465_v51  ;;  %5867 = vmatprep.subr.mxu1 %v3546_v57  ;;  %v3543_v9 = vld [vmem:[#allocation5 + $0x2c0] sm:$0xff] }
 0x20b   : > { %v8380_v0 = vadd.f32 %v2154_v60, %v1930_v39  ;;  %2736 = vmatprep.mubr.f32.mxu1 %v1469_v61  ;;  %5868 = vmatpush3.msra.mxu1 %v3546_v57  ;;  %v10942_v33 = vld [vmem:[#allocation32_spill] sm:$0xff] }
 0x20c   : > { %v1709_v11 = vpop.f32.mrf.mxu0  ;;  %v2156_v6 = vpop.f32.mrf.mxu1  ;;  %5857 = vmatmul.mubr.f32.gmra.mxu0 %v1470_v8  ;;  %5869 = vmatprep.subr.mxu1 %v3545_v53 }
 0x20d   : > { %v1935_v49 = vadd.f32 %v10941_v34, %v1709_v11  ;;  %5870 = vmatpush3.msra.mxu1 %v3545_v53  ;;  %v3542_v11 = vld [vmem:[#allocation5 + $0x2b8] sm:$0xff]  ;;  %v3541_v53 = vld [vmem:[#allocation5 + $0x2b0] sm:$0xff] }
 0x20e   : > { %v1711_v51 = vpop.f32.mrf.mxu0  ;;  %v2159_v25 = vpop.f32.mrf.mxu1  ;;  %2737 = vmatmul.mubr.f32.gmra.mxu1 %v1468_v18  ;;  %5871 = vmatprep.subr.mxu1 %v3544_v2  ;;  %v10943_v34 = vld [vmem:[#allocation106_spill] sm:$0xff] }
 0x20f   : > { %v8385_v39 = vadd.f32 %v2159_v25, %v1935_v49  ;;  %5872 = vmatpush3.msra.mxu1 %v3544_v2  ;;  %v3540_v2 = vld [vmem:[#allocation5 + $0x2a8] sm:$0xff] }
 0x210   : > { %v1714_v61 = vpop.f32.mrf.mxu0  ;;  %v2161_v19 = vpop.f32.mrf.mxu1  ;;  %5873 = vmatprep.subr.mxu1 %v3543_v9 }
 0x211   : > { %v1940_v60 = vadd.f32 %v10942_v33, %v1714_v61  ;;  %5874 = vmatpush3.msra.mxu1 %v3543_v9 }
 0x212   : > { %v1716_v8 = vpop.f32.mrf.mxu0  ;;  %v2164_v6 = vpop.f32.mrf.mxu1  ;;  %5875 = vmatprep.subr.mxu1 %v3542_v11 }
 0x213   : > { %v8388_v57 = vadd.f32 %v2164_v6, %v1940_v60  ;;  %5876 = vmatpush3.msra.mxu1 %v3542_v11  ;;  %v10944_v60 = vld [vmem:[#allocation110_spill] sm:$0xff]  ;;  %v3539_v8 = vld [vmem:[#allocation5 + $0x2a0] sm:$0xff] }
 0x214   : > { %v1719_v36 = vpop.f32.mrf.mxu0  ;;  %v2166_v18 = vpop.f32.mrf.mxu1  ;;  %5877 = vmatprep.subr.mxu1 %v3541_v53  ;;  %v3538_v11 = vld [vmem:[#allocation5 + $0x298] sm:$0xff] }
 0x215   : > { %v1945_v49 = vadd.f32 %v10943_v34, %v1719_v36  ;;  %5878 = vmatpush3.msra.mxu1 %v3541_v53  ;;  %v10945_v53 = vld [vmem:[#allocation100_spill] sm:$0xff] }
 0x216   : > { %v1721_v51 = vpop.f32.mrf.mxu0  ;;  %v2169_v25 = vpop.f32.mrf.mxu1  ;;  %5879 = vmatprep.subr.mxu1 %v3540_v2 }
 0x217   : > { %v8391_v61 = vadd.f32 %v2169_v25, %v1945_v49  ;;  %5880 = vmatpush3.msra.mxu1 %v3540_v2  ;;  %v3518_v49 = vld [vmem:[#allocation5 + $0x1f8] sm:$0xff]  ;;  %v10946_v2 = vmov 0.0  }
 0x218   : > { %v1724_v19 = vpop.f32.mrf.mxu0  ;;  %v2171_v33 = vpop.f32.mrf.mxu1  ;;  %5881 = vmatprep.subr.mxu1 %v3539_v8  ;;  %3552 = vmatpush1.msra.mxu0 %v3518_v49 }
 0x219   : > { %v1950_v9 = vadd.f32 %v10944_v60, %v1724_v19  ;;  %5882 = vmatpush3.msra.mxu1 %v3539_v8  ;;  %v3537_v33 = vld [vmem:[#allocation5 + $0x290] sm:$0xff]  ;;  %3553 = vmatprep.subr.mxu0 %v10946_v2 }
 0x21a   : > { %v1726_v6 = vpop.f32.mrf.mxu0  ;;  %v2174_v18 = vpop.f32.mrf.mxu1  ;;  %5883 = vmatprep.subr.mxu1 %v3538_v11  ;;  %v3517_v60 = vld [vmem:[#allocation5 + $0x1f0] sm:$0xff] }
 0x21b   : > { %v8394_v36 = vadd.f32 %v2174_v18, %v1950_v9  ;;  %5884 = vmatpush3.msra.mxu1 %v3538_v11  ;;  %3554 = vmatpush1.msra.mxu0 %v3517_v60  ;;  %v3536_v9 = vld [vmem:[#allocation5 + $0x288] sm:$0xff] }
 0x21c   : > { %v1729_v34 = vpop.f32.mrf.mxu0  ;;  %v2176_v51 = vpop.f32.mrf.mxu1  ;;  %5885 = vmatprep.subr.mxu1 %v3537_v33  ;;  %3555 = vmatprep.subr.mxu0 %v10946_v2 }
 0x21d   : > { %v1955_v25 = vadd.f32 %v10945_v53, %v1729_v34  ;;  %5886 = vmatpush3.msra.mxu1 %v3537_v33  ;;  %v3516_v51 = vld [vmem:[#allocation5 + $0x1e8] sm:$0xff]  ;;  %v10947_v34 = vld [vmem:[#allocation115_spill] sm:$0xff] }
 0x21e   : > { %v1731_v32 = vpop.f32.mrf.mxu0  ;;  %v2179_v19 = vpop.f32.mrf.mxu1  ;;  %5887 = vmatprep.subr.mxu1 %v3536_v9  ;;  %3556 = vmatpush1.msra.mxu0 %v3516_v51  ;;  %v3535_v53 = vld [vmem:[#allocation5 + $0x280] sm:$0xff] }
 0x21f   : > { %v8398_v6 = vadd.f32 %v2179_v19, %v1955_v25  ;;  %5888 = vmatpush3.msra.mxu1 %v3536_v9  ;;  %3557 = vmatprep.subr.mxu0 %v10946_v2  ;;  %v3515_v19 = vld [vmem:[#allocation5 + $0x1e0] sm:$0xff] }
 0x220   : > { %v1734_v8 = vpop.f32.mrf.mxu0  ;;  %v2181_v18 = vpop.f32.mrf.mxu1  ;;  %5889 = vmatprep.subr.mxu1 %v3535_v53  ;;  %3558 = vmatpush1.msra.mxu0 %v3515_v19  ;;  %v10949_v19 = vld [vmem:[#allocation107_spill] sm:$0xff] }
 0x221   : > { %v1960_v11 = vadd.f32 %v10947_v34, %v1734_v8  ;;  %5890 = vmatpush3.msra.mxu1 %v3535_v53  ;;  %v10948_v18 = vld [vmem:[#allocation39_spill] sm:$0xff]  ;;  %3559 = vmatprep.subr.mxu0 %v10946_v2  ;;  %v3514_v8 = vld [vmem:[#allocation5 + $0x1d8] sm:$0xff] }
 0x222   : > { %v1736_v32 = vpop.f32.mrf.mxu0  ;;  %v2184_v49 = vpop.f32.mrf.mxu1  ;;  %4001 = vmatprep.subr.mxu1 %v10946_v2  ;;  %3560 = vmatpush1.msra.mxu0 %v3514_v8 }
 0x223   : > { %v8403_v25 = vadd.f32 %v2184_v49, %v1960_v11  ;;  %3561 = vmatprep.subr.mxu0 %v10946_v2  ;;  %v3513_v11 = vld [vmem:[#allocation5 + $0x1d0] sm:$0xff] }
 0x224   : > { %v1739_v33 = vpop.f32.mrf.mxu0  ;;  %v2186_v60 = vpop.f32.mrf.mxu1  ;;  %3562 = vmatpush1.msra.mxu0 %v3513_v11 }
 0x225   : > { %v1965_v13 = vadd.f32 %v10948_v18, %v1739_v33  ;;  %3563 = vmatprep.subr.mxu0 %v10946_v2  ;;  %v3512_v33 = vld [vmem:[#allocation5 + $0x1c8] sm:$0xff] }
 0x226   : > { %v1741_v9 = vpop.f32.mrf.mxu0  ;;  %v2189_v51 = vpop.f32.mrf.mxu1  ;;  %3564 = vmatpush1.msra.mxu0 %v3512_v33 }
 0x227   : > { %v8408_v34 = vadd.f32 %v2189_v51, %v1965_v13  ;;  %3565 = vmatprep.subr.mxu0 %v10946_v2  ;;  %v3511_v9 = vld [vmem:[#allocation5 + $0x1c0] sm:$0xff]  ;;  %v10951_v51 = vld [vmem:[#allocation40_spill] sm:$0xff] }
 0x228   : > { %v1744_v32 = vpop.f32.mrf.mxu0  ;;  %v2191_v49 = vpop.f32.mrf.mxu1  ;;  %3566 = vmatpush1.msra.mxu0 %v3511_v9 }
 0x229   : > { %v1970_v53 = vadd.f32 %v10949_v19, %v1744_v32  ;;  %3567 = vmatprep.subr.mxu0 %v10946_v2  ;;  %v3510_v32 = vld [vmem:[#allocation5 + $0x1b8] sm:$0xff] }
 0x22a   : > { %v1746_v60 = vpop.f32.mrf.mxu0  ;;  %v2194_v18 = vpop.f32.mrf.mxu1  ;;  %3568 = vmatpush1.msra.mxu0 %v3510_v32 }
 0x22b   : > { %v8413_v26 = vadd.f32 %v2194_v18, %v1970_v53  ;;  %3569 = vmatprep.subr.mxu0 %v10946_v2  ;;  %v3509_v53 = vld [vmem:[#allocation5 + $0x1b0] sm:$0xff]  ;;  %v10952_v18 = vld [vmem:[#allocation47_spill] sm:$0xff] }
 0x22c   : > { %v1749_v13 = vpop.f32.mrf.mxu0  ;;  %v2196_v8 = vpop.f32.mrf.mxu1  ;;  %3570 = vmatpush1.msra.mxu0 %v3509_v53 }
 0x22d   : > { %10950 = vst [vmem:[#allocation145_spill] sm:$0xff] %v8413_v26  ;;  %v1975_v20 = vadd.f32 %v10951_v51, %v1749_v13  ;;  %3571 = vmatprep.subr.mxu0 %v10946_v2  ;;  %v3508_v13 = vld [vmem:[#allocation5 + $0x1a8] sm:$0xff] }
 0x22e   : > { %v1751_v49 = vpop.f32.mrf.mxu0  ;;  %v2199_v11 = vpop.f32.mrf.mxu1  ;;  %3572 = vmatpush1.msra.mxu0 %v3508_v13 }
 0x22f   : > { %v8418_v19 = vadd.f32 %v2199_v11, %v1975_v20  ;;  %3573 = vmatprep.subr.mxu0 %v10946_v2  ;;  %v3507_v49 = vld [vmem:[#allocation5 + $0x1a0] sm:$0xff]  ;;  %v10954_v11 = vld [vmem:[#allocation44_spill] sm:$0xff] }
 0x230   : > { %v1754_v60 = vpop.f32.mrf.mxu0  ;;  %v2201_v33 = vpop.f32.mrf.mxu1  ;;  %3574 = vmatpush1.msra.mxu0 %v3507_v49 }
 0x231   : > { %v1980_v4 = vadd.f32 %v10952_v18, %v1754_v60  ;;  %3575 = vmatprep.subr.mxu0 %v10946_v2  ;;  %v3506_v60 = vld [vmem:[#allocation5 + $0x198] sm:$0xff] }
 0x232   : > { %v1756_v8 = vpop.f32.mrf.mxu0  ;;  %v2204_v50 = vpop.f32.mrf.mxu1  ;;  %3576 = vmatpush1.msra.mxu0 %v3506_v60 }
 0x233   : > { %v8423_v9 = vadd.f32 %v2204_v50, %v1980_v4  ;;  %3577 = vmatprep.subr.mxu0 %v10946_v2  ;;  %v3505_v4 = vld [vmem:[#allocation5 + $0x190] sm:$0xff]  ;;  %v10955_v8 = vld [vmem:[#allocation50_spill] sm:$0xff] }
 0x234   : > { %v1759_v51 = vpop.f32.mrf.mxu0  ;;  %v2206_v20 = vpop.f32.mrf.mxu1  ;;  %3578 = vmatpush1.msra.mxu0 %v3505_v4 }
 0x235   : > { %10953 = vst [vmem:[#allocation152_spill] sm:$0xff] %v8423_v9  ;;  %v1985_v32 = vadd.f32 %v10954_v11, %v1759_v51  ;;  %3579 = vmatprep.subr.mxu0 %v10946_v2  ;;  %v3504_v51 = vld [vmem:[#allocation5 + $0x188] sm:$0xff] }
 0x236   : > { %v1761_v33 = vpop.f32.mrf.mxu0  ;;  %v2209_v22 = vpop.f32.mrf.mxu1  ;;  %3580 = vmatpush1.msra.mxu0 %v3504_v51 }
 0x237   : > { %v8428_v53 = vadd.f32 %v2209_v22, %v1985_v32  ;;  %3581 = vmatprep.subr.mxu0 %v10946_v2  ;;  %v3503_v32 = vld [vmem:[#allocation5 + $0x180] sm:$0xff] }
 0x238   : > { %v1764_v18 = vpop.f32.mrf.mxu0  ;;  %v2211_v50 = vpop.f32.mrf.mxu1  ;;  %v10957_v33 = vld [vmem:[#allocation119_spill] sm:$0xff]  ;;  %3582 = vmatpush1.msra.mxu0 %v3503_v32 }
 0x239   : > { %v1990_v13 = vadd.f32 %v10955_v8, %v1764_v18  ;;  %3583 = vmatprep.subr.mxu0 %v10946_v2  ;;  %v3534_v18 = vld [vmem:[#allocation5 + $0x278] sm:$0xff] }
 0x23a   : > { %v1766_v20 = vpop.f32.mrf.mxu0  ;;  %v2214_v23 = vpop.f32.mrf.mxu1  ;;  %3584 = vmatpush2.msra.mxu0 %v3534_v18 }
 0x23b   : > { %v8433_v49 = vadd.f32 %v2214_v23, %v1990_v13  ;;  %3585 = vmatprep.subr.mxu0 %v10946_v2  ;;  %v3533_v13 = vld [vmem:[#allocation5 + $0x270] sm:$0xff] }
 0x23c   : > { %v1769_v11 = vpop.f32.mrf.mxu0  ;;  %v2216_v22 = vpop.f32.mrf.mxu1  ;;  %v10958_v20 = vld [vmem:[#allocation129_spill] sm:$0xff]  ;;  %3586 = vmatpush2.msra.mxu0 %v3533_v13 }
 0x23d   : > { %10956 = vst [vmem:[#allocation149_spill] sm:$0xff] %v8433_v49  ;;  %v1995_v60 = vadd.f32 %v10957_v33, %v1769_v11  ;;  %3587 = vmatprep.subr.mxu0 %v10946_v2  ;;  %v3532_v11 = vld [vmem:[#allocation5 + $0x268] sm:$0xff] }
 0x23e   : > { %v1771_v50 = vpop.f32.mrf.mxu0  ;;  %v2219_v35 = vpop.f32.mrf.mxu1  ;;  %3588 = vmatpush2.msra.mxu0 %v3532_v11 }
 0x23f   : > { %v8438_v4 = vadd.f32 %v2219_v35, %v1995_v60  ;;  %3589 = vmatprep.subr.mxu0 %v10946_v2  ;;  %v3531_v60 = vld [vmem:[#allocation5 + $0x260] sm:$0xff]  ;;  %v10960_v50 = vld [vmem:[#allocation124_spill] sm:$0xff] }
 0x240   : > { %v1774_v8 = vpop.f32.mrf.mxu0  ;;  %v2221_v23 = vpop.f32.mrf.mxu1  ;;  %3590 = vmatpush2.msra.mxu0 %v3531_v60 }
 0x241   : > { %v2000_v51 = vadd.f32 %v10958_v20, %v1774_v8  ;;  %3591 = vmatprep.subr.mxu0 %v10946_v2  ;;  %v3530_v8 = vld [vmem:[#allocation5 + $0x258] sm:$0xff] }
 0x242   : > { %v1776_v22 = vpop.f32.mrf.mxu0  ;;  %v2224_v63 = vpop.f32.mrf.mxu1  ;;  %3592 = vmatpush2.msra.mxu0 %v3530_v8 }
 0x243   : > { %v8443_v32 = vadd.f32 %v2224_v63, %v2000_v51  ;;  %3593 = vmatprep.subr.mxu0 %v10946_v2  ;;  %v3529_v51 = vld [vmem:[#allocation5 + $0x250] sm:$0xff] }
 0x244   : > { %v1779_v33 = vpop.f32.mrf.mxu0  ;;  %v2226_v35 = vpop.f32.mrf.mxu1  ;;  %3594 = vmatpush2.msra.mxu0 %v3529_v51 }
 0x245   : > { %10959 = vst [vmem:[#allocation156_spill] sm:$0xff] %v8443_v32  ;;  %v2005_v18 = vadd.f32 %v10960_v50, %v1779_v33  ;;  %3595 = vmatprep.subr.mxu0 %v10946_v2  ;;  %v3528_v33 = vld [vmem:[#allocation5 + $0x248] sm:$0xff] }
 0x246   : > { %v1781_v23 = vpop.f32.mrf.mxu0  ;;  %v2229_v38 = vpop.f32.mrf.mxu1  ;;  %3596 = vmatpush2.msra.mxu0 %v3528_v33 }
 0x247   : > { %v8448_v13 = vadd.f32 %v2229_v38, %v2005_v18  ;;  %3597 = vmatprep.subr.mxu0 %v10946_v2  ;;  %v3527_v18 = vld [vmem:[#allocation5 + $0x240] sm:$0xff]  ;;  %v10962_v23 = vld [vmem:[#allocation58_spill] sm:$0xff] }
 0x248   : > { %v1784_v20 = vpop.f32.mrf.mxu0  ;;  %v2231_v63 = vpop.f32.mrf.mxu1  ;;  %3598 = vmatpush2.msra.mxu0 %v3527_v18 }
 0x249   : > { %v2010_v22 = vadd.f32 %v8180_v24, %v1784_v20  ;;  %3599 = vmatprep.subr.mxu0 %v10946_v2  ;;  %v3526_v24 = vld [vmem:[#allocation5 + $0x238] sm:$0xff] }
 0x24a   : > { %v1786_v11 = vpop.f32.mrf.mxu0  ;;  %v2234_v35 = vpop.f32.mrf.mxu1  ;;  %3600 = vmatpush2.msra.mxu0 %v3526_v24  ;;  %v3522_v24 = vld [vmem:[#allocation5 + $0x218] sm:$0xff] }
 0x24b   : > { %v8453_v60 = vadd.f32 %v2234_v35, %v2010_v22  ;;  %3601 = vmatprep.subr.mxu0 %v10946_v2  ;;  %v3525_v11 = vld [vmem:[#allocation5 + $0x230] sm:$0xff] }
 0x24c   : > { %v1789_v50 = vpop.f32.mrf.mxu0  ;;  %v2236_v38 = vpop.f32.mrf.mxu1  ;;  %3602 = vmatpush2.msra.mxu0 %v3525_v11  ;;  %v3521_v11 = vld [vmem:[#allocation5 + $0x210] sm:$0xff] }
 0x24d   : > { %10961 = vst [vmem:[#allocation153_spill] sm:$0xff] %v8453_v60  ;;  %v2015_v8 = vadd.f32 %v10962_v23, %v1789_v50  ;;  %3603 = vmatprep.subr.mxu0 %v10946_v2  ;;  %v3524_v38 = vld [vmem:[#allocation5 + $0x228] sm:$0xff]  ;;  %v3523_v23 = vld [vmem:[#allocation5 + $0x220] sm:$0xff] }
 0x24e   : > { %v1791_v63 = vpop.f32.mrf.mxu0  ;;  %v2239_v42 = vpop.f32.mrf.mxu1  ;;  %3604 = vmatpush2.msra.mxu0 %v3524_v38 }
 0x24f   : > { %v8458_v20 = vadd.f32 %v2239_v42, %v2015_v8  ;;  %3605 = vmatprep.subr.mxu0 %v10946_v2 }
 0x250   : > { %v2241_v51 = vpop.f32.mrf.mxu1  ;;  %v5733_v22 = vpop.f32.mrf.mxu0  ;;  %3606 = vmatpush2.msra.mxu0 %v3523_v23  ;;  %v3519_v23 = vld [vmem:[#allocation5 + $0x200] sm:$0xff] }
 0x251   : > { %v8462_v35 = vadd.f32 %v5733_v22, %v8203_v10  ;;  %3607 = vmatprep.subr.mxu0 %v10946_v2 }
 0x252   : > { %v8464_v33 = vpop.f32.mrf.mxu0  ;;  %v8466_v50 = vpop.f32.mrf.mxu1  ;;  %3608 = vmatpush2.msra.mxu0 %v3522_v24 }
 0x253   : > { %3609 = vmatprep.subr.mxu0 %v10946_v2 }
 0x254   : > { %v5736_v42 = vpop.f32.mrf.mxu0  ;;  %v2585_v18 = vpop.f32.mrf.mxu1  ;;  %3610 = vmatpush2.msra.mxu0 %v3521_v11 }
 0x255   : > { %v8471_v8 = vadd.f32 %v5736_v42, %v8229_v16  ;;  %v3520_v16 = vld [vmem:[#allocation5 + $0x208] sm:$0xff]  ;;  %3611 = vmatprep.subr.mxu0 %v10946_v2 }
 0x256   : > { %v8473_v10 = vpop.f32.mrf.mxu0  ;;  %v8475_v63 = vpop.f32.mrf.mxu1  ;;  %3612 = vmatpush2.msra.mxu0 %v3520_v16 }
 0x257   : > { %3613 = vmatprep.subr.mxu0 %v10946_v2 }
 0x258   : > { %v5739_v51 = vpop.f32.mrf.mxu0  ;;  %v2590_v22 = vpop.f32.mrf.mxu1  ;;  %3614 = vmatpush2.msra.mxu0 %v3519_v23 }
 0x259   : > { %v8480_v38 = vadd.f32 %v5739_v51, %v8257_v5  ;;  %v8488_v22 = vld [vmem:[#allocation5 + $0x178] sm:$0xff] }
 0x25a   : > { %v8482_v42 = vpop.f32.mrf.mxu0  ;;  %v8484_v18 = vpop.f32.mrf.mxu1  ;;  %10963 = vst [vmem:[#allocation160_spill] sm:$0xff] %v8488_v22  ;;  %5939 = vmatprep.subr.mxu0 %v8488_v22 }
 0x25c   : > { %v5742_v48 = vpop.f32.mrf.mxu0  ;;  %v2595_v24 = vpop.f32.mrf.mxu1 }
 0x25d   : > { %v8491_v37 = vadd.f32 %v5742_v48, %v8283_v30 }
 0x25e   : > { %v8493_v5 = vpop.f32.mrf.mxu0  ;;  %v8495_v51 = vpop.f32.mrf.mxu1 }
 0x260   : > { %v5745_v11 = vpop.f32.mrf.mxu0  ;;  %v2600_v47 = vpop.f32.mrf.mxu1 }
 0x261   : > { %v8499_v16 = vadd.f32 %v5745_v11, %v8311_v31 }
 0x262   : > { %v8501_v24 = vpop.f32.mrf.mxu0  ;;  %v8503_v40 = vpop.f32.mrf.mxu1 }
 0x264   : > { %v5748_v44 = vpop.f32.mrf.mxu0  ;;  %v2605_v59 = vpop.f32.mrf.mxu1 }
 0x265   : > { %v8506_v48 = vadd.f32 %v5748_v44, %v8341_v62 }
 0x266   : > { %v8508_v30 = vpop.f32.mrf.mxu0  ;;  %v8510_v23 = vpop.f32.mrf.mxu1 }
 0x268   : > { %v5751_v56 = vpop.f32.mrf.mxu0  ;;  %v2610_v45 = vpop.f32.mrf.mxu1 }
 0x269   : > { %v8513_v47 = vadd.f32 %v5751_v56, %v8369_v1 }
 0x26a   : > { %v8515_v31 = vpop.f32.mrf.mxu0  ;;  %v8517_v11 = vpop.f32.mrf.mxu1 }
 0x26c   : > { %v5754_v27 = vpop.f32.mrf.mxu0  ;;  %v2615_v17 = vpop.f32.mrf.mxu1 }
 0x26d   : > { %v8520_v59 = vadd.f32 %v5754_v27, %v8385_v39 }
 0x26e   : > { %v8522_v44 = vpop.f32.mrf.mxu0  ;;  %v8524_v62 = vpop.f32.mrf.mxu1 }
 0x270   : > { %v5757_v52 = vpop.f32.mrf.mxu0  ;;  %v2620_v14 = vpop.f32.mrf.mxu1 }
 0x271   : > { %v8527_v45 = vadd.f32 %v5757_v52, %v8391_v61 }
 0x272   : > { %v8529_v56 = vpop.f32.mrf.mxu0  ;;  %v8531_v1 = vpop.f32.mrf.mxu1 }
 0x274   : > { %v5760_v41 = vpop.f32.mrf.mxu0  ;;  %v2625_v46 = vpop.f32.mrf.mxu1 }
 0x275   : > { %v8534_v17 = vadd.f32 %v5760_v41, %v8398_v6 }
 0x276   : > { %v8536_v27 = vpop.f32.mrf.mxu0  ;;  %v8538_v39 = vpop.f32.mrf.mxu1 }
 0x278   : > { %v5763_v28 = vpop.f32.mrf.mxu0  ;;  %v2630_v54 = vpop.f32.mrf.mxu1 }
 0x279   : > { %v8541_v14 = vadd.f32 %v5763_v28, %v8408_v34 }
 0x27a   : > { %v8543_v52 = vpop.f32.mrf.mxu0  ;;  %v8545_v61 = vpop.f32.mrf.mxu1 }
 0x27b   : > { %10964 = vst [vmem:[#allocation157_spill] sm:$0xff] %v8541_v14 }
 0x27c   : > { %v5766_v55 = vpop.f32.mrf.mxu0  ;;  %v2635_v29 = vpop.f32.mrf.mxu1 }
 0x27d   : > { %v8548_v46 = vadd.f32 %v5766_v55, %v8418_v19 }
 0x27e   : > { %v8550_v41 = vpop.f32.mrf.mxu0  ;;  %v8552_v6 = vpop.f32.mrf.mxu1 }
 0x27f   : > { %10965 = vst [vmem:[#allocation164_spill] sm:$0xff] %v8548_v46  ;;  %10966 = vst [vmem:[#allocation161_spill] sm:$0xff] %v8550_v41 }
 0x280   : > { %v5769_v22 = vpop.f32.mrf.mxu0  ;;  %v2640_v60 = vpop.f32.mrf.mxu1 }
 0x281   : > { %v8555_v54 = vadd.f32 %v5769_v22, %v8428_v53 }
 0x282   : > { %v8557_v28 = vpop.f32.mrf.mxu0  ;;  %v8559_v34 = vpop.f32.mrf.mxu1 }
 0x283   : > { %10967 = vst [vmem:[#allocation51_spill] sm:$0xff] %v8555_v54  ;;  %10968 = vst [vmem:[#allocation168_spill] sm:$0xff] %v8557_v28 }
 0x284   : > { %v5772_v32 = vpop.f32.mrf.mxu0  ;;  %v2645_v49 = vpop.f32.mrf.mxu1 }
 0x285   : > { %v8562_v29 = vadd.f32 %v5772_v32, %v8438_v4 }
 0x286   : > { %v8564_v55 = vpop.f32.mrf.mxu0  ;;  %v8566_v19 = vpop.f32.mrf.mxu1 }
 0x287   : > { %10969 = vst [vmem:[#allocation165_spill] sm:$0xff] %v8562_v29  ;;  %10970 = vst [vmem:[#allocation54_spill] sm:$0xff] %v8564_v55 }
 0x288   : > { %v5775_v9 = vpop.f32.mrf.mxu0  ;;  %v2650_v46 = vpop.f32.mrf.mxu1 }
 0x289   : > { %v8569_v60 = vadd.f32 %v5775_v9, %v8448_v13  ;;  %v8586_v9 = vld [vmem:[%s10201_s4] ss:$0 sm:$0xff] }
 0x28a   : > { %v8571_v53 = vpop.f32.mrf.mxu0  ;;  %v8573_v22 = vpop.f32.mrf.mxu1 }
 0x28b   : > { %10971 = vst [vmem:[#allocation183_spill] sm:$0xff] %v8569_v60  ;;  %10972 = vst [vmem:[#allocation57_spill] sm:$0xff] %v8571_v53  ;;  %v2320_v53 = vadd.f32 %v8473_v10, %v8216_v12  ;;  %v2330_v10 = vadd.f32 %v8482_v42, %v8242_v3 }
 0x28c   : > { %v5778_v54 = vpop.f32.mrf.mxu0  ;;  %v2655_v28 = vpop.f32.mrf.mxu1 }
 0x28d   : > { %v8576_v49 = vadd.f32 %v5778_v54, %v8458_v20  ;;  %v2310_v20 = vadd.f32 %v8464_v33, %v8190_v43 }
 0x28e   : > { %v8578_v4 = vpop.f32.mrf.mxu0  ;;  %v8580_v32 = vpop.f32.mrf.mxu1 }
 0x28f   : > { %10973 = vst [vmem:[#allocation171_spill] sm:$0xff] %v8576_v49  ;;  %10974 = vst [vmem:[#allocation169_spill] sm:$0xff] %v8578_v4 }
 0x290   : > { %v2660_v29 = vpop.f32.mrf.mxu1  ;;  %v5813_v55 = vpop.f32.mrf.mxu0 }
 0x291   : > { %v2814_v46 = vadd.f32 %v5813_v55, %v8475_v63 }
 0x292   : > { %v8588_v13 = vpop.f32.mrf.mxu1  ;;  %v2808_v60 = vpop.f32.mrf.mxu0 }
 0x293   : > { %v2968_v54 = vadd.f32 %v2814_v46, %v8462_v35  ;;  %v2809_v28 = vadd.f32 %v2808_v60, %v8466_v50 }
 0x294   : > { %v2665_v49 = vpop.f32.mrf.mxu1  ;;  %v5816_v29 = vpop.f32.mrf.mxu0 }
 0x295   : > { %v3007_v4 = vadd.f32 %v8586_v9, %v2968_v54  ;;  %v2967_v63 = vadd.f32 %v2809_v28, %v2310_v20  ;;  %v2824_v55 = vadd.f32 %v5816_v29, %v8495_v51  ;;  %v10977_v54 = vld [vmem:[#allocation15_spill] sm:$0xff] }
 0x296   : > { %v8598_v41 = vpop.f32.mrf.mxu1  ;;  %v2818_v26 = vpop.f32.mrf.mxu0 }
 0x297   : > { %v8600_v14 = vmax.f32 %v3007_v4, 0.0  ;;  %v3006_v43 = vadd.f32 %v8586_v9, %v2967_v63  ;;  %v2970_v35 = vadd.f32 %v2824_v55, %v8471_v8  ;;  %v2819_v33 = vadd.f32 %v2818_v26, %v8484_v18  ;;  %v10979_v63 = vld [vmem:[#allocation12_spill] sm:$0xff] }
 0x298   : > { %v2670_v50 = vpop.f32.mrf.mxu1  ;;  %v5819_v60 = vpop.f32.mrf.mxu0 }
 0x299   : > { %10975 = vst [vmem:[#allocation186_spill] sm:$0xff] %v8600_v14  ;;  %v8605_v49 = vmax.f32 %v3006_v43, 0.0  ;;  %v3009_v51 = vadd.f32 %v8586_v9, %v2970_v35  ;;  %v2969_v46 = vadd.f32 %v2819_v33, %v2320_v53  ;;  %v2834_v12 = vadd.f32 %v5819_v60, %v8510_v23 }
 0x29a   : > { %v8611_v4 = vpop.f32.mrf.mxu1  ;;  %v2828_v20 = vpop.f32.mrf.mxu0  ;;  %v3103_v8 = vmul.f32 %v8600_v14, %v10977_v54 }
 0x29b   : > { %10976 = vst [vmem:[#allocation172_spill] sm:$0xff] %v8605_v49  ;;  %v8615_v28 = vmax.f32 %v3009_v51, 0.0  ;;  %v3008_v26 = vadd.f32 %v8586_v9, %v2969_v46  ;;  %v2972_v18 = vadd.f32 %v2834_v12, %v8480_v38  ;;  %v2829_v29 = vadd.f32 %v2828_v20, %v8503_v40  ;;  %3615 = vmatprep.mubr.f32.mxu0 %v8605_v49  ;;  %v10981_v51 = vld [vmem:[#allocation14_spill] sm:$0xff] }
 0x29c   : > { %v2675_v23 = vpop.f32.mrf.mxu1  ;;  %v5822_v53 = vpop.f32.mrf.mxu0  ;;  %v8623_v3 = vmul.f32 %v8605_v49, %v10979_v63  ;;  %v2340_v38 = vadd.f32 %v8493_v5, %v8270_v7  ;;  %v3199_v60 = vrot.slane %v3103_v8, 1  ;;  %v10984_v8 = vld [vmem:[#allocation11_spill] sm:$0xff] }
 0x29d   : > { %10978 = vst [vmem:[#allocation174_spill] sm:$0xff] %v8615_v28  ;;  %v8625_v42 = vmax.f32 %v3008_v26, 0.0  ;;  %v3011_v55 = vadd.f32 %v8586_v9, %v2972_v18  ;;  %v2971_v43 = vadd.f32 %v2829_v29, %v2330_v10  ;;  %v2844_v35 = vadd.f32 %v5822_v53, %v8524_v62 }
 0x29e   : > { %v8631_v33 = vpop.f32.mrf.mxu1  ;;  %v2838_v40 = vpop.f32.mrf.mxu0  ;;  %v10496_v50 = vrot.slane %v8623_v3, 1  ;;  %v3105_v46 = vmul.f32 %v8615_v28, %v10981_v51 }
 0x29f   : > { %10980 = vst [vmem:[#allocation62_spill] sm:$0xff] %v8625_v42  ;;  %v8636_v12 = vmax.f32 %v3011_v55, 0.0  ;;  %v3010_v20 = vadd.f32 %v8586_v9, %v2971_v43  ;;  %v2974_v10 = vadd.f32 %v2844_v35, %v8491_v37  ;;  %v2839_v62 = vadd.f32 %v2838_v40, %v8517_v11  ;;  %v10986_v40 = vld [vmem:[#allocation16_spill] sm:$0xff] }
 0x2a0   : > { %v2680_v54 = vpop.f32.mrf.mxu1  ;;  %v5825_v26 = vpop.f32.mrf.mxu0  ;;  %v8645_v5 = vsel %vm926_vm0, %v10496_v50, %v3199_v60  ;;  %v3104_v18 = vmul.f32 %v8625_v42, %v10984_v8  ;;  %v2350_v11 = vadd.f32 %v8501_v24, %v8296_v58  ;;  %v3201_v35 = vrot.slane %v3105_v46, 1 }
 0x2a1   : > { %10982 = vst [vmem:[#allocation65_spill] sm:$0xff] %v8636_v12  ;;  %v8649_v29 = vmax.f32 %v3010_v20, 0.0  ;;  %v3013_v23 = vadd.f32 %v8586_v9, %v2974_v10  ;;  %v2973_v53 = vadd.f32 %v2839_v62, %v2340_v38  ;;  %v2854_v37 = vadd.f32 %v5825_v26, %v8538_v39  ;;  %5891 = vmatprep.mubr.f32.mxu1 %v8645_v5  ;;  %v3469_v62 = vld [vmem:[#allocation5 + $0x78] sm:$0xff]  ;;  %v10988_v26 = vld [vmem:[#allocation17_spill] sm:$0xff] }
 0x2a2   : > { %v8656_v63 = vpop.f32.mrf.mxu1  ;;  %v2848_v55 = vpop.f32.mrf.mxu0  ;;  %v3200_v43 = vrot.slane %v3104_v18, 1  ;;  %v8660_v51 = vmul.f32 %v8636_v12, %v10986_v40 }
 0x2a3   : > { %10985 = vst [vmem:[#allocation185_spill] sm:$0xff] %v8649_v29  ;;  %v8662_v20 = vmax.f32 %v3013_v23, 0.0  ;;  %v3012_v38 = vadd.f32 %v8586_v9, %v2973_v53  ;;  %v2976_v39 = vadd.f32 %v2854_v37, %v8499_v16  ;;  %v2849_v10 = vadd.f32 %v2848_v55, %v8531_v1  ;;  %v3468_v53 = vld [vmem:[#allocation5 + $0x70] sm:$0xff] }
 0x2a4   : > { %v2685_v54 = vpop.f32.mrf.mxu1  ;;  %v5828_v58 = vpop.f32.mrf.mxu0  ;;  %v8669_v24 = vsel %vm926_vm0, %v3199_v60, %v3200_v43  ;;  %v8673_v46 = vsel %vm926_vm0, %v3200_v43, %v3201_v35  ;;  %v3106_v8 = vmul.f32 %v8649_v29, %v10988_v26  ;;  %v2360_v60 = vadd.f32 %v8508_v30, %v8324_v15  ;;  %v3467_v30 = vld [vmem:[#allocation5 + $0x68] sm:$0xff]  ;;  %v10993_v26 = vld [vmem:[#allocation21_spill] sm:$0xff] }
 0x2a5   : > { %10987 = vst [vmem:[#allocation176_spill] sm:$0xff] %v8662_v20  ;;  %v8677_v18 = vmax.f32 %v3012_v38, 0.0  ;;  %v3015_v16 = vadd.f32 %v8586_v9, %v2976_v39  ;;  %v2975_v23 = vadd.f32 %v2849_v10, %v2350_v11  ;;  %v2864_v1 = vadd.f32 %v5828_v58, %v8552_v6  ;;  %5892 = vmatmul.mubr.f32.vlgmr.msra.gmra.mxu1 %v8669_v24  ;;  %v10990_v38 = vld [vmem:[#allocation20_spill] sm:$0xff] }
 0x2a6   : > { %5894 = vmatprep.mubr.f32.mxu1 %v8673_v46  ;;  %4002 = vmatpush1.msra.mxu1 %v3469_v62  ;;  %v8685_v37 = vpop.f32.mrf.mxu1  ;;  %v2858_v55 = vpop.f32.mrf.mxu0  ;;  %v3202_v43 = vrot.slane %v3106_v8, 1  ;;  %v3203_v40 = vrot.slane %v8660_v51, 1  ;;  %v8690_v11 = vmul.f32 %v8662_v20, %v10990_v38 }
 0x2a7   : > { %10989 = vst [vmem:[#allocation177_spill] sm:$0xff] %v8677_v18  ;;  %v8692_v6 = vmax.f32 %v3015_v16, 0.0  ;;  %v3014_v39 = vadd.f32 %v8586_v9, %v2975_v23  ;;  %v2978_v10 = vadd.f32 %v2864_v1, %v8506_v48  ;;  %v2859_v15 = vadd.f32 %v2858_v55, %v8545_v61  ;;  %4003 = vmatprep.subr.mxu1 %v10946_v2 }
 0x2a8   : > { %4004 = vmatpush1.msra.mxu1 %v3468_v53  ;;  %v2690_v62 = vpop.f32.mrf.mxu1  ;;  %v5831_v54 = vpop.f32.mrf.mxu0  ;;  %v8700_v51 = vsel %vm926_vm0, %v3201_v35, %v3202_v43  ;;  %v8704_v58 = vsel %vm926_vm0, %v3202_v43, %v3203_v40  ;;  %v3108_v8 = vmul.f32 %v8677_v18, %v10993_v26  ;;  %v3466_v35 = vld [vmem:[#allocation5 + $0x60] sm:$0xff]  ;;  %v2370_v1 = vadd.f32 %v8515_v31, %v8354_v21  ;;  %v3465_v31 = vld [vmem:[#allocation5 + $0x58] sm:$0xff] }
 0x2a9   : > { %10991 = vst [vmem:[#allocation70_spill] sm:$0xff] %v8692_v6  ;;  %10992 = vst [vmem:[#allocation190_spill] sm:$0xff] %v8704_v58  ;;  %v8708_v48 = vmax.f32 %v3014_v39, 0.0  ;;  %v3017_v61 = vadd.f32 %v8586_v9, %v2978_v10  ;;  %v2977_v16 = vadd.f32 %v2859_v15, %v2360_v60  ;;  %v2874_v23 = vadd.f32 %v5831_v54, %v8566_v19  ;;  %v10995_v60 = vld [vmem:[#allocation22_spill] sm:$0xff]  ;;  %v10999_v26 = vld [vmem:[#allocation23_spill] sm:$0xff] }
 0x2aa   : > { %5895 = vmatmul.mubr.f32.gmra.mxu1 %v8700_v51  ;;  %4005 = vmatprep.subr.mxu1 %v10946_v2  ;;  %v8717_v53 = vpop.f32.mrf.mxu1  ;;  %v2868_v55 = vpop.f32.mrf.mxu0  ;;  %v3204_v43 = vrot.slane %v3108_v8, 1  ;;  %v3205_v38 = vrot.slane %v8690_v11, 1  ;;  %v8722_v19 = vmul.f32 %v8692_v6, %v10995_v60 }
 0x2ab   : > { %10994 = vst [vmem:[#allocation80_spill] sm:$0xff] %v8708_v48  ;;  %5897 = vmatprep.mubr.f32.mxu1 %v8704_v58  ;;  %4006 = vmatpush1.msra.mxu1 %v3467_v30  ;;  %v8724_v39 = vmax.f32 %v3017_v61, 0.0  ;;  %v3016_v10 = vadd.f32 %v8586_v9, %v2977_v16  ;;  %v2980_v15 = vadd.f32 %v2874_v23, %v8513_v47  ;;  %v3493_v58 = vld [vmem:[#allocation5 + $0x138] sm:$0xff] }
 0x2ac   : > { %v2869_v21 = vadd.f32 %v2868_v55, %v8559_v34  ;;  %4007 = vmatprep.subr.mxu1 %v10946_v2  ;;  %v2695_v30 = vpop.f32.mrf.mxu1  ;;  %v5834_v62 = vpop.f32.mrf.mxu0  ;;  %v8732_v11 = vsel %vm926_vm0, %v3203_v40, %v3204_v43  ;;  %v8736_v54 = vsel %vm926_vm0, %v3204_v43, %v3205_v38  ;;  %v3110_v8 = vmul.f32 %v8708_v48, %v10999_v26  ;;  %v3464_v40 = vld [vmem:[#allocation5 + $0x50] sm:$0xff] }
 0x2ad   : > { %10996 = vst [vmem:[#allocation179_spill] sm:$0xff] %v8724_v39  ;;  %4008 = vmatpush1.msra.mxu1 %v3466_v35  ;;  %10997 = vst [vmem:[#allocation77_spill] sm:$0xff] %v8732_v11  ;;  %v8740_v47 = vmax.f32 %v3016_v10, 0.0  ;;  %v3019_v34 = vadd.f32 %v8586_v9, %v2980_v15  ;;  %v2884_v16 = vadd.f32 %v5834_v62, %v8580_v32  ;;  %v3207_v60 = vrot.slane %v8722_v19, 1  ;;  %v11004_v26 = vld [vmem:[#allocation25_spill] sm:$0xff] }
 0x2ae   : > { %10998 = vst [vmem:[#allocation84_spill] sm:$0xff] %v8736_v54  ;;  %v2979_v61 = vadd.f32 %v2869_v21, %v2370_v1  ;;  %5898 = vmatmul.mubr.f32.gmra.mxu1 %v8732_v11  ;;  %4009 = vmatprep.subr.mxu1 %v10946_v2  ;;  %v2380_v23 = vadd.f32 %v8522_v44, %v8380_v0  ;;  %v8749_v35 = vpop.f32.mrf.mxu1  ;;  %v2878_v55 = vpop.f32.mrf.mxu0  ;;  %v3206_v43 = vrot.slane %v3110_v8, 1  ;;  %v11001_v1 = vld [vmem:[#allocation24_spill] sm:$0xff] }
 0x2af   : > { %11000 = vst [vmem:[#allocation188_spill] sm:$0xff] %v8740_v47  ;;  %5900 = vmatprep.mubr.f32.mxu1 %v8736_v54  ;;  %4010 = vmatpush1.msra.mxu1 %v3465_v31  ;;  %v8754_v32 = vmul.f32 %v8724_v39, %v11001_v1  ;;  %v8756_v10 = vmax.f32 %v3019_v34, 0.0  ;;  %v2982_v21 = vadd.f32 %v2884_v16, %v8520_v59  ;;  %v3463_v44 = vld [vmem:[#allocation5 + $0x48] sm:$0xff]  ;;  %v11103_v54 = vld [vmem:[#allocation85_spill] sm:$0xff] }
 0x2b0   : > { %v3018_v15 = vadd.f32 %v8586_v9, %v2979_v61  ;;  %v2879_v0 = vadd.f32 %v2878_v55, %v8573_v22  ;;  %4011 = vmatprep.subr.mxu1 %v10946_v2  ;;  %v2700_v31 = vpop.f32.mrf.mxu1  ;;  %v5837_v30 = vpop.f32.mrf.mxu0  ;;  %v8764_v19 = vsel %vm926_vm0, %v3205_v38, %v3206_v43  ;;  %v8768_v62 = vsel %vm926_vm0, %v3206_v43, %v3207_v60  ;;  %v3462_v38 = vld [vmem:[#allocation5 + $0x40] sm:$0xff] }
 0x2b1   : > { %4012 = vmatpush1.msra.mxu1 %v3464_v40  ;;  %11002 = vst [vmem:[#allocation81_spill] sm:$0xff] %v8764_v19  ;;  %11003 = vst [vmem:[#allocation18_spill] sm:$0xff] %v8768_v62  ;;  %v3112_v8 = vmul.f32 %v8740_v47, %v11004_v26  ;;  %v3021_v22 = vadd.f32 %v8586_v9, %v2982_v21  ;;  %v2894_v61 = vadd.f32 %v5837_v30, %v8598_v41  ;;  %v11010_v26 = vld [vmem:[#allocation27_spill] sm:$0xff] }
 0x2b2   : > { %v8772_v59 = vmax.f32 %v3018_v15, 0.0  ;;  %v2981_v34 = vadd.f32 %v2879_v0, %v2380_v23  ;;  %5901 = vmatmul.mubr.f32.gmra.mxu1 %v8764_v19  ;;  %4013 = vmatprep.subr.mxu1 %v10946_v2  ;;  %v2390_v16 = vadd.f32 %v8529_v56, %v8388_v57  ;;  %v8781_v40 = vpop.f32.mrf.mxu1  ;;  %v2888_v55 = vpop.f32.mrf.mxu0  ;;  %v3209_v1 = vrot.slane %v8754_v32, 1  ;;  %v11006_v23 = vld [vmem:[#allocation26_spill] sm:$0xff] }
 0x2b3   : > { %5903 = vmatprep.mubr.f32.mxu1 %v8768_v62  ;;  %4014 = vmatpush1.msra.mxu1 %v3463_v44  ;;  %v3208_v43 = vrot.slane %v3112_v8, 1  ;;  %v8786_v41 = vmul.f32 %v8756_v10, %v11006_v23  ;;  %v8788_v15 = vmax.f32 %v3021_v22, 0.0  ;;  %v2984_v0 = vadd.f32 %v2894_v61, %v8527_v45  ;;  %v3461_v56 = vld [vmem:[#allocation5 + $0x38] sm:$0xff]  ;;  %v3479_v62 = vld [vmem:[#allocation5 + $0xc8] sm:$0xff] }
 0x2b4   : > { %11005 = vst [vmem:[#allocation69_spill] sm:$0xff] %v8772_v59  ;;  %v3020_v21 = vadd.f32 %v8586_v9, %v2981_v34  ;;  %v2889_v57 = vadd.f32 %v2888_v55, %v8588_v13  ;;  %4015 = vmatprep.subr.mxu1 %v10946_v2  ;;  %v2705_v44 = vpop.f32.mrf.mxu1  ;;  %v5840_v31 = vpop.f32.mrf.mxu0  ;;  %v3114_v8 = vmul.f32 %v8772_v59, %v11010_v26  ;;  %v11016_v26 = vld [vmem:[#allocation29_spill] sm:$0xff] }
 0x2b5   : > { %11007 = vst [vmem:[#allocation193_spill] sm:$0xff] %v8788_v15  ;;  %4016 = vmatpush1.msra.mxu1 %v3462_v38  ;;  %v8796_v32 = vsel %vm926_vm0, %v3207_v60, %v3208_v43  ;;  %v8800_v30 = vsel %vm926_vm0, %v3208_v43, %v3209_v1  ;;  %v3023_v13 = vadd.f32 %v8586_v9, %v2984_v0  ;;  %v3460_v60 = vld [vmem:[#allocation5 + $0x30] sm:$0xff]  ;;  %v3211_v23 = vrot.slane %v8786_v41, 1 }
 0x2b6   : > { %11008 = vst [vmem:[#allocation19_spill] sm:$0xff] %v8796_v32  ;;  %11009 = vst [vmem:[#allocation73_spill] sm:$0xff] %v8800_v30  ;;  %v8804_v45 = vmax.f32 %v3020_v21, 0.0  ;;  %v2983_v22 = vadd.f32 %v2889_v57, %v2390_v16  ;;  %v2904_v34 = vadd.f32 %v5840_v31, %v8631_v33  ;;  %5904 = vmatmul.mubr.f32.gmra.mxu1 %v8796_v32  ;;  %4017 = vmatprep.subr.mxu1 %v10946_v2  ;;  %v8813_v38 = vpop.f32.mrf.mxu1  ;;  %v2898_v55 = vpop.f32.mrf.mxu0  ;;  %v11012_v16 = vld [vmem:[#allocation28_spill] sm:$0xff] }
 0x2b7   : > { %v2400_v61 = vadd.f32 %v8536_v27, %v8394_v36  ;;  %5906 = vmatprep.mubr.f32.mxu1 %v8800_v30  ;;  %4018 = vmatpush1.msra.mxu1 %v3461_v56  ;;  %v3210_v43 = vrot.slane %v3114_v8, 1  ;;  %v8818_v33 = vmul.f32 %v8788_v15, %v11012_v16  ;;  %v8820_v21 = vmax.f32 %v3023_v13, 0.0  ;;  %v3459_v27 = vld [vmem:[#allocation5 + $0x28] sm:$0xff]  ;;  %v11054_v30 = vld [vmem:[#allocation45_spill] sm:$0xff] }
 0x2b8   : > { %11011 = vst [vmem:[#allocation191_spill] sm:$0xff] %v8804_v45  ;;  %v3022_v0 = vadd.f32 %v8586_v9, %v2983_v22  ;;  %v2986_v57 = vadd.f32 %v2904_v34, %v8534_v17  ;;  %v2899_v36 = vadd.f32 %v2898_v55, %v8611_v4  ;;  %4019 = vmatprep.subr.mxu1 %v10946_v2  ;;  %v2710_v56 = vpop.f32.mrf.mxu1  ;;  %v5843_v44 = vpop.f32.mrf.mxu0 }
 0x2b9   : > { %11013 = vst [vmem:[#allocation32_spill] sm:$0xff] %v8820_v21  ;;  %4020 = vmatpush1.msra.mxu1 %v3460_v60  ;;  %v8828_v41 = vsel %vm926_vm0, %v3209_v1, %v3210_v43  ;;  %v8832_v31 = vsel %vm926_vm0, %v3210_v43, %v3211_v23  ;;  %v3116_v8 = vmul.f32 %v8804_v45, %v11016_v26  ;;  %v3458_v1 = vld [vmem:[#allocation5 + $0x20] sm:$0xff]  ;;  %v3213_v16 = vrot.slane %v8818_v33, 1 }
 0x2ba   : > { %11014 = vst [vmem:[#allocation106_spill] sm:$0xff] %v8828_v41  ;;  %11015 = vst [vmem:[#allocation110_spill] sm:$0xff] %v8832_v31  ;;  %v8836_v17 = vmax.f32 %v3022_v0, 0.0  ;;  %v3025_v4 = vadd.f32 %v8586_v9, %v2986_v57  ;;  %v2985_v13 = vadd.f32 %v2899_v36, %v2400_v61  ;;  %v2914_v22 = vadd.f32 %v5843_v44, %v8685_v37  ;;  %v8845_v60 = vpop.f32.mrf.mxu1  ;;  %v2908_v55 = vpop.f32.mrf.mxu0  ;;  %v11018_v61 = vld [vmem:[#allocation30_spill] sm:$0xff]  ;;  %v11020_v36 = vld [vmem:[#allocation157_spill] sm:$0xff] }
 0x2bb   : > { %5907 = vmatmul.mubr.f32.gmra.mxu1 %v8828_v41  ;;  %4021 = vmatprep.subr.mxu1 %v10946_v2  ;;  %v2410_v34 = vadd.f32 %v8543_v52, %v8403_v25  ;;  %v3212_v43 = vrot.slane %v3116_v8, 1  ;;  %v8850_v37 = vmul.f32 %v8820_v21, %v11018_v61  ;;  %v2909_v25 = vadd.f32 %v2908_v55, %v8656_v63  ;;  %v3457_v52 = vld [vmem:[#allocation5 + $0x18] sm:$0xff]  ;;  %v11023_v8 = vld [vmem:[#allocation31_spill] sm:$0xff]  ;;  %v11025_v55 = vld [vmem:[#allocation145_spill] sm:$0xff] }
 0x2bc   : > { %11017 = vst [vmem:[#allocation100_spill] sm:$0xff] %v8836_v17  ;;  %5909 = vmatprep.mubr.f32.mxu1 %v8832_v31  ;;  %4022 = vmatpush1.msra.mxu1 %v3459_v27  ;;  %v8852_v0 = vmax.f32 %v3025_v4, 0.0  ;;  %v3024_v57 = vadd.f32 %v8586_v9, %v2985_v13  ;;  %v2988_v56 = vadd.f32 %v2914_v22, %v11020_v36  ;;  %v2715_v27 = vpop.f32.mrf.mxu1  ;;  %v5846_v44 = vpop.f32.mrf.mxu0  ;;  %v11026_v61 = vld [vmem:[#allocation161_spill] sm:$0xff] }
 0x2bd   : > { %4023 = vmatprep.subr.mxu1 %v10946_v2  ;;  %v8860_v33 = vsel %vm926_vm0, %v3211_v23, %v3212_v43  ;;  %v8864_v26 = vsel %vm926_vm0, %v3212_v43, %v3213_v16  ;;  %v3118_v4 = vmul.f32 %v8836_v17, %v11023_v8  ;;  %v2987_v22 = vadd.f32 %v2909_v25, %v2410_v34  ;;  %v3456_v23 = vld [vmem:[#allocation5 + $0x10] sm:$0xff] }
 0x2be   : > { %11019 = vst [vmem:[#allocation115_spill] sm:$0xff] %v8852_v0  ;;  %4024 = vmatpush1.msra.mxu1 %v3458_v1  ;;  %11021 = vst [vmem:[#allocation39_spill] sm:$0xff] %v8860_v33  ;;  %v8868_v13 = vmax.f32 %v3024_v57, 0.0  ;;  %v3027_v63 = vadd.f32 %v8586_v9, %v2988_v56  ;;  %v2924_v1 = vadd.f32 %v5846_v44, %v8749_v35  ;;  %v2718_v43 = vpop.f32.mrf.mxu1  ;;  %v2918_v27 = vpop.f32.mrf.mxu0  ;;  %v3215_v8 = vrot.slane %v8850_v37, 1  ;;  %v11027_v56 = vld [vmem:[#allocation34_spill] sm:$0xff]  ;;  %v11029_v44 = vld [vmem:[#allocation164_spill] sm:$0xff] }
 0x2bf   : > { %11022 = vst [vmem:[#allocation107_spill] sm:$0xff] %v8864_v26  ;;  %5910 = vmatmul.mubr.f32.gmra.mxu1 %v8860_v33  ;;  %4025 = vmatprep.subr.mxu1 %v10946_v2  ;;  %v2420_v36 = vadd.f32 %v11026_v61, %v11025_v55  ;;  %v3214_v57 = vrot.slane %v3118_v4, 1  ;;  %v8880_v34 = vmul.f32 %v8852_v0, %v11027_v56  ;;  %v11032_v56 = vld [vmem:[#allocation35_spill] sm:$0xff]  ;;  %v11045_v41 = vld [vmem:[#allocation41_spill] sm:$0xff] }
 0x2c0   : > { %11024 = vst [vmem:[#allocation40_spill] sm:$0xff] %v8868_v13  ;;  %5912 = vmatprep.mubr.f32.mxu1 %v8864_v26  ;;  %4026 = vmatpush1.msra.mxu1 %v3457_v52  ;;  %v8882_v35 = vmax.f32 %v3027_v63, 0.0  ;;  %v3026_v25 = vadd.f32 %v8586_v9, %v2987_v22  ;;  %v2990_v50 = vadd.f32 %v2924_v1, %v11029_v44  ;;  %v3455_v52 = vld [vmem:[#allocation5 + $0x8] sm:$0xff]  ;;  %v2720_v61 = vpop.f32.mrf.mxu1  ;;  %v5849_v4 = vpop.f32.mrf.mxu0 }
 0x2c1   : > { %v2919_v55 = vadd.f32 %v2918_v27, %v8717_v53  ;;  %4027 = vmatprep.subr.mxu1 %v10946_v2  ;;  %v8890_v37 = vsel %vm926_vm0, %v3213_v16, %v3214_v57  ;;  %v8894_v63 = vsel %vm926_vm0, %v3214_v57, %v3215_v8  ;;  %v3120_v22 = vmul.f32 %v8868_v13, %v11032_v56  ;;  %v3454_v16 = vld [vmem:[#allocation5] sm:$0xff]  ;;  %v11034_v44 = vld [vmem:[#allocation152_spill] sm:$0xff] }
 0x2c2   : > { %11028 = vst [vmem:[#allocation47_spill] sm:$0xff] %v8882_v35  ;;  %4028 = vmatpush1.msra.mxu1 %v3456_v23  ;;  %11030 = vst [vmem:[#allocation44_spill] sm:$0xff] %v8890_v37  ;;  %v8898_v1 = vmax.f32 %v3026_v25, 0.0  ;;  %v3029_v53 = vadd.f32 %v8586_v9, %v2990_v50  ;;  %v2934_v23 = vadd.f32 %v5849_v4, %v8813_v38  ;;  %v11035_v61 = vld [vmem:[#allocation168_spill] sm:$0xff]  ;;  %v2723_v57 = vpop.f32.mrf.mxu1  ;;  %v2928_v56 = vpop.f32.mrf.mxu0  ;;  %v3217_v33 = vrot.slane %v8880_v34, 1  ;;  %v11036_v50 = vld [vmem:[#allocation37_spill] sm:$0xff] }
 0x2c3   : > { %11031 = vst [vmem:[#allocation50_spill] sm:$0xff] %v8894_v63  ;;  %v2989_v27 = vadd.f32 %v2919_v55, %v2420_v36  ;;  %5913 = vmatmul.mubr.f32.gmra.mxu1 %v8890_v37  ;;  %4029 = vmatprep.subr.mxu1 %v10946_v2  ;;  %v2430_v26 = vadd.f32 %v11035_v61, %v11034_v44  ;;  %v3216_v25 = vrot.slane %v3120_v22, 1  ;;  %v11038_v4 = vld [vmem:[#allocation51_spill] sm:$0xff] }
 0x2c4   : > { %11033 = vst [vmem:[#allocation119_spill] sm:$0xff] %v8898_v1  ;;  %5915 = vmatprep.mubr.f32.mxu1 %v8894_v63  ;;  %4030 = vmatpush1.msra.mxu1 %v3455_v52  ;;  %v8910_v36 = vmul.f32 %v8882_v35, %v11036_v50  ;;  %v8912_v38 = vmax.f32 %v3029_v53, 0.0  ;;  %v2992_v37 = vadd.f32 %v2934_v23, %v11038_v4  ;;  %v3485_v52 = vld [vmem:[#allocation5 + $0xf8] sm:$0xff]  ;;  %v2725_v61 = vpop.f32.mrf.mxu1  ;;  %v5852_v22 = vpop.f32.mrf.mxu0 }
 0x2c5   : > { %v3028_v55 = vadd.f32 %v8586_v9, %v2989_v27  ;;  %v2929_v44 = vadd.f32 %v2928_v56, %v8781_v40  ;;  %4031 = vmatprep.subr.mxu1 %v10946_v2  ;;  %v8920_v34 = vsel %vm926_vm0, %v3215_v8, %v3216_v25  ;;  %v8924_v53 = vsel %vm926_vm0, %v3216_v25, %v3217_v33  ;;  %v11041_v50 = vld [vmem:[#allocation38_spill] sm:$0xff]  ;;  %v11043_v8 = vld [vmem:[#allocation149_spill] sm:$0xff] }
 0x2c6   : > { %11037 = vst [vmem:[#allocation129_spill] sm:$0xff] %v8912_v38  ;;  %4032 = vmatpush1.msra.mxu1 %v3454_v16  ;;  %11039 = vst [vmem:[#allocation124_spill] sm:$0xff] %v8920_v34  ;;  %v3122_v27 = vmul.f32 %v8898_v1, %v11041_v50  ;;  %v3031_v40 = vadd.f32 %v8586_v9, %v2992_v37  ;;  %v2944_v4 = vadd.f32 %v5852_v22, %v2718_v43  ;;  %v3484_v16 = vld [vmem:[#allocation5 + $0xf0] sm:$0xff]  ;;  %v11044_v61 = vld [vmem:[#allocation54_spill] sm:$0xff]  ;;  %v2728_v25 = vpop.f32.mrf.mxu1  ;;  %v2938_v31 = vpop.f32.mrf.mxu0 }
 0x2c7   : > { %11040 = vst [vmem:[#allocation58_spill] sm:$0xff] %v8924_v53  ;;  %v8928_v23 = vmax.f32 %v3028_v55, 0.0  ;;  %v2991_v56 = vadd.f32 %v2929_v44, %v2430_v26  ;;  %5916 = vmatmul.mubr.f32.gmra.mxu1 %v8920_v34  ;;  %4033 = vmatprep.subr.mxu1 %v10946_v2  ;;  %v2440_v63 = vadd.f32 %v11044_v61, %v11043_v8  ;;  %v3219_v55 = vrot.slane %v8910_v36, 1  ;;  %v11047_v44 = vld [vmem:[#allocation165_spill] sm:$0xff] }
 0x2c8   : > { %5918 = vmatprep.mubr.f32.mxu1 %v8924_v53  ;;  %4034 = vmatpush2.msra.mxu1 %v3485_v52  ;;  %v3218_v50 = vrot.slane %v3122_v27, 1  ;;  %v8939_v26 = vmul.f32 %v8912_v38, %v11045_v41  ;;  %v8941_v43 = vmax.f32 %v3031_v40, 0.0  ;;  %v2994_v22 = vadd.f32 %v2944_v4, %v11047_v44  ;;  %v3483_v52 = vld [vmem:[#allocation5 + $0xe8] sm:$0xff]  ;;  %v2730_v61 = vpop.f32.mrf.mxu1  ;;  %v5855_v27 = vpop.f32.mrf.mxu0  ;;  %v11050_v40 = vld [vmem:[#allocation42_spill] sm:$0xff] }
 0x2c9   : > { %11042 = vst [vmem:[#allocation15_spill] sm:$0xff] %v8928_v23  ;;  %v3030_v37 = vadd.f32 %v8586_v9, %v2991_v56  ;;  %v2939_v8 = vadd.f32 %v2938_v31, %v8845_v60  ;;  %4035 = vmatprep.subr.mxu1 %v10946_v2  ;;  %v3124_v56 = vmul.f32 %v8928_v23, %v11050_v40  ;;  %v11053_v61 = vld [vmem:[#allocation57_spill] sm:$0xff] }
 0x2ca   : > { %11046 = vst [vmem:[#allocation12_spill] sm:$0xff] %v8941_v43  ;;  %4036 = vmatpush2.msra.mxu1 %v3484_v16  ;;  %v8949_v36 = vsel %vm926_vm0, %v3217_v33, %v3218_v50  ;;  %v8953_v41 = vsel %vm926_vm0, %v3218_v50, %v3219_v55  ;;  %v3033_v31 = vadd.f32 %v8586_v9, %v2994_v22  ;;  %v3482_v16 = vld [vmem:[#allocation5 + $0xe0] sm:$0xff]  ;;  %v11052_v33 = vld [vmem:[#allocation156_spill] sm:$0xff]  ;;  %v2733_v50 = vpop.f32.mrf.mxu1  ;;  %v2948_v34 = vpop.f32.mrf.mxu0 }
 0x2cb   : > { %11048 = vst [vmem:[#allocation14_spill] sm:$0xff] %v8949_v36  ;;  %11049 = vst [vmem:[#allocation13_spill] sm:$0xff] %v8953_v41  ;;  %v8957_v4 = vmax.f32 %v3030_v37, 0.0  ;;  %v2993_v60 = vadd.f32 %v2939_v8, %v2440_v63  ;;  %v2954_v44 = vadd.f32 %v5855_v27, %v2728_v25  ;;  %5919 = vmatmul.mubr.f32.gmra.mxu1 %v8949_v36  ;;  %4037 = vmatprep.subr.mxu1 %v10946_v2  ;;  %v11056_v8 = vld [vmem:[#allocation183_spill] sm:$0xff] }
 0x2cc   : > { %v2450_v53 = vadd.f32 %v11053_v61, %v11052_v33  ;;  %5921 = vmatprep.mubr.f32.mxu1 %v8953_v41  ;;  %4038 = vmatpush2.msra.mxu1 %v3483_v52  ;;  %v3220_v40 = vrot.slane %v3124_v56, 1  ;;  %v3221_v37 = vrot.slane %v8939_v26, 1  ;;  %v3127_v63 = vmul.f32 %v8941_v43, %v11054_v30  ;;  %v3481_v33 = vld [vmem:[#allocation5 + $0xd8] sm:$0xff]  ;;  %v2735_v52 = vpop.f32.mrf.mxu1  ;;  %v5858_v61 = vpop.f32.mrf.mxu0 }
 0x2cd   : > { %11051 = vst [vmem:[#allocation11_spill] sm:$0xff] %v8957_v4  ;;  %v8968_v25 = vmax.f32 %v3033_v31, 0.0  ;;  %v3032_v22 = vadd.f32 %v8586_v9, %v2993_v60  ;;  %v2996_v27 = vadd.f32 %v2954_v44, %v11056_v8  ;;  %v2949_v36 = vadd.f32 %v2948_v34, %v2723_v57  ;;  %4039 = vmatprep.subr.mxu1 %v10946_v2  ;;  %v11059_v26 = vld [vmem:[#allocation46_spill] sm:$0xff]  ;;  %v3480_v44 = vld [vmem:[#allocation5 + $0xd0] sm:$0xff] }
 0x2ce   : > { %4040 = vmatpush2.msra.mxu1 %v3482_v16  ;;  %v8975_v56 = vsel %vm926_vm0, %v3219_v55, %v3220_v40  ;;  %v8979_v30 = vsel %vm926_vm0, %v3220_v40, %v3221_v37  ;;  %v3126_v31 = vmul.f32 %v8957_v4, %v11059_v26  ;;  %v11061_v16 = vld [vmem:[#allocation153_spill] sm:$0xff]  ;;  %v2738_v40 = vpop.f32.mrf.mxu1  ;;  %v2958_v52 = vpop.f32.mrf.mxu0  ;;  %v3223_v26 = vrot.slane %v3127_v63, 1 }
 0x2cf   : > { %11055 = vst [vmem:[#allocation16_spill] sm:$0xff] %v8968_v25  ;;  %11057 = vst [vmem:[#allocation17_spill] sm:$0xff] %v8975_v56  ;;  %v8983_v60 = vmax.f32 %v3032_v22, 0.0  ;;  %v3035_v57 = vadd.f32 %v8586_v9, %v2996_v27  ;;  %v2995_v34 = vadd.f32 %v2949_v36, %v2450_v53  ;;  %5922 = vmatmul.mubr.f32.gmra.mxu1 %v8975_v56  ;;  %4041 = vmatprep.subr.mxu1 %v10946_v2  ;;  %v11062_v55 = vld [vmem:[#allocation169_spill] sm:$0xff]  ;;  %v11063_v22 = vld [vmem:[#allocation48_spill] sm:$0xff] }
 0x2d0   : > { %11058 = vst [vmem:[#allocation20_spill] sm:$0xff] %v8979_v30  ;;  %v2460_v8 = vadd.f32 %v11062_v55, %v11061_v16  ;;  %5924 = vmatprep.mubr.f32.mxu1 %v8979_v30  ;;  %4042 = vmatpush2.msra.mxu1 %v3481_v33  ;;  %v3222_v41 = vrot.slane %v3126_v31, 1  ;;  %v3129_v32 = vmul.f32 %v8968_v25, %v11063_v22  ;;  %v2740_v16 = vpop.f32.mrf.mxu1  ;;  %v11067_v31 = vld [vmem:[#allocation49_spill] sm:$0xff]  ;;  %v11097_v30 = vld [vmem:[#allocation72_spill] sm:$0xff] }
 0x2d1   : > { %11060 = vst [vmem:[#allocation21_spill] sm:$0xff] %v8983_v60  ;;  %v8993_v27 = vmax.f32 %v3035_v57, 0.0  ;;  %v3034_v53 = vadd.f32 %v8586_v9, %v2995_v34  ;;  %v2964_v36 = vadd.f32 %v5858_v61, %v2738_v40  ;;  %v2959_v56 = vadd.f32 %v2958_v52, %v2733_v50  ;;  %4043 = vmatprep.subr.mxu1 %v10946_v2  ;;  %v11069_v61 = vld [vmem:[#allocation171_spill] sm:$0xff] }
 0x2d2   : > { %4044 = vmatpush2.msra.mxu1 %v3480_v44  ;;  %v8999_v33 = vsel %vm926_vm0, %v3221_v37, %v3222_v41  ;;  %v9003_v63 = vsel %vm926_vm0, %v3222_v41, %v3223_v26  ;;  %v3128_v57 = vmul.f32 %v8983_v60, %v11067_v31  ;;  %v3478_v44 = vld [vmem:[#allocation5 + $0xc0] sm:$0xff]  ;;  %v3225_v40 = vrot.slane %v3129_v32, 1  ;;  %v11070_v41 = vld [vmem:[#allocation52_spill] sm:$0xff] }
 0x2d3   : > { %11064 = vst [vmem:[#allocation22_spill] sm:$0xff] %v8993_v27  ;;  %11065 = vst [vmem:[#allocation23_spill] sm:$0xff] %v8999_v33  ;;  %v9007_v55 = vmax.f32 %v3034_v53, 0.0  ;;  %v2998_v50 = vadd.f32 %v2964_v36, %v11069_v61  ;;  %v2997_v34 = vadd.f32 %v2959_v56, %v2460_v8  ;;  %5925 = vmatmul.mubr.f32.gmra.mxu1 %v8999_v33  ;;  %4045 = vmatprep.subr.mxu1 %v10946_v2  ;;  %v3477_v56 = vld [vmem:[#allocation5 + $0xb8] sm:$0xff]  ;;  %v11071_v8 = vld [vmem:[#allocation53_spill] sm:$0xff] }
 0x2d4   : > { %11066 = vst [vmem:[#allocation24_spill] sm:$0xff] %v9003_v63  ;;  %5927 = vmatprep.mubr.f32.mxu1 %v9003_v63  ;;  %4046 = vmatpush2.msra.mxu1 %v3479_v62  ;;  %v3224_v37 = vrot.slane %v3128_v57, 1  ;;  %v3131_v52 = vmul.f32 %v8993_v27, %v11070_v41  ;;  %v11076_v57 = vld [vmem:[#allocation64_spill] sm:$0xff] }
 0x2d5   : > { %11068 = vst [vmem:[#allocation25_spill] sm:$0xff] %v9007_v55  ;;  %v3037_v22 = vadd.f32 %v8586_v9, %v2998_v50  ;;  %v3036_v53 = vadd.f32 %v8586_v9, %v2997_v34  ;;  %4047 = vmatprep.subr.mxu1 %v10946_v2  ;;  %v3130_v36 = vmul.f32 %v9007_v55, %v11071_v8  ;;  %v3476_v9 = vld [vmem:[#allocation5 + $0xb0] sm:$0xff]  ;;  %v3475_v34 = vld [vmem:[#allocation5 + $0xa8] sm:$0xff] }
 0x2d6   : > { %4048 = vmatpush2.msra.mxu1 %v3478_v44  ;;  %v9022_v16 = vsel %vm926_vm0, %v3223_v26, %v3224_v37  ;;  %v9026_v62 = vsel %vm926_vm0, %v3224_v37, %v3225_v40  ;;  %v3070_v61 = vmul.f32 %v8605_v49, %v11076_v57  ;;  %v3227_v50 = vrot.slane %v3131_v52, 1  ;;  %v11077_v44 = vld [vmem:[#allocation63_spill] sm:$0xff]  ;;  %v11078_v41 = vld [vmem:[#allocation56_spill] sm:$0xff] }
 0x2d7   : > { %11072 = vst [vmem:[#allocation26_spill] sm:$0xff] %v9022_v16  ;;  %11073 = vst [vmem:[#allocation27_spill] sm:$0xff] %v9026_v62  ;;  %v9028_v32 = vmax.f32 %v3037_v22, 0.0  ;;  %v9030_v31 = vmax.f32 %v3036_v53, 0.0  ;;  %5928 = vmatmul.mubr.f32.gmra.mxu1 %v9022_v16  ;;  %4049 = vmatprep.subr.mxu1 %v10946_v2  ;;  %v3226_v26 = vrot.slane %v3130_v36, 1  ;;  %v11079_v53 = vld [vmem:[#allocation55_spill] sm:$0xff] }
 0x2d8   : > { %5930 = vmatprep.mubr.f32.mxu1 %v9026_v62  ;;  %4050 = vmatpush2.msra.mxu1 %v3477_v56  ;;  %v11082_v56 = vld [vmem:[#allocation59_spill] sm:$0xff]  ;;  %v11084_v16 = vld [vmem:[#allocation60_spill] sm:$0xff] }
 0x2d9   : > { %11074 = vst [vmem:[#allocation28_spill] sm:$0xff] %v9028_v32  ;;  %11075 = vst [vmem:[#allocation29_spill] sm:$0xff] %v9030_v31  ;;  %4051 = vmatprep.subr.mxu1 %v10946_v2  ;;  %v9040_v37 = vmul.f32 %v9028_v32, %v11077_v44  ;;  %v3132_v22 = vmul.f32 %v9030_v31, %v11078_v41  ;;  %v3133_v8 = vmul.f32 %v9028_v32, %v11079_v53  ;;  %v3474_v44 = vld [vmem:[#allocation5 + $0xa0] sm:$0xff] }
 0x2da   : > { %4052 = vmatpush2.msra.mxu1 %v3476_v9  ;;  %v9048_v57 = vsel %vm926_vm0, %v3225_v40, %v3226_v26  ;;  %v9052_v52 = vsel %vm926_vm0, %v3226_v26, %v3227_v50  ;;  %v3100_v36 = vmul.f32 %v9030_v31, %v11082_v56  ;;  %v3134_v41 = vrot.slane %v3070_v61, 7  ;;  %v11083_v9 = vld [vmem:[#allocation66_spill] sm:$0xff] }
 0x2db   : > { %11080 = vst [vmem:[#allocation30_spill] sm:$0xff] %v9048_v57  ;;  %11081 = vst [vmem:[#allocation157_spill] sm:$0xff] %v9052_v52  ;;  %5931 = vmatmul.mubr.f32.gmra.mxu1 %v9048_v57  ;;  %4053 = vmatprep.subr.mxu1 %v10946_v2  ;;  %v3165_v53 = vrot.slane %v9040_v37, 7  ;;  %v3071_v62 = vmul.f32 %v8600_v14, %v11083_v9  ;;  %v3228_v40 = vrot.slane %v3132_v22, 1  ;;  %v3229_v26 = vrot.slane %v3133_v8, 1  ;;  %v3473_v37 = vld [vmem:[#allocation5 + $0x98] sm:$0xff] }
 0x2dc   : > { %5933 = vmatprep.mubr.f32.mxu1 %v9052_v52  ;;  %4054 = vmatpush2.msra.mxu1 %v3475_v34  ;;  %v9064_v63 = vmul.f32 %v8993_v27, %v11084_v16  ;;  %v11087_v16 = vld [vmem:[#allocation71_spill] sm:$0xff]  ;;  %v3164_v8 = vrot.slane %v3100_v36, 7  ;;  %v11088_v9 = vld [vmem:[#allocation160_spill] sm:$0xff] }
 0x2dd   : > { %4055 = vmatprep.subr.mxu1 %v10946_v2  ;;  %v9069_v56 = vsel %vm861_vm1, %v3165_v53, %v3134_v41  ;;  %v9074_v61 = vsel %vm926_vm0, %v3227_v50, %v3228_v40  ;;  %v9078_v34 = vsel %vm926_vm0, %v3228_v40, %v3229_v26  ;;  %v3072_v22 = vmul.f32 %v8625_v42, %v11087_v16  ;;  %v3472_v50 = vld [vmem:[#allocation5 + $0x90] sm:$0xff]  ;;  %v3471_v36 = vld [vmem:[#allocation5 + $0x88] sm:$0xff] }
 0x2de   : > { %11085 = vst [vmem:[#allocation31_spill] sm:$0xff] %v9069_v56  ;;  %4056 = vmatpush2.msra.mxu1 %v3474_v44  ;;  %3616 = vmatmul.mubr.f32.vlgmr.msra.gmra.mxu0 %v9069_v56  ;;  %11086 = vst [vmem:[#allocation145_spill] sm:$0xff] %v9074_v61  ;;  %v3135_v44 = vrot.slane %v3071_v62, 7  ;;  %v11090_v16 = vrot.slane %v8623_v3, 1  ;;  %v3470_v3 = vld [vmem:[#allocation5 + $0x80] sm:$0xff] }
 0x2df   : > { %5934 = vmatmul.mubr.f32.gmra.mxu1 %v9074_v61  ;;  %4057 = vmatprep.subr.mxu1 %v10946_v2  ;;  %v3136_v62 = vrot.slane %v3072_v22, 7  ;;  %v11092_v61 = vrot.slane %v9064_v63, 7  ;;  %v11094_v22 = vld [vmem:[#allocation75_spill] sm:$0xff] }
 0x2e0   : > { %5940 = vmatpush3.msra.mxu0 %v11088_v9  ;;  %3620 = vmatprep.mubr.f32.mxu0 %v8600_v14  ;;  %v9090_v40 = vsel %vm861_vm1, %v3134_v41, %v3135_v44  ;;  %v9098_v9 = vsel %vm926_vm0, %v3229_v26, %v11090_v16  ;;  %v3500_v41 = vld [vmem:[#allocation5 + $0x170] sm:$0xff]  ;;  %v3073_v26 = vmul.f32 %v8615_v28, %v11094_v22  ;;  %v11096_v16 = vld [vmem:[#allocation78_spill] sm:$0xff]  ;;  %v3499_v22 = vld [vmem:[#allocation5 + $0x168] sm:$0xff] }
 0x2e1   : > { %5936 = vmatprep.mubr.f32.mxu1 %v9078_v34  ;;  %4058 = vmatpush2.msra.mxu1 %v3473_v37  ;;  %11089 = vst [vmem:[#allocation161_spill] sm:$0xff] %v9090_v40  ;;  %v11091_v37 = vld [vmem:[#allocation67_spill] sm:$0xff]  ;;  %v9107_v57 = vsel %vm861_vm1, %v11092_v61, %v3164_v8  ;;  %v3074_v33 = vmul.f32 %v8649_v29, %v11096_v16 }
 0x2e2   : > { %4059 = vmatprep.subr.mxu1 %v10946_v2  ;;  %3621 = vmatmul.mubr.f32.gmra.mxu0 %v9090_v40  ;;  %v3263_v52 = vmul.f32 %v9030_v31, %v11091_v37  ;;  %11093 = vst [vmem:[#allocation34_spill] sm:$0xff] %v9107_v57  ;;  %v3262_v61 = vmul.f32 %v9107_v57, %v11091_v37 }
 0x2e3   : > { %4060 = vmatpush2.msra.mxu1 %v3472_v50  ;;  %3625 = vmatprep.mubr.f32.mxu0 %v8625_v42  ;;  %v9116_v50 = vsel %vm861_vm1, %v3135_v44, %v3136_v62  ;;  %v3137_v44 = vrot.slane %v3073_v26, 7  ;;  %v3138_v19 = vrot.slane %v3074_v33, 7  ;;  %v11101_v26 = vld [vmem:[#allocation82_spill] sm:$0xff] }
 0x2e4   : > { %5937 = vmatmul.mubr.f32.gmra.mxu1 %v9098_v9  ;;  %4061 = vmatprep.subr.mxu1 %v10946_v2  ;;  %11095 = vst [vmem:[#allocation164_spill] sm:$0xff] %v9116_v50 }
 0x2e5   : > { %4062 = vmatpush2.msra.mxu1 %v3471_v36  ;;  %4065 = vmatprep.mubr.f32.mxu1 %v3263_v52  ;;  %v3266_v36 = vmul.f32 %v9028_v32, %v11097_v30  ;;  %v9127_v52 = vsel %vm861_vm1, %v3164_v8, %v3165_v53  ;;  %v9132_v16 = vsel %vm861_vm1, %v3136_v62, %v3137_v44  ;;  %v11100_v53 = vld [vmem:[#allocation76_spill] sm:$0xff] }
 0x2e6   : > { %4063 = vmatprep.subr.mxu1 %v10946_v2  ;;  %5941 = vmatprep.subr.mxu0 %v3500_v41  ;;  %11098 = vst [vmem:[#allocation35_spill] sm:$0xff] %v9127_v52  ;;  %11099 = vst [vmem:[#allocation152_spill] sm:$0xff] %v9132_v16  ;;  %v3269_v8 = vmul.f32 %v8605_v49, %v11100_v53  ;;  %v9144_v62 = vsel %vm861_vm1, %v3137_v44, %v3138_v19 }
 0x2e7   : > { %4064 = vmatpush2.msra.mxu1 %v3470_v3  ;;  %3626 = vmatmul.mubr.f32.gmra.mxu0 %v9116_v50  ;;  %v3265_v3 = vmul.f32 %v9127_v52, %v11097_v30  ;;  %11102 = vst [vmem:[#allocation168_spill] sm:$0xff] %v9144_v62  ;;  %v3268_v33 = vmul.f32 %v9069_v56, %v11100_v53 }
 0x2e8   : > { %4066 = vmatmul.mubr.f32.vlgmr.msra.gmra.mxu1 %v3262_v61  ;;  %5942 = vmatpush3.msra.mxu0 %v3500_v41  ;;  %v3498_v61 = vld [vmem:[#allocation5 + $0x160] sm:$0xff]  ;;  %v4499_v41 = vld [vmem:[#allocation5 + $0x478] sm:$0xff]  ;;  %v3076_v49 = vmul.f32 %v8677_v18, %v11103_v54 }
 0x2e9   : > { %3630 = vmatprep.mubr.f32.mxu0 %v8615_v28  ;;  %4070 = vmatprep.mubr.f32.mxu1 %v3266_v36  ;;  %v3075_v36 = vmul.f32 %v8636_v12, %v11101_v26  ;;  %v3497_v26 = vld [vmem:[#allocation5 + $0x158] sm:$0xff] }
 0x2ea   : > { %5943 = vmatprep.subr.mxu0 %v3499_v22  ;;  %6019 = vmatprep.subr.mxu1 %v4499_v41 }
 0x2eb   : > { %3631 = vmatmul.mubr.f32.gmra.mxu0 %v9132_v16  ;;  %6020 = vmatpush3.msra.mxu1 %v4499_v41 }
 0x2ec   : > { %4071 = vmatmul.mubr.f32.gmra.mxu1 %v3265_v3  ;;  %3635 = vmatprep.mubr.f32.mxu0 %v8649_v29  ;;  %v11104_v3 = vld [vmem:[#allocation79_spill] sm:$0xff] }
 0x2ed   : > { %4075 = vmatprep.mubr.f32.mxu1 %v3269_v8  ;;  %5944 = vmatpush3.msra.mxu0 %v3499_v22  ;;  %v3272_v11 = vmul.f32 %v8600_v14, %v11104_v3  ;;  %v3139_v22 = vrot.slane %v3075_v36, 7  ;;  %v3271_v44 = vmul.f32 %v9090_v40, %v11104_v3  ;;  %v3140_v8 = vrot.slane %v3076_v49, 7  ;;  %v11105_v14 = vld [vmem:[#allocation83_spill] sm:$0xff]  ;;  %v4498_v36 = vld [vmem:[#allocation5 + $0x470] sm:$0xff] }
 0x2ee   : > { %5945 = vmatprep.subr.mxu0 %v3498_v61  ;;  %v3275_v41 = vmul.f32 %v8625_v42, %v11105_v14  ;;  %v11108_v40 = vld [vmem:[#allocation89_spill] sm:$0xff]  ;;  %6021 = vmatprep.subr.mxu1 %v4498_v36 }
 0x2ef   : > { %3636 = vmatmul.mubr.f32.gmra.mxu0 %v9144_v62  ;;  %v9158_v54 = vsel %vm861_vm1, %v3138_v19, %v3139_v22  ;;  %v3274_v19 = vmul.f32 %v9116_v50, %v11105_v14  ;;  %v9170_v49 = vsel %vm861_vm1, %v3139_v22, %v3140_v8  ;;  %v3078_v56 = vmul.f32 %v8708_v48, %v11108_v40 }
 0x2f0   : > { %4076 = vmatmul.mubr.f32.gmra.mxu1 %v3268_v33  ;;  %3640 = vmatprep.mubr.f32.mxu0 %v8636_v12  ;;  %v3496_v33 = vld [vmem:[#allocation5 + $0x150] sm:$0xff]  ;;  %11107 = vst [vmem:[#allocation37_spill] sm:$0xff] %v9170_v49 }
 0x2f1   : > { %4080 = vmatprep.mubr.f32.mxu1 %v3272_v11  ;;  %5946 = vmatpush3.msra.mxu0 %v3498_v61  ;;  %v11106_v11 = vld [vmem:[#allocation87_spill] sm:$0xff] }
 0x2f2   : > { %5947 = vmatprep.subr.mxu0 %v3497_v26  ;;  %v3077_v61 = vmul.f32 %v8662_v20, %v11106_v11  ;;  %v3495_v11 = vld [vmem:[#allocation5 + $0x148] sm:$0xff]  ;;  %6022 = vmatpush3.msra.mxu1 %v4498_v36 }
 0x2f3   : > { %3641 = vmatmul.mubr.f32.gmra.mxu0 %v9158_v54 }
 0x2f4   : > { %4081 = vmatmul.mubr.f32.gmra.mxu1 %v3271_v44  ;;  %3645 = vmatprep.mubr.f32.mxu0 %v8677_v18  ;;  %v11109_v44 = vld [vmem:[#allocation86_spill] sm:$0xff] }
 0x2f5   : > { %4085 = vmatprep.mubr.f32.mxu1 %v3275_v41  ;;  %5948 = vmatpush3.msra.mxu0 %v3497_v26  ;;  %v3278_v42 = vmul.f32 %v8615_v28, %v11109_v44  ;;  %v3141_v26 = vrot.slane %v3077_v61, 7  ;;  %v3277_v22 = vmul.f32 %v9132_v16, %v11109_v44  ;;  %v3142_v41 = vrot.slane %v3078_v56, 7  ;;  %v11111_v28 = vld [vmem:[#allocation88_spill] sm:$0xff]  ;;  %v11114_v16 = vld [vmem:[#allocation93_spill] sm:$0xff] }
 0x2f6   : > { %5949 = vmatprep.subr.mxu0 %v3496_v33  ;;  %v3281_v50 = vmul.f32 %v8649_v29, %v11111_v28  ;;  %v4497_v61 = vld [vmem:[#allocation5 + $0x468] sm:$0xff]  ;;  %v3080_v29 = vmul.f32 %v8740_v47, %v11114_v16 }
 0x2f7   : > { %3646 = vmatmul.mubr.f32.gmra.mxu0 %v9170_v49  ;;  %v9182_v40 = vsel %vm861_vm1, %v3140_v8, %v3141_v26  ;;  %v3280_v8 = vmul.f32 %v9144_v62, %v11111_v28  ;;  %v9194_v56 = vsel %vm861_vm1, %v3141_v26, %v3142_v41  ;;  %6023 = vmatprep.subr.mxu1 %v4497_v61  ;;  %v11117_v26 = vld [vmem:[#allocation92_spill] sm:$0xff]  ;;  %v4496_v62 = vld [vmem:[#allocation5 + $0x460] sm:$0xff] }
 0x2f8   : > { %4086 = vmatmul.mubr.f32.gmra.mxu1 %v3274_v19  ;;  %3650 = vmatprep.mubr.f32.mxu0 %v8662_v20  ;;  %11110 = vst [vmem:[#allocation51_spill] sm:$0xff] %v9182_v40  ;;  %v3494_v19 = vld [vmem:[#allocation5 + $0x140] sm:$0xff]  ;;  %11113 = vst [vmem:[#allocation38_spill] sm:$0xff] %v9194_v56  ;;  %v3144_v36 = vrot.slane %v3080_v29, 7  ;;  %v3286_v29 = vmul.f32 %v9170_v49, %v11117_v26 }
 0x2f9   : > { %4090 = vmatprep.mubr.f32.mxu1 %v3278_v42  ;;  %5950 = vmatpush3.msra.mxu0 %v3496_v33  ;;  %v11112_v42 = vld [vmem:[#allocation91_spill] sm:$0xff] }
 0x2fa   : > { %5951 = vmatprep.subr.mxu0 %v3495_v11  ;;  %v3079_v33 = vmul.f32 %v8692_v6, %v11112_v42  ;;  %6024 = vmatpush3.msra.mxu1 %v4497_v61  ;;  %v11120_v61 = vld [vmem:[#allocation98_spill] sm:$0xff] }
 0x2fb   : > { %3651 = vmatmul.mubr.f32.gmra.mxu0 %v9182_v40  ;;  %6025 = vmatprep.subr.mxu1 %v4496_v62 }
 0x2fc   : > { %4091 = vmatmul.mubr.f32.gmra.mxu1 %v3277_v22  ;;  %3655 = vmatprep.mubr.f32.mxu0 %v8708_v48  ;;  %v11115_v22 = vld [vmem:[#allocation90_spill] sm:$0xff] }
 0x2fd   : > { %4095 = vmatprep.mubr.f32.mxu1 %v3281_v50  ;;  %5952 = vmatpush3.msra.mxu0 %v3495_v11  ;;  %v3284_v42 = vmul.f32 %v8636_v12, %v11115_v22  ;;  %v3143_v50 = vrot.slane %v3079_v33, 7  ;;  %v3283_v11 = vmul.f32 %v9158_v54, %v11115_v22  ;;  %v3492_v12 = vld [vmem:[#allocation5 + $0x130] sm:$0xff] }
 0x2fe   : > { %5953 = vmatprep.subr.mxu0 %v3494_v19  ;;  %6026 = vmatpush3.msra.mxu1 %v4496_v62  ;;  %v11123_v62 = vld [vmem:[#allocation96_spill] sm:$0xff] }
 0x2ff   : > { %3656 = vmatmul.mubr.f32.gmra.mxu0 %v9194_v56  ;;  %v9206_v16 = vsel %vm861_vm1, %v3142_v41, %v3143_v50  ;;  %v9218_v41 = vsel %vm861_vm1, %v3143_v50, %v3144_v36 }
 0x300   : > { %4096 = vmatmul.mubr.f32.gmra.mxu1 %v3280_v8  ;;  %3660 = vmatprep.mubr.f32.mxu0 %v8692_v6  ;;  %11116 = vst [vmem:[#allocation149_spill] sm:$0xff] %v9206_v16  ;;  %v3287_v8 = vmul.f32 %v8677_v18, %v11117_v26  ;;  %11119 = vst [vmem:[#allocation54_spill] sm:$0xff] %v9218_v41 }
 0x301   : > { %4100 = vmatprep.mubr.f32.mxu1 %v3284_v42  ;;  %5954 = vmatpush3.msra.mxu0 %v3494_v19  ;;  %v11118_v19 = vld [vmem:[#allocation95_spill] sm:$0xff]  ;;  %v3082_v42 = vmul.f32 %v8772_v59, %v11120_v61 }
 0x302   : > { %5955 = vmatprep.subr.mxu0 %v3493_v58  ;;  %v3081_v33 = vmul.f32 %v8724_v39, %v11118_v19  ;;  %v3491_v19 = vld [vmem:[#allocation5 + $0x128] sm:$0xff] }
 0x303   : > { %3661 = vmatmul.mubr.f32.gmra.mxu0 %v9206_v16  ;;  %v3146_v49 = vrot.slane %v3082_v42, 7 }
 0x304   : > { %4101 = vmatmul.mubr.f32.gmra.mxu1 %v3283_v11  ;;  %3665 = vmatprep.mubr.f32.mxu0 %v8740_v47  ;;  %v11121_v11 = vld [vmem:[#allocation94_spill] sm:$0xff] }
 0x305   : > { %4105 = vmatprep.mubr.f32.mxu1 %v3287_v8  ;;  %5956 = vmatpush3.msra.mxu0 %v3493_v58  ;;  %v3290_v18 = vmul.f32 %v8662_v20, %v11121_v11  ;;  %v4495_v58 = vld [vmem:[#allocation5 + $0x458] sm:$0xff]  ;;  %v3145_v8 = vrot.slane %v3081_v33, 7  ;;  %v3289_v50 = vmul.f32 %v9182_v40, %v11121_v11  ;;  %v3490_v20 = vld [vmem:[#allocation5 + $0x120] sm:$0xff]  ;;  %v4494_v33 = vld [vmem:[#allocation5 + $0x450] sm:$0xff] }
 0x306   : > { %5957 = vmatprep.subr.mxu0 %v3492_v12  ;;  %6027 = vmatprep.subr.mxu1 %v4495_v58  ;;  %v11126_v40 = vld [vmem:[#allocation104_spill] sm:$0xff] }
 0x307   : > { %3666 = vmatmul.mubr.f32.gmra.mxu0 %v9218_v41  ;;  %v9230_v61 = vsel %vm861_vm1, %v3144_v36, %v3145_v8  ;;  %6028 = vmatpush3.msra.mxu1 %v4495_v58  ;;  %v3292_v36 = vmul.f32 %v9194_v56, %v11123_v62  ;;  %v9242_v42 = vsel %vm861_vm1, %v3145_v8, %v3146_v49  ;;  %v11127_v58 = vld [vmem:[#allocation99_spill] sm:$0xff] }
 0x308   : > { %4106 = vmatmul.mubr.f32.gmra.mxu1 %v3286_v29  ;;  %3670 = vmatprep.mubr.f32.mxu0 %v8724_v39  ;;  %11122 = vst [vmem:[#allocation41_spill] sm:$0xff] %v9230_v61  ;;  %v3293_v29 = vmul.f32 %v8708_v48, %v11123_v62  ;;  %11125 = vst [vmem:[#allocation165_spill] sm:$0xff] %v9242_v42  ;;  %v3084_v48 = vmul.f32 %v8804_v45, %v11126_v40 }
 0x309   : > { %4110 = vmatprep.mubr.f32.mxu1 %v3290_v18  ;;  %5958 = vmatpush3.msra.mxu0 %v3492_v12  ;;  %v11124_v12 = vld [vmem:[#allocation101_spill] sm:$0xff]  ;;  %v3295_v8 = vmul.f32 %v9206_v16, %v11127_v58  ;;  %v11132_v16 = vld [vmem:[#allocation111_spill] sm:$0xff] }
 0x30a   : > { %5959 = vmatprep.subr.mxu0 %v3491_v19  ;;  %v3083_v18 = vmul.f32 %v8756_v10, %v11124_v12  ;;  %6029 = vmatprep.subr.mxu1 %v4494_v33  ;;  %v3489_v12 = vld [vmem:[#allocation5 + $0x118] sm:$0xff]  ;;  %v3148_v56 = vrot.slane %v3084_v48, 7 }
 0x30b   : > { %3671 = vmatmul.mubr.f32.gmra.mxu0 %v9230_v61  ;;  %6030 = vmatpush3.msra.mxu1 %v4494_v33  ;;  %v11129_v33 = vld [vmem:[#allocation102_spill] sm:$0xff] }
 0x30c   : > { %4111 = vmatmul.mubr.f32.gmra.mxu1 %v3289_v50  ;;  %3675 = vmatprep.mubr.f32.mxu0 %v8772_v59  ;;  %v3296_v50 = vmul.f32 %v8692_v6, %v11127_v58  ;;  %v3488_v6 = vld [vmem:[#allocation5 + $0x110] sm:$0xff]  ;;  %v3298_v48 = vmul.f32 %v9218_v41, %v11129_v33 }
 0x30d   : > { %4115 = vmatprep.mubr.f32.mxu1 %v3293_v29  ;;  %5960 = vmatpush3.msra.mxu0 %v3491_v19  ;;  %v4493_v19 = vld [vmem:[#allocation5 + $0x448] sm:$0xff]  ;;  %v3147_v29 = vrot.slane %v3083_v18, 7  ;;  %v4492_v18 = vld [vmem:[#allocation5 + $0x440] sm:$0xff] }
 0x30e   : > { %5961 = vmatprep.subr.mxu0 %v3490_v20  ;;  %6031 = vmatprep.subr.mxu1 %v4493_v19 }
 0x30f   : > { %3676 = vmatmul.mubr.f32.gmra.mxu0 %v9242_v42  ;;  %v9254_v40 = vsel %vm861_vm1, %v3146_v49, %v3147_v29  ;;  %6032 = vmatpush3.msra.mxu1 %v4493_v19  ;;  %v9266_v49 = vsel %vm861_vm1, %v3147_v29, %v3148_v56  ;;  %v11133_v19 = vld [vmem:[#allocation105_spill] sm:$0xff] }
 0x310   : > { %4116 = vmatmul.mubr.f32.gmra.mxu1 %v3292_v36  ;;  %3680 = vmatprep.mubr.f32.mxu0 %v8756_v10  ;;  %11128 = vst [vmem:[#allocation42_spill] sm:$0xff] %v9254_v40  ;;  %v3299_v36 = vmul.f32 %v8740_v47, %v11129_v33  ;;  %11131 = vst [vmem:[#allocation156_spill] sm:$0xff] %v9266_v49  ;;  %v3086_v47 = vmul.f32 %v8836_v17, %v11132_v16 }
 0x311   : > { %4120 = vmatprep.mubr.f32.mxu1 %v3296_v50  ;;  %5962 = vmatpush3.msra.mxu0 %v3490_v20  ;;  %v11130_v20 = vld [vmem:[#allocation108_spill] sm:$0xff]  ;;  %v3301_v29 = vmul.f32 %v9230_v61, %v11133_v19 }
 0x312   : > { %5963 = vmatprep.subr.mxu0 %v3489_v12  ;;  %v3085_v50 = vmul.f32 %v8788_v15, %v11130_v20  ;;  %6033 = vmatprep.subr.mxu1 %v4492_v18  ;;  %v3487_v20 = vld [vmem:[#allocation5 + $0x108] sm:$0xff]  ;;  %v3150_v41 = vrot.slane %v3086_v47, 7 }
 0x313   : > { %3681 = vmatmul.mubr.f32.gmra.mxu0 %v9254_v40  ;;  %6034 = vmatpush3.msra.mxu1 %v4492_v18  ;;  %v11135_v18 = vld [vmem:[#allocation109_spill] sm:$0xff]  ;;  %v11137_v61 = vld [vmem:[#allocation120_spill] sm:$0xff] }
 0x314   : > { %4121 = vmatmul.mubr.f32.gmra.mxu1 %v3295_v8  ;;  %3685 = vmatprep.mubr.f32.mxu0 %v8804_v45  ;;  %v3302_v8 = vmul.f32 %v8724_v39, %v11133_v19  ;;  %v3486_v39 = vld [vmem:[#allocation5 + $0x100] sm:$0xff]  ;;  %v3304_v47 = vmul.f32 %v9242_v42, %v11135_v18 }
 0x315   : > { %4125 = vmatprep.mubr.f32.mxu1 %v3299_v36  ;;  %5964 = vmatpush3.msra.mxu0 %v3489_v12  ;;  %v4491_v12 = vld [vmem:[#allocation5 + $0x438] sm:$0xff]  ;;  %v3149_v36 = vrot.slane %v3085_v50, 7  ;;  %v4490_v50 = vld [vmem:[#allocation5 + $0x430] sm:$0xff]  ;;  %v4488_v42 = vld [vmem:[#allocation5 + $0x420] sm:$0xff] }
 0x316   : > { %5965 = vmatprep.subr.mxu0 %v3488_v6  ;;  %6035 = vmatprep.subr.mxu1 %v4491_v12 }
 0x317   : > { %3686 = vmatmul.mubr.f32.gmra.mxu0 %v9266_v49  ;;  %v9278_v16 = vsel %vm861_vm1, %v3148_v56, %v3149_v36  ;;  %6036 = vmatpush3.msra.mxu1 %v4491_v12  ;;  %v9290_v56 = vsel %vm861_vm1, %v3149_v36, %v3150_v41  ;;  %v11138_v12 = vld [vmem:[#allocation112_spill] sm:$0xff] }
 0x318   : > { %4126 = vmatmul.mubr.f32.gmra.mxu1 %v3298_v48  ;;  %3690 = vmatprep.mubr.f32.mxu0 %v8788_v15  ;;  %11134 = vst [vmem:[#allocation57_spill] sm:$0xff] %v9278_v16  ;;  %v3305_v48 = vmul.f32 %v8772_v59, %v11135_v18  ;;  %v3088_v59 = vmul.f32 %v8868_v13, %v11137_v61 }
 0x319   : > { %4130 = vmatprep.mubr.f32.mxu1 %v3302_v8  ;;  %5966 = vmatpush3.msra.mxu0 %v3488_v6  ;;  %v11136_v6 = vld [vmem:[#allocation116_spill] sm:$0xff]  ;;  %v3307_v36 = vmul.f32 %v9254_v40, %v11138_v12 }
 0x31a   : > { %5967 = vmatprep.subr.mxu0 %v3487_v20  ;;  %v3087_v8 = vmul.f32 %v8820_v21, %v11136_v6  ;;  %6037 = vmatprep.subr.mxu1 %v4490_v50  ;;  %v3152_v6 = vrot.slane %v3088_v59, 7  ;;  %v11143_v40 = vld [vmem:[#allocation132_spill] sm:$0xff] }
 0x31b   : > { %3691 = vmatmul.mubr.f32.gmra.mxu0 %v9278_v16  ;;  %6038 = vmatpush3.msra.mxu1 %v4490_v50  ;;  %v11140_v50 = vld [vmem:[#allocation117_spill] sm:$0xff] }
 0x31c   : > { %4131 = vmatmul.mubr.f32.gmra.mxu1 %v3301_v29  ;;  %3695 = vmatprep.mubr.f32.mxu0 %v8836_v17  ;;  %v3308_v29 = vmul.f32 %v8756_v10, %v11138_v12  ;;  %v3310_v59 = vmul.f32 %v9266_v49, %v11140_v50  ;;  %v4485_v49 = vld [vmem:[#allocation5 + $0x408] sm:$0xff] }
 0x31d   : > { %4135 = vmatprep.mubr.f32.mxu1 %v3305_v48  ;;  %5968 = vmatpush3.msra.mxu0 %v3487_v20  ;;  %v4489_v48 = vld [vmem:[#allocation5 + $0x428] sm:$0xff]  ;;  %v3151_v20 = vrot.slane %v3087_v8, 7 }
 0x31e   : > { %5969 = vmatprep.subr.mxu0 %v3486_v39  ;;  %6039 = vmatprep.subr.mxu1 %v4489_v48 }
 0x31f   : > { %3696 = vmatmul.mubr.f32.gmra.mxu0 %v9290_v56  ;;  %v9302_v61 = vsel %vm861_vm1, %v3150_v41, %v3151_v20  ;;  %6040 = vmatpush3.msra.mxu1 %v4489_v48  ;;  %v9315_v41 = vsel %vm861_vm1, %v3151_v20, %v3152_v6  ;;  %v11144_v48 = vld [vmem:[#allocation121_spill] sm:$0xff] }
 0x320   : > { %4136 = vmatmul.mubr.f32.gmra.mxu1 %v3304_v47  ;;  %3700 = vmatprep.mubr.f32.mxu0 %v8820_v21  ;;  %11139 = vst [vmem:[#allocation45_spill] sm:$0xff] %v9302_v61  ;;  %v3311_v47 = vmul.f32 %v8804_v45, %v11140_v50  ;;  %11142 = vst [vmem:[#allocation183_spill] sm:$0xff] %v9315_v41  ;;  %v3090_v45 = vmul.f32 %v8898_v1, %v11143_v40 }
 0x321   : > { %4140 = vmatprep.mubr.f32.mxu1 %v3308_v29  ;;  %5970 = vmatpush3.msra.mxu0 %v3486_v39  ;;  %v11141_v39 = vld [vmem:[#allocation127_spill] sm:$0xff]  ;;  %v4487_v29 = vld [vmem:[#allocation5 + $0x418] sm:$0xff]  ;;  %v3313_v20 = vmul.f32 %v9278_v16, %v11144_v48  ;;  %v11149_v16 = vld [vmem:[#allocation140_spill] sm:$0xff] }
 0x322   : > { %4500 = vmatprep.subr.mxu0 %v10946_v2  ;;  %v3089_v8 = vmul.f32 %v8852_v0, %v11141_v39  ;;  %6041 = vmatprep.subr.mxu1 %v4488_v42  ;;  %v4486_v39 = vld [vmem:[#allocation5 + $0x410] sm:$0xff] }
 0x323   : > { %3701 = vmatmul.mubr.f32.gmra.mxu0 %v9302_v61  ;;  %6042 = vmatpush3.msra.mxu1 %v4488_v42  ;;  %v3154_v42 = vrot.slane %v3090_v45, 7 }
 0x324   : > { %4141 = vmatmul.mubr.f32.gmra.mxu1 %v3307_v36  ;;  %3705 = vmatprep.mubr.f32.mxu0 %v8868_v13  ;;  %v3314_v36 = vmul.f32 %v8788_v15, %v11144_v48  ;;  %v11146_v15 = vld [vmem:[#allocation128_spill] sm:$0xff] }
 0x325   : > { %4145 = vmatprep.mubr.f32.mxu1 %v3311_v47  ;;  %6043 = vmatprep.subr.mxu1 %v4487_v29  ;;  %v3153_v47 = vrot.slane %v3089_v8, 7  ;;  %v11147_v8 = vld [vmem:[#allocation136_spill] sm:$0xff]  ;;  %v3316_v45 = vmul.f32 %v9290_v56, %v11146_v15 }
 0x326   : > { %6044 = vmatpush3.msra.mxu1 %v4487_v29  ;;  %v3091_v29 = vmul.f32 %v8882_v35, %v11147_v8 }
 0x327   : > { %3706 = vmatmul.mubr.f32.gmra.mxu0 %v9315_v41  ;;  %v9327_v40 = vsel %vm861_vm1, %v3152_v6, %v3153_v47  ;;  %6045 = vmatprep.subr.mxu1 %v4486_v39  ;;  %v9339_v6 = vsel %vm861_vm1, %v3153_v47, %v3154_v42 }
 0x328   : > { %4146 = vmatmul.mubr.f32.gmra.mxu1 %v3310_v59  ;;  %3710 = vmatprep.mubr.f32.mxu0 %v8852_v0  ;;  %11145 = vst [vmem:[#allocation46_spill] sm:$0xff] %v9327_v40  ;;  %v3317_v59 = vmul.f32 %v8836_v17, %v11146_v15  ;;  %11148 = vst [vmem:[#allocation153_spill] sm:$0xff] %v9339_v6  ;;  %v3092_v17 = vmul.f32 %v8928_v23, %v11149_v16  ;;  %v11152_v16 = vld [vmem:[#allocation137_spill] sm:$0xff] }
 0x329   : > { %4150 = vmatprep.mubr.f32.mxu1 %v3314_v36  ;;  %6046 = vmatpush3.msra.mxu1 %v4486_v39  ;;  %v4484_v36 = vld [vmem:[#allocation5 + $0x400] sm:$0xff]  ;;  %v11150_v39 = vld [vmem:[#allocation133_spill] sm:$0xff] }
 0x32a   : > { %6047 = vmatprep.subr.mxu1 %v4485_v49  ;;  %v3319_v47 = vmul.f32 %v9302_v61, %v11150_v39 }
 0x32b   : > { %3711 = vmatmul.mubr.f32.gmra.mxu0 %v9327_v40  ;;  %6048 = vmatpush3.msra.mxu1 %v4485_v49  ;;  %v3156_v49 = vrot.slane %v3092_v17, 7  ;;  %v11155_v17 = vld [vmem:[#allocation150_spill] sm:$0xff] }
 0x32c   : > { %4151 = vmatmul.mubr.f32.gmra.mxu1 %v3313_v20  ;;  %3715 = vmatprep.mubr.f32.mxu0 %v8898_v1  ;;  %v3320_v20 = vmul.f32 %v8820_v21, %v11150_v39  ;;  %v3323_v21 = vmul.f32 %v8868_v13, %v11152_v16  ;;  %v11156_v13 = vld [vmem:[#allocation141_spill] sm:$0xff] }
 0x32d   : > { %4155 = vmatprep.mubr.f32.mxu1 %v3317_v59  ;;  %6049 = vmatprep.subr.mxu1 %v4484_v36  ;;  %v3155_v59 = vrot.slane %v3091_v29, 7 }
 0x32e   : > { %6050 = vmatpush3.msra.mxu1 %v4484_v36  ;;  %v3322_v36 = vmul.f32 %v9315_v41, %v11152_v16 }
 0x32f   : > { %3716 = vmatmul.mubr.f32.gmra.mxu0 %v9339_v6  ;;  %v9351_v8 = vsel %vm861_vm1, %v3154_v42, %v3155_v59  ;;  %v9363_v42 = vsel %vm861_vm1, %v3155_v59, %v3156_v49 }
 0x330   : > { %4156 = vmatmul.mubr.f32.gmra.mxu1 %v3316_v45  ;;  %3720 = vmatprep.mubr.f32.mxu0 %v8882_v35  ;;  %11151 = vst [vmem:[#allocation169_spill] sm:$0xff] %v9351_v8  ;;  %v11153_v45 = vld [vmem:[#allocation146_spill] sm:$0xff]  ;;  %11154 = vst [vmem:[#allocation48_spill] sm:$0xff] %v9363_v42 }
 0x331   : > { %4160 = vmatprep.mubr.f32.mxu1 %v3320_v20  ;;  %v3093_v29 = vmul.f32 %v8912_v38, %v11153_v45  ;;  %v3094_v20 = vmul.f32 %v8957_v4, %v11155_v17  ;;  %v11158_v17 = vld [vmem:[#allocation147_spill] sm:$0xff] }
 0x332   : > { %v3329_v61 = vmul.f32 %v8898_v1, %v11158_v17  ;;  %v11162_v1 = vld [vmem:[#allocation151_spill] sm:$0xff] }
 0x333   : > { %3721 = vmatmul.mubr.f32.gmra.mxu0 %v9351_v8  ;;  %v3157_v45 = vrot.slane %v3093_v29, 7  ;;  %v3158_v41 = vrot.slane %v3094_v20, 7  ;;  %v11161_v20 = vld [vmem:[#allocation158_spill] sm:$0xff] }
 0x334   : > { %4161 = vmatmul.mubr.f32.gmra.mxu1 %v3319_v47  ;;  %3725 = vmatprep.mubr.f32.mxu0 %v8928_v23  ;;  %v3326_v47 = vmul.f32 %v8852_v0, %v11156_v13 }
 0x335   : > { %4165 = vmatprep.mubr.f32.mxu1 %v3323_v21  ;;  %v3325_v21 = vmul.f32 %v9327_v40, %v11156_v13  ;;  %v9375_v59 = vsel %vm861_vm1, %v3156_v49, %v3157_v45  ;;  %v9387_v49 = vsel %vm861_vm1, %v3157_v45, %v3158_v41  ;;  %v3096_v40 = vmul.f32 %v8983_v60, %v11161_v20  ;;  %v11164_v20 = vld [vmem:[#allocation155_spill] sm:$0xff] }
 0x336   : > { %11157 = vst [vmem:[#allocation49_spill] sm:$0xff] %v9375_v59  ;;  %11160 = vst [vmem:[#allocation171_spill] sm:$0xff] %v9387_v49  ;;  %v3335_v0 = vmul.f32 %v8928_v23, %v11164_v20  ;;  %v11168_v23 = vld [vmem:[#allocation159_spill] sm:$0xff] }
 0x337   : > { %3726 = vmatmul.mubr.f32.gmra.mxu0 %v9363_v42 }
 0x338   : > { %4166 = vmatmul.mubr.f32.gmra.mxu1 %v3322_v36  ;;  %3730 = vmatprep.mubr.f32.mxu0 %v8912_v38  ;;  %v11159_v36 = vld [vmem:[#allocation154_spill] sm:$0xff] }
 0x339   : > { %4170 = vmatprep.mubr.f32.mxu1 %v3326_v47  ;;  %v3095_v29 = vmul.f32 %v8941_v43, %v11159_v36  ;;  %v3328_v47 = vmul.f32 %v9339_v6, %v11158_v17  ;;  %v3160_v6 = vrot.slane %v3096_v40, 7  ;;  %v11167_v40 = vld [vmem:[#allocation166_spill] sm:$0xff] }
 0x33b   : > { %3731 = vmatmul.mubr.f32.gmra.mxu0 %v9375_v59  ;;  %v3159_v36 = vrot.slane %v3095_v29, 7 }
 0x33c   : > { %4171 = vmatmul.mubr.f32.gmra.mxu1 %v3325_v21  ;;  %3735 = vmatprep.mubr.f32.mxu0 %v8957_v4  ;;  %v3332_v21 = vmul.f32 %v8882_v35, %v11162_v1 }
 0x33d   : > { %4175 = vmatprep.mubr.f32.mxu1 %v3329_v61  ;;  %v3331_v61 = vmul.f32 %v9351_v8, %v11162_v1  ;;  %v9399_v45 = vsel %vm861_vm1, %v3158_v41, %v3159_v36  ;;  %v9411_v41 = vsel %vm861_vm1, %v3159_v36, %v3160_v6  ;;  %v3098_v8 = vmul.f32 %v9007_v55, %v11167_v40  ;;  %v11170_v40 = vld [vmem:[#allocation163_spill] sm:$0xff] }
 0x33e   : > { %11163 = vst [vmem:[#allocation52_spill] sm:$0xff] %v9399_v45  ;;  %11166 = vst [vmem:[#allocation53_spill] sm:$0xff] %v9411_v41  ;;  %v3341_v35 = vmul.f32 %v8957_v4, %v11170_v40  ;;  %v11208_v4 = vld [vmem:[#allocation124_spill] sm:$0xff] }
 0x33f   : > { %3736 = vmatmul.mubr.f32.gmra.mxu0 %v9387_v49 }
 0x340   : > { %4176 = vmatmul.mubr.f32.gmra.mxu1 %v3328_v47  ;;  %3740 = vmatprep.mubr.f32.mxu0 %v8941_v43  ;;  %v11165_v47 = vld [vmem:[#allocation162_spill] sm:$0xff] }
 0x341   : > { %4180 = vmatprep.mubr.f32.mxu1 %v3332_v21  ;;  %v3097_v29 = vmul.f32 %v8968_v25, %v11165_v47  ;;  %v3334_v21 = vmul.f32 %v9363_v42, %v11164_v20  ;;  %v3162_v42 = vrot.slane %v3098_v8, 7 }
 0x343   : > { %3741 = vmatmul.mubr.f32.gmra.mxu0 %v9399_v45  ;;  %v3161_v47 = vrot.slane %v3097_v29, 7  ;;  %v3340_v29 = vmul.f32 %v9387_v49, %v11170_v40 }
 0x344   : > { %4181 = vmatmul.mubr.f32.gmra.mxu1 %v3331_v61  ;;  %3745 = vmatprep.mubr.f32.mxu0 %v8983_v60  ;;  %v3338_v61 = vmul.f32 %v8912_v38, %v11168_v23  ;;  %v11213_v38 = vld [vmem:[#allocation14_spill] sm:$0xff] }
 0x345   : > { %4185 = vmatprep.mubr.f32.mxu1 %v3335_v0  ;;  %v3337_v0 = vmul.f32 %v9375_v59, %v11168_v23  ;;  %v9423_v36 = vsel %vm861_vm1, %v3160_v6, %v3161_v47  ;;  %v11172_v6 = vld [vmem:[#allocation167_spill] sm:$0xff]  ;;  %v11211_v59 = vld [vmem:[#allocation61_spill] sm:$0xff] }
 0x346   : > { %11169 = vst [vmem:[#allocation64_spill] sm:$0xff] %v9423_v36  ;;  %v3344_v8 = vmul.f32 %v8941_v43, %v11172_v6  ;;  %v11206_v43 = vld [vmem:[#allocation118_spill] sm:$0xff] }
 0x347   : > { %3746 = vmatmul.mubr.f32.gmra.mxu0 %v9411_v41 }
 0x348   : > { %4186 = vmatmul.mubr.f32.gmra.mxu1 %v3334_v21  ;;  %3750 = vmatprep.mubr.f32.mxu0 %v8968_v25  ;;  %v9433_v21 = vsel %vm861_vm1, %v3161_v47, %v3162_v42  ;;  %v11175_v47 = vld [vmem:[#allocation170_spill] sm:$0xff] }
 0x349   : > { %4190 = vmatprep.mubr.f32.mxu1 %v3338_v61  ;;  %11171 = vst [vmem:[#allocation63_spill] sm:$0xff] %v9433_v21  ;;  %v3343_v61 = vmul.f32 %v9399_v45, %v11172_v6  ;;  %v3347_v49 = vmul.f32 %v8983_v60, %v11175_v47  ;;  %v11202_v60 = vld [vmem:[#allocation114_spill] sm:$0xff]  ;;  %v11204_v45 = vld [vmem:[#allocation44_spill] sm:$0xff] }
 0x34b   : > { %3751 = vmatmul.mubr.f32.gmra.mxu0 %v9423_v36 }
 0x34c   : > { %4191 = vmatmul.mubr.f32.gmra.mxu1 %v3337_v0  ;;  %3755 = vmatprep.mubr.f32.mxu0 %v9007_v55 }
 0x34d   : > { %4195 = vmatprep.mubr.f32.mxu1 %v3341_v35  ;;  %v11173_v35 = vrot.slane %v9064_v63, 7 }
 0x34f   : > { %3756 = vmatmul.mubr.f32.gmra.mxu0 %v9433_v21  ;;  %v9445_v0 = vsel %vm861_vm1, %v3162_v42, %v11173_v35  ;;  %v3264_v42 = vmul.f32 %v9078_v34, %v11091_v37  ;;  %v3267_v35 = vmul.f32 %v9098_v9, %v11097_v30  ;;  %v3270_v37 = vmul.f32 %v8645_v5, %v11100_v53  ;;  %v4464_v53 = vld [vmem:[#allocation5 + $0x360] sm:$0xff] }
 0x350   : > { %4196 = vmatmul.mubr.f32.gmra.mxu1 %v3340_v29  ;;  %3760 = vmatprep.mubr.f32.mxu0 %v8993_v27  ;;  %11174 = vst [vmem:[#allocation56_spill] sm:$0xff] %v9445_v0  ;;  %v3346_v29 = vmul.f32 %v9411_v41, %v11175_v47  ;;  %v11200_v41 = vld [vmem:[#allocation39_spill] sm:$0xff] }
 0x351   : > { %4200 = vmatprep.mubr.f32.mxu1 %v3344_v8  ;;  %v11176_v8 = vld [vmem:[#allocation173_spill] sm:$0xff] }
 0x352   : > { %v3350_v63 = vmul.f32 %v8968_v25, %v11176_v8  ;;  %v3349_v7 = vmul.f32 %v9423_v36, %v11176_v8  ;;  %v11196_v36 = vld [vmem:[#allocation106_spill] sm:$0xff]  ;;  %v11198_v25 = vld [vmem:[#allocation103_spill] sm:$0xff] }
 0x353   : > { %3761 = vmatmul.mubr.f32.gmra.mxu0 %v9445_v0 }
 0x354   : > { %4201 = vmatmul.mubr.f32.gmra.mxu1 %v3343_v61  ;;  %3765 = vmatprep.mubr.f32.mxu0 %v9030_v31  ;;  %v11186_v31 = vld [vmem:[#allocation187_spill] sm:$0xff] }
 0x355   : > { %4205 = vmatprep.mubr.f32.mxu1 %v3347_v49  ;;  %v11177_v49 = vld [vmem:[#allocation175_spill] sm:$0xff] }
 0x356   : > { %v3353_v61 = vmul.f32 %v9007_v55, %v11177_v49  ;;  %v11194_v55 = vld [vmem:[#allocation33_spill] sm:$0xff] }
 0x357   : > { %3766 = vmatmul.mubr.f32.gmra.mxu0 %v9107_v57 }
 0x358   : > { %4206 = vmatmul.mubr.f32.gmra.mxu1 %v3346_v29  ;;  %3770 = vmatprep.mubr.f32.mxu0 %v9028_v32  ;;  %v4467_v29 = vld [vmem:[#allocation5 + $0x378] sm:$0xff] }
 0x359   : > { %4210 = vmatprep.mubr.f32.mxu1 %v3350_v63  ;;  %v3352_v63 = vmul.f32 %v9433_v21, %v11177_v49  ;;  %v11178_v32 = vld [vmem:[#allocation178_spill] sm:$0xff]  ;;  %v11192_v21 = vld [vmem:[#allocation19_spill] sm:$0xff] }
 0x35a   : > { %v3356_v57 = vmul.f32 %v8993_v27, %v11178_v32  ;;  %v3355_v30 = vmul.f32 %v9445_v0, %v11178_v32  ;;  %v11188_v0 = vld [vmem:[#allocation81_spill] sm:$0xff]  ;;  %v11190_v27 = vld [vmem:[#allocation192_spill] sm:$0xff] }
 0x35b   : > { %3771 = vmatmul.mubr.f32.gmra.mxu0 %v9127_v52  ;;  %v4466_v52 = vld [vmem:[#allocation5 + $0x370] sm:$0xff] }
 0x35c   : > { %4211 = vmatmul.mubr.f32.gmra.mxu1 %v3349_v7  ;;  %5971 = vmatprep.mubr.f32.mxu0 %v3264_v42  ;;  %v3273_v7 = vmul.f32 %v8669_v24, %v11104_v3  ;;  %v4465_v42 = vld [vmem:[#allocation5 + $0x368] sm:$0xff] }
 0x35d   : > { %4215 = vmatprep.mubr.f32.mxu1 %v3353_v61  ;;  %v11179_v61 = vld [vmem:[#allocation180_spill] sm:$0xff] }
 0x35f   : > { %5972 = vmatmul.mubr.f32.vlgmr.msra.gmra.mxu0 %v3267_v35  ;;  %v3360_v35 = vmul.f32 %v8673_v46, %v11179_v61 }
 0x360   : > { %4216 = vmatmul.mubr.f32.gmra.mxu1 %v3352_v63  ;;  %4501 = vmatpush1.msra.mxu0 %v4467_v29  ;;  %v11180_v29 = vld [vmem:[#allocation181_spill] sm:$0xff] }
 0x361   : > { %4220 = vmatprep.mubr.f32.mxu1 %v3356_v57  ;;  %5974 = vmatprep.mubr.f32.mxu0 %v3270_v37  ;;  %v3276_v57 = vmul.f32 %v8673_v46, %v11105_v14  ;;  %v3363_v63 = vmul.f32 %v8700_v51, %v11180_v29  ;;  %v4463_v37 = vld [vmem:[#allocation5 + $0x358] sm:$0xff] }
 0x362   : > { %4502 = vmatprep.subr.mxu0 %v10946_v2  ;;  %v11181_v14 = vld [vmem:[#allocation190_spill] sm:$0xff] }
 0x363   : > { %4503 = vmatpush1.msra.mxu0 %v4466_v52  ;;  %v3279_v52 = vmul.f32 %v8700_v51, %v11109_v44  ;;  %v3282_v46 = vmul.f32 %v11181_v14, %v11111_v28  ;;  %v11183_v51 = vld [vmem:[#allocation184_spill] sm:$0xff]  ;;  %v11184_v44 = vld [vmem:[#allocation77_spill] sm:$0xff] }
 0x364   : > { %4504 = vmatprep.subr.mxu0 %v10946_v2  ;;  %4221 = vmatmul.mubr.f32.gmra.mxu1 %v3355_v30  ;;  %v11182_v30 = vld [vmem:[#allocation182_spill] sm:$0xff] }
 0x365   : > { %5975 = vmatmul.mubr.f32.gmra.mxu0 %v3273_v7  ;;  %6051 = vmatprep.mubr.f32.mxu1 %v3360_v35  ;;  %v9487_v3 = vpop.f32.mrf.mxu1  ;;  %v3366_v7 = vmul.f32 %v11181_v14, %v11182_v30  ;;  %v4462_v35 = vld [vmem:[#allocation5 + $0x350] sm:$0xff] }
 0x366   : > { %4505 = vmatpush1.msra.mxu0 %v4465_v42  ;;  %5977 = vmatprep.mubr.f32.mxu0 %v3276_v57  ;;  %v3369_v57 = vmul.f32 %v11184_v44, %v11183_v51 }
 0x367   : > { %4506 = vmatprep.subr.mxu0 %v10946_v2  ;;  %v9494_v42 = vpop.f32.mrf.mxu1 }
 0x368   : > { %4507 = vmatpush1.msra.mxu0 %v4464_v53  ;;  %6052 = vmatmul.mubr.f32.vlgmr.msra.gmra.mxu1 %v3363_v63  ;;  %v3285_v53 = vmul.f32 %v11184_v44, %v11115_v22  ;;  %v4461_v63 = vld [vmem:[#allocation5 + $0x348] sm:$0xff]  ;;  %v4460_v22 = vld [vmem:[#allocation5 + $0x340] sm:$0xff]  ;;  %v11187_v44 = vld [vmem:[#allocation189_spill] sm:$0xff] }
 0x369   : > { %4508 = vmatprep.subr.mxu0 %v10946_v2  ;;  %5978 = vmatmul.mubr.f32.gmra.mxu0 %v3279_v52  ;;  %v11185_v52 = vld [vmem:[#allocation84_spill] sm:$0xff] }
 0x36a   : > { %4509 = vmatpush1.msra.mxu0 %v4463_v37  ;;  %5980 = vmatprep.mubr.f32.mxu0 %v3282_v46  ;;  %v9501_v28 = vpop.f32.mrf.mxu1  ;;  %v3288_v14 = vmul.f32 %v11185_v52, %v11117_v26  ;;  %v3372_v37 = vmul.f32 %v11185_v52, %v11186_v31 }
 0x36b   : > { %4510 = vmatprep.subr.mxu0 %v10946_v2  ;;  %6054 = vmatprep.mubr.f32.mxu1 %v3366_v7  ;;  %v3375_v7 = vmul.f32 %v11188_v0, %v11187_v44 }
 0x36c   : > { %4511 = vmatpush1.msra.mxu0 %v4462_v35  ;;  %6055 = vmatmul.mubr.f32.gmra.mxu1 %v3369_v57  ;;  %v9508_v46 = vpop.f32.mrf.mxu1  ;;  %v3291_v35 = vmul.f32 %v11188_v0, %v11121_v11  ;;  %v4459_v57 = vld [vmem:[#allocation5 + $0x338] sm:$0xff]  ;;  %v4458_v11 = vld [vmem:[#allocation5 + $0x330] sm:$0xff] }
 0x36d   : > { %4512 = vmatprep.subr.mxu0 %v10946_v2  ;;  %5981 = vmatmul.mubr.f32.gmra.mxu0 %v3285_v53  ;;  %v11189_v53 = vld [vmem:[#allocation18_spill] sm:$0xff]  ;;  %v11191_v0 = vld [vmem:[#allocation97_spill] sm:$0xff] }
 0x36e   : > { %4513 = vmatpush1.msra.mxu0 %v4461_v63  ;;  %5983 = vmatprep.mubr.f32.mxu0 %v3288_v14  ;;  %v9515_v26 = vpop.f32.mrf.mxu1  ;;  %v3294_v52 = vmul.f32 %v11189_v53, %v11123_v62  ;;  %v3378_v63 = vmul.f32 %v11189_v53, %v11190_v27 }
 0x36f   : > { %4514 = vmatprep.subr.mxu0 %v10946_v2  ;;  %6057 = vmatprep.mubr.f32.mxu1 %v3372_v37  ;;  %v3381_v37 = vmul.f32 %v11192_v21, %v11191_v0 }
 0x370   : > { %4515 = vmatpush1.msra.mxu0 %v4460_v22  ;;  %6058 = vmatmul.mubr.f32.gmra.mxu1 %v3375_v7  ;;  %v9522_v14 = vpop.f32.mrf.mxu1  ;;  %v3297_v22 = vmul.f32 %v11192_v21, %v11127_v58  ;;  %v4457_v7 = vld [vmem:[#allocation5 + $0x328] sm:$0xff]  ;;  %v4456_v58 = vld [vmem:[#allocation5 + $0x320] sm:$0xff] }
 0x371   : > { %4516 = vmatprep.subr.mxu0 %v10946_v2  ;;  %5984 = vmatmul.mubr.f32.gmra.mxu0 %v3291_v35  ;;  %v11193_v35 = vld [vmem:[#allocation73_spill] sm:$0xff]  ;;  %v11195_v21 = vld [vmem:[#allocation36_spill] sm:$0xff] }
 0x372   : > { %4517 = vmatpush1.msra.mxu0 %v4459_v57  ;;  %5986 = vmatprep.mubr.f32.mxu0 %v3294_v52  ;;  %v9529_v62 = vpop.f32.mrf.mxu1  ;;  %v3300_v53 = vmul.f32 %v11193_v35, %v11129_v33  ;;  %v3384_v57 = vmul.f32 %v11193_v35, %v11194_v55 }
 0x373   : > { %4518 = vmatprep.subr.mxu0 %v10946_v2  ;;  %6060 = vmatprep.mubr.f32.mxu1 %v3378_v63  ;;  %v3387_v63 = vmul.f32 %v11196_v36, %v11195_v21 }
 0x374   : > { %4519 = vmatpush1.msra.mxu0 %v4458_v11  ;;  %6061 = vmatmul.mubr.f32.gmra.mxu1 %v3381_v37  ;;  %v9536_v52 = vpop.f32.mrf.mxu1  ;;  %v3303_v11 = vmul.f32 %v11196_v36, %v11133_v19  ;;  %v4455_v37 = vld [vmem:[#allocation5 + $0x318] sm:$0xff]  ;;  %v4454_v19 = vld [vmem:[#allocation5 + $0x310] sm:$0xff]  ;;  %v11199_v36 = vld [vmem:[#allocation43_spill] sm:$0xff] }
 0x375   : > { %4520 = vmatprep.subr.mxu0 %v10946_v2  ;;  %5987 = vmatmul.mubr.f32.gmra.mxu0 %v3297_v22  ;;  %v11197_v22 = vld [vmem:[#allocation110_spill] sm:$0xff] }
 0x376   : > { %4521 = vmatpush1.msra.mxu0 %v4457_v7  ;;  %5989 = vmatprep.mubr.f32.mxu0 %v3300_v53  ;;  %v9543_v33 = vpop.f32.mrf.mxu1  ;;  %v3306_v35 = vmul.f32 %v11197_v22, %v11135_v18  ;;  %v3390_v7 = vmul.f32 %v11197_v22, %v11198_v25 }
 0x377   : > { %4522 = vmatprep.subr.mxu0 %v10946_v2  ;;  %6063 = vmatprep.mubr.f32.mxu1 %v3384_v57  ;;  %v3393_v57 = vmul.f32 %v11200_v41, %v11199_v36 }
 0x378   : > { %4523 = vmatpush1.msra.mxu0 %v4456_v58  ;;  %6064 = vmatmul.mubr.f32.gmra.mxu1 %v3387_v63  ;;  %v9550_v53 = vpop.f32.mrf.mxu1  ;;  %v3309_v58 = vmul.f32 %v11200_v41, %v11138_v12  ;;  %v4453_v63 = vld [vmem:[#allocation5 + $0x308] sm:$0xff]  ;;  %v4452_v12 = vld [vmem:[#allocation5 + $0x300] sm:$0xff]  ;;  %v11203_v41 = vld [vmem:[#allocation113_spill] sm:$0xff] }
 0x379   : > { %4524 = vmatprep.subr.mxu0 %v10946_v2  ;;  %5990 = vmatmul.mubr.f32.gmra.mxu0 %v3303_v11  ;;  %v11201_v11 = vld [vmem:[#allocation107_spill] sm:$0xff] }
 0x37a   : > { %4525 = vmatpush1.msra.mxu0 %v4455_v37  ;;  %5992 = vmatprep.mubr.f32.mxu0 %v3306_v35  ;;  %v3312_v22 = vmul.f32 %v11201_v11, %v11140_v50  ;;  %v3396_v37 = vmul.f32 %v11201_v11, %v11202_v60 }
 0x37b   : > { %4526 = vmatprep.subr.mxu0 %v10946_v2  ;;  %6066 = vmatprep.mubr.f32.mxu1 %v3390_v7  ;;  %v9557_v18 = vpop.f32.mrf.mxu1  ;;  %v3399_v7 = vmul.f32 %v11204_v45, %v11203_v41 }
 0x37c   : > { %4527 = vmatpush1.msra.mxu0 %v4454_v19  ;;  %6067 = vmatmul.mubr.f32.gmra.mxu1 %v3393_v57  ;;  %v3315_v19 = vmul.f32 %v11204_v45, %v11144_v48  ;;  %v4483_v57 = vld [vmem:[#allocation5 + $0x3f8] sm:$0xff]  ;;  %v4482_v48 = vld [vmem:[#allocation5 + $0x3f0] sm:$0xff] }
 0x37d   : > { %4528 = vmatprep.subr.mxu0 %v10946_v2  ;;  %5993 = vmatmul.mubr.f32.gmra.mxu0 %v3309_v58  ;;  %v9564_v35 = vpop.f32.mrf.mxu1  ;;  %v11205_v58 = vld [vmem:[#allocation50_spill] sm:$0xff] }
 0x37e   : > { %4529 = vmatpush1.msra.mxu0 %v4453_v63  ;;  %5995 = vmatprep.mubr.f32.mxu0 %v3312_v22  ;;  %v3318_v11 = vmul.f32 %v11205_v58, %v11146_v15  ;;  %v3402_v63 = vmul.f32 %v11205_v58, %v11206_v43  ;;  %v11207_v45 = vld [vmem:[#allocation122_spill] sm:$0xff] }
 0x37f   : > { %4530 = vmatprep.subr.mxu0 %v10946_v2  ;;  %6069 = vmatprep.mubr.f32.mxu1 %v3396_v37  ;;  %v9571_v50 = vpop.f32.mrf.mxu1  ;;  %v3405_v37 = vmul.f32 %v11208_v4, %v11207_v45 }
 0x380   : > { %4531 = vmatpush1.msra.mxu0 %v4452_v12  ;;  %6070 = vmatmul.mubr.f32.gmra.mxu1 %v3399_v7  ;;  %v3321_v12 = vmul.f32 %v11208_v4, %v11150_v39  ;;  %v4481_v7 = vld [vmem:[#allocation5 + $0x3e8] sm:$0xff]  ;;  %v4480_v4 = vld [vmem:[#allocation5 + $0x3e0] sm:$0xff]  ;;  %v11212_v39 = vld [vmem:[#allocation125_spill] sm:$0xff] }
 0x381   : > { %4532 = vmatprep.subr.mxu0 %v10946_v2  ;;  %5996 = vmatmul.mubr.f32.gmra.mxu0 %v3315_v19  ;;  %v9578_v22 = vpop.f32.mrf.mxu1  ;;  %v11210_v19 = vld [vmem:[#allocation58_spill] sm:$0xff] }
 0x382   : > { %4533 = vmatpush2.msra.mxu0 %v4483_v57  ;;  %5998 = vmatprep.mubr.f32.mxu0 %v3318_v11  ;;  %v3324_v58 = vmul.f32 %v11210_v19, %v11152_v16  ;;  %v3408_v57 = vmul.f32 %v11210_v19, %v11211_v59 }
 0x383   : > { %4534 = vmatprep.subr.mxu0 %v10946_v2  ;;  %6072 = vmatprep.mubr.f32.mxu1 %v3402_v63  ;;  %v9585_v15 = vpop.f32.mrf.mxu1  ;;  %v3411_v63 = vmul.f32 %v11213_v38, %v11212_v39  ;;  %v11218_v39 = vld [vmem:[#allocation17_spill] sm:$0xff] }
 0x384   : > { %11209 = vst [vmem:[#allocation55_spill] sm:$0xff] %v9585_v15  ;;  %4535 = vmatpush2.msra.mxu0 %v4482_v48  ;;  %6073 = vmatmul.mubr.f32.gmra.mxu1 %v3405_v37  ;;  %v3327_v48 = vmul.f32 %v11213_v38, %v11156_v13  ;;  %v4479_v37 = vld [vmem:[#allocation5 + $0x3d8] sm:$0xff]  ;;  %v11216_v15 = vld [vmem:[#allocation123_spill] sm:$0xff]  ;;  %v4478_v13 = vld [vmem:[#allocation5 + $0x3d0] sm:$0xff] }
 0x385   : > { %4536 = vmatprep.subr.mxu0 %v10946_v2  ;;  %5999 = vmatmul.mubr.f32.gmra.mxu0 %v3321_v12  ;;  %v9592_v11 = vpop.f32.mrf.mxu1  ;;  %v11215_v12 = vld [vmem:[#allocation13_spill] sm:$0xff]  ;;  %v11217_v38 = vld [vmem:[#allocation130_spill] sm:$0xff] }
 0x386   : > { %4537 = vmatpush2.msra.mxu0 %v4481_v7  ;;  %6001 = vmatprep.mubr.f32.mxu0 %v3324_v58  ;;  %v3330_v19 = vmul.f32 %v11215_v12, %v11158_v17  ;;  %v3414_v7 = vmul.f32 %v11215_v12, %v11216_v15 }
 0x387   : > { %4538 = vmatprep.subr.mxu0 %v10946_v2  ;;  %6075 = vmatprep.mubr.f32.mxu1 %v3408_v57  ;;  %v9599_v16 = vpop.f32.mrf.mxu1  ;;  %v3417_v57 = vmul.f32 %v11218_v39, %v11217_v38  ;;  %v11223_v38 = vld [vmem:[#allocation23_spill] sm:$0xff] }
 0x388   : > { %11214 = vst [vmem:[#allocation59_spill] sm:$0xff] %v9599_v16  ;;  %4539 = vmatpush2.msra.mxu0 %v4480_v4  ;;  %6076 = vmatmul.mubr.f32.gmra.mxu1 %v3411_v63  ;;  %v3333_v4 = vmul.f32 %v11218_v39, %v11162_v1  ;;  %v4477_v63 = vld [vmem:[#allocation5 + $0x3c8] sm:$0xff]  ;;  %v11221_v16 = vld [vmem:[#allocation126_spill] sm:$0xff]  ;;  %v4476_v1 = vld [vmem:[#allocation5 + $0x3c0] sm:$0xff] }
 0x389   : > { %4540 = vmatprep.subr.mxu0 %v10946_v2  ;;  %6002 = vmatmul.mubr.f32.gmra.mxu0 %v3327_v48  ;;  %v9606_v58 = vpop.f32.mrf.mxu1  ;;  %v11220_v48 = vld [vmem:[#allocation20_spill] sm:$0xff] }
 0x38a   : > { %4541 = vmatpush2.msra.mxu0 %v4479_v37  ;;  %6004 = vmatprep.mubr.f32.mxu0 %v3330_v19  ;;  %v3336_v12 = vmul.f32 %v11220_v48, %v11164_v20  ;;  %v3420_v37 = vmul.f32 %v11220_v48, %v11221_v16  ;;  %v11222_v39 = vld [vmem:[#allocation68_spill] sm:$0xff] }
 0x38b   : > { %4542 = vmatprep.subr.mxu0 %v10946_v2  ;;  %6078 = vmatprep.mubr.f32.mxu1 %v3414_v7  ;;  %v9613_v17 = vpop.f32.mrf.mxu1  ;;  %v3423_v7 = vmul.f32 %v11223_v38, %v11222_v39  ;;  %v11228_v39 = vld [vmem:[#allocation26_spill] sm:$0xff] }
 0x38c   : > { %11219 = vst [vmem:[#allocation66_spill] sm:$0xff] %v9613_v17  ;;  %4543 = vmatpush2.msra.mxu0 %v4478_v13  ;;  %6079 = vmatmul.mubr.f32.gmra.mxu1 %v3417_v57  ;;  %v3339_v13 = vmul.f32 %v11223_v38, %v11168_v23  ;;  %v4475_v57 = vld [vmem:[#allocation5 + $0x3b8] sm:$0xff]  ;;  %v4474_v23 = vld [vmem:[#allocation5 + $0x3b0] sm:$0xff]  ;;  %v11227_v38 = vld [vmem:[#allocation131_spill] sm:$0xff] }
 0x38d   : > { %4544 = vmatprep.subr.mxu0 %v10946_v2  ;;  %6005 = vmatmul.mubr.f32.gmra.mxu0 %v3333_v4  ;;  %v9620_v19 = vpop.f32.mrf.mxu1  ;;  %v11225_v4 = vld [vmem:[#allocation24_spill] sm:$0xff]  ;;  %v11226_v17 = vld [vmem:[#allocation134_spill] sm:$0xff] }
 0x38e   : > { %4545 = vmatpush2.msra.mxu0 %v4477_v63  ;;  %6007 = vmatprep.mubr.f32.mxu0 %v3336_v12  ;;  %v3342_v48 = vmul.f32 %v11225_v4, %v11170_v40  ;;  %v3426_v63 = vmul.f32 %v11225_v4, %v11226_v17 }
 0x38f   : > { %4546 = vmatprep.subr.mxu0 %v10946_v2  ;;  %6081 = vmatprep.mubr.f32.mxu1 %v3420_v37  ;;  %v9627_v20 = vpop.f32.mrf.mxu1  ;;  %v3429_v37 = vmul.f32 %v11228_v39, %v11227_v38  ;;  %v11233_v38 = vld [vmem:[#allocation30_spill] sm:$0xff] }
 0x390   : > { %11224 = vst [vmem:[#allocation60_spill] sm:$0xff] %v9627_v20  ;;  %4547 = vmatpush2.msra.mxu0 %v4476_v1  ;;  %6082 = vmatmul.mubr.f32.gmra.mxu1 %v3423_v7  ;;  %v3345_v1 = vmul.f32 %v11228_v39, %v11172_v6  ;;  %v4473_v7 = vld [vmem:[#allocation5 + $0x3a8] sm:$0xff]  ;;  %v11231_v20 = vld [vmem:[#allocation74_spill] sm:$0xff]  ;;  %v4472_v6 = vld [vmem:[#allocation5 + $0x3a0] sm:$0xff] }
 0x391   : > { %4548 = vmatprep.subr.mxu0 %v10946_v2  ;;  %6008 = vmatmul.mubr.f32.gmra.mxu0 %v3339_v13  ;;  %v9634_v12 = vpop.f32.mrf.mxu1  ;;  %v11230_v13 = vld [vmem:[#allocation27_spill] sm:$0xff]  ;;  %v11232_v39 = vld [vmem:[#allocation138_spill] sm:$0xff] }
 0x392   : > { %4549 = vmatpush2.msra.mxu0 %v4475_v57  ;;  %6010 = vmatprep.mubr.f32.mxu0 %v3342_v48  ;;  %v3348_v4 = vmul.f32 %v11230_v13, %v11175_v47  ;;  %v3432_v57 = vmul.f32 %v11230_v13, %v11231_v20 }
 0x393   : > { %4550 = vmatprep.subr.mxu0 %v10946_v2  ;;  %6084 = vmatprep.mubr.f32.mxu1 %v3426_v63  ;;  %v9641_v40 = vpop.f32.mrf.mxu1  ;;  %v3435_v63 = vmul.f32 %v11233_v38, %v11232_v39  ;;  %v11238_v39 = vld [vmem:[#allocation145_spill] sm:$0xff] }
 0x394   : > { %11229 = vst [vmem:[#allocation71_spill] sm:$0xff] %v9641_v40  ;;  %4551 = vmatpush2.msra.mxu0 %v4474_v23  ;;  %6085 = vmatmul.mubr.f32.gmra.mxu1 %v3429_v37  ;;  %v3351_v23 = vmul.f32 %v11233_v38, %v11176_v8  ;;  %v4471_v37 = vld [vmem:[#allocation5 + $0x398] sm:$0xff]  ;;  %v11236_v40 = vld [vmem:[#allocation135_spill] sm:$0xff]  ;;  %v4470_v8 = vld [vmem:[#allocation5 + $0x390] sm:$0xff] }
 0x395   : > { %4552 = vmatprep.subr.mxu0 %v10946_v2  ;;  %6011 = vmatmul.mubr.f32.gmra.mxu0 %v3345_v1  ;;  %v9648_v48 = vpop.f32.mrf.mxu1  ;;  %v11235_v1 = vld [vmem:[#allocation157_spill] sm:$0xff]  ;;  %v11237_v38 = vld [vmem:[#allocation142_spill] sm:$0xff] }
 0x396   : > { %4553 = vmatpush2.msra.mxu0 %v4473_v7  ;;  %6013 = vmatprep.mubr.f32.mxu0 %v3348_v4  ;;  %v3354_v13 = vmul.f32 %v11235_v1, %v11177_v49  ;;  %v3438_v7 = vmul.f32 %v11235_v1, %v11236_v40 }
 0x397   : > { %4554 = vmatprep.subr.mxu0 %v10946_v2  ;;  %6087 = vmatprep.mubr.f32.mxu1 %v3432_v57  ;;  %v9655_v47 = vpop.f32.mrf.mxu1  ;;  %v3441_v57 = vmul.f32 %v11238_v39, %v11237_v38 }
 0x398   : > { %11234 = vst [vmem:[#allocation160_spill] sm:$0xff] %v9655_v47  ;;  %4555 = vmatpush2.msra.mxu0 %v4472_v6  ;;  %6088 = vmatmul.mubr.f32.gmra.mxu1 %v3435_v63  ;;  %v3357_v6 = vmul.f32 %v11238_v39, %v11178_v32  ;;  %v4469_v63 = vld [vmem:[#allocation5 + $0x388] sm:$0xff]  ;;  %v11241_v47 = vld [vmem:[#allocation139_spill] sm:$0xff] }
 0x399   : > { %4556 = vmatprep.subr.mxu0 %v10946_v2  ;;  %6014 = vmatmul.mubr.f32.gmra.mxu0 %v3351_v23  ;;  %v9662_v4 = vpop.f32.mrf.mxu1  ;;  %v11240_v23 = vld [vmem:[#allocation62_spill] sm:$0xff]  ;;  %v4468_v32 = vld [vmem:[#allocation5 + $0x380] sm:$0xff]  ;;  %v11243_v39 = vld [vmem:[#allocation144_spill] sm:$0xff] }
 0x39a   : > { %4557 = vmatpush2.msra.mxu0 %v4471_v37  ;;  %6016 = vmatprep.mubr.f32.mxu0 %v3354_v13  ;;  %v3359_v1 = vmul.f32 %v11240_v23, %v11179_v61  ;;  %v3444_v37 = vmul.f32 %v9078_v34, %v11241_v47  ;;  %v11245_v34 = vld [vmem:[#allocation143_spill] sm:$0xff] }
 0x39b   : > { %4558 = vmatprep.subr.mxu0 %v10946_v2  ;;  %6090 = vmatprep.mubr.f32.mxu1 %v3438_v7  ;;  %v9669_v49 = vpop.f32.mrf.mxu1  ;;  %v3447_v7 = vmul.f32 %v9098_v9, %v11243_v39  ;;  %v11246_v9 = vld [vmem:[#allocation174_spill] sm:$0xff] }
 0x39c   : > { %11239 = vst [vmem:[#allocation67_spill] sm:$0xff] %v9669_v49  ;;  %4559 = vmatpush2.msra.mxu0 %v4470_v8  ;;  %6091 = vmatmul.mubr.f32.gmra.mxu1 %v3441_v57  ;;  %v11244_v8 = vld [vmem:[#allocation164_spill] sm:$0xff] }
 0x39d   : > { %4560 = vmatprep.subr.mxu0 %v10946_v2  ;;  %6017 = vmatmul.mubr.f32.gmra.mxu0 %v3357_v6  ;;  %v9676_v13 = vpop.f32.mrf.mxu1  ;;  %v3358_v57 = vmul.f32 %v11244_v8, %v11179_v61  ;;  %v11247_v61 = vld [vmem:[#allocation148_spill] sm:$0xff] }
 0x39e   : > { %11242 = vst [vmem:[#allocation75_spill] sm:$0xff] %v9676_v13  ;;  %4561 = vmatpush2.msra.mxu0 %v4469_v63  ;;  %4564 = vmatprep.mubr.f32.mxu0 %v3359_v1  ;;  %v3617_v49 = vpop.f32.mrf.mxu0  ;;  %v3450_v13 = vmul.f32 %v8645_v5, %v11245_v34  ;;  %v3362_v63 = vmul.f32 %v11246_v9, %v11180_v29  ;;  %v11250_v9 = vld [vmem:[#allocation168_spill] sm:$0xff] }
 0x39f   : > { %4562 = vmatprep.subr.mxu0 %v10946_v2  ;;  %6093 = vmatprep.mubr.f32.mxu1 %v3444_v37  ;;  %v3843_v6 = vadd.f32 %v9494_v42, %v3617_v49  ;;  %v9684_v23 = vpop.f32.mrf.mxu1  ;;  %v3453_v42 = vmul.f32 %v8669_v24, %v11247_v61  ;;  %v11248_v49 = vld [vmem:[#allocation152_spill] sm:$0xff] }
 0x3a0   : > { %4563 = vmatpush2.msra.mxu0 %v4468_v32  ;;  %6094 = vmatmul.mubr.f32.gmra.mxu1 %v3447_v7  ;;  %v3619_v1 = vpop.f32.mrf.mxu0  ;;  %v3361_v37 = vmul.f32 %v11248_v49, %v11180_v29  ;;  %v11249_v7 = vld [vmem:[#allocation185_spill] sm:$0xff] }
 0x3a1   : > { %4565 = vmatmul.mubr.f32.vlgmr.msra.gmra.mxu0 %v3358_v57  ;;  %6096 = vmatprep.mubr.f32.mxu1 %v3450_v13  ;;  %v9690_v39 = vpop.f32.mrf.mxu1  ;;  %v3365_v8 = vmul.f32 %v11249_v7, %v11182_v30 }
 0x3a2   : > { %4569 = vmatprep.mubr.f32.mxu0 %v3362_v63  ;;  %v3622_v2 = vpop.f32.mrf.mxu0  ;;  %v3364_v63 = vmul.f32 %v11250_v9, %v11182_v30  ;;  %v11252_v9 = vld [vmem:[#allocation177_spill] sm:$0xff] }
 0x3a3   : > { %v3848_v5 = vadd.f32 %v9487_v3, %v3622_v2  ;;  %v11251_v3 = vld [vmem:[#allocation65_spill] sm:$0xff] }
 0x3a4   : > { %v9697_v32 = vpop.f32.mrf.mxu1  ;;  %6097 = vmatmul.mubr.f32.gmra.mxu1 %v3453_v42  ;;  %v3624_v57 = vpop.f32.mrf.mxu0  ;;  %v3368_v2 = vmul.f32 %v11251_v3, %v11183_v51 }
 0x3a5   : > { %4570 = vmatmul.mubr.f32.gmra.mxu0 %v3361_v37  ;;  %v3367_v37 = vmul.f32 %v9158_v54, %v11183_v51  ;;  %v11254_v51 = vld [vmem:[#allocation176_spill] sm:$0xff] }
 0x3a6   : > { %4574 = vmatprep.mubr.f32.mxu0 %v3365_v8  ;;  %v9701_v13 = vpop.f32.mrf.mxu1 }
 0x3a7   : > { %v3627_v24 = vpop.f32.mrf.mxu0 }
 0x3a8   : > { %v3853_v1 = vadd.f32 %v9508_v46, %v3627_v24  ;;  %v4067_v29 = vpop.f32.mrf.mxu1  ;;  %v3371_v46 = vmul.f32 %v11252_v9, %v11186_v31 }
 0x3a9   : > { %v9708_v49 = vadd.f32 %v4067_v29, %v3843_v6  ;;  %4575 = vmatmul.mubr.f32.gmra.mxu0 %v3364_v63  ;;  %v3629_v42 = vpop.f32.mrf.mxu0  ;;  %v11253_v63 = vld [vmem:[#allocation37_spill] sm:$0xff] }
 0x3aa   : > { %4579 = vmatprep.mubr.f32.mxu0 %v3368_v2  ;;  %v4069_v7 = vpop.f32.mrf.mxu1  ;;  %v3370_v29 = vmul.f32 %v11253_v63, %v11186_v31  ;;  %v11256_v31 = vld [vmem:[#allocation80_spill] sm:$0xff] }
 0x3ab   : > { %v3632_v8 = vpop.f32.mrf.mxu0 }
 0x3ac   : > { %v3858_v57 = vadd.f32 %v9501_v28, %v3632_v8  ;;  %v4072_v30 = vpop.f32.mrf.mxu1  ;;  %v3374_v28 = vmul.f32 %v11254_v51, %v11187_v44  ;;  %v11258_v51 = vld [vmem:[#allocation70_spill] sm:$0xff] }
 0x3ad   : > { %v9715_v24 = vadd.f32 %v4072_v30, %v3848_v5  ;;  %4580 = vmatmul.mubr.f32.gmra.mxu0 %v3367_v37  ;;  %v3634_v3 = vpop.f32.mrf.mxu0  ;;  %v11255_v37 = vld [vmem:[#allocation51_spill] sm:$0xff] }
 0x3ae   : > { %4584 = vmatprep.mubr.f32.mxu0 %v3371_v46  ;;  %v4074_v6 = vpop.f32.mrf.mxu1  ;;  %v3373_v30 = vmul.f32 %v11255_v37, %v11187_v44  ;;  %v3377_v3 = vmul.f32 %v11256_v31, %v11190_v27 }
 0x3af   : > { %v3637_v2 = vpop.f32.mrf.mxu0 }
 0x3b0   : > { %v3863_v42 = vadd.f32 %v9522_v14, %v3637_v2  ;;  %v4077_v54 = vpop.f32.mrf.mxu1 }
 0x3b1   : > { %v9722_v7 = vadd.f32 %v4077_v54, %v3853_v1  ;;  %4585 = vmatmul.mubr.f32.gmra.mxu0 %v3370_v29  ;;  %v3639_v8 = vpop.f32.mrf.mxu0  ;;  %v11257_v1 = vld [vmem:[#allocation38_spill] sm:$0xff] }
 0x3b2   : > { %4589 = vmatprep.mubr.f32.mxu0 %v3374_v28  ;;  %v4079_v5 = vpop.f32.mrf.mxu1  ;;  %v3376_v29 = vmul.f32 %v11257_v1, %v11190_v27  ;;  %v3380_v28 = vmul.f32 %v11258_v51, %v11191_v0  ;;  %v11260_v27 = vld [vmem:[#allocation188_spill] sm:$0xff]  ;;  %v11261_v1 = vld [vmem:[#allocation54_spill] sm:$0xff] }
 0x3b3   : > { %v3642_v9 = vpop.f32.mrf.mxu0 }
 0x3b4   : > { %v4082_v46 = vpop.f32.mrf.mxu1 }
 0x3b5   : > { %v9728_v6 = vadd.f32 %v4082_v46, %v3858_v57  ;;  %4590 = vmatmul.mubr.f32.gmra.mxu0 %v3373_v30  ;;  %v3644_v14 = vpop.f32.mrf.mxu0  ;;  %v11259_v57 = vld [vmem:[#allocation149_spill] sm:$0xff]  ;;  %v3868_v30 = vadd.f32 %v9515_v26, %v3642_v9  ;;  %v11262_v26 = vld [vmem:[#allocation179_spill] sm:$0xff] }
 0x3b6   : > { %4594 = vmatprep.mubr.f32.mxu0 %v3377_v3  ;;  %v4084_v63 = vpop.f32.mrf.mxu1  ;;  %v3379_v37 = vmul.f32 %v11259_v57, %v11191_v0  ;;  %v3383_v3 = vmul.f32 %v11260_v27, %v11194_v55  ;;  %v3386_v9 = vmul.f32 %v11262_v26, %v11195_v21  ;;  %v11263_v57 = vld [vmem:[#allocation41_spill] sm:$0xff] }
 0x3b7   : > { %v3647_v2 = vpop.f32.mrf.mxu0 }
 0x3b8   : > { %v4087_v54 = vpop.f32.mrf.mxu1 }
 0x3b9   : > { %v9734_v44 = vadd.f32 %v4087_v54, %v3863_v42  ;;  %4595 = vmatmul.mubr.f32.gmra.mxu0 %v3376_v29  ;;  %v3649_v8 = vpop.f32.mrf.mxu0  ;;  %v3382_v29 = vmul.f32 %v11261_v1, %v11194_v55  ;;  %v3873_v54 = vadd.f32 %v9536_v52, %v3647_v2  ;;  %v11264_v52 = vld [vmem:[#allocation69_spill] sm:$0xff] }
 0x3ba   : > { %4599 = vmatprep.mubr.f32.mxu0 %v3380_v28  ;;  %v4089_v5 = vpop.f32.mrf.mxu1  ;;  %v3389_v2 = vmul.f32 %v11264_v52, %v11198_v25 }
 0x3bb   : > { %v3652_v46 = vpop.f32.mrf.mxu0 }
 0x3bc   : > { %v4092_v31 = vpop.f32.mrf.mxu1 }
 0x3bd   : > { %v9741_v14 = vadd.f32 %v4092_v31, %v3868_v30  ;;  %4600 = vmatmul.mubr.f32.gmra.mxu0 %v3379_v37  ;;  %v3654_v63 = vpop.f32.mrf.mxu0  ;;  %v3385_v37 = vmul.f32 %v11263_v57, %v11195_v21  ;;  %v3878_v30 = vadd.f32 %v9529_v62, %v3652_v46  ;;  %v3392_v62 = vmul.f32 %v8756_v10, %v11199_v36 }
 0x3be   : > { %4604 = vmatprep.mubr.f32.mxu0 %v3383_v3  ;;  %v4094_v42 = vpop.f32.mrf.mxu1 }
 0x3bf   : > { %v3657_v51 = vpop.f32.mrf.mxu0  ;;  %v11265_v42 = vld [vmem:[#allocation165_spill] sm:$0xff] }
 0x3c0   : > { %v4097_v0 = vpop.f32.mrf.mxu1  ;;  %v3388_v1 = vmul.f32 %v11265_v42, %v11198_v25 }
 0x3c1   : > { %v9748_v28 = vadd.f32 %v4097_v0, %v3873_v54  ;;  %4605 = vmatmul.mubr.f32.gmra.mxu0 %v3382_v29  ;;  %v3659_v8 = vpop.f32.mrf.mxu0  ;;  %v3883_v29 = vadd.f32 %v9550_v53, %v3657_v51  ;;  %v11267_v53 = vld [vmem:[#allocation191_spill] sm:$0xff] }
 0x3c2   : > { %4609 = vmatprep.mubr.f32.mxu0 %v3386_v9  ;;  %v4099_v5 = vpop.f32.mrf.mxu1  ;;  %v11266_v9 = vld [vmem:[#allocation42_spill] sm:$0xff]  ;;  %v3395_v51 = vmul.f32 %v11267_v53, %v11202_v60 }
 0x3c3   : > { %v3662_v31 = vpop.f32.mrf.mxu0  ;;  %v3391_v8 = vmul.f32 %v11266_v9, %v11199_v36 }
 0x3c4   : > { %v4102_v55 = vpop.f32.mrf.mxu1  ;;  %v3888_v5 = vadd.f32 %v9543_v33, %v3662_v31  ;;  %v11269_v33 = vld [vmem:[#allocation193_spill] sm:$0xff] }
 0x3c5   : > { %v9755_v27 = vadd.f32 %v4102_v55, %v3878_v30  ;;  %4610 = vmatmul.mubr.f32.gmra.mxu0 %v3385_v37  ;;  %v3664_v3 = vpop.f32.mrf.mxu0  ;;  %v11268_v55 = vld [vmem:[#allocation156_spill] sm:$0xff]  ;;  %v3398_v31 = vmul.f32 %v11269_v33, %v11203_v41 }
 0x3c6   : > { %4614 = vmatprep.mubr.f32.mxu0 %v3389_v2  ;;  %v4104_v63 = vpop.f32.mrf.mxu1  ;;  %v3394_v52 = vmul.f32 %v11268_v55, %v11202_v60  ;;  %v11273_v55 = vld [vmem:[#allocation45_spill] sm:$0xff] }
 0x3c7   : > { %v3667_v54 = vpop.f32.mrf.mxu0 }
 0x3c8   : > { %v4107_v21 = vpop.f32.mrf.mxu1  ;;  %v3893_v2 = vadd.f32 %v9564_v35, %v3667_v54  ;;  %v11271_v35 = vld [vmem:[#allocation100_spill] sm:$0xff] }
 0x3c9   : > { %v9762_v46 = vadd.f32 %v4107_v21, %v3883_v29  ;;  %4615 = vmatmul.mubr.f32.gmra.mxu0 %v3388_v1  ;;  %v3669_v0 = vpop.f32.mrf.mxu0  ;;  %v11270_v29 = vld [vmem:[#allocation57_spill] sm:$0xff]  ;;  %v3401_v54 = vmul.f32 %v11271_v35, %v11206_v43 }
 0x3ca   : > { %4619 = vmatprep.mubr.f32.mxu0 %v3392_v62  ;;  %v4109_v26 = vpop.f32.mrf.mxu1  ;;  %v3397_v21 = vmul.f32 %v11270_v29, %v11203_v41 }
 0x3cb   : > { %v3672_v57 = vpop.f32.mrf.mxu0 }
 0x3cc   : > { %v4112_v25 = vpop.f32.mrf.mxu1  ;;  %v3898_v62 = vadd.f32 %v9557_v18, %v3672_v57  ;;  %v11272_v18 = vld [vmem:[#allocation32_spill] sm:$0xff] }
 0x3cd   : > { %v9769_v37 = vadd.f32 %v4112_v25, %v3888_v5  ;;  %4620 = vmatmul.mubr.f32.gmra.mxu0 %v3391_v8  ;;  %v3674_v10 = vpop.f32.mrf.mxu0  ;;  %v3400_v5 = vmul.f32 %v9290_v56, %v11206_v43  ;;  %v3404_v57 = vmul.f32 %v11272_v18, %v11207_v45  ;;  %v11274_v56 = vld [vmem:[#allocation40_spill] sm:$0xff] }
 0x3ce   : > { %4624 = vmatprep.mubr.f32.mxu0 %v3395_v51  ;;  %v4114_v30 = vpop.f32.mrf.mxu1 }
 0x3cf   : > { %v3677_v3 = vpop.f32.mrf.mxu0 }
 0x3d0   : > { %v4117_v36 = vpop.f32.mrf.mxu1  ;;  %v3903_v25 = vadd.f32 %v9578_v22, %v3677_v3  ;;  %v3407_v22 = vmul.f32 %v11274_v56, %v11211_v59  ;;  %v11282_v56 = vld [vmem:[#allocation130_spill] sm:$0xff] }
 0x3d1   : > { %v9776_v63 = vadd.f32 %v4117_v36, %v3893_v2  ;;  %4625 = vmatmul.mubr.f32.gmra.mxu0 %v3394_v52  ;;  %v3679_v42 = vpop.f32.mrf.mxu0  ;;  %v3403_v52 = vmul.f32 %v11273_v55, %v11207_v45 }
 0x3d2   : > { %4629 = vmatprep.mubr.f32.mxu0 %v3398_v31  ;;  %v4119_v1 = vpop.f32.mrf.mxu1  ;;  %v11275_v42 = vld [vmem:[#allocation183_spill] sm:$0xff] }
 0x3d3   : > { %v3682_v0 = vpop.f32.mrf.mxu0  ;;  %v3406_v1 = vmul.f32 %v11275_v42, %v11211_v59 }
 0x3d4   : > { %v4122_v60 = vpop.f32.mrf.mxu1  ;;  %v3908_v2 = vadd.f32 %v9571_v50, %v3682_v0  ;;  %v11277_v50 = vld [vmem:[#allocation115_spill] sm:$0xff] }
 0x3d5   : > { %v9783_v26 = vadd.f32 %v4122_v60, %v3898_v62  ;;  %4630 = vmatmul.mubr.f32.gmra.mxu0 %v3397_v21  ;;  %v3684_v9 = vpop.f32.mrf.mxu0  ;;  %v11276_v62 = vld [vmem:[#allocation125_spill] sm:$0xff] }
 0x3d6   : > { %4634 = vmatprep.mubr.f32.mxu0 %v3401_v54  ;;  %v4124_v8 = vpop.f32.mrf.mxu1  ;;  %v3410_v0 = vmul.f32 %v11277_v50, %v11276_v62  ;;  %v11278_v9 = vld [vmem:[#allocation46_spill] sm:$0xff] }
 0x3d7   : > { %v3687_v53 = vpop.f32.mrf.mxu0  ;;  %v3409_v8 = vmul.f32 %v11278_v9, %v11276_v62  ;;  %v11287_v9 = vld [vmem:[#allocation48_spill] sm:$0xff] }
 0x3d8   : > { %v4127_v41 = vpop.f32.mrf.mxu1  ;;  %v3913_v29 = vadd.f32 %v9592_v11, %v3687_v53  ;;  %v11280_v11 = vld [vmem:[#allocation119_spill] sm:$0xff] }
 0x3d9   : > { %v9790_v51 = vadd.f32 %v4127_v41, %v3903_v25  ;;  %4635 = vmatmul.mubr.f32.gmra.mxu0 %v3400_v5  ;;  %v3689_v10 = vpop.f32.mrf.mxu0  ;;  %v11279_v5 = vld [vmem:[#allocation55_spill] sm:$0xff]  ;;  %v3413_v53 = vmul.f32 %v11280_v11, %v11216_v15  ;;  %v11288_v11 = vld [vmem:[#allocation68_spill] sm:$0xff] }
 0x3da   : > { %4639 = vmatprep.mubr.f32.mxu0 %v3404_v57  ;;  %v4129_v30 = vpop.f32.mrf.mxu1 }
 0x3db   : > { %v3692_v36 = vpop.f32.mrf.mxu0  ;;  %v11281_v30 = vld [vmem:[#allocation153_spill] sm:$0xff] }
 0x3dc   : > { %v4132_v43 = vpop.f32.mrf.mxu1  ;;  %v3918_v25 = vadd.f32 %v11279_v5, %v3692_v36  ;;  %v3412_v55 = vmul.f32 %v11281_v30, %v11216_v15  ;;  %v11283_v36 = vld [vmem:[#allocation47_spill] sm:$0xff] }
 0x3dd   : > { %v9797_v3 = vadd.f32 %v4132_v43, %v3908_v2  ;;  %4640 = vmatmul.mubr.f32.gmra.mxu0 %v3403_v52  ;;  %v3694_v33 = vpop.f32.mrf.mxu0 }
 0x3de   : > { %4644 = vmatprep.mubr.f32.mxu0 %v3407_v22  ;;  %v4134_v31 = vpop.f32.mrf.mxu1  ;;  %v3416_v22 = vmul.f32 %v11283_v36, %v11282_v56 }
 0x3df   : > { %v3697_v21 = vpop.f32.mrf.mxu0 }
 0x3e0   : > { %v4137_v45 = vpop.f32.mrf.mxu1  ;;  %v3923_v52 = vadd.f32 %v9606_v58, %v3697_v21  ;;  %v11286_v58 = vld [vmem:[#allocation15_spill] sm:$0xff] }
 0x3e1   : > { %v9804_v60 = vadd.f32 %v4137_v45, %v3913_v29  ;;  %4645 = vmatmul.mubr.f32.gmra.mxu0 %v3406_v1  ;;  %v3699_v35 = vpop.f32.mrf.mxu0  ;;  %v11284_v1 = vld [vmem:[#allocation169_spill] sm:$0xff]  ;;  %v11285_v45 = vld [vmem:[#allocation59_spill] sm:$0xff]  ;;  %v3419_v21 = vmul.f32 %v11286_v58, %v11221_v16 }
 0x3e2   : > { %4649 = vmatprep.mubr.f32.mxu0 %v3410_v0  ;;  %v4139_v54 = vpop.f32.mrf.mxu1  ;;  %v3415_v29 = vmul.f32 %v11284_v1, %v11282_v56  ;;  %v11293_v1 = vld [vmem:[#allocation171_spill] sm:$0xff] }
 0x3e3   : > { %v3702_v41 = vpop.f32.mrf.mxu0  ;;  %v11294_v58 = vld [vmem:[#allocation131_spill] sm:$0xff] }
 0x3e4   : > { %v4142_v59 = vpop.f32.mrf.mxu1  ;;  %v3928_v62 = vadd.f32 %v11285_v45, %v3702_v41  ;;  %v11289_v41 = vld [vmem:[#allocation129_spill] sm:$0xff] }
 0x3e5   : > { %v9811_v18 = vadd.f32 %v4142_v59, %v3918_v25  ;;  %4650 = vmatmul.mubr.f32.gmra.mxu0 %v3409_v8  ;;  %v3704_v57 = vpop.f32.mrf.mxu0  ;;  %v3418_v8 = vmul.f32 %v11287_v9, %v11221_v16 }
 0x3e6   : > { %4654 = vmatprep.mubr.f32.mxu0 %v3413_v53  ;;  %v4144_v10 = vpop.f32.mrf.mxu1  ;;  %v3422_v53 = vmul.f32 %v11289_v41, %v11288_v11 }
 0x3e7   : > { %v3707_v2 = vpop.f32.mrf.mxu0 }
 0x3e8   : > { %v4147_v43 = vpop.f32.mrf.mxu1  ;;  %v3933_v5 = vadd.f32 %v9620_v19, %v3707_v2  ;;  %v11292_v19 = vld [vmem:[#allocation11_spill] sm:$0xff] }
 0x3e9   : > { %v9818_v33 = vadd.f32 %v4147_v43, %v3923_v52  ;;  %4655 = vmatmul.mubr.f32.gmra.mxu0 %v3412_v55  ;;  %v3709_v31 = vpop.f32.mrf.mxu0  ;;  %v11290_v55 = vld [vmem:[#allocation49_spill] sm:$0xff]  ;;  %v11291_v43 = vld [vmem:[#allocation66_spill] sm:$0xff]  ;;  %v3425_v2 = vmul.f32 %v11292_v19, %v11226_v17 }
 0x3ea   : > { %4659 = vmatprep.mubr.f32.mxu0 %v3416_v22  ;;  %v4149_v42 = vpop.f32.mrf.mxu1  ;;  %v3421_v52 = vmul.f32 %v11290_v55, %v11288_v11  ;;  %v11299_v55 = vld [vmem:[#allocation53_spill] sm:$0xff]  ;;  %v11300_v19 = vld [vmem:[#allocation138_spill] sm:$0xff] }
 0x3eb   : > { %v3712_v50 = vpop.f32.mrf.mxu0 }
 0x3ec   : > { %v4152_v15 = vpop.f32.mrf.mxu1  ;;  %v3938_v56 = vadd.f32 %v11291_v43, %v3712_v50  ;;  %v11295_v50 = vld [vmem:[#allocation12_spill] sm:$0xff] }
 0x3ed   : > { %v9825_v0 = vadd.f32 %v4152_v15, %v3928_v62  ;;  %4660 = vmatmul.mubr.f32.gmra.mxu0 %v3415_v29  ;;  %v3714_v35 = vpop.f32.mrf.mxu0  ;;  %v3424_v29 = vmul.f32 %v11293_v1, %v11226_v17 }
 0x3ee   : > { %4664 = vmatprep.mubr.f32.mxu0 %v3419_v21  ;;  %v4154_v54 = vpop.f32.mrf.mxu1  ;;  %v3428_v21 = vmul.f32 %v11295_v50, %v11294_v58 }
 0x3ef   : > { %v3717_v25 = vpop.f32.mrf.mxu0 }
 0x3f0   : > { %v4157_v59 = vpop.f32.mrf.mxu1  ;;  %v3943_v45 = vadd.f32 %v9634_v12, %v3717_v25  ;;  %v11298_v12 = vld [vmem:[#allocation21_spill] sm:$0xff] }
 0x3f1   : > { %v9832_v57 = vadd.f32 %v4157_v59, %v3933_v5  ;;  %4665 = vmatmul.mubr.f32.gmra.mxu0 %v3418_v8  ;;  %v3719_v10 = vpop.f32.mrf.mxu0  ;;  %v11296_v8 = vld [vmem:[#allocation52_spill] sm:$0xff]  ;;  %v3431_v25 = vmul.f32 %v11298_v12, %v11231_v20 }
 0x3f2   : > { %4669 = vmatprep.mubr.f32.mxu0 %v3422_v53  ;;  %v4159_v30 = vpop.f32.mrf.mxu1  ;;  %v3427_v5 = vmul.f32 %v11296_v8, %v11294_v58  ;;  %v11297_v59 = vld [vmem:[#allocation60_spill] sm:$0xff]  ;;  %v11305_v8 = vld [vmem:[#allocation63_spill] sm:$0xff] }
 0x3f3   : > { %v3722_v36 = vpop.f32.mrf.mxu0 }
 0x3f4   : > { %v4162_v16 = vpop.f32.mrf.mxu1  ;;  %v3948_v11 = vadd.f32 %v11297_v59, %v3722_v36  ;;  %v11301_v36 = vld [vmem:[#allocation16_spill] sm:$0xff] }
 0x3f5   : > { %v9839_v22 = vadd.f32 %v4162_v16, %v3938_v56  ;;  %4670 = vmatmul.mubr.f32.gmra.mxu0 %v3421_v52  ;;  %v3724_v31 = vpop.f32.mrf.mxu0  ;;  %v3430_v52 = vmul.f32 %v11299_v55, %v11231_v20  ;;  %v11307_v55 = vld [vmem:[#allocation56_spill] sm:$0xff] }
 0x3f6   : > { %4674 = vmatprep.mubr.f32.mxu0 %v3425_v2  ;;  %v4164_v42 = vpop.f32.mrf.mxu1  ;;  %v3434_v2 = vmul.f32 %v11301_v36, %v11300_v19 }
 0x3f7   : > { %v3727_v62 = vpop.f32.mrf.mxu0 }
 0x3f8   : > { %v4167_v15 = vpop.f32.mrf.mxu1  ;;  %v3953_v43 = vadd.f32 %v9648_v48, %v3727_v62  ;;  %v11304_v48 = vld [vmem:[#allocation25_spill] sm:$0xff] }
 0x3f9   : > { %v9846_v35 = vadd.f32 %v4167_v15, %v3943_v45  ;;  %4675 = vmatmul.mubr.f32.gmra.mxu0 %v3424_v29  ;;  %v3729_v54 = vpop.f32.mrf.mxu0  ;;  %v11302_v29 = vld [vmem:[#allocation64_spill] sm:$0xff]  ;;  %v11303_v15 = vld [vmem:[#allocation71_spill] sm:$0xff]  ;;  %v3437_v62 = vmul.f32 %v11304_v48, %v11236_v40 }
 0x3fa   : > { %4679 = vmatprep.mubr.f32.mxu0 %v3428_v21  ;;  %v4169_v9 = vpop.f32.mrf.mxu1  ;;  %v3433_v45 = vmul.f32 %v11302_v29, %v11300_v19 }
 0x3fb   : > { %v3732_v41 = vpop.f32.mrf.mxu0 }
 0x3fc   : > { %v4172_v17 = vpop.f32.mrf.mxu1  ;;  %v3958_v58 = vadd.f32 %v11303_v15, %v3732_v41  ;;  %v11306_v41 = vld [vmem:[#allocation22_spill] sm:$0xff] }
 0x3fd   : > { %v9853_v53 = vadd.f32 %v4172_v17, %v3948_v11  ;;  %4680 = vmatmul.mubr.f32.gmra.mxu0 %v3427_v5  ;;  %v3734_v10 = vpop.f32.mrf.mxu0  ;;  %v3436_v5 = vmul.f32 %v11305_v8, %v11236_v40  ;;  %v3440_v12 = vmul.f32 %v11306_v41, %v11237_v38  ;;  %v11311_v15 = vld [vmem:[#allocation34_spill] sm:$0xff]  ;;  %v11314_v8 = vld [vmem:[#allocation67_spill] sm:$0xff] }
 0x3fe   : > { %4684 = vmatprep.mubr.f32.mxu0 %v3431_v25  ;;  %v4174_v30 = vpop.f32.mrf.mxu1 }
 0x3ff   : > { %v3737_v56 = vpop.f32.mrf.mxu0 }
 0x400   : > { %v4177_v16 = vpop.f32.mrf.mxu1  ;;  %v3963_v59 = vadd.f32 %v9662_v4, %v3737_v56  ;;  %v11309_v4 = vld [vmem:[#allocation29_spill] sm:$0xff] }
 0x401   : > { %v9860_v31 = vadd.f32 %v4177_v16, %v3953_v43  ;;  %4685 = vmatmul.mubr.f32.gmra.mxu0 %v3430_v52  ;;  %v3739_v42 = vpop.f32.mrf.mxu0  ;;  %v3439_v52 = vmul.f32 %v11307_v55, %v11237_v38  ;;  %v11308_v43 = vld [vmem:[#allocation160_spill] sm:$0xff]  ;;  %v3443_v56 = vmul.f32 %v11309_v4, %v11241_v47  ;;  %v11318_v4 = vld [vmem:[#allocation186_spill] sm:$0xff] }
 0x402   : > { %4689 = vmatprep.mubr.f32.mxu0 %v3434_v2  ;;  %v4179_v1 = vpop.f32.mrf.mxu1 }
 0x403   : > { %v3742_v50 = vpop.f32.mrf.mxu0  ;;  %v11310_v1 = vld [vmem:[#allocation75_spill] sm:$0xff] }
 0x404   : > { %v4182_v20 = vpop.f32.mrf.mxu1  ;;  %v3968_v16 = vadd.f32 %v11308_v43, %v3742_v50  ;;  %v11313_v50 = vld [vmem:[#allocation28_spill] sm:$0xff] }
 0x405   : > { %v9867_v21 = vadd.f32 %v4182_v20, %v3958_v58  ;;  %4690 = vmatmul.mubr.f32.gmra.mxu0 %v3433_v45  ;;  %v3744_v54 = vpop.f32.mrf.mxu0  ;;  %v3442_v58 = vmul.f32 %v11311_v15, %v11241_v47  ;;  %v11312_v20 = vld [vmem:[#allocation144_spill] sm:$0xff] }
 0x406   : > { %4694 = vmatprep.mubr.f32.mxu0 %v3437_v62  ;;  %v4184_v9 = vpop.f32.mrf.mxu1  ;;  %v3446_v48 = vmul.f32 %v11313_v50, %v11312_v20 }
 0x407   : > { %v3747_v11 = vpop.f32.mrf.mxu0 }
 0x408   : > { %v4187_v17 = vpop.f32.mrf.mxu1  ;;  %v3973_v29 = vadd.f32 %v11310_v1, %v3747_v11 }
 0x409   : > { %v9874_v25 = vadd.f32 %v4187_v17, %v3963_v59  ;;  %4695 = vmatmul.mubr.f32.gmra.mxu0 %v3436_v5  ;;  %v3749_v10 = vpop.f32.mrf.mxu0  ;;  %v11315_v17 = vld [vmem:[#allocation35_spill] sm:$0xff] }
 0x40a   : > { %4699 = vmatprep.mubr.f32.mxu0 %v3440_v12  ;;  %v4189_v30 = vpop.f32.mrf.mxu1  ;;  %v3445_v11 = vmul.f32 %v11315_v17, %v11312_v20  ;;  %v11316_v12 = vld [vmem:[#allocation172_spill] sm:$0xff] }
 0x40b   : > { %v3752_v19 = vpop.f32.mrf.mxu0  ;;  %v3449_v47 = vmul.f32 %v11316_v12, %v11245_v34 }
 0x40c   : > { %v4192_v40 = vpop.f32.mrf.mxu1  ;;  %v3978_v5 = vadd.f32 %v11314_v8, %v3752_v19 }
 0x40d   : > { %v9881_v36 = vadd.f32 %v4192_v40, %v3968_v16  ;;  %4700 = vmatmul.mubr.f32.gmra.mxu0 %v3439_v52  ;;  %v3754_v2 = vpop.f32.mrf.mxu0  ;;  %v11317_v16 = vld [vmem:[#allocation31_spill] sm:$0xff] }
 0x40e   : > { %4704 = vmatprep.mubr.f32.mxu0 %v3443_v56  ;;  %v4194_v42 = vpop.f32.mrf.mxu1  ;;  %v3448_v19 = vmul.f32 %v11317_v16, %v11245_v34  ;;  %v3452_v56 = vmul.f32 %v11318_v4, %v11247_v61 }
 0x40f   : > { %v3757_v45 = vpop.f32.mrf.mxu0 }
 0x410   : > { %v4197_v38 = vpop.f32.mrf.mxu1  ;;  %v3983_v52 = vadd.f32 %v9690_v39, %v3757_v45 }
 0x411   : > { %v9888_v62 = vadd.f32 %v4197_v38, %v3973_v29  ;;  %4705 = vmatmul.mubr.f32.gmra.mxu0 %v3442_v58  ;;  %v3759_v54 = vpop.f32.mrf.mxu0  ;;  %v11319_v29 = vld [vmem:[#allocation161_spill] sm:$0xff] }
 0x412   : > { %4709 = vmatprep.mubr.f32.mxu0 %v3446_v48  ;;  %v4199_v9 = vpop.f32.mrf.mxu1  ;;  %v3451_v15 = vmul.f32 %v11319_v29, %v11247_v61 }
 0x413   : > { %v3762_v59 = vpop.f32.mrf.mxu0 }
 0x414   : > { %v4202_v41 = vpop.f32.mrf.mxu1  ;;  %v3988_v58 = vadd.f32 %v9684_v23, %v3762_v59 }
 0x415   : > { %v9895_v10 = vadd.f32 %v4202_v41, %v3978_v5  ;;  %4710 = vmatmul.mubr.f32.gmra.mxu0 %v3445_v11  ;;  %v3764_v30 = vpop.f32.mrf.mxu0 }
 0x416   : > { %4714 = vmatprep.mubr.f32.mxu0 %v3449_v47  ;;  %v4204_v55 = vpop.f32.mrf.mxu1 }
 0x417   : > { %v3767_v43 = vpop.f32.mrf.mxu0 }
 0x418   : > { %v4207_v40 = vpop.f32.mrf.mxu1  ;;  %v3993_v50 = vadd.f32 %v9701_v13, %v3767_v43 }
 0x419   : > { %v9902_v2 = vadd.f32 %v4207_v40, %v3983_v52  ;;  %4715 = vmatmul.mubr.f32.gmra.mxu0 %v3448_v19  ;;  %v3769_v42 = vpop.f32.mrf.mxu0 }
 0x41a   : > { %4719 = vmatprep.mubr.f32.mxu0 %v3452_v56  ;;  %v4209_v1 = vpop.f32.mrf.mxu1 }
 0x41b   : > { %v3772_v39 = vpop.f32.mrf.mxu0 }
 0x41c   : > { %v4212_v45 = vpop.f32.mrf.mxu1  ;;  %v3998_v23 = vadd.f32 %v9697_v32, %v3772_v39 }
 0x41d   : > { %v9907_v38 = vadd.f32 %v4212_v45, %v3988_v58  ;;  %4720 = vmatmul.mubr.f32.gmra.mxu0 %v3451_v15  ;;  %v3774_v34 = vpop.f32.mrf.mxu0 }
 0x41e   : > { %v4214_v20 = vpop.f32.mrf.mxu1 }
 0x41f   : > { %v5973_v48 = vpop.f32.mrf.mxu0 }
 0x420   : > { %v4217_v54 = vpop.f32.mrf.mxu1  ;;  %v9911_v9 = vadd.f32 %v5973_v48, %v9715_v24 }
 0x421   : > { %v9913_v8 = vadd.f32 %v4217_v54, %v3993_v50  ;;  %v9915_v5 = vpop.f32.mrf.mxu0 }
 0x422   : > { %v4219_v61 = vpop.f32.mrf.mxu1 }
 0x424   : > { %v4222_v59 = vpop.f32.mrf.mxu1 }
 0x425   : > { %v4223_v17 = vadd.f32 %v4222_v59, %v3998_v23  ;;  %v5976_v11 = vpop.f32.mrf.mxu0 }
 0x426   : > { %v9919_v41 = vadd.f32 %v5976_v11, %v9728_v6  ;;  %v4224_v12 = vpop.f32.mrf.mxu1 }
 0x427   : > { %v4302_v13 = vpop.f32.mrf.mxu0 }
 0x428   : > { %v9922_v47 = vadd.f32 %v4302_v13, %v9722_v7 }
 0x429   : > { %v5979_v24 = vpop.f32.mrf.mxu0 }
 0x42a   : > { %v9925_v30 = vadd.f32 %v5979_v24, %v9741_v14 }
 0x42b   : > { %v4312_v55 = vpop.f32.mrf.mxu0 }
 0x42c   : > { %v9928_v52 = vadd.f32 %v4312_v55, %v9734_v44 }
 0x42d   : > { %v5982_v32 = vpop.f32.mrf.mxu0 }
 0x42e   : > { %v9931_v43 = vadd.f32 %v5982_v32, %v9755_v27 }
 0x42f   : > { %v4322_v16 = vpop.f32.mrf.mxu0 }
 0x430   : > { %v9934_v6 = vadd.f32 %v4322_v16, %v9748_v28 }
 0x431   : > { %v5985_v19 = vpop.f32.mrf.mxu0 }
 0x432   : > { %v9937_v7 = vadd.f32 %v5985_v19, %v9769_v37 }
 0x433   : > { %v4332_v40 = vpop.f32.mrf.mxu0 }
 0x434   : > { %v9940_v14 = vadd.f32 %v4332_v40, %v9762_v46 }
 0x435   : > { %v5988_v4 = vpop.f32.mrf.mxu0 }
 0x436   : > { %v9943_v44 = vadd.f32 %v5988_v4, %v9783_v26 }
 0x437   : > { %v4342_v56 = vpop.f32.mrf.mxu0 }
 0x438   : > { %v9946_v27 = vadd.f32 %v4342_v56, %v9776_v63 }
 0x439   : > { %v5991_v42 = vpop.f32.mrf.mxu0 }
 0x43a   : > { %v9949_v28 = vadd.f32 %v5991_v42, %v9797_v3 }
 0x43b   : > { %v4352_v1 = vpop.f32.mrf.mxu0 }
 0x43c   : > { %v9952_v37 = vadd.f32 %v4352_v1, %v9790_v51 }
 0x43d   : > { %v5994_v29 = vpop.f32.mrf.mxu0 }
 0x43e   : > { %v9955_v46 = vadd.f32 %v5994_v29, %v9811_v18  ;;  %v6200_v29 = vld [vmem:[%s6535_s9] sm:$0xff] }
 0x43f   : > { %v4362_v15 = vpop.f32.mrf.mxu0 }
 0x440   : > { %v9958_v26 = vadd.f32 %v4362_v15, %v9804_v60 }
 0x441   : > { %v5997_v58 = vpop.f32.mrf.mxu0 }
 0x442   : > { %v9961_v63 = vadd.f32 %v5997_v58, %v9825_v0 }
 0x443   : > { %v4372_v39 = vpop.f32.mrf.mxu0 }
 0x444   : > { %v9964_v3 = vadd.f32 %v4372_v39, %v9818_v33 }
 0x445   : > { %v6000_v45 = vpop.f32.mrf.mxu0 }
 0x446   : > { %v9967_v51 = vadd.f32 %v6000_v45, %v9839_v22 }
 0x447   : > { %v4382_v34 = vpop.f32.mrf.mxu0 }
 0x448   : > { %v9970_v18 = vadd.f32 %v4382_v34, %v9832_v57 }
 0x449   : > { %v6003_v20 = vpop.f32.mrf.mxu0 }
 0x44a   : > { %v9973_v60 = vadd.f32 %v6003_v20, %v9853_v53 }
 0x44b   : > { %v4392_v50 = vpop.f32.mrf.mxu0 }
 0x44c   : > { %v9976_v0 = vadd.f32 %v4392_v50, %v9846_v35  ;;  %v6201_v50 = vld [vmem:[%s6535_s9 + $0x8] sm:$0xff] }
 0x44d   : > { %v6006_v48 = vpop.f32.mrf.mxu0 }
 0x44e   : > { %v9979_v33 = vadd.f32 %v6006_v48, %v9867_v21 }
 0x44f   : > { %v4402_v54 = vpop.f32.mrf.mxu0 }
 0x450   : > { %v9982_v22 = vadd.f32 %v4402_v54, %v9860_v31 }
 0x451   : > { %v6009_v61 = vpop.f32.mrf.mxu0 }
 0x452   : > { %v9985_v57 = vadd.f32 %v6009_v61, %v9881_v36 }
 0x453   : > { %v4412_v23 = vpop.f32.mrf.mxu0 }
 0x454   : > { %v9988_v53 = vadd.f32 %v4412_v23, %v9874_v25  ;;  %v6053_v25 = vpop.f32.mrf.mxu1 }
 0x455   : > { %v6012_v59 = vpop.f32.mrf.mxu0 }
 0x456   : > { %v9991_v35 = vadd.f32 %v6012_v59, %v9895_v10 }
 0x457   : > { %v4422_v11 = vpop.f32.mrf.mxu0 }
 0x458   : > { %v9994_v21 = vadd.f32 %v4422_v11, %v9888_v62  ;;  %v4791_v62 = vpop.f32.mrf.mxu1 }
 0x459   : > { %v6015_v12 = vpop.f32.mrf.mxu0 }
 0x45a   : > { %v9997_v31 = vadd.f32 %v6015_v12, %v9907_v38  ;;  %v4293_v38 = vadd.f32 %v9915_v5, %v9708_v49  ;;  %v6056_v4 = vpop.f32.mrf.mxu1 }
 0x45b   : > { %v4432_v13 = vpop.f32.mrf.mxu0 }
 0x45c   : > { %v10000_v36 = vadd.f32 %v4432_v13, %v9902_v2  ;;  %v10013_v2 = vld [vmem:[%s10202_s5] ss:$0 sm:$0xff]  ;;  %v4801_v15 = vpop.f32.mrf.mxu1  ;;  %v6202_v13 = vld [vmem:[%s6535_s9 + $0x10] sm:$0xff] }
 0x45d   : > { %v6018_v24 = vpop.f32.mrf.mxu0 }
 0x45e   : > { %v10002_v55 = vadd.f32 %v6018_v24, %v4223_v17  ;;  %v6059_v61 = vpop.f32.mrf.mxu1 }
 0x45f   : > { %v4442_v10 = vpop.f32.mrf.mxu0 }
 0x460   : > { %v10005_v32 = vadd.f32 %v4442_v10, %v9913_v8  ;;  %v4811_v10 = vpop.f32.mrf.mxu1 }
 0x461   : > { %v4566_v16 = vpop.f32.mrf.mxu0 }
 0x462   : > { %v4792_v19 = vadd.f32 %v4791_v62, %v4566_v16 }
 0x463   : > { %v4568_v40 = vpop.f32.mrf.mxu0 }
 0x464   : > { %v4950_v17 = vadd.f32 %v4792_v19, %v4293_v38  ;;  %v6203_v40 = vld [vmem:[%s6535_s9 + $0x18] sm:$0xff] }
 0x465   : > { %v4571_v56 = vpop.f32.mrf.mxu0 }
 0x466   : > { %v4989_v8 = vadd.f32 %v10013_v2, %v4950_v17  ;;  %v4797_v42 = vadd.f32 %v6053_v25, %v4571_v56  ;;  %v6062_v56 = vpop.f32.mrf.mxu1 }
 0x467   : > { %v4573_v1 = vpop.f32.mrf.mxu0 }
 0x468   : > { %v5021_v49 = vadd.f32 %v6200_v29, %v4989_v8  ;;  %v4951_v5 = vadd.f32 %v4797_v42, %v9911_v9 }
 0x469   : > { %v4576_v58 = vpop.f32.mrf.mxu0 }
 0x46a   : > { %v5053_v39 = vmax.f32 %v5021_v49, 0.0  ;;  %v4990_v45 = vadd.f32 %v10013_v2, %v4951_v5  ;;  %v4802_v34 = vadd.f32 %v4801_v15, %v4576_v58  ;;  %v6204_v49 = vld [vmem:[%s6535_s9 + $0x20] sm:$0xff]  ;;  %v4821_v58 = vpop.f32.mrf.mxu1 }
 0x46b   : > { %v4578_v20 = vpop.f32.mrf.mxu0 }
 0x46c   : > { %5085 = vst [vmem:[%s10021_s26] sm:$0xff] %v5053_v39  ;;  %v5022_v48 = vadd.f32 %v6201_v50, %v4990_v45  ;;  %v4952_v54 = vadd.f32 %v4802_v34, %v9922_v47  ;;  %v6205_v50 = vld [vmem:[%s6535_s9 + $0x28] sm:$0xff] }
 0x46d   : > { %v4581_v9 = vpop.f32.mrf.mxu0 }
 0x46e   : > { %v5054_v23 = vmax.f32 %v5022_v48, 0.0  ;;  %v4991_v59 = vadd.f32 %v10013_v2, %v4952_v54  ;;  %v4807_v11 = vadd.f32 %v6056_v4, %v4581_v9 }
 0x46f   : > { %v4583_v12 = vpop.f32.mrf.mxu0 }
 0x470   : > { %5086 = vst [vmem:[%s10021_s26 + $0x8] sm:$0xff] %v5054_v23  ;;  %v5023_v25 = vadd.f32 %v6202_v13, %v4991_v59  ;;  %v4953_v24 = vadd.f32 %v4807_v11, %v9919_v41  ;;  %v6206_v12 = vld [vmem:[%s6535_s9 + $0x30] sm:$0xff] }
 0x471   : > { %v4586_v62 = vpop.f32.mrf.mxu0 }
 0x472   : > { %v5055_v16 = vmax.f32 %v5023_v25, 0.0  ;;  %v4992_v47 = vadd.f32 %v10013_v2, %v4953_v24  ;;  %v4812_v38 = vadd.f32 %v4811_v10, %v4586_v62 }
 0x473   : > { %v4588_v19 = vpop.f32.mrf.mxu0 }
 0x474   : > { %5087 = vst [vmem:[%s10021_s26 + $0x10] sm:$0xff] %v5055_v16  ;;  %v5024_v17 = vadd.f32 %v6203_v40, %v4992_v47  ;;  %v4954_v4 = vadd.f32 %v4812_v38, %v9928_v52  ;;  %v6207_v38 = vld [vmem:[%s6535_s9 + $0x38] sm:$0xff] }
 0x475   : > { %v4591_v8 = vpop.f32.mrf.mxu0 }
 0x476   : > { %v5056_v42 = vmax.f32 %v5024_v17, 0.0  ;;  %v4993_v41 = vadd.f32 %v10013_v2, %v4954_v4  ;;  %v4817_v1 = vadd.f32 %v6059_v61, %v4591_v8  ;;  %v6065_v61 = vpop.f32.mrf.mxu1 }
 0x477   : > { %v4593_v29 = vpop.f32.mrf.mxu0 }
 0x478   : > { %5088 = vst [vmem:[%s10021_s26 + $0x18] sm:$0xff] %v5056_v42  ;;  %v5025_v5 = vadd.f32 %v6204_v49, %v4993_v41  ;;  %v4955_v15 = vadd.f32 %v4817_v1, %v9925_v30  ;;  %v4831_v24 = vpop.f32.mrf.mxu1  ;;  %v6208_v41 = vld [vmem:[%s6535_s9 + $0x40] sm:$0xff] }
 0x479   : > { %v4596_v39 = vpop.f32.mrf.mxu0 }
 0x47a   : > { %v5057_v45 = vmax.f32 %v5025_v5, 0.0  ;;  %v4994_v52 = vadd.f32 %v10013_v2, %v4955_v15  ;;  %v4822_v34 = vadd.f32 %v4821_v58, %v4596_v39  ;;  %v6068_v17 = vpop.f32.mrf.mxu1 }
 0x47b   : > { %v4598_v20 = vpop.f32.mrf.mxu0 }
 0x47c   : > { %5089 = vst [vmem:[%s10021_s26 + $0x20] sm:$0xff] %v5057_v45  ;;  %v5026_v48 = vadd.f32 %v6205_v50, %v4994_v52  ;;  %v4956_v54 = vadd.f32 %v4822_v34, %v9934_v6  ;;  %v4841_v49 = vpop.f32.mrf.mxu1  ;;  %v6209_v45 = vld [vmem:[%s6535_s9 + $0x48] sm:$0xff] }
 0x47d   : > { %v4601_v9 = vpop.f32.mrf.mxu0 }
 0x47e   : > { %v5058_v23 = vmax.f32 %v5026_v48, 0.0  ;;  %v4995_v30 = vadd.f32 %v10013_v2, %v4956_v54  ;;  %v4827_v59 = vadd.f32 %v6062_v56, %v4601_v9  ;;  %v6071_v20 = vpop.f32.mrf.mxu1  ;;  %v6210_v9 = vld [vmem:[%s6535_s9 + $0x50] sm:$0xff] }
 0x47f   : > { %v4603_v11 = vpop.f32.mrf.mxu0 }
 0x480   : > { %5090 = vst [vmem:[%s10021_s26 + $0x28] sm:$0xff] %v5058_v23  ;;  %v5027_v13 = vadd.f32 %v6206_v12, %v4995_v30  ;;  %v4957_v25 = vadd.f32 %v4827_v59, %v9931_v43  ;;  %v4851_v59 = vpop.f32.mrf.mxu1 }
 0x481   : > { %v4606_v10 = vpop.f32.mrf.mxu0 }
 0x482   : > { %v5059_v62 = vmax.f32 %v5027_v13, 0.0  ;;  %v4996_v6 = vadd.f32 %v10013_v2, %v4957_v25  ;;  %v4832_v16 = vadd.f32 %v4831_v24, %v4606_v10  ;;  %v6211_v24 = vld [vmem:[%s6535_s9 + $0x58] sm:$0xff] }
 0x483   : > { %v4608_v47 = vpop.f32.mrf.mxu0 }
 0x484   : > { %5091 = vst [vmem:[%s10021_s26 + $0x30] sm:$0xff] %v5059_v62  ;;  %v5028_v19 = vadd.f32 %v6207_v38, %v4996_v6  ;;  %v4958_v40 = vadd.f32 %v4832_v16, %v9940_v14  ;;  %v6074_v6 = vpop.f32.mrf.mxu1 }
 0x485   : > { %v4611_v4 = vpop.f32.mrf.mxu0 }
 0x486   : > { %v5060_v56 = vmax.f32 %v5028_v19, 0.0  ;;  %v4997_v43 = vadd.f32 %v10013_v2, %v4958_v40  ;;  %v4837_v8 = vadd.f32 %v6065_v61, %v4611_v4  ;;  %v6212_v40 = vld [vmem:[%s6535_s9 + $0x60] sm:$0xff] }
 0x487   : > { %v4613_v42 = vpop.f32.mrf.mxu0 }
 0x488   : > { %5092 = vst [vmem:[%s10021_s26 + $0x38] sm:$0xff] %v5060_v56  ;;  %v5029_v1 = vadd.f32 %v6208_v41, %v4997_v43  ;;  %v4959_v29 = vadd.f32 %v4837_v8, %v9937_v7  ;;  %v4861_v56 = vpop.f32.mrf.mxu1 }
 0x489   : > { %v4616_v5 = vpop.f32.mrf.mxu0 }
 0x48a   : > { %v5061_v15 = vmax.f32 %v5029_v1, 0.0  ;;  %v4998_v14 = vadd.f32 %v10013_v2, %v4959_v29  ;;  %v4842_v58 = vadd.f32 %v4841_v49, %v4616_v5  ;;  %v6213_v1 = vld [vmem:[%s6535_s9 + $0x68] sm:$0xff]  ;;  %v6077_v5 = vpop.f32.mrf.mxu1 }
 0x48b   : > { %v4618_v39 = vpop.f32.mrf.mxu0 }
 0x48c   : > { %5093 = vst [vmem:[%s10021_s26 + $0x40] sm:$0xff] %v5061_v15  ;;  %v5030_v52 = vadd.f32 %v6209_v45, %v4998_v14  ;;  %v4960_v34 = vadd.f32 %v4842_v58, %v9946_v27  ;;  %v6214_v45 = vld [vmem:[%s6535_s9 + $0x70] sm:$0xff] }
 0x48d   : > { %v4621_v50 = vpop.f32.mrf.mxu0 }
 0x48e   : > { %v5062_v48 = vmax.f32 %v5030_v52, 0.0  ;;  %v4999_v7 = vadd.f32 %v10013_v2, %v4960_v34  ;;  %v4847_v54 = vadd.f32 %v6068_v17, %v4621_v50 }
 0x48f   : > { %v4623_v61 = vpop.f32.mrf.mxu0 }
 0x490   : > { %5094 = vst [vmem:[%s10021_s26 + $0x48] sm:$0xff] %v5062_v48  ;;  %v5031_v23 = vadd.f32 %v6210_v9, %v4999_v7  ;;  %v4961_v30 = vadd.f32 %v4847_v54, %v9943_v44  ;;  %v6215_v61 = vld [vmem:[%s6535_s9 + $0x78] sm:$0xff] }
 0x491   : > { %v4626_v11 = vpop.f32.mrf.mxu0 }
 0x492   : > { %v5063_v12 = vmax.f32 %v5031_v23, 0.0  ;;  %v5000_v27 = vadd.f32 %v10013_v2, %v4961_v30  ;;  %v4852_v13 = vadd.f32 %v4851_v59, %v4626_v11 }
 0x493   : > { %v4628_v25 = vpop.f32.mrf.mxu0 }
 0x494   : > { %5095 = vst [vmem:[%s10021_s26 + $0x50] sm:$0xff] %v5063_v12  ;;  %v5032_v10 = vadd.f32 %v6211_v24, %v5000_v27  ;;  %v4962_v62 = vadd.f32 %v4852_v13, %v9952_v37  ;;  %v6216_v13 = vld [vmem:[%s6535_s9 + $0x80] sm:$0xff] }
 0x495   : > { %v4631_v16 = vpop.f32.mrf.mxu0 }
 0x496   : > { %v5064_v47 = vmax.f32 %v5032_v10, 0.0  ;;  %v5001_v44 = vadd.f32 %v10013_v2, %v4962_v62  ;;  %v4857_v38 = vadd.f32 %v6071_v20, %v4631_v16  ;;  %v4871_v20 = vpop.f32.mrf.mxu1 }
 0x497   : > { %v4633_v19 = vpop.f32.mrf.mxu0 }
 0x498   : > { %5096 = vst [vmem:[%s10021_s26 + $0x58] sm:$0xff] %v5064_v47  ;;  %v5033_v17 = vadd.f32 %v6212_v40, %v5001_v44  ;;  %v4963_v4 = vadd.f32 %v4857_v38, %v9949_v28  ;;  %v6080_v30 = vpop.f32.mrf.mxu1  ;;  %v6217_v44 = vld [vmem:[%s6535_s9 + $0x88] sm:$0xff] }
 0x499   : > { %v4636_v43 = vpop.f32.mrf.mxu0 }
 0x49a   : > { %v5065_v8 = vmax.f32 %v5033_v17, 0.0  ;;  %v5002_v37 = vadd.f32 %v10013_v2, %v4963_v4  ;;  %v4862_v42 = vadd.f32 %v4861_v56, %v4636_v43  ;;  %v4881_v10 = vpop.f32.mrf.mxu1 }
 0x49b   : > { %v4638_v41 = vpop.f32.mrf.mxu0 }
 0x49c   : > { %5097 = vst [vmem:[%s10021_s26 + $0x60] sm:$0xff] %v5065_v8  ;;  %v5034_v29 = vadd.f32 %v6213_v1, %v5002_v37  ;;  %v4964_v49 = vadd.f32 %v4862_v42, %v9958_v26  ;;  %v6083_v40 = vpop.f32.mrf.mxu1  ;;  %v6218_v8 = vld [vmem:[%s6535_s9 + $0x90] sm:$0xff] }
 0x49d   : > { %v4641_v15 = vpop.f32.mrf.mxu0 }
 0x49e   : > { %v5066_v14 = vmax.f32 %v5034_v29, 0.0  ;;  %v5003_v28 = vadd.f32 %v10013_v2, %v4964_v49  ;;  %v4867_v58 = vadd.f32 %v6074_v6, %v4641_v15  ;;  %v4891_v41 = vpop.f32.mrf.mxu1  ;;  %v6219_v15 = vld [vmem:[%s6535_s9 + $0x98] sm:$0xff] }
 0x49f   : > { %v4643_v39 = vpop.f32.mrf.mxu0 }
 0x4a0   : > { %5098 = vst [vmem:[%s10021_s26 + $0x68] sm:$0xff] %v5066_v14  ;;  %v5035_v52 = vadd.f32 %v6214_v45, %v5003_v28  ;;  %v4965_v34 = vadd.f32 %v4867_v58, %v9955_v46  ;;  %v6086_v58 = vpop.f32.mrf.mxu1 }
 0x4a1   : > { %v4646_v50 = vpop.f32.mrf.mxu0 }
 0x4a2   : > { %v5067_v48 = vmax.f32 %v5035_v52, 0.0  ;;  %v5004_v26 = vadd.f32 %v10013_v2, %v4965_v34  ;;  %v4872_v7 = vadd.f32 %v4871_v20, %v4646_v50  ;;  %v6220_v20 = vld [vmem:[%s6535_s9 + $0xa0] sm:$0xff] }
 0x4a3   : > { %v4648_v54 = vpop.f32.mrf.mxu0 }
 0x4a4   : > { %5099 = vst [vmem:[%s10021_s26 + $0x70] sm:$0xff] %v5067_v48  ;;  %v5036_v9 = vadd.f32 %v6215_v61, %v5004_v26  ;;  %v4966_v23 = vadd.f32 %v4872_v7, %v9964_v3  ;;  %v4901_v26 = vpop.f32.mrf.mxu1 }
 0x4a5   : > { %v4651_v59 = vpop.f32.mrf.mxu0 }
 0x4a6   : > { %v5068_v11 = vmax.f32 %v5036_v9, 0.0  ;;  %v5005_v46 = vadd.f32 %v10013_v2, %v4966_v23  ;;  %v4877_v12 = vadd.f32 %v6077_v5, %v4651_v59  ;;  %v6221_v23 = vld [vmem:[%s6535_s9 + $0xa8] sm:$0xff] }
 0x4a7   : > { %v4653_v27 = vpop.f32.mrf.mxu0 }
 0x4a8   : > { %5100 = vst [vmem:[%s10021_s26 + $0x78] sm:$0xff] %v5068_v11  ;;  %v5037_v25 = vadd.f32 %v6216_v13, %v5005_v46  ;;  %v4967_v24 = vadd.f32 %v4877_v12, %v9961_v63  ;;  %v6089_v11 = vpop.f32.mrf.mxu1 }
 0x4a9   : > { %v4656_v62 = vpop.f32.mrf.mxu0 }
 0x4aa   : > { %v5069_v6 = vmax.f32 %v5037_v25, 0.0  ;;  %v5006_v3 = vadd.f32 %v10013_v2, %v4967_v24  ;;  %v4882_v16 = vadd.f32 %v4881_v10, %v4656_v62  ;;  %v6222_v25 = vld [vmem:[%s6535_s9 + $0xb0] sm:$0xff]  ;;  %v4911_v62 = vpop.f32.mrf.mxu1 }
 0x4ab   : > { %v4658_v47 = vpop.f32.mrf.mxu0 }
 0x4ac   : > { %5101 = vst [vmem:[%s10021_s26 + $0x80] sm:$0xff] %v5069_v6  ;;  %v5038_v38 = vadd.f32 %v6217_v44, %v5006_v3  ;;  %v4968_v19 = vadd.f32 %v4882_v16, %v9970_v18  ;;  %v6223_v44 = vld [vmem:[%s6535_s9 + $0xb8] sm:$0xff] }
 0x4ad   : > { %v4661_v17 = vpop.f32.mrf.mxu0 }
 0x4ae   : > { %v5070_v4 = vmax.f32 %v5038_v38, 0.0  ;;  %v5007_v63 = vadd.f32 %v10013_v2, %v4968_v19  ;;  %v4887_v56 = vadd.f32 %v6080_v30, %v4661_v17 }
 0x4af   : > { %v4663_v43 = vpop.f32.mrf.mxu0 }
 0x4b0   : > { %5102 = vst [vmem:[%s10021_s26 + $0x88] sm:$0xff] %v5070_v4  ;;  %v5039_v37 = vadd.f32 %v6218_v8, %v5007_v63  ;;  %v4969_v42 = vadd.f32 %v4887_v56, %v9967_v51  ;;  %v6224_v43 = vld [vmem:[%s6535_s9 + $0xc0] sm:$0xff] }
 0x4b1   : > { %v4666_v1 = vpop.f32.mrf.mxu0 }
 0x4b2   : > { %v5071_v29 = vmax.f32 %v5039_v37, 0.0  ;;  %v5008_v18 = vadd.f32 %v10013_v2, %v4969_v42  ;;  %v4892_v49 = vadd.f32 %v4891_v41, %v4666_v1 }
 0x4b3   : > { %v4668_v5 = vpop.f32.mrf.mxu0 }
 0x4b4   : > { %5103 = vst [vmem:[%s10021_s26 + $0x90] sm:$0xff] %v5071_v29  ;;  %v5040_v14 = vadd.f32 %v6219_v15, %v5008_v18  ;;  %v4970_v28 = vadd.f32 %v4892_v49, %v9976_v0  ;;  %v6225_v49 = vld [vmem:[%s6535_s9 + $0xc8] sm:$0xff] }
 0x4b5   : > { %v4671_v39 = vpop.f32.mrf.mxu0 }
 0x4b6   : > { %v5072_v45 = vmax.f32 %v5040_v14, 0.0  ;;  %v5009_v51 = vadd.f32 %v10013_v2, %v4970_v28  ;;  %v4897_v52 = vadd.f32 %v6083_v40, %v4671_v39  ;;  %v6092_v40 = vpop.f32.mrf.mxu1 }
 0x4b7   : > { %v4673_v34 = vpop.f32.mrf.mxu0 }
 0x4b8   : > { %5104 = vst [vmem:[%s10021_s26 + $0x98] sm:$0xff] %v5072_v45  ;;  %v5041_v50 = vadd.f32 %v6220_v20, %v5009_v51  ;;  %v4971_v48 = vadd.f32 %v4897_v52, %v9973_v60  ;;  %v4921_v42 = vpop.f32.mrf.mxu1  ;;  %v6226_v51 = vld [vmem:[%s6535_s9 + $0xd0] sm:$0xff] }
 0x4b9   : > { %v4676_v7 = vpop.f32.mrf.mxu0 }
 0x4ba   : > { %v5073_v54 = vmax.f32 %v5041_v50, 0.0  ;;  %v5010_v0 = vadd.f32 %v10013_v2, %v4971_v48  ;;  %v4902_v61 = vadd.f32 %v4901_v26, %v4676_v7  ;;  %v6095_v14 = vpop.f32.mrf.mxu1 }
 0x4bb   : > { %v4678_v9 = vpop.f32.mrf.mxu0 }
 0x4bc   : > { %5105 = vst [vmem:[%s10021_s26 + $0xa0] sm:$0xff] %v5073_v54  ;;  %v5042_v30 = vadd.f32 %v6221_v23, %v5010_v0  ;;  %v4972_v59 = vadd.f32 %v4902_v61, %v9982_v22  ;;  %v4931_v20 = vpop.f32.mrf.mxu1  ;;  %v6227_v54 = vld [vmem:[%s6535_s9 + $0xd8] sm:$0xff] }
 0x4bd   : > { %v4681_v46 = vpop.f32.mrf.mxu0 }
 0x4be   : > { %v5074_v12 = vmax.f32 %v5042_v30, 0.0  ;;  %v5011_v60 = vadd.f32 %v10013_v2, %v4972_v59  ;;  %v4907_v27 = vadd.f32 %v6086_v58, %v4681_v46  ;;  %v6098_v9 = vpop.f32.mrf.mxu1  ;;  %v6228_v46 = vld [vmem:[%s6535_s9 + $0xe0] sm:$0xff] }
 0x4bf   : > { %v4683_v13 = vpop.f32.mrf.mxu0 }
 0x4c0   : > { %5106 = vst [vmem:[%s10021_s26 + $0xa8] sm:$0xff] %v5074_v12  ;;  %v5043_v24 = vadd.f32 %v6222_v25, %v5011_v60  ;;  %v4973_v10 = vadd.f32 %v4907_v27, %v9979_v33  ;;  %v4941_v27 = vpop.f32.mrf.mxu1 }
 0x4c1   : > { %v4686_v6 = vpop.f32.mrf.mxu0 }
 0x4c2   : > { %v5075_v3 = vmax.f32 %v5043_v24, 0.0  ;;  %v5012_v22 = vadd.f32 %v10013_v2, %v4973_v10  ;;  %v4912_v16 = vadd.f32 %v4911_v62, %v4686_v6  ;;  %v6229_v62 = vld [vmem:[%s6535_s9 + $0xe8] sm:$0xff] }
 0x4c3   : > { %v4688_v47 = vpop.f32.mrf.mxu0 }
 0x4c4   : > { %5107 = vst [vmem:[%s10021_s26 + $0xb0] sm:$0xff] %v5075_v3  ;;  %v5044_v38 = vadd.f32 %v6223_v44, %v5012_v22  ;;  %v4974_v19 = vadd.f32 %v4912_v16, %v9988_v53 }
 0x4c5   : > { %v4691_v17 = vpop.f32.mrf.mxu0 }
 0x4c6   : > { %v5076_v4 = vmax.f32 %v5044_v38, 0.0  ;;  %v5013_v33 = vadd.f32 %v10013_v2, %v4974_v19  ;;  %v4917_v63 = vadd.f32 %v6089_v11, %v4691_v17  ;;  %v6230_v38 = vld [vmem:[%s6535_s9 + $0xf0] sm:$0xff] }
 0x4c7   : > { %v4693_v56 = vpop.f32.mrf.mxu0 }
 0x4c8   : > { %5108 = vst [vmem:[%s10021_s26 + $0xb8] sm:$0xff] %v5076_v4  ;;  %v5045_v8 = vadd.f32 %v6224_v43, %v5013_v33  ;;  %v4975_v37 = vadd.f32 %v4917_v63, %v9985_v57 }
 0x4c9   : > { %v4696_v41 = vpop.f32.mrf.mxu0 }
 0x4ca   : > { %v5077_v1 = vmax.f32 %v5045_v8, 0.0  ;;  %v5014_v53 = vadd.f32 %v10013_v2, %v4975_v37  ;;  %v4922_v29 = vadd.f32 %v4921_v42, %v4696_v41 }
 0x4cb   : > { %v4698_v18 = vpop.f32.mrf.mxu0 }
 0x4cc   : > { %5109 = vst [vmem:[%s10021_s26 + $0xc0] sm:$0xff] %v5077_v1  ;;  %v5046_v5 = vadd.f32 %v6225_v49, %v5014_v53  ;;  %v4976_v15 = vadd.f32 %v4922_v29, %v9994_v21 }
 0x4cd   : > { %v4701_v28 = vpop.f32.mrf.mxu0 }
 0x4ce   : > { %v5078_v58 = vmax.f32 %v5046_v5, 0.0  ;;  %v5015_v57 = vadd.f32 %v10013_v2, %v4976_v15  ;;  %v4927_v39 = vadd.f32 %v6092_v40, %v4701_v28 }
 0x4cf   : > { %v4703_v45 = vpop.f32.mrf.mxu0 }
 0x4d0   : > { %5110 = vst [vmem:[%s10021_s26 + $0xc8] sm:$0xff] %v5078_v58  ;;  %v5047_v52 = vadd.f32 %v6226_v51, %v5015_v57  ;;  %v4977_v34 = vadd.f32 %v4927_v39, %v9991_v35 }
 0x4d1   : > { %v4706_v50 = vpop.f32.mrf.mxu0 }
 0x4d2   : > { %v5079_v48 = vmax.f32 %v5047_v52, 0.0  ;;  %v5016_v21 = vadd.f32 %v10013_v2, %v4977_v34  ;;  %v4932_v26 = vadd.f32 %v4931_v20, %v4706_v50 }
 0x4d3   : > { %v4708_v7 = vpop.f32.mrf.mxu0 }
 0x4d4   : > { %5111 = vst [vmem:[%s10021_s26 + $0xd0] sm:$0xff] %v5079_v48  ;;  %v5048_v0 = vadd.f32 %v6227_v54, %v5016_v21  ;;  %v4978_v61 = vadd.f32 %v4932_v26, %v10000_v36 }
 0x4d5   : > { %v4711_v23 = vpop.f32.mrf.mxu0 }
 0x4d6   : > { %v5080_v30 = vmax.f32 %v5048_v0, 0.0  ;;  %v5017_v35 = vadd.f32 %v10013_v2, %v4978_v61  ;;  %v4937_v59 = vadd.f32 %v6095_v14, %v4711_v23 }
 0x4d7   : > { %v4713_v11 = vpop.f32.mrf.mxu0 }
 0x4d8   : > { %5112 = vst [vmem:[%s10021_s26 + $0xd8] sm:$0xff] %v5080_v30  ;;  %v5049_v12 = vadd.f32 %v6228_v46, %v5017_v35  ;;  %v4979_v60 = vadd.f32 %v4937_v59, %v9997_v31 }
 0x4d9   : > { %v4716_v13 = vpop.f32.mrf.mxu0 }
 0x4da   : > { %v5081_v25 = vmax.f32 %v5049_v12, 0.0  ;;  %v5018_v36 = vadd.f32 %v10013_v2, %v4979_v60  ;;  %v4942_v24 = vadd.f32 %v4941_v27, %v4716_v13 }
 0x4db   : > { %v4718_v10 = vpop.f32.mrf.mxu0 }
 0x4dc   : > { %5113 = vst [vmem:[%s10021_s26 + $0xe0] sm:$0xff] %v5081_v25  ;;  %v5050_v6 = vadd.f32 %v6229_v62, %v5018_v36  ;;  %v4980_v3 = vadd.f32 %v4942_v24, %v10005_v32  ;;  %v6231_v32 = vld [vmem:[%s6535_s9 + $0xf8] sm:$0xff]  ;;  %s6360_s9 = smov [#allocation7]  }
 0x4dd   : > { %v4721_v22 = vpop.f32.mrf.mxu0  ;;  %s6288_s14 = sshll.u32 %s6360_s9, 4  ;;  %s6289_s14 = int_to_ptr.vmem [resolvable:$false] %s6288_s14 }
 0x4de   : > { %v5082_v31 = vmax.f32 %v5050_v6, 0.0  ;;  %v5019_v16 = vadd.f32 %v10013_v2, %v4980_v3  ;;  %v4947_v47 = vadd.f32 %v6098_v9, %v4721_v22  ;;  %s6290_s15 = scalar_lea.vmem %s6289_s14, 8192  ;;  %p6291_p11 = scmp.lt.s32.totalorder %s10152_s29, %s6289_s14 }
 0x4df   : > { %v4723_v44 = vpop.f32.mrf.mxu0  ;;  %p6292_p0 = scmp.lt.s32.totalorder %s6290_s15, %s6284_s25 }
 0x4e0   : > { %5114 = vst [vmem:[%s10021_s26 + $0xe8] sm:$0xff] %v5082_v31  ;;  %v5051_v19 = vadd.f32 %v6230_v38, %v5019_v16  ;;  %v4981_v40 = vadd.f32 %v4947_v47, %v10002_v55 }
 0x4e1   : > { %p6293_p1 = por %p6292_p0, %p6291_p11 }
 0x4e2   : > { %v5083_v17 = vmax.f32 %v5051_v19, 0.0  ;;  %v5020_v4 = vadd.f32 %v10013_v2, %v4981_v40 }
 0x4e3   : > { %p6294_p3 = pnand %p6293_p1, %p6287_p8 }
 0x4e4   : > { %5115 = vst [vmem:[%s10021_s26 + $0xf0] sm:$0xff] %v5083_v17  ;;  %v5052_v33 = vadd.f32 %v6231_v32, %v5020_v4 }
 0x4e6   : > { %v5084_v63 = vmax.f32 %v5052_v33, 0.0 }
 0x4e8   : > { %5116 = vst [vmem:[%s10021_s26 + $0xf8] sm:$0xff] %v5084_v63 }
 0x4e9   : > { %6297 = shalt.err (!%p6294_p3)
}
 0x4ea   : > { %s6298_s16 = scalar_lea.hbm %s10150_s12, 4096  ;;  %s6302_s19 = scalar_lea.hbm %s10203_s6, 8192 }
 0x4eb   : > { %p6299_p2 = scmp.ne.s32.totalorder %s10150_s12, %s6298_s16  ;;  %p6303_p7 = scmp.lt.s32.totalorder %s10150_s12, %s10203_s6 }
 0x4ec   : > { %p6304_p6 = scmp.lt.s32.totalorder %s6302_s19, %s6298_s16 }
 0x4ed   : > { %p6300_p4 = pnand %p6299_p2, %p6436_p5 }
 0x4ee   : > { %p6305_p9 = por %p6304_p6, %p6303_p7 }
 0x4ef   : > { %p6301_p13 = pneg %p6300_p4 }
 0x4f1   : > { %p6306_p10 = pnand %p6305_p9, %p6301_p13 }
 0x4f3   : > { %6309 = shalt.err (!%p6306_p10)
}
 0x4f4   : > { %s6361_s28 = smov 128   ;;  %s6362_s10 = smov 8  }
 0x4f5   : > { %6107 = dma.vmem_to_hbm [thread:$0]  (%p6436_p5), %s10152_s29, 4096, %s10150_s12, %s10157_s13, %s6361_s28, %s6361_s28, %s6362_s10  }
 0x4f6 PF: > { %p6124_p12 = scmp.ge.s32.totalorder %s6352_s24, 2  ;;  %s5146_s11 = sand.u32 1, %s6340_s21  }
 0x4f7   : > { %p11320_p8 = scmp.ne.s32.totalorder %s10611_s8, 0  ;;  %s5147_s25 = scalar_lea.sflag [#allocation4], %s5146_s11 }
 0x4f9   : > { %p6117_p11 = pnand %p6124_p12, %p11320_p8 }
 0x4fb   : > { %p6118_p0 = pneg %p6117_p11 }
 0x4fd   : > { %6335 = dma.done.wait (%p6118_p0), %s5147_s25, 4096  }
 0x4fe   : > { %6337 = vsyncadd (%p6118_p0), %s5147_s25, 4294963200  ;;  %p18_p1 = scmp.ge.s32.totalorder %s6423_s27, 4   ;;  %s11321_s21 = smov %s6344_s22 }
 0x4ff   : > { %s11322_s22 = smov %s6348_s23  ;;  %s11323_s23 = smov %s6434_s30 }
 0x500   : > { %s11324_s24 = smov %s6423_s27  ;;  %20 = sbr.rel (!%p18_p1) target bundleno = 5 (0x5), region = 95 }
 0x505   :  { %5152 = vsyncpa [#allocation3], 1 }
 0x506   :  { %5154 = vsyncpa [#allocation3 + $0x1], 1 }
 0x507   :  { %5155 = vsyncpa [#allocation6], 1 }
 0x508   :  { %5156 = vsyncpa [#allocation4], 1 }
 0x509   :  { %5158 = vsyncpa [#allocation4 + $0x1], 1 }

</bundles_post_ra>
